<compile_context>
chip_gen: v7x
topology: tpu7x:2x2x1
jax: 0.10.0
libtpu: 0.0.40
codegen_flags: <defaults>
</compile_context>

<pallas_src>
import functools

import jax
import jax.numpy as jnp
from jax import lax
from jax.experimental import pallas as pl
from jax.experimental.pallas import tpu as pltpu


# ------------------------------ fused kernel --------------------------------

def _da_block_kernel(x_ref, mask_ref, w5_ref, gmv_ref, w5152_ref, m67_ref,
                     m8_ref, gam_ref, out_ref, *, D, H, W, cin, inter):
    f32 = jnp.float32
    bf16 = jnp.bfloat16
    HW = H * W
    N = D * HW
    Npad = (D + 2) * HW

    def dwsep3_relu(src, w_tap_ref, nout):
        """Depthwise-separable 3x3x3 conv (+ReLU) on a (nc, N) tile.

        One zero guard plane is added on each depth side, so only the 9 in-plane
        (dh, dw) offsets need a lane roll; the three depth taps of every rolled
        copy are 128-aligned static slices (depth boundary handled by the guard
        zeros, h/w boundary by the 9 precomputed masks).  Each tap immediately
        feeds an accumulated matmul (no taps scratch round-trip)."""
        nc = src.shape[0]
        guard = jnp.zeros((nc, HW), f32)
        xpad = jnp.concatenate([guard, src, guard], axis=1)        # (nc, Npad)
        acc = jnp.zeros((nout, N), f32)
        p = 0
        for dh in (-1, 0, 1):
            for dw in (-1, 0, 1):
                off = dh * W + dw
                rolled = xpad if off == 0 else pltpu.roll(
                    xpad, shift=(-off) % Npad, axis=1)
                if off != 0:                                       # center mask is all ones
                    rolled = rolled * mask_ref[pl.ds(p, 1), :]
                for dzi in range(3):                               # dd = dzi - 1
                    tap = rolled[:, dzi * HW: dzi * HW + N]        # 128-aligned slice
                    acc = acc + jnp.dot(w_tap_ref[dzi * 9 + p], tap,
                                        preferred_element_type=f32)
                p += 1
        return jnp.maximum(acc, 0.0)

    # ---- conv5a / conv5c : depthwise 3x3x3 + pointwise (folded, stacked) + ReLU
    x = x_ref[...]                                                 # (Cin, N)
    feat12 = dwsep3_relu(x, w5_ref, 2 * inter)                     # (2*inter, N)
    feat1 = feat12[:inter]                                         # PAM branch input
    feat2 = feat12[inter:]                                         # CAM branch input

    # ---- PAM (position attention), transposed-energy / folded-normalization form
    # gmv = [Mq^T·Mk ; Mv] folded host-side, so only two tiny projections are needed.
    kv = jnp.dot(gmv_ref[...], feat1, preferred_element_type=f32)  # (2*inter, N)
    kg = kv[:inter].astype(bf16)                                   # (Mq^T Mk) @ feat1
    v = kv[inter:].astype(bf16)
    f1b = feat1.astype(bf16)
    # energy_t[j, i] = sum_c kg[c, j] * feat1[c, i]  (keys j on sublanes, queries i on lanes)
    energy_t = lax.dot_general(kg, f1b, (((0,), (0,)), ((), ())),
                               preferred_element_type=f32)         # (N, N)
    e_t = jnp.exp(energy_t - jnp.max(energy_t, axis=0, keepdims=True))
    denom = jnp.sum(e_t, axis=0, keepdims=True)                    # (1, N)
    pam = jnp.dot(v, e_t.astype(bf16), preferred_element_type=f32)  # un-normalized (inter, N)
    scale = gam_ref[0, 0] * pl.reciprocal(denom, approx=True)      # softmax norm + gamma folded
    sa_feat = feat1 + scale * pam

    # ---- CAM (channel attention) on feat2 ------------------------------------
    energy_c = lax.dot_general(feat2, feat2, (((1,), (1,)), ((), ())),
                               preferred_element_type=f32)         # (inter, inter)
    en = jnp.max(energy_c, axis=-1, keepdims=True) - energy_c
    ec = jnp.exp(en - jnp.max(en, axis=-1, keepdims=True))
    att_c = ec / jnp.sum(ec, axis=-1, keepdims=True)               # (inter, inter)
    cam_rows = []
    for a in range(inter):                                         # K=inter mix on the VPU
        row = att_c[a:a + 1, 0:1] * feat2[0:1, :]
        for b in range(1, inter):
            row = row + att_c[a:a + 1, b:b + 1] * feat2[b:b + 1, :]
        cam_rows.append(row)
    cam = jnp.concatenate(cam_rows, axis=0)                        # (inter, N)
    sc_feat = feat2 + gam_ref[0, 1] * cam

    # ---- conv51 / conv52 : stacked block-diagonal depthwise-sep 3x3x3 + ReLU --
    s = jnp.concatenate([sa_feat, sc_feat], axis=0)                # (2*inter, N)
    conv5152 = dwsep3_relu(s, w5152_ref, 2 * inter)

    # ---- conv6 / conv7 (stacked) + sum + conv8, all pointwise + ReLU ----------
    # TODO(synk): Dropout3d(0.05) treated as identity (inference semantics).
    y67 = jnp.maximum(
        jnp.dot(m67_ref[...], conv5152, preferred_element_type=f32), 0.0)   # (2C, N)
    feat_sum = y67[:cin] + y67[cin:]
    out_ref[...] = jnp.maximum(
        jnp.dot(m8_ref[...], feat_sum, preferred_element_type=f32), 0.0)


# ------------------------------ JAX wrapper ----------------------------------

def _make_inplane_masks(D, H, W):
    """(9, (D+2)*H*W) f32 validity mask of each (dh, dw) offset (h/w bounds only)."""
    HW = H * W
    m = jnp.arange((D + 2) * HW, dtype=jnp.int32) % HW
    h, w = m // W, m % W
    rows = []
    for dh in (-1, 0, 1):
        for dw in (-1, 0, 1):
            ok = (h + dh >= 0) & (h + dh < H) & (w + dw >= 0) & (w + dw < W)
            rows.append(ok.astype(jnp.float32))
    return jnp.stack(rows, axis=0)


def _fold_dwsep_tapmajor(dw, pw):
    """Fold depthwise (Cin, 27) + pointwise (Cout, Cin) into (27, Cout, Cin)."""
    return jnp.einsum("oc,ct->toc", pw, dw)


def prepare_kernel_params(p, in_channels):
    """Fold / stack the module parameters into the fused-kernel operand set."""
    C = in_channels
    inter = p["pw5a"].shape[0]
    kp = {}
    kp["w5"] = jnp.concatenate([_fold_dwsep_tapmajor(p["dw5a"], p["pw5a"]),
                                _fold_dwsep_tapmajor(p["dw5c"], p["pw5c"])],
                               axis=1)                               # (27, 2*inter, C)
    # PAM: energy is bilinear -> fold Mq^T Mk host-side; stack with Mv.
    kp["gmv"] = jnp.concatenate([p["mq"].T @ p["mk"], p["mv"]], axis=0)  # (2*inter, inter)
    w51 = _fold_dwsep_tapmajor(p["dw51"], p["pw51"])                 # (27, inter, inter)
    w52 = _fold_dwsep_tapmajor(p["dw52"], p["pw52"])
    w5152 = jnp.zeros((27, 2 * inter, 2 * inter), jnp.float32)
    w5152 = w5152.at[:, :inter, :inter].set(w51)
    w5152 = w5152.at[:, inter:, inter:].set(w52)
    kp["w5152"] = w5152
    m67 = jnp.zeros((2 * C, 2 * inter), jnp.float32)
    m67 = m67.at[:C, :inter].set(p["m6"])
    m67 = m67.at[C:, inter:].set(p["m7"])
    kp["m67"] = m67
    kp["m8"] = p["m8"]
    kp["gammas"] = jnp.concatenate([p["gamma_pam"], p["gamma_cam"]], axis=1)  # (1, 2)
    return kp


def da_block_forward(x, kp):
    B, C, D, H, W = x.shape
    HW = H * W
    N = D * HW
    Npad = (D + 2) * HW
    inter = kp["gmv"].shape[1]
    masks = _make_inplane_masks(D, H, W)

    kernel = functools.partial(_da_block_kernel, D=D, H=H, W=W, cin=C, inter=inter)

    flops = B * (2 * (2 * inter) * N * 27 * C          # conv5a / conv5c
                 + 2 * (2 * inter) * N * inter         # PAM projections
                 + 4 * N * N * inter                   # energy + value matmuls
                 + 2 * inter * inter * N               # CAM energy
                 + 2 * (2 * inter) * N * 27 * (2 * inter)  # conv51 / conv52
                 + 2 * (2 * C) * N * (2 * inter)       # conv6 / conv7
                 + 2 * C * C * N)                      # conv8
    bytes_accessed = 4 * (2 * B * C * N + 9 * Npad + 27 * 2 * inter * C
                          + 27 * 4 * inter * inter + 2 * inter * inter
                          + 4 * C * inter + C * C + 2)
    cost = pl.CostEstimate(flops=int(flops),
                           transcendentals=int(B * (N * N + N)),
                           bytes_accessed=int(bytes_accessed))

    out = pl.pallas_call(
        kernel,
        out_shape=jax.ShapeDtypeStruct((B, C, N), jnp.float32),
        grid=(B,),
        in_specs=[
            pl.BlockSpec((None, C, N), lambda b: (b, 0, 0)),              # x (per batch)
            pl.BlockSpec((9, Npad), lambda b: (0, 0)),                    # in-plane masks
            pl.BlockSpec((27, 2 * inter, C), lambda b: (0, 0, 0)),        # conv5a|5c folded
            pl.BlockSpec((2 * inter, inter), lambda b: (0, 0)),           # [Mq^T Mk ; Mv]
            pl.BlockSpec((27, 2 * inter, 2 * inter), lambda b: (0, 0, 0)),  # conv51|52 folded
            pl.BlockSpec((2 * C, 2 * inter), lambda b: (0, 0)),           # conv6|conv7 folded
            pl.BlockSpec((C, C), lambda b: (0, 0)),                       # conv8 folded
            pl.BlockSpec((1, 2), lambda b: (0, 0)),                       # gamma_pam, gamma_cam
        ],
        out_specs=pl.BlockSpec((None, C, N), lambda b: (b, 0, 0)),
        compiler_params=pltpu.CompilerParams(
            dimension_semantics=("parallel",),
            vmem_limit_bytes=48 * 1024 * 1024),
        cost_estimate=cost,
    )(x.reshape(B, C, N), masks, kp["w5"], kp["gmv"], kp["w5152"],
      kp["m67"], kp["m8"], kp["gammas"])
    return out.reshape(B, C, D, H, W)


# --------------------------- parameter setup --------------------------------

def init_params(key, in_channels):
    inter = in_channels // 16
    ks = jax.random.split(key, 20)
    f = lambda k, shape, s=0.1: jax.random.normal(k, shape, jnp.float32) * s
    p = {}
    # conv5a / conv5c : depthwise 3x3x3 (Cin, 27) + pointwise (inter, Cin)
    p["dw5a"], p["pw5a"] = f(ks[0], (in_channels, 27)), f(ks[1], (inter, in_channels))
    p["dw5c"], p["pw5c"] = f(ks[2], (in_channels, 27)), f(ks[3], (inter, in_channels))
    # PAM q/k/v are 1x1x1 depthwise + pointwise -> fold into single matrices
    dwq, pwq = f(ks[4], (inter,), 0.5), f(ks[5], (inter, inter), 0.5)
    dwk, pwk = f(ks[6], (inter,), 0.5), f(ks[7], (inter, inter), 0.5)
    dwv, pwv = f(ks[8], (inter,), 0.5), f(ks[9], (inter, inter), 0.5)
    p["mq"], p["mk"], p["mv"] = pwq * dwq[None, :], pwk * dwk[None, :], pwv * dwv[None, :]
    # torch inits gamma = 0; use nonzero values to actually exercise the attention paths
    p["gamma_pam"] = jnp.full((1, 1), 0.5, jnp.float32)
    p["gamma_cam"] = jnp.full((1, 1), 0.5, jnp.float32)
    # conv51 / conv52 : depthwise 3x3x3 + pointwise on inter channels
    p["dw51"], p["pw51"] = f(ks[10], (inter, 27)), f(ks[11], (inter, inter), 0.5)
    p["dw52"], p["pw52"] = f(ks[12], (inter, 27)), f(ks[13], (inter, inter), 0.5)
    # conv6 / conv7 / conv8 : 1x1x1 depthwise + pointwise folded
    dw6, pw6 = f(ks[14], (inter,), 0.5), f(ks[15], (in_channels, inter), 0.5)
    dw7, pw7 = f(ks[16], (inter,), 0.5), f(ks[17], (in_channels, inter), 0.5)
    dw8, pw8 = f(ks[18], (in_channels,), 0.3), f(ks[19], (in_channels, in_channels), 0.3)
    p["m6"], p["m7"], p["m8"] = pw6 * dw6[None, :], pw7 * dw7[None, :], pw8 * dw8[None, :]
    return p


# ------------------------- pure-JAX reference -------------------------------

def _im2col_3x3x3(x5d):
    B, C, D, H, W = x5d.shape
    xp = jnp.pad(x5d, ((0, 0), (0, 0), (1, 1), (1, 1), (1, 1)))
    taps = [xp[:, :, kd:kd + D, kh:kh + H, kw:kw + W]
            for kd in range(3) for kh in range(3) for kw in range(3)]
    return jnp.stack(taps, axis=1).reshape(B, 27, C, D * H * W)


def ref_forward(x, p):
    B, C, D, H, W = x.shape
    inter = p["pw5a"].shape[0]

    def dwsep3(x5, dww, pww):
        taps = _im2col_3x3x3(x5)
        acc = jnp.einsum("btcn,ct->bcn", taps, dww)
        return jnp.maximum(jnp.einsum("oc,bcn->bon", pww, acc), 0.0)

    feat1 = dwsep3(x, p["dw5a"], p["pw5a"])
    q = jnp.einsum("oc,bcn->bon", p["mq"], feat1)
    k = jnp.einsum("oc,bcn->bon", p["mk"], feat1)
    v = jnp.einsum("oc,bcn->bon", p["mv"], feat1)
    att = jax.nn.softmax(jnp.einsum("bci,bcj->bij", q, k), axis=-1)
    sa_feat = p["gamma_pam"][0, 0] * jnp.einsum("bcj,bij->bci", v, att) + feat1
    sa_conv = dwsep3(sa_feat.reshape(B, inter, D, H, W), p["dw51"], p["pw51"])
    sa_out = jnp.maximum(jnp.einsum("oc,bcn->bon", p["m6"], sa_conv), 0.0)

    feat2 = dwsep3(x, p["dw5c"], p["pw5c"])
    energy = jnp.einsum("bcn,bdn->bcd", feat2, feat2)
    att2 = jax.nn.softmax(jnp.max(energy, -1, keepdims=True) - energy, axis=-1)
    sc_feat = p["gamma_cam"][0, 0] * jnp.einsum("bcd,bdn->bcn", att2, feat2) + feat2
    sc_conv = dwsep3(sc_feat.reshape(B, inter, D, H, W), p["dw52"], p["pw52"])
    sc_out = jnp.maximum(jnp.einsum("oc,bcn->bon", p["m7"], sc_conv), 0.0)

    out = jnp.maximum(jnp.einsum("oc,bcn->bon", p["m8"], sa_out + sc_out), 0.0)
    return out.reshape(B, C, D, H, W)


# --------------------------------- main --------------------------------------

if __name__ == "__main__":
    # in_channels = 32 -> inter_channels = 2 ; N = D*H*W = 512, H*W = 128 (lane aligned)
    B, C, D, H, W = 2, 32, 4, 8, 16
    key = jax.random.PRNGKey(0)
    kx, kp_key = jax.random.split(key)
    x = jax.random.normal(kx, (B, C, D, H, W), jnp.float32)
    params = init_params(kp_key, C)
    kparams = prepare_kernel_params(params, C)

    out = jax.jit(da_block_forward)(x, kparams)
    out = jax.block_until_ready(out)
    assert out.shape == (B, C, D, H, W), out.shape

    ref = ref_forward(x, params)
    err = float(jnp.max(jnp.abs(out - ref)))
    if err > 1e-2:
        raise AssertionError(f"mismatch vs pure-JAX reference: max abs err = {err}")
    print("KERNEL_OK")
</pallas_src>

<mosaic_0001>
module attributes {stable_mosaic.version = 11 : i64} {
  func.func @_da_block_kernel(%arg0: i32, %arg1: memref<1x32x512xf32, #tpu.memory_space<vmem>>, %arg2: memref<9x768xf32, #tpu.memory_space<vmem>>, %arg3: memref<27x4x32xf32, #tpu.memory_space<vmem>>, %arg4: memref<4x2xf32, #tpu.memory_space<vmem>>, %arg5: memref<27x4x4xf32, #tpu.memory_space<vmem>>, %arg6: memref<64x4xf32, #tpu.memory_space<vmem>>, %arg7: memref<32x32xf32, #tpu.memory_space<vmem>>, %arg8: memref<1x2xf32, #tpu.memory_space<vmem>>, %arg9: memref<1x32x512xf32, #tpu.memory_space<vmem>>) attributes {dimension_semantics = [#tpu.dimension_semantics<parallel>], iteration_bounds = array<i64: 2>, scalar_prefetch = 0 : i64, scratch_operands = 0 : i64, tpu.core_type = #tpu.core_type<tc>, window_params = [{transform_indices = @transform_0, window_bounds = array<i64: 1, 32, 512>}, {pipeline_mode = #tpu.pipeline_mode<synchronous>, transform_indices = @transform_1, window_bounds = array<i64: 9, 768>}, {pipeline_mode = #tpu.pipeline_mode<synchronous>, transform_indices = @transform_2, window_bounds = array<i64: 27, 4, 32>}, {pipeline_mode = #tpu.pipeline_mode<synchronous>, transform_indices = @transform_3, window_bounds = array<i64: 4, 2>}, {pipeline_mode = #tpu.pipeline_mode<synchronous>, transform_indices = @transform_4, window_bounds = array<i64: 27, 4, 4>}, {pipeline_mode = #tpu.pipeline_mode<synchronous>, transform_indices = @transform_5, window_bounds = array<i64: 64, 4>}, {pipeline_mode = #tpu.pipeline_mode<synchronous>, transform_indices = @transform_6, window_bounds = array<i64: 32, 32>}, {pipeline_mode = #tpu.pipeline_mode<synchronous>, transform_indices = @transform_7, window_bounds = array<i64: 1, 2>}, {transform_indices = @transform_8, window_bounds = array<i64: 1, 32, 512>}]} {
    %c0 = arith.constant 0 : index
    %c0_0 = arith.constant 0 : index
    %c0_1 = arith.constant 0 : index
    %0 = vector.load %arg1[%c0, %c0_0, %c0_1] : memref<1x32x512xf32, #tpu.memory_space<vmem>>, vector<1x32x512xf32>
    %1 = vector.shape_cast %0 : vector<1x32x512xf32> to vector<32x512xf32>
    %cst = arith.constant 0.000000e+00 : f32
    %2 = vector.broadcast %cst : f32 to vector<32x128xf32>
    %3 = tpu.concatenate %2, %1, %2 in 1 : vector<32x128xf32>, vector<32x512xf32>, vector<32x128xf32> -> vector<32x768xf32>
    %cst_2 = arith.constant 0.000000e+00 : f32
    %4 = vector.broadcast %cst_2 : f32 to vector<4x512xf32>
    %c17_i32 = arith.constant 17 : i32
    %5 = tpu.dynamic_rotate %3 by %c17_i32 dim 1 : vector<32x768xf32>, i32 -> vector<32x768xf32>
    %c0_3 = arith.constant 0 : index
    %c0_4 = arith.constant 0 : index
    %6 = vector.load %arg2[%c0_3, %c0_4] : memref<9x768xf32, #tpu.memory_space<vmem>>, vector<1x768xf32>
    %7 = vector.broadcast %6 : vector<1x768xf32> to vector<32x768xf32>
    %8 = arith.mulf %5, %7 : vector<32x768xf32>
    %9 = vector.extract_strided_slice %8 {offsets = [0, 0], sizes = [32, 512], strides = [1, 1]} : vector<32x768xf32> to vector<32x512xf32>
    %c0_5 = arith.constant 0 : index
    %c0_6 = arith.constant 0 : index
    %c0_7 = arith.constant 0 : index
    %10 = vector.load %arg3[%c0_5, %c0_6, %c0_7] : memref<27x4x32xf32, #tpu.memory_space<vmem>>, vector<1x4x32xf32>
    %11 = vector.shape_cast %10 : vector<1x4x32xf32> to vector<4x32xf32>
    %cst_8 = arith.constant dense<0.000000e+00> : vector<4x512xf32>
    %12 = tpu.matmul %11, %9, %cst_8 {dimension_numbers = #tpu.dot_dimension_numbers<[1], [0], [0], [1], [0, 0, 1, 1], [], []>} : vector<4x32xf32>, vector<32x512xf32>, vector<4x512xf32> -> vector<4x512xf32>
    %13 = arith.addf %4, %12 : vector<4x512xf32>
    %14 = vector.extract_strided_slice %8 {offsets = [0, 128], sizes = [32, 512], strides = [1, 1]} : vector<32x768xf32> to vector<32x512xf32>
    %c9 = arith.constant 9 : index
    %c0_9 = arith.constant 0 : index
    %c0_10 = arith.constant 0 : index
    %15 = vector.load %arg3[%c9, %c0_9, %c0_10] : memref<27x4x32xf32, #tpu.memory_space<vmem>>, vector<1x4x32xf32>
    %16 = vector.shape_cast %15 : vector<1x4x32xf32> to vector<4x32xf32>
    %cst_11 = arith.constant dense<0.000000e+00> : vector<4x512xf32>
    %17 = tpu.matmul %16, %14, %cst_11 {dimension_numbers = #tpu.dot_dimension_numbers<[1], [0], [0], [1], [0, 0, 1, 1], [], []>} : vector<4x32xf32>, vector<32x512xf32>, vector<4x512xf32> -> vector<4x512xf32>
    %18 = arith.addf %13, %17 : vector<4x512xf32>
    %19 = vector.extract_strided_slice %8 {offsets = [0, 256], sizes = [32, 512], strides = [1, 1]} : vector<32x768xf32> to vector<32x512xf32>
    %c18 = arith.constant 18 : index
    %c0_12 = arith.constant 0 : index
    %c0_13 = arith.constant 0 : index
    %20 = vector.load %arg3[%c18, %c0_12, %c0_13] : memref<27x4x32xf32, #tpu.memory_space<vmem>>, vector<1x4x32xf32>
    %21 = vector.shape_cast %20 : vector<1x4x32xf32> to vector<4x32xf32>
    %cst_14 = arith.constant dense<0.000000e+00> : vector<4x512xf32>
    %22 = tpu.matmul %21, %19, %cst_14 {dimension_numbers = #tpu.dot_dimension_numbers<[1], [0], [0], [1], [0, 0, 1, 1], [], []>} : vector<4x32xf32>, vector<32x512xf32>, vector<4x512xf32> -> vector<4x512xf32>
    %23 = arith.addf %18, %22 : vector<4x512xf32>
    %c16_i32 = arith.constant 16 : i32
    %24 = tpu.dynamic_rotate %3 by %c16_i32 dim 1 : vector<32x768xf32>, i32 -> vector<32x768xf32>
    %c1 = arith.constant 1 : index
    %c0_15 = arith.constant 0 : index
    %25 = vector.load %arg2[%c1, %c0_15] : memref<9x768xf32, #tpu.memory_space<vmem>>, vector<1x768xf32>
    %26 = vector.broadcast %25 : vector<1x768xf32> to vector<32x768xf32>
    %27 = arith.mulf %24, %26 : vector<32x768xf32>
    %28 = vector.extract_strided_slice %27 {offsets = [0, 0], sizes = [32, 512], strides = [1, 1]} : vector<32x768xf32> to vector<32x512xf32>
    %c1_16 = arith.constant 1 : index
    %c0_17 = arith.constant 0 : index
    %c0_18 = arith.constant 0 : index
    %29 = vector.load %arg3[%c1_16, %c0_17, %c0_18] : memref<27x4x32xf32, #tpu.memory_space<vmem>>, vector<1x4x32xf32>
    %30 = vector.shape_cast %29 : vector<1x4x32xf32> to vector<4x32xf32>
    %cst_19 = arith.constant dense<0.000000e+00> : vector<4x512xf32>
    %31 = tpu.matmul %30, %28, %cst_19 {dimension_numbers = #tpu.dot_dimension_numbers<[1], [0], [0], [1], [0, 0, 1, 1], [], []>} : vector<4x32xf32>, vector<32x512xf32>, vector<4x512xf32> -> vector<4x512xf32>
    %32 = arith.addf %23, %31 : vector<4x512xf32>
    %33 = vector.extract_strided_slice %27 {offsets = [0, 128], sizes = [32, 512], strides = [1, 1]} : vector<32x768xf32> to vector<32x512xf32>
    %c10 = arith.constant 10 : index
    %c0_20 = arith.constant 0 : index
    %c0_21 = arith.constant 0 : index
    %34 = vector.load %arg3[%c10, %c0_20, %c0_21] : memref<27x4x32xf32, #tpu.memory_space<vmem>>, vector<1x4x32xf32>
    %35 = vector.shape_cast %34 : vector<1x4x32xf32> to vector<4x32xf32>
    %cst_22 = arith.constant dense<0.000000e+00> : vector<4x512xf32>
    %36 = tpu.matmul %35, %33, %cst_22 {dimension_numbers = #tpu.dot_dimension_numbers<[1], [0], [0], [1], [0, 0, 1, 1], [], []>} : vector<4x32xf32>, vector<32x512xf32>, vector<4x512xf32> -> vector<4x512xf32>
    %37 = arith.addf %32, %36 : vector<4x512xf32>
    %38 = vector.extract_strided_slice %27 {offsets = [0, 256], sizes = [32, 512], strides = [1, 1]} : vector<32x768xf32> to vector<32x512xf32>
    %c19 = arith.constant 19 : index
    %c0_23 = arith.constant 0 : index
    %c0_24 = arith.constant 0 : index
    %39 = vector.load %arg3[%c19, %c0_23, %c0_24] : memref<27x4x32xf32, #tpu.memory_space<vmem>>, vector<1x4x32xf32>
    %40 = vector.shape_cast %39 : vector<1x4x32xf32> to vector<4x32xf32>
    %cst_25 = arith.constant dense<0.000000e+00> : vector<4x512xf32>
    %41 = tpu.matmul %40, %38, %cst_25 {dimension_numbers = #tpu.dot_dimension_numbers<[1], [0], [0], [1], [0, 0, 1, 1], [], []>} : vector<4x32xf32>, vector<32x512xf32>, vector<4x512xf32> -> vector<4x512xf32>
    %42 = arith.addf %37, %41 : vector<4x512xf32>
    %c15_i32 = arith.constant 15 : i32
    %43 = tpu.dynamic_rotate %3 by %c15_i32 dim 1 : vector<32x768xf32>, i32 -> vector<32x768xf32>
    %c2 = arith.constant 2 : index
    %c0_26 = arith.constant 0 : index
    %44 = vector.load %arg2[%c2, %c0_26] : memref<9x768xf32, #tpu.memory_space<vmem>>, vector<1x768xf32>
    %45 = vector.broadcast %44 : vector<1x768xf32> to vector<32x768xf32>
    %46 = arith.mulf %43, %45 : vector<32x768xf32>
    %47 = vector.extract_strided_slice %46 {offsets = [0, 0], sizes = [32, 512], strides = [1, 1]} : vector<32x768xf32> to vector<32x512xf32>
    %c2_27 = arith.constant 2 : index
    %c0_28 = arith.constant 0 : index
    %c0_29 = arith.constant 0 : index
    %48 = vector.load %arg3[%c2_27, %c0_28, %c0_29] : memref<27x4x32xf32, #tpu.memory_space<vmem>>, vector<1x4x32xf32>
    %49 = vector.shape_cast %48 : vector<1x4x32xf32> to vector<4x32xf32>
    %cst_30 = arith.constant dense<0.000000e+00> : vector<4x512xf32>
    %50 = tpu.matmul %49, %47, %cst_30 {dimension_numbers = #tpu.dot_dimension_numbers<[1], [0], [0], [1], [0, 0, 1, 1], [], []>} : vector<4x32xf32>, vector<32x512xf32>, vector<4x512xf32> -> vector<4x512xf32>
    %51 = arith.addf %42, %50 : vector<4x512xf32>
    %52 = vector.extract_strided_slice %46 {offsets = [0, 128], sizes = [32, 512], strides = [1, 1]} : vector<32x768xf32> to vector<32x512xf32>
    %c11 = arith.constant 11 : index
    %c0_31 = arith.constant 0 : index
    %c0_32 = arith.constant 0 : index
    %53 = vector.load %arg3[%c11, %c0_31, %c0_32] : memref<27x4x32xf32, #tpu.memory_space<vmem>>, vector<1x4x32xf32>
    %54 = vector.shape_cast %53 : vector<1x4x32xf32> to vector<4x32xf32>
    %cst_33 = arith.constant dense<0.000000e+00> : vector<4x512xf32>
    %55 = tpu.matmul %54, %52, %cst_33 {dimension_numbers = #tpu.dot_dimension_numbers<[1], [0], [0], [1], [0, 0, 1, 1], [], []>} : vector<4x32xf32>, vector<32x512xf32>, vector<4x512xf32> -> vector<4x512xf32>
    %56 = arith.addf %51, %55 : vector<4x512xf32>
    %57 = vector.extract_strided_slice %46 {offsets = [0, 256], sizes = [32, 512], strides = [1, 1]} : vector<32x768xf32> to vector<32x512xf32>
    %c20 = arith.constant 20 : index
    %c0_34 = arith.constant 0 : index
    %c0_35 = arith.constant 0 : index
    %58 = vector.load %arg3[%c20, %c0_34, %c0_35] : memref<27x4x32xf32, #tpu.memory_space<vmem>>, vector<1x4x32xf32>
    %59 = vector.shape_cast %58 : vector<1x4x32xf32> to vector<4x32xf32>
    %cst_36 = arith.constant dense<0.000000e+00> : vector<4x512xf32>
    %60 = tpu.matmul %59, %57, %cst_36 {dimension_numbers = #tpu.dot_dimension_numbers<[1], [0], [0], [1], [0, 0, 1, 1], [], []>} : vector<4x32xf32>, vector<32x512xf32>, vector<4x512xf32> -> vector<4x512xf32>
    %61 = arith.addf %56, %60 : vector<4x512xf32>
    %c1_i32 = arith.constant 1 : i32
    %62 = tpu.dynamic_rotate %3 by %c1_i32 dim 1 : vector<32x768xf32>, i32 -> vector<32x768xf32>
    %c3 = arith.constant 3 : index
    %c0_37 = arith.constant 0 : index
    %63 = vector.load %arg2[%c3, %c0_37] : memref<9x768xf32, #tpu.memory_space<vmem>>, vector<1x768xf32>
    %64 = vector.broadcast %63 : vector<1x768xf32> to vector<32x768xf32>
    %65 = arith.mulf %62, %64 : vector<32x768xf32>
    %66 = vector.extract_strided_slice %65 {offsets = [0, 0], sizes = [32, 512], strides = [1, 1]} : vector<32x768xf32> to vector<32x512xf32>
    %c3_38 = arith.constant 3 : index
    %c0_39 = arith.constant 0 : index
    %c0_40 = arith.constant 0 : index
    %67 = vector.load %arg3[%c3_38, %c0_39, %c0_40] : memref<27x4x32xf32, #tpu.memory_space<vmem>>, vector<1x4x32xf32>
    %68 = vector.shape_cast %67 : vector<1x4x32xf32> to vector<4x32xf32>
    %cst_41 = arith.constant dense<0.000000e+00> : vector<4x512xf32>
    %69 = tpu.matmul %68, %66, %cst_41 {dimension_numbers = #tpu.dot_dimension_numbers<[1], [0], [0], [1], [0, 0, 1, 1], [], []>} : vector<4x32xf32>, vector<32x512xf32>, vector<4x512xf32> -> vector<4x512xf32>
    %70 = arith.addf %61, %69 : vector<4x512xf32>
    %71 = vector.extract_strided_slice %65 {offsets = [0, 128], sizes = [32, 512], strides = [1, 1]} : vector<32x768xf32> to vector<32x512xf32>
    %c12 = arith.constant 12 : index
    %c0_42 = arith.constant 0 : index
    %c0_43 = arith.constant 0 : index
    %72 = vector.load %arg3[%c12, %c0_42, %c0_43] : memref<27x4x32xf32, #tpu.memory_space<vmem>>, vector<1x4x32xf32>
    %73 = vector.shape_cast %72 : vector<1x4x32xf32> to vector<4x32xf32>
    %cst_44 = arith.constant dense<0.000000e+00> : vector<4x512xf32>
    %74 = tpu.matmul %73, %71, %cst_44 {dimension_numbers = #tpu.dot_dimension_numbers<[1], [0], [0], [1], [0, 0, 1, 1], [], []>} : vector<4x32xf32>, vector<32x512xf32>, vector<4x512xf32> -> vector<4x512xf32>
    %75 = arith.addf %70, %74 : vector<4x512xf32>
    %76 = vector.extract_strided_slice %65 {offsets = [0, 256], sizes = [32, 512], strides = [1, 1]} : vector<32x768xf32> to vector<32x512xf32>
    %c21 = arith.constant 21 : index
    %c0_45 = arith.constant 0 : index
    %c0_46 = arith.constant 0 : index
    %77 = vector.load %arg3[%c21, %c0_45, %c0_46] : memref<27x4x32xf32, #tpu.memory_space<vmem>>, vector<1x4x32xf32>
    %78 = vector.shape_cast %77 : vector<1x4x32xf32> to vector<4x32xf32>
    %cst_47 = arith.constant dense<0.000000e+00> : vector<4x512xf32>
    %79 = tpu.matmul %78, %76, %cst_47 {dimension_numbers = #tpu.dot_dimension_numbers<[1], [0], [0], [1], [0, 0, 1, 1], [], []>} : vector<4x32xf32>, vector<32x512xf32>, vector<4x512xf32> -> vector<4x512xf32>
    %80 = arith.addf %75, %79 : vector<4x512xf32>
    %81 = vector.extract_strided_slice %3 {offsets = [0, 0], sizes = [32, 512], strides = [1, 1]} : vector<32x768xf32> to vector<32x512xf32>
    %c4 = arith.constant 4 : index
    %c0_48 = arith.constant 0 : index
    %c0_49 = arith.constant 0 : index
    %82 = vector.load %arg3[%c4, %c0_48, %c0_49] : memref<27x4x32xf32, #tpu.memory_space<vmem>>, vector<1x4x32xf32>
    %83 = vector.shape_cast %82 : vector<1x4x32xf32> to vector<4x32xf32>
    %cst_50 = arith.constant dense<0.000000e+00> : vector<4x512xf32>
    %84 = tpu.matmul %83, %81, %cst_50 {dimension_numbers = #tpu.dot_dimension_numbers<[1], [0], [0], [1], [0, 0, 1, 1], [], []>} : vector<4x32xf32>, vector<32x512xf32>, vector<4x512xf32> -> vector<4x512xf32>
    %85 = arith.addf %80, %84 : vector<4x512xf32>
    %86 = vector.extract_strided_slice %3 {offsets = [0, 128], sizes = [32, 512], strides = [1, 1]} : vector<32x768xf32> to vector<32x512xf32>
    %c13 = arith.constant 13 : index
    %c0_51 = arith.constant 0 : index
    %c0_52 = arith.constant 0 : index
    %87 = vector.load %arg3[%c13, %c0_51, %c0_52] : memref<27x4x32xf32, #tpu.memory_space<vmem>>, vector<1x4x32xf32>
    %88 = vector.shape_cast %87 : vector<1x4x32xf32> to vector<4x32xf32>
    %cst_53 = arith.constant dense<0.000000e+00> : vector<4x512xf32>
    %89 = tpu.matmul %88, %86, %cst_53 {dimension_numbers = #tpu.dot_dimension_numbers<[1], [0], [0], [1], [0, 0, 1, 1], [], []>} : vector<4x32xf32>, vector<32x512xf32>, vector<4x512xf32> -> vector<4x512xf32>
    %90 = arith.addf %85, %89 : vector<4x512xf32>
    %91 = vector.extract_strided_slice %3 {offsets = [0, 256], sizes = [32, 512], strides = [1, 1]} : vector<32x768xf32> to vector<32x512xf32>
    %c22 = arith.constant 22 : index
    %c0_54 = arith.constant 0 : index
    %c0_55 = arith.constant 0 : index
    %92 = vector.load %arg3[%c22, %c0_54, %c0_55] : memref<27x4x32xf32, #tpu.memory_space<vmem>>, vector<1x4x32xf32>
    %93 = vector.shape_cast %92 : vector<1x4x32xf32> to vector<4x32xf32>
    %cst_56 = arith.constant dense<0.000000e+00> : vector<4x512xf32>
    %94 = tpu.matmul %93, %91, %cst_56 {dimension_numbers = #tpu.dot_dimension_numbers<[1], [0], [0], [1], [0, 0, 1, 1], [], []>} : vector<4x32xf32>, vector<32x512xf32>, vector<4x512xf32> -> vector<4x512xf32>
    %95 = arith.addf %90, %94 : vector<4x512xf32>
    %c767_i32 = arith.constant 767 : i32
    %96 = tpu.dynamic_rotate %3 by %c767_i32 dim 1 : vector<32x768xf32>, i32 -> vector<32x768xf32>
    %c5 = arith.constant 5 : index
    %c0_57 = arith.constant 0 : index
    %97 = vector.load %arg2[%c5, %c0_57] : memref<9x768xf32, #tpu.memory_space<vmem>>, vector<1x768xf32>
    %98 = vector.broadcast %97 : vector<1x768xf32> to vector<32x768xf32>
    %99 = arith.mulf %96, %98 : vector<32x768xf32>
    %100 = vector.extract_strided_slice %99 {offsets = [0, 0], sizes = [32, 512], strides = [1, 1]} : vector<32x768xf32> to vector<32x512xf32>
    %c5_58 = arith.constant 5 : index
    %c0_59 = arith.constant 0 : index
    %c0_60 = arith.constant 0 : index
    %101 = vector.load %arg3[%c5_58, %c0_59, %c0_60] : memref<27x4x32xf32, #tpu.memory_space<vmem>>, vector<1x4x32xf32>
    %102 = vector.shape_cast %101 : vector<1x4x32xf32> to vector<4x32xf32>
    %cst_61 = arith.constant dense<0.000000e+00> : vector<4x512xf32>
    %103 = tpu.matmul %102, %100, %cst_61 {dimension_numbers = #tpu.dot_dimension_numbers<[1], [0], [0], [1], [0, 0, 1, 1], [], []>} : vector<4x32xf32>, vector<32x512xf32>, vector<4x512xf32> -> vector<4x512xf32>
    %104 = arith.addf %95, %103 : vector<4x512xf32>
    %105 = vector.extract_strided_slice %99 {offsets = [0, 128], sizes = [32, 512], strides = [1, 1]} : vector<32x768xf32> to vector<32x512xf32>
    %c14 = arith.constant 14 : index
    %c0_62 = arith.constant 0 : index
    %c0_63 = arith.constant 0 : index
    %106 = vector.load %arg3[%c14, %c0_62, %c0_63] : memref<27x4x32xf32, #tpu.memory_space<vmem>>, vector<1x4x32xf32>
    %107 = vector.shape_cast %106 : vector<1x4x32xf32> to vector<4x32xf32>
    %cst_64 = arith.constant dense<0.000000e+00> : vector<4x512xf32>
    %108 = tpu.matmul %107, %105, %cst_64 {dimension_numbers = #tpu.dot_dimension_numbers<[1], [0], [0], [1], [0, 0, 1, 1], [], []>} : vector<4x32xf32>, vector<32x512xf32>, vector<4x512xf32> -> vector<4x512xf32>
    %109 = arith.addf %104, %108 : vector<4x512xf32>
    %110 = vector.extract_strided_slice %99 {offsets = [0, 256], sizes = [32, 512], strides = [1, 1]} : vector<32x768xf32> to vector<32x512xf32>
    %c23 = arith.constant 23 : index
    %c0_65 = arith.constant 0 : index
    %c0_66 = arith.constant 0 : index
    %111 = vector.load %arg3[%c23, %c0_65, %c0_66] : memref<27x4x32xf32, #tpu.memory_space<vmem>>, vector<1x4x32xf32>
    %112 = vector.shape_cast %111 : vector<1x4x32xf32> to vector<4x32xf32>
    %cst_67 = arith.constant dense<0.000000e+00> : vector<4x512xf32>
    %113 = tpu.matmul %112, %110, %cst_67 {dimension_numbers = #tpu.dot_dimension_numbers<[1], [0], [0], [1], [0, 0, 1, 1], [], []>} : vector<4x32xf32>, vector<32x512xf32>, vector<4x512xf32> -> vector<4x512xf32>
    %114 = arith.addf %109, %113 : vector<4x512xf32>
    %c753_i32 = arith.constant 753 : i32
    %115 = tpu.dynamic_rotate %3 by %c753_i32 dim 1 : vector<32x768xf32>, i32 -> vector<32x768xf32>
    %c6 = arith.constant 6 : index
    %c0_68 = arith.constant 0 : index
    %116 = vector.load %arg2[%c6, %c0_68] : memref<9x768xf32, #tpu.memory_space<vmem>>, vector<1x768xf32>
    %117 = vector.broadcast %116 : vector<1x768xf32> to vector<32x768xf32>
    %118 = arith.mulf %115, %117 : vector<32x768xf32>
    %119 = vector.extract_strided_slice %118 {offsets = [0, 0], sizes = [32, 512], strides = [1, 1]} : vector<32x768xf32> to vector<32x512xf32>
    %c6_69 = arith.constant 6 : index
    %c0_70 = arith.constant 0 : index
    %c0_71 = arith.constant 0 : index
    %120 = vector.load %arg3[%c6_69, %c0_70, %c0_71] : memref<27x4x32xf32, #tpu.memory_space<vmem>>, vector<1x4x32xf32>
    %121 = vector.shape_cast %120 : vector<1x4x32xf32> to vector<4x32xf32>
    %cst_72 = arith.constant dense<0.000000e+00> : vector<4x512xf32>
    %122 = tpu.matmul %121, %119, %cst_72 {dimension_numbers = #tpu.dot_dimension_numbers<[1], [0], [0], [1], [0, 0, 1, 1], [], []>} : vector<4x32xf32>, vector<32x512xf32>, vector<4x512xf32> -> vector<4x512xf32>
    %123 = arith.addf %114, %122 : vector<4x512xf32>
    %124 = vector.extract_strided_slice %118 {offsets = [0, 128], sizes = [32, 512], strides = [1, 1]} : vector<32x768xf32> to vector<32x512xf32>
    %c15 = arith.constant 15 : index
    %c0_73 = arith.constant 0 : index
    %c0_74 = arith.constant 0 : index
    %125 = vector.load %arg3[%c15, %c0_73, %c0_74] : memref<27x4x32xf32, #tpu.memory_space<vmem>>, vector<1x4x32xf32>
    %126 = vector.shape_cast %125 : vector<1x4x32xf32> to vector<4x32xf32>
    %cst_75 = arith.constant dense<0.000000e+00> : vector<4x512xf32>
    %127 = tpu.matmul %126, %124, %cst_75 {dimension_numbers = #tpu.dot_dimension_numbers<[1], [0], [0], [1], [0, 0, 1, 1], [], []>} : vector<4x32xf32>, vector<32x512xf32>, vector<4x512xf32> -> vector<4x512xf32>
    %128 = arith.addf %123, %127 : vector<4x512xf32>
    %129 = vector.extract_strided_slice %118 {offsets = [0, 256], sizes = [32, 512], strides = [1, 1]} : vector<32x768xf32> to vector<32x512xf32>
    %c24 = arith.constant 24 : index
    %c0_76 = arith.constant 0 : index
    %c0_77 = arith.constant 0 : index
    %130 = vector.load %arg3[%c24, %c0_76, %c0_77] : memref<27x4x32xf32, #tpu.memory_space<vmem>>, vector<1x4x32xf32>
    %131 = vector.shape_cast %130 : vector<1x4x32xf32> to vector<4x32xf32>
    %cst_78 = arith.constant dense<0.000000e+00> : vector<4x512xf32>
    %132 = tpu.matmul %131, %129, %cst_78 {dimension_numbers = #tpu.dot_dimension_numbers<[1], [0], [0], [1], [0, 0, 1, 1], [], []>} : vector<4x32xf32>, vector<32x512xf32>, vector<4x512xf32> -> vector<4x512xf32>
    %133 = arith.addf %128, %132 : vector<4x512xf32>
    %c752_i32 = arith.constant 752 : i32
    %134 = tpu.dynamic_rotate %3 by %c752_i32 dim 1 : vector<32x768xf32>, i32 -> vector<32x768xf32>
    %c7 = arith.constant 7 : index
    %c0_79 = arith.constant 0 : index
    %135 = vector.load %arg2[%c7, %c0_79] : memref<9x768xf32, #tpu.memory_space<vmem>>, vector<1x768xf32>
    %136 = vector.broadcast %135 : vector<1x768xf32> to vector<32x768xf32>
    %137 = arith.mulf %134, %136 : vector<32x768xf32>
    %138 = vector.extract_strided_slice %137 {offsets = [0, 0], sizes = [32, 512], strides = [1, 1]} : vector<32x768xf32> to vector<32x512xf32>
    %c7_80 = arith.constant 7 : index
    %c0_81 = arith.constant 0 : index
    %c0_82 = arith.constant 0 : index
    %139 = vector.load %arg3[%c7_80, %c0_81, %c0_82] : memref<27x4x32xf32, #tpu.memory_space<vmem>>, vector<1x4x32xf32>
    %140 = vector.shape_cast %139 : vector<1x4x32xf32> to vector<4x32xf32>
    %cst_83 = arith.constant dense<0.000000e+00> : vector<4x512xf32>
    %141 = tpu.matmul %140, %138, %cst_83 {dimension_numbers = #tpu.dot_dimension_numbers<[1], [0], [0], [1], [0, 0, 1, 1], [], []>} : vector<4x32xf32>, vector<32x512xf32>, vector<4x512xf32> -> vector<4x512xf32>
    %142 = arith.addf %133, %141 : vector<4x512xf32>
    %143 = vector.extract_strided_slice %137 {offsets = [0, 128], sizes = [32, 512], strides = [1, 1]} : vector<32x768xf32> to vector<32x512xf32>
    %c16 = arith.constant 16 : index
    %c0_84 = arith.constant 0 : index
    %c0_85 = arith.constant 0 : index
    %144 = vector.load %arg3[%c16, %c0_84, %c0_85] : memref<27x4x32xf32, #tpu.memory_space<vmem>>, vector<1x4x32xf32>
    %145 = vector.shape_cast %144 : vector<1x4x32xf32> to vector<4x32xf32>
    %cst_86 = arith.constant dense<0.000000e+00> : vector<4x512xf32>
    %146 = tpu.matmul %145, %143, %cst_86 {dimension_numbers = #tpu.dot_dimension_numbers<[1], [0], [0], [1], [0, 0, 1, 1], [], []>} : vector<4x32xf32>, vector<32x512xf32>, vector<4x512xf32> -> vector<4x512xf32>
    %147 = arith.addf %142, %146 : vector<4x512xf32>
    %148 = vector.extract_strided_slice %137 {offsets = [0, 256], sizes = [32, 512], strides = [1, 1]} : vector<32x768xf32> to vector<32x512xf32>
    %c25 = arith.constant 25 : index
    %c0_87 = arith.constant 0 : index
    %c0_88 = arith.constant 0 : index
    %149 = vector.load %arg3[%c25, %c0_87, %c0_88] : memref<27x4x32xf32, #tpu.memory_space<vmem>>, vector<1x4x32xf32>
    %150 = vector.shape_cast %149 : vector<1x4x32xf32> to vector<4x32xf32>
    %cst_89 = arith.constant dense<0.000000e+00> : vector<4x512xf32>
    %151 = tpu.matmul %150, %148, %cst_89 {dimension_numbers = #tpu.dot_dimension_numbers<[1], [0], [0], [1], [0, 0, 1, 1], [], []>} : vector<4x32xf32>, vector<32x512xf32>, vector<4x512xf32> -> vector<4x512xf32>
    %152 = arith.addf %147, %151 : vector<4x512xf32>
    %c751_i32 = arith.constant 751 : i32
    %153 = tpu.dynamic_rotate %3 by %c751_i32 dim 1 : vector<32x768xf32>, i32 -> vector<32x768xf32>
    %c8 = arith.constant 8 : index
    %c0_90 = arith.constant 0 : index
    %154 = vector.load %arg2[%c8, %c0_90] : memref<9x768xf32, #tpu.memory_space<vmem>>, vector<1x768xf32>
    %155 = vector.broadcast %154 : vector<1x768xf32> to vector<32x768xf32>
    %156 = arith.mulf %153, %155 : vector<32x768xf32>
    %157 = vector.extract_strided_slice %156 {offsets = [0, 0], sizes = [32, 512], strides = [1, 1]} : vector<32x768xf32> to vector<32x512xf32>
    %c8_91 = arith.constant 8 : index
    %c0_92 = arith.constant 0 : index
    %c0_93 = arith.constant 0 : index
    %158 = vector.load %arg3[%c8_91, %c0_92, %c0_93] : memref<27x4x32xf32, #tpu.memory_space<vmem>>, vector<1x4x32xf32>
    %159 = vector.shape_cast %158 : vector<1x4x32xf32> to vector<4x32xf32>
    %cst_94 = arith.constant dense<0.000000e+00> : vector<4x512xf32>
    %160 = tpu.matmul %159, %157, %cst_94 {dimension_numbers = #tpu.dot_dimension_numbers<[1], [0], [0], [1], [0, 0, 1, 1], [], []>} : vector<4x32xf32>, vector<32x512xf32>, vector<4x512xf32> -> vector<4x512xf32>
    %161 = arith.addf %152, %160 : vector<4x512xf32>
    %162 = vector.extract_strided_slice %156 {offsets = [0, 128], sizes = [32, 512], strides = [1, 1]} : vector<32x768xf32> to vector<32x512xf32>
    %c17 = arith.constant 17 : index
    %c0_95 = arith.constant 0 : index
    %c0_96 = arith.constant 0 : index
    %163 = vector.load %arg3[%c17, %c0_95, %c0_96] : memref<27x4x32xf32, #tpu.memory_space<vmem>>, vector<1x4x32xf32>
    %164 = vector.shape_cast %163 : vector<1x4x32xf32> to vector<4x32xf32>
    %cst_97 = arith.constant dense<0.000000e+00> : vector<4x512xf32>
    %165 = tpu.matmul %164, %162, %cst_97 {dimension_numbers = #tpu.dot_dimension_numbers<[1], [0], [0], [1], [0, 0, 1, 1], [], []>} : vector<4x32xf32>, vector<32x512xf32>, vector<4x512xf32> -> vector<4x512xf32>
    %166 = arith.addf %161, %165 : vector<4x512xf32>
    %167 = vector.extract_strided_slice %156 {offsets = [0, 256], sizes = [32, 512], strides = [1, 1]} : vector<32x768xf32> to vector<32x512xf32>
    %c26 = arith.constant 26 : index
    %c0_98 = arith.constant 0 : index
    %c0_99 = arith.constant 0 : index
    %168 = vector.load %arg3[%c26, %c0_98, %c0_99] : memref<27x4x32xf32, #tpu.memory_space<vmem>>, vector<1x4x32xf32>
    %169 = vector.shape_cast %168 : vector<1x4x32xf32> to vector<4x32xf32>
    %cst_100 = arith.constant dense<0.000000e+00> : vector<4x512xf32>
    %170 = tpu.matmul %169, %167, %cst_100 {dimension_numbers = #tpu.dot_dimension_numbers<[1], [0], [0], [1], [0, 0, 1, 1], [], []>} : vector<4x32xf32>, vector<32x512xf32>, vector<4x512xf32> -> vector<4x512xf32>
    %171 = arith.addf %166, %170 : vector<4x512xf32>
    %cst_101 = arith.constant 0.000000e+00 : f32
    %172 = vector.broadcast %cst_101 : f32 to vector<4x512xf32>
    %173 = arith.maximumf %171, %172 : vector<4x512xf32>
    %174 = vector.extract_strided_slice %173 {offsets = [0, 0], sizes = [2, 512], strides = [1, 1]} : vector<4x512xf32> to vector<2x512xf32>
    %175 = vector.extract_strided_slice %173 {offsets = [2, 0], sizes = [2, 512], strides = [1, 1]} : vector<4x512xf32> to vector<2x512xf32>
    %c0_102 = arith.constant 0 : index
    %c0_103 = arith.constant 0 : index
    %176 = vector.load %arg4[%c0_102, %c0_103] : memref<4x2xf32, #tpu.memory_space<vmem>>, vector<4x2xf32>
    %cst_104 = arith.constant dense<0.000000e+00> : vector<4x512xf32>
    %177 = tpu.matmul %176, %174, %cst_104 {dimension_numbers = #tpu.dot_dimension_numbers<[1], [0], [0], [1], [0, 0, 1, 1], [], []>} : vector<4x2xf32>, vector<2x512xf32>, vector<4x512xf32> -> vector<4x512xf32>
    %178 = vector.extract_strided_slice %177 {offsets = [0, 0], sizes = [2, 512], strides = [1, 1]} : vector<4x512xf32> to vector<2x512xf32>
    %179 = arith.truncf %178 : vector<2x512xf32> to vector<2x512xbf16>
    %180 = vector.extract_strided_slice %177 {offsets = [2, 0], sizes = [2, 512], strides = [1, 1]} : vector<4x512xf32> to vector<2x512xf32>
    %181 = arith.truncf %180 : vector<2x512xf32> to vector<2x512xbf16>
    %182 = arith.truncf %174 : vector<2x512xf32> to vector<2x512xbf16>
    %cst_105 = arith.constant dense<0.000000e+00> : vector<512x512xf32>
    %183 = tpu.matmul %179, %182, %cst_105 {dimension_numbers = #tpu.dot_dimension_numbers<[0], [0], [1], [1], [0, 1, 1, 1], [], []>} : vector<2x512xbf16>, vector<2x512xbf16>, vector<512x512xf32> -> vector<512x512xf32>
    %cst_106 = arith.constant dense<0xFF800000> : vector<512xf32>
    %184 = vector.multi_reduction <maximumf>, %183, %cst_106 [0] : vector<512x512xf32> to vector<512xf32>
    %185 = vector.shape_cast %184 : vector<512xf32> to vector<1x512xf32>
    %186 = vector.broadcast %185 : vector<1x512xf32> to vector<512x512xf32>
    %187 = arith.subf %183, %186 : vector<512x512xf32>
    %188 = math.exp %187 : vector<512x512xf32>
    %cst_107 = arith.constant dense<0.000000e+00> : vector<512xf32>
    %189 = vector.multi_reduction <add>, %188, %cst_107 [0] : vector<512x512xf32> to vector<512xf32>
    %190 = vector.shape_cast %189 : vector<512xf32> to vector<1x512xf32>
    %191 = arith.truncf %188 : vector<512x512xf32> to vector<512x512xbf16>
    %cst_108 = arith.constant dense<0.000000e+00> : vector<2x512xf32>
    %192 = tpu.matmul %181, %191, %cst_108 {dimension_numbers = #tpu.dot_dimension_numbers<[1], [0], [0], [1], [0, 0, 1, 1], [], []>} : vector<2x512xbf16>, vector<512x512xbf16>, vector<2x512xf32> -> vector<2x512xf32>
    %c0_109 = arith.constant 0 : index
    %c0_110 = arith.constant 0 : index
    %193 = vector.load %arg8[%c0_109, %c0_110] : memref<1x2xf32, #tpu.memory_space<vmem>>, vector<1x1xf32>
    %194 = vector.extract %193[0, 0] : f32 from vector<1x1xf32>
    %195 = tpu.reciprocal %190 {approx = true} : vector<1x512xf32> -> vector<1x512xf32>
    %196 = vector.broadcast %194 : f32 to vector<1x512xf32>
    %197 = arith.mulf %196, %195 : vector<1x512xf32>
    %198 = vector.broadcast %197 : vector<1x512xf32> to vector<2x512xf32>
    %199 = arith.mulf %198, %192 : vector<2x512xf32>
    %200 = arith.addf %174, %199 : vector<2x512xf32>
    %cst_111 = arith.constant dense<0.000000e+00> : vector<2x2xf32>
    %201 = tpu.matmul %175, %175, %cst_111 {dimension_numbers = #tpu.dot_dimension_numbers<[1], [1], [0], [0], [0, 0, 1, 0], [], []>} : vector<2x512xf32>, vector<2x512xf32>, vector<2x2xf32> -> vector<2x2xf32>
    %cst_112 = arith.constant dense<0xFF800000> : vector<2xf32>
    %202 = vector.multi_reduction <maximumf>, %201, %cst_112 [1] : vector<2x2xf32> to vector<2xf32>
    %203 = vector.shape_cast %202 : vector<2xf32> to vector<2x1xf32>
    %204 = vector.broadcast %203 : vector<2x1xf32> to vector<2x2xf32>
    %205 = arith.subf %204, %201 : vector<2x2xf32>
    %cst_113 = arith.constant dense<0xFF800000> : vector<2xf32>
    %206 = vector.multi_reduction <maximumf>, %205, %cst_113 [1] : vector<2x2xf32> to vector<2xf32>
    %207 = vector.shape_cast %206 : vector<2xf32> to vector<2x1xf32>
    %208 = vector.broadcast %207 : vector<2x1xf32> to vector<2x2xf32>
    %209 = arith.subf %205, %208 : vector<2x2xf32>
    %210 = math.exp %209 : vector<2x2xf32>
    %cst_114 = arith.constant dense<0.000000e+00> : vector<2xf32>
    %211 = vector.multi_reduction <add>, %210, %cst_114 [1] : vector<2x2xf32> to vector<2xf32>
    %212 = vector.shape_cast %211 : vector<2xf32> to vector<2x1xf32>
    %213 = vector.broadcast %212 : vector<2x1xf32> to vector<2x2xf32>
    %214 = arith.divf %210, %213 : vector<2x2xf32>
    %215 = vector.extract_strided_slice %214 {offsets = [0, 0], sizes = [1, 1], strides = [1, 1]} : vector<2x2xf32> to vector<1x1xf32>
    %216 = vector.extract_strided_slice %175 {offsets = [0, 0], sizes = [1, 512], strides = [1, 1]} : vector<2x512xf32> to vector<1x512xf32>
    %217 = vector.broadcast %215 : vector<1x1xf32> to vector<1x512xf32>
    %218 = arith.mulf %217, %216 : vector<1x512xf32>
    %219 = vector.extract_strided_slice %214 {offsets = [0, 1], sizes = [1, 1], strides = [1, 1]} : vector<2x2xf32> to vector<1x1xf32>
    %220 = vector.extract_strided_slice %175 {offsets = [1, 0], sizes = [1, 512], strides = [1, 1]} : vector<2x512xf32> to vector<1x512xf32>
    %221 = vector.broadcast %219 : vector<1x1xf32> to vector<1x512xf32>
    %222 = arith.mulf %221, %220 : vector<1x512xf32>
    %223 = arith.addf %218, %222 : vector<1x512xf32>
    %224 = vector.extract_strided_slice %214 {offsets = [1, 0], sizes = [1, 1], strides = [1, 1]} : vector<2x2xf32> to vector<1x1xf32>
    %225 = vector.extract_strided_slice %175 {offsets = [0, 0], sizes = [1, 512], strides = [1, 1]} : vector<2x512xf32> to vector<1x512xf32>
    %226 = vector.broadcast %224 : vector<1x1xf32> to vector<1x512xf32>
    %227 = arith.mulf %226, %225 : vector<1x512xf32>
    %228 = vector.extract_strided_slice %214 {offsets = [1, 1], sizes = [1, 1], strides = [1, 1]} : vector<2x2xf32> to vector<1x1xf32>
    %229 = vector.extract_strided_slice %175 {offsets = [1, 0], sizes = [1, 512], strides = [1, 1]} : vector<2x512xf32> to vector<1x512xf32>
    %230 = vector.broadcast %228 : vector<1x1xf32> to vector<1x512xf32>
    %231 = arith.mulf %230, %229 : vector<1x512xf32>
    %232 = arith.addf %227, %231 : vector<1x512xf32>
    %233 = tpu.concatenate %223, %232 in 0 : vector<1x512xf32>, vector<1x512xf32> -> vector<2x512xf32>
    %c0_115 = arith.constant 0 : index
    %c1_116 = arith.constant 1 : index
    %234 = vector.load %arg8[%c0_115, %c1_116] : memref<1x2xf32, #tpu.memory_space<vmem>>, vector<1x1xf32>
    %235 = vector.extract %234[0, 0] : f32 from vector<1x1xf32>
    %236 = vector.broadcast %235 : f32 to vector<2x512xf32>
    %237 = arith.mulf %236, %233 : vector<2x512xf32>
    %238 = arith.addf %175, %237 : vector<2x512xf32>
    %239 = tpu.concatenate %200, %238 in 0 : vector<2x512xf32>, vector<2x512xf32> -> vector<4x512xf32>
    %cst_117 = arith.constant 0.000000e+00 : f32
    %240 = vector.broadcast %cst_117 : f32 to vector<4x128xf32>
    %241 = tpu.concatenate %240, %239, %240 in 1 : vector<4x128xf32>, vector<4x512xf32>, vector<4x128xf32> -> vector<4x768xf32>
    %cst_118 = arith.constant 0.000000e+00 : f32
    %242 = vector.broadcast %cst_118 : f32 to vector<4x512xf32>
    %c17_i32_119 = arith.constant 17 : i32
    %243 = tpu.dynamic_rotate %241 by %c17_i32_119 dim 1 : vector<4x768xf32>, i32 -> vector<4x768xf32>
    %c0_120 = arith.constant 0 : index
    %c0_121 = arith.constant 0 : index
    %244 = vector.load %arg2[%c0_120, %c0_121] : memref<9x768xf32, #tpu.memory_space<vmem>>, vector<1x768xf32>
    %245 = vector.broadcast %244 : vector<1x768xf32> to vector<4x768xf32>
    %246 = arith.mulf %243, %245 : vector<4x768xf32>
    %247 = vector.extract_strided_slice %246 {offsets = [0, 0], sizes = [4, 512], strides = [1, 1]} : vector<4x768xf32> to vector<4x512xf32>
    %c0_122 = arith.constant 0 : index
    %c0_123 = arith.constant 0 : index
    %c0_124 = arith.constant 0 : index
    %248 = vector.load %arg5[%c0_122, %c0_123, %c0_124] : memref<27x4x4xf32, #tpu.memory_space<vmem>>, vector<1x4x4xf32>
    %249 = vector.shape_cast %248 : vector<1x4x4xf32> to vector<4x4xf32>
    %cst_125 = arith.constant dense<0.000000e+00> : vector<4x512xf32>
    %250 = tpu.matmul %249, %247, %cst_125 {dimension_numbers = #tpu.dot_dimension_numbers<[1], [0], [0], [1], [0, 0, 1, 1], [], []>} : vector<4x4xf32>, vector<4x512xf32>, vector<4x512xf32> -> vector<4x512xf32>
    %251 = arith.addf %242, %250 : vector<4x512xf32>
    %252 = vector.extract_strided_slice %246 {offsets = [0, 128], sizes = [4, 512], strides = [1, 1]} : vector<4x768xf32> to vector<4x512xf32>
    %c9_126 = arith.constant 9 : index
    %c0_127 = arith.constant 0 : index
    %c0_128 = arith.constant 0 : index
    %253 = vector.load %arg5[%c9_126, %c0_127, %c0_128] : memref<27x4x4xf32, #tpu.memory_space<vmem>>, vector<1x4x4xf32>
    %254 = vector.shape_cast %253 : vector<1x4x4xf32> to vector<4x4xf32>
    %cst_129 = arith.constant dense<0.000000e+00> : vector<4x512xf32>
    %255 = tpu.matmul %254, %252, %cst_129 {dimension_numbers = #tpu.dot_dimension_numbers<[1], [0], [0], [1], [0, 0, 1, 1], [], []>} : vector<4x4xf32>, vector<4x512xf32>, vector<4x512xf32> -> vector<4x512xf32>
    %256 = arith.addf %251, %255 : vector<4x512xf32>
    %257 = vector.extract_strided_slice %246 {offsets = [0, 256], sizes = [4, 512], strides = [1, 1]} : vector<4x768xf32> to vector<4x512xf32>
    %c18_130 = arith.constant 18 : index
    %c0_131 = arith.constant 0 : index
    %c0_132 = arith.constant 0 : index
    %258 = vector.load %arg5[%c18_130, %c0_131, %c0_132] : memref<27x4x4xf32, #tpu.memory_space<vmem>>, vector<1x4x4xf32>
    %259 = vector.shape_cast %258 : vector<1x4x4xf32> to vector<4x4xf32>
    %cst_133 = arith.constant dense<0.000000e+00> : vector<4x512xf32>
    %260 = tpu.matmul %259, %257, %cst_133 {dimension_numbers = #tpu.dot_dimension_numbers<[1], [0], [0], [1], [0, 0, 1, 1], [], []>} : vector<4x4xf32>, vector<4x512xf32>, vector<4x512xf32> -> vector<4x512xf32>
    %261 = arith.addf %256, %260 : vector<4x512xf32>
    %c16_i32_134 = arith.constant 16 : i32
    %262 = tpu.dynamic_rotate %241 by %c16_i32_134 dim 1 : vector<4x768xf32>, i32 -> vector<4x768xf32>
    %c1_135 = arith.constant 1 : index
    %c0_136 = arith.constant 0 : index
    %263 = vector.load %arg2[%c1_135, %c0_136] : memref<9x768xf32, #tpu.memory_space<vmem>>, vector<1x768xf32>
    %264 = vector.broadcast %263 : vector<1x768xf32> to vector<4x768xf32>
    %265 = arith.mulf %262, %264 : vector<4x768xf32>
    %266 = vector.extract_strided_slice %265 {offsets = [0, 0], sizes = [4, 512], strides = [1, 1]} : vector<4x768xf32> to vector<4x512xf32>
    %c1_137 = arith.constant 1 : index
    %c0_138 = arith.constant 0 : index
    %c0_139 = arith.constant 0 : index
    %267 = vector.load %arg5[%c1_137, %c0_138, %c0_139] : memref<27x4x4xf32, #tpu.memory_space<vmem>>, vector<1x4x4xf32>
    %268 = vector.shape_cast %267 : vector<1x4x4xf32> to vector<4x4xf32>
    %cst_140 = arith.constant dense<0.000000e+00> : vector<4x512xf32>
    %269 = tpu.matmul %268, %266, %cst_140 {dimension_numbers = #tpu.dot_dimension_numbers<[1], [0], [0], [1], [0, 0, 1, 1], [], []>} : vector<4x4xf32>, vector<4x512xf32>, vector<4x512xf32> -> vector<4x512xf32>
    %270 = arith.addf %261, %269 : vector<4x512xf32>
    %271 = vector.extract_strided_slice %265 {offsets = [0, 128], sizes = [4, 512], strides = [1, 1]} : vector<4x768xf32> to vector<4x512xf32>
    %c10_141 = arith.constant 10 : index
    %c0_142 = arith.constant 0 : index
    %c0_143 = arith.constant 0 : index
    %272 = vector.load %arg5[%c10_141, %c0_142, %c0_143] : memref<27x4x4xf32, #tpu.memory_space<vmem>>, vector<1x4x4xf32>
    %273 = vector.shape_cast %272 : vector<1x4x4xf32> to vector<4x4xf32>
    %cst_144 = arith.constant dense<0.000000e+00> : vector<4x512xf32>
    %274 = tpu.matmul %273, %271, %cst_144 {dimension_numbers = #tpu.dot_dimension_numbers<[1], [0], [0], [1], [0, 0, 1, 1], [], []>} : vector<4x4xf32>, vector<4x512xf32>, vector<4x512xf32> -> vector<4x512xf32>
    %275 = arith.addf %270, %274 : vector<4x512xf32>
    %276 = vector.extract_strided_slice %265 {offsets = [0, 256], sizes = [4, 512], strides = [1, 1]} : vector<4x768xf32> to vector<4x512xf32>
    %c19_145 = arith.constant 19 : index
    %c0_146 = arith.constant 0 : index
    %c0_147 = arith.constant 0 : index
    %277 = vector.load %arg5[%c19_145, %c0_146, %c0_147] : memref<27x4x4xf32, #tpu.memory_space<vmem>>, vector<1x4x4xf32>
    %278 = vector.shape_cast %277 : vector<1x4x4xf32> to vector<4x4xf32>
    %cst_148 = arith.constant dense<0.000000e+00> : vector<4x512xf32>
    %279 = tpu.matmul %278, %276, %cst_148 {dimension_numbers = #tpu.dot_dimension_numbers<[1], [0], [0], [1], [0, 0, 1, 1], [], []>} : vector<4x4xf32>, vector<4x512xf32>, vector<4x512xf32> -> vector<4x512xf32>
    %280 = arith.addf %275, %279 : vector<4x512xf32>
    %c15_i32_149 = arith.constant 15 : i32
    %281 = tpu.dynamic_rotate %241 by %c15_i32_149 dim 1 : vector<4x768xf32>, i32 -> vector<4x768xf32>
    %c2_150 = arith.constant 2 : index
    %c0_151 = arith.constant 0 : index
    %282 = vector.load %arg2[%c2_150, %c0_151] : memref<9x768xf32, #tpu.memory_space<vmem>>, vector<1x768xf32>
    %283 = vector.broadcast %282 : vector<1x768xf32> to vector<4x768xf32>
    %284 = arith.mulf %281, %283 : vector<4x768xf32>
    %285 = vector.extract_strided_slice %284 {offsets = [0, 0], sizes = [4, 512], strides = [1, 1]} : vector<4x768xf32> to vector<4x512xf32>
    %c2_152 = arith.constant 2 : index
    %c0_153 = arith.constant 0 : index
    %c0_154 = arith.constant 0 : index
    %286 = vector.load %arg5[%c2_152, %c0_153, %c0_154] : memref<27x4x4xf32, #tpu.memory_space<vmem>>, vector<1x4x4xf32>
    %287 = vector.shape_cast %286 : vector<1x4x4xf32> to vector<4x4xf32>
    %cst_155 = arith.constant dense<0.000000e+00> : vector<4x512xf32>
    %288 = tpu.matmul %287, %285, %cst_155 {dimension_numbers = #tpu.dot_dimension_numbers<[1], [0], [0], [1], [0, 0, 1, 1], [], []>} : vector<4x4xf32>, vector<4x512xf32>, vector<4x512xf32> -> vector<4x512xf32>
    %289 = arith.addf %280, %288 : vector<4x512xf32>
    %290 = vector.extract_strided_slice %284 {offsets = [0, 128], sizes = [4, 512], strides = [1, 1]} : vector<4x768xf32> to vector<4x512xf32>
    %c11_156 = arith.constant 11 : index
    %c0_157 = arith.constant 0 : index
    %c0_158 = arith.constant 0 : index
    %291 = vector.load %arg5[%c11_156, %c0_157, %c0_158] : memref<27x4x4xf32, #tpu.memory_space<vmem>>, vector<1x4x4xf32>
    %292 = vector.shape_cast %291 : vector<1x4x4xf32> to vector<4x4xf32>
    %cst_159 = arith.constant dense<0.000000e+00> : vector<4x512xf32>
    %293 = tpu.matmul %292, %290, %cst_159 {dimension_numbers = #tpu.dot_dimension_numbers<[1], [0], [0], [1], [0, 0, 1, 1], [], []>} : vector<4x4xf32>, vector<4x512xf32>, vector<4x512xf32> -> vector<4x512xf32>
    %294 = arith.addf %289, %293 : vector<4x512xf32>
    %295 = vector.extract_strided_slice %284 {offsets = [0, 256], sizes = [4, 512], strides = [1, 1]} : vector<4x768xf32> to vector<4x512xf32>
    %c20_160 = arith.constant 20 : index
    %c0_161 = arith.constant 0 : index
    %c0_162 = arith.constant 0 : index
    %296 = vector.load %arg5[%c20_160, %c0_161, %c0_162] : memref<27x4x4xf32, #tpu.memory_space<vmem>>, vector<1x4x4xf32>
    %297 = vector.shape_cast %296 : vector<1x4x4xf32> to vector<4x4xf32>
    %cst_163 = arith.constant dense<0.000000e+00> : vector<4x512xf32>
    %298 = tpu.matmul %297, %295, %cst_163 {dimension_numbers = #tpu.dot_dimension_numbers<[1], [0], [0], [1], [0, 0, 1, 1], [], []>} : vector<4x4xf32>, vector<4x512xf32>, vector<4x512xf32> -> vector<4x512xf32>
    %299 = arith.addf %294, %298 : vector<4x512xf32>
    %c1_i32_164 = arith.constant 1 : i32
    %300 = tpu.dynamic_rotate %241 by %c1_i32_164 dim 1 : vector<4x768xf32>, i32 -> vector<4x768xf32>
    %c3_165 = arith.constant 3 : index
    %c0_166 = arith.constant 0 : index
    %301 = vector.load %arg2[%c3_165, %c0_166] : memref<9x768xf32, #tpu.memory_space<vmem>>, vector<1x768xf32>
    %302 = vector.broadcast %301 : vector<1x768xf32> to vector<4x768xf32>
    %303 = arith.mulf %300, %302 : vector<4x768xf32>
    %304 = vector.extract_strided_slice %303 {offsets = [0, 0], sizes = [4, 512], strides = [1, 1]} : vector<4x768xf32> to vector<4x512xf32>
    %c3_167 = arith.constant 3 : index
    %c0_168 = arith.constant 0 : index
    %c0_169 = arith.constant 0 : index
    %305 = vector.load %arg5[%c3_167, %c0_168, %c0_169] : memref<27x4x4xf32, #tpu.memory_space<vmem>>, vector<1x4x4xf32>
    %306 = vector.shape_cast %305 : vector<1x4x4xf32> to vector<4x4xf32>
    %cst_170 = arith.constant dense<0.000000e+00> : vector<4x512xf32>
    %307 = tpu.matmul %306, %304, %cst_170 {dimension_numbers = #tpu.dot_dimension_numbers<[1], [0], [0], [1], [0, 0, 1, 1], [], []>} : vector<4x4xf32>, vector<4x512xf32>, vector<4x512xf32> -> vector<4x512xf32>
    %308 = arith.addf %299, %307 : vector<4x512xf32>
    %309 = vector.extract_strided_slice %303 {offsets = [0, 128], sizes = [4, 512], strides = [1, 1]} : vector<4x768xf32> to vector<4x512xf32>
    %c12_171 = arith.constant 12 : index
    %c0_172 = arith.constant 0 : index
    %c0_173 = arith.constant 0 : index
    %310 = vector.load %arg5[%c12_171, %c0_172, %c0_173] : memref<27x4x4xf32, #tpu.memory_space<vmem>>, vector<1x4x4xf32>
    %311 = vector.shape_cast %310 : vector<1x4x4xf32> to vector<4x4xf32>
    %cst_174 = arith.constant dense<0.000000e+00> : vector<4x512xf32>
    %312 = tpu.matmul %311, %309, %cst_174 {dimension_numbers = #tpu.dot_dimension_numbers<[1], [0], [0], [1], [0, 0, 1, 1], [], []>} : vector<4x4xf32>, vector<4x512xf32>, vector<4x512xf32> -> vector<4x512xf32>
    %313 = arith.addf %308, %312 : vector<4x512xf32>
    %314 = vector.extract_strided_slice %303 {offsets = [0, 256], sizes = [4, 512], strides = [1, 1]} : vector<4x768xf32> to vector<4x512xf32>
    %c21_175 = arith.constant 21 : index
    %c0_176 = arith.constant 0 : index
    %c0_177 = arith.constant 0 : index
    %315 = vector.load %arg5[%c21_175, %c0_176, %c0_177] : memref<27x4x4xf32, #tpu.memory_space<vmem>>, vector<1x4x4xf32>
    %316 = vector.shape_cast %315 : vector<1x4x4xf32> to vector<4x4xf32>
    %cst_178 = arith.constant dense<0.000000e+00> : vector<4x512xf32>
    %317 = tpu.matmul %316, %314, %cst_178 {dimension_numbers = #tpu.dot_dimension_numbers<[1], [0], [0], [1], [0, 0, 1, 1], [], []>} : vector<4x4xf32>, vector<4x512xf32>, vector<4x512xf32> -> vector<4x512xf32>
    %318 = arith.addf %313, %317 : vector<4x512xf32>
    %319 = vector.extract_strided_slice %241 {offsets = [0, 0], sizes = [4, 512], strides = [1, 1]} : vector<4x768xf32> to vector<4x512xf32>
    %c4_179 = arith.constant 4 : index
    %c0_180 = arith.constant 0 : index
    %c0_181 = arith.constant 0 : index
    %320 = vector.load %arg5[%c4_179, %c0_180, %c0_181] : memref<27x4x4xf32, #tpu.memory_space<vmem>>, vector<1x4x4xf32>
    %321 = vector.shape_cast %320 : vector<1x4x4xf32> to vector<4x4xf32>
    %cst_182 = arith.constant dense<0.000000e+00> : vector<4x512xf32>
    %322 = tpu.matmul %321, %319, %cst_182 {dimension_numbers = #tpu.dot_dimension_numbers<[1], [0], [0], [1], [0, 0, 1, 1], [], []>} : vector<4x4xf32>, vector<4x512xf32>, vector<4x512xf32> -> vector<4x512xf32>
    %323 = arith.addf %318, %322 : vector<4x512xf32>
    %324 = vector.extract_strided_slice %241 {offsets = [0, 128], sizes = [4, 512], strides = [1, 1]} : vector<4x768xf32> to vector<4x512xf32>
    %c13_183 = arith.constant 13 : index
    %c0_184 = arith.constant 0 : index
    %c0_185 = arith.constant 0 : index
    %325 = vector.load %arg5[%c13_183, %c0_184, %c0_185] : memref<27x4x4xf32, #tpu.memory_space<vmem>>, vector<1x4x4xf32>
    %326 = vector.shape_cast %325 : vector<1x4x4xf32> to vector<4x4xf32>
    %cst_186 = arith.constant dense<0.000000e+00> : vector<4x512xf32>
    %327 = tpu.matmul %326, %324, %cst_186 {dimension_numbers = #tpu.dot_dimension_numbers<[1], [0], [0], [1], [0, 0, 1, 1], [], []>} : vector<4x4xf32>, vector<4x512xf32>, vector<4x512xf32> -> vector<4x512xf32>
    %328 = arith.addf %323, %327 : vector<4x512xf32>
    %329 = vector.extract_strided_slice %241 {offsets = [0, 256], sizes = [4, 512], strides = [1, 1]} : vector<4x768xf32> to vector<4x512xf32>
    %c22_187 = arith.constant 22 : index
    %c0_188 = arith.constant 0 : index
    %c0_189 = arith.constant 0 : index
    %330 = vector.load %arg5[%c22_187, %c0_188, %c0_189] : memref<27x4x4xf32, #tpu.memory_space<vmem>>, vector<1x4x4xf32>
    %331 = vector.shape_cast %330 : vector<1x4x4xf32> to vector<4x4xf32>
    %cst_190 = arith.constant dense<0.000000e+00> : vector<4x512xf32>
    %332 = tpu.matmul %331, %329, %cst_190 {dimension_numbers = #tpu.dot_dimension_numbers<[1], [0], [0], [1], [0, 0, 1, 1], [], []>} : vector<4x4xf32>, vector<4x512xf32>, vector<4x512xf32> -> vector<4x512xf32>
    %333 = arith.addf %328, %332 : vector<4x512xf32>
    %c767_i32_191 = arith.constant 767 : i32
    %334 = tpu.dynamic_rotate %241 by %c767_i32_191 dim 1 : vector<4x768xf32>, i32 -> vector<4x768xf32>
    %c5_192 = arith.constant 5 : index
    %c0_193 = arith.constant 0 : index
    %335 = vector.load %arg2[%c5_192, %c0_193] : memref<9x768xf32, #tpu.memory_space<vmem>>, vector<1x768xf32>
    %336 = vector.broadcast %335 : vector<1x768xf32> to vector<4x768xf32>
    %337 = arith.mulf %334, %336 : vector<4x768xf32>
    %338 = vector.extract_strided_slice %337 {offsets = [0, 0], sizes = [4, 512], strides = [1, 1]} : vector<4x768xf32> to vector<4x512xf32>
    %c5_194 = arith.constant 5 : index
    %c0_195 = arith.constant 0 : index
    %c0_196 = arith.constant 0 : index
    %339 = vector.load %arg5[%c5_194, %c0_195, %c0_196] : memref<27x4x4xf32, #tpu.memory_space<vmem>>, vector<1x4x4xf32>
    %340 = vector.shape_cast %339 : vector<1x4x4xf32> to vector<4x4xf32>
    %cst_197 = arith.constant dense<0.000000e+00> : vector<4x512xf32>
    %341 = tpu.matmul %340, %338, %cst_197 {dimension_numbers = #tpu.dot_dimension_numbers<[1], [0], [0], [1], [0, 0, 1, 1], [], []>} : vector<4x4xf32>, vector<4x512xf32>, vector<4x512xf32> -> vector<4x512xf32>
    %342 = arith.addf %333, %341 : vector<4x512xf32>
    %343 = vector.extract_strided_slice %337 {offsets = [0, 128], sizes = [4, 512], strides = [1, 1]} : vector<4x768xf32> to vector<4x512xf32>
    %c14_198 = arith.constant 14 : index
    %c0_199 = arith.constant 0 : index
    %c0_200 = arith.constant 0 : index
    %344 = vector.load %arg5[%c14_198, %c0_199, %c0_200] : memref<27x4x4xf32, #tpu.memory_space<vmem>>, vector<1x4x4xf32>
    %345 = vector.shape_cast %344 : vector<1x4x4xf32> to vector<4x4xf32>
    %cst_201 = arith.constant dense<0.000000e+00> : vector<4x512xf32>
    %346 = tpu.matmul %345, %343, %cst_201 {dimension_numbers = #tpu.dot_dimension_numbers<[1], [0], [0], [1], [0, 0, 1, 1], [], []>} : vector<4x4xf32>, vector<4x512xf32>, vector<4x512xf32> -> vector<4x512xf32>
    %347 = arith.addf %342, %346 : vector<4x512xf32>
    %348 = vector.extract_strided_slice %337 {offsets = [0, 256], sizes = [4, 512], strides = [1, 1]} : vector<4x768xf32> to vector<4x512xf32>
    %c23_202 = arith.constant 23 : index
    %c0_203 = arith.constant 0 : index
    %c0_204 = arith.constant 0 : index
    %349 = vector.load %arg5[%c23_202, %c0_203, %c0_204] : memref<27x4x4xf32, #tpu.memory_space<vmem>>, vector<1x4x4xf32>
    %350 = vector.shape_cast %349 : vector<1x4x4xf32> to vector<4x4xf32>
    %cst_205 = arith.constant dense<0.000000e+00> : vector<4x512xf32>
    %351 = tpu.matmul %350, %348, %cst_205 {dimension_numbers = #tpu.dot_dimension_numbers<[1], [0], [0], [1], [0, 0, 1, 1], [], []>} : vector<4x4xf32>, vector<4x512xf32>, vector<4x512xf32> -> vector<4x512xf32>
    %352 = arith.addf %347, %351 : vector<4x512xf32>
    %c753_i32_206 = arith.constant 753 : i32
    %353 = tpu.dynamic_rotate %241 by %c753_i32_206 dim 1 : vector<4x768xf32>, i32 -> vector<4x768xf32>
    %c6_207 = arith.constant 6 : index
    %c0_208 = arith.constant 0 : index
    %354 = vector.load %arg2[%c6_207, %c0_208] : memref<9x768xf32, #tpu.memory_space<vmem>>, vector<1x768xf32>
    %355 = vector.broadcast %354 : vector<1x768xf32> to vector<4x768xf32>
    %356 = arith.mulf %353, %355 : vector<4x768xf32>
    %357 = vector.extract_strided_slice %356 {offsets = [0, 0], sizes = [4, 512], strides = [1, 1]} : vector<4x768xf32> to vector<4x512xf32>
    %c6_209 = arith.constant 6 : index
    %c0_210 = arith.constant 0 : index
    %c0_211 = arith.constant 0 : index
    %358 = vector.load %arg5[%c6_209, %c0_210, %c0_211] : memref<27x4x4xf32, #tpu.memory_space<vmem>>, vector<1x4x4xf32>
    %359 = vector.shape_cast %358 : vector<1x4x4xf32> to vector<4x4xf32>
    %cst_212 = arith.constant dense<0.000000e+00> : vector<4x512xf32>
    %360 = tpu.matmul %359, %357, %cst_212 {dimension_numbers = #tpu.dot_dimension_numbers<[1], [0], [0], [1], [0, 0, 1, 1], [], []>} : vector<4x4xf32>, vector<4x512xf32>, vector<4x512xf32> -> vector<4x512xf32>
    %361 = arith.addf %352, %360 : vector<4x512xf32>
    %362 = vector.extract_strided_slice %356 {offsets = [0, 128], sizes = [4, 512], strides = [1, 1]} : vector<4x768xf32> to vector<4x512xf32>
    %c15_213 = arith.constant 15 : index
    %c0_214 = arith.constant 0 : index
    %c0_215 = arith.constant 0 : index
    %363 = vector.load %arg5[%c15_213, %c0_214, %c0_215] : memref<27x4x4xf32, #tpu.memory_space<vmem>>, vector<1x4x4xf32>
    %364 = vector.shape_cast %363 : vector<1x4x4xf32> to vector<4x4xf32>
    %cst_216 = arith.constant dense<0.000000e+00> : vector<4x512xf32>
    %365 = tpu.matmul %364, %362, %cst_216 {dimension_numbers = #tpu.dot_dimension_numbers<[1], [0], [0], [1], [0, 0, 1, 1], [], []>} : vector<4x4xf32>, vector<4x512xf32>, vector<4x512xf32> -> vector<4x512xf32>
    %366 = arith.addf %361, %365 : vector<4x512xf32>
    %367 = vector.extract_strided_slice %356 {offsets = [0, 256], sizes = [4, 512], strides = [1, 1]} : vector<4x768xf32> to vector<4x512xf32>
    %c24_217 = arith.constant 24 : index
    %c0_218 = arith.constant 0 : index
    %c0_219 = arith.constant 0 : index
    %368 = vector.load %arg5[%c24_217, %c0_218, %c0_219] : memref<27x4x4xf32, #tpu.memory_space<vmem>>, vector<1x4x4xf32>
    %369 = vector.shape_cast %368 : vector<1x4x4xf32> to vector<4x4xf32>
    %cst_220 = arith.constant dense<0.000000e+00> : vector<4x512xf32>
    %370 = tpu.matmul %369, %367, %cst_220 {dimension_numbers = #tpu.dot_dimension_numbers<[1], [0], [0], [1], [0, 0, 1, 1], [], []>} : vector<4x4xf32>, vector<4x512xf32>, vector<4x512xf32> -> vector<4x512xf32>
    %371 = arith.addf %366, %370 : vector<4x512xf32>
    %c752_i32_221 = arith.constant 752 : i32
    %372 = tpu.dynamic_rotate %241 by %c752_i32_221 dim 1 : vector<4x768xf32>, i32 -> vector<4x768xf32>
    %c7_222 = arith.constant 7 : index
    %c0_223 = arith.constant 0 : index
    %373 = vector.load %arg2[%c7_222, %c0_223] : memref<9x768xf32, #tpu.memory_space<vmem>>, vector<1x768xf32>
    %374 = vector.broadcast %373 : vector<1x768xf32> to vector<4x768xf32>
    %375 = arith.mulf %372, %374 : vector<4x768xf32>
    %376 = vector.extract_strided_slice %375 {offsets = [0, 0], sizes = [4, 512], strides = [1, 1]} : vector<4x768xf32> to vector<4x512xf32>
    %c7_224 = arith.constant 7 : index
    %c0_225 = arith.constant 0 : index
    %c0_226 = arith.constant 0 : index
    %377 = vector.load %arg5[%c7_224, %c0_225, %c0_226] : memref<27x4x4xf32, #tpu.memory_space<vmem>>, vector<1x4x4xf32>
    %378 = vector.shape_cast %377 : vector<1x4x4xf32> to vector<4x4xf32>
    %cst_227 = arith.constant dense<0.000000e+00> : vector<4x512xf32>
    %379 = tpu.matmul %378, %376, %cst_227 {dimension_numbers = #tpu.dot_dimension_numbers<[1], [0], [0], [1], [0, 0, 1, 1], [], []>} : vector<4x4xf32>, vector<4x512xf32>, vector<4x512xf32> -> vector<4x512xf32>
    %380 = arith.addf %371, %379 : vector<4x512xf32>
    %381 = vector.extract_strided_slice %375 {offsets = [0, 128], sizes = [4, 512], strides = [1, 1]} : vector<4x768xf32> to vector<4x512xf32>
    %c16_228 = arith.constant 16 : index
    %c0_229 = arith.constant 0 : index
    %c0_230 = arith.constant 0 : index
    %382 = vector.load %arg5[%c16_228, %c0_229, %c0_230] : memref<27x4x4xf32, #tpu.memory_space<vmem>>, vector<1x4x4xf32>
    %383 = vector.shape_cast %382 : vector<1x4x4xf32> to vector<4x4xf32>
    %cst_231 = arith.constant dense<0.000000e+00> : vector<4x512xf32>
    %384 = tpu.matmul %383, %381, %cst_231 {dimension_numbers = #tpu.dot_dimension_numbers<[1], [0], [0], [1], [0, 0, 1, 1], [], []>} : vector<4x4xf32>, vector<4x512xf32>, vector<4x512xf32> -> vector<4x512xf32>
    %385 = arith.addf %380, %384 : vector<4x512xf32>
    %386 = vector.extract_strided_slice %375 {offsets = [0, 256], sizes = [4, 512], strides = [1, 1]} : vector<4x768xf32> to vector<4x512xf32>
    %c25_232 = arith.constant 25 : index
    %c0_233 = arith.constant 0 : index
    %c0_234 = arith.constant 0 : index
    %387 = vector.load %arg5[%c25_232, %c0_233, %c0_234] : memref<27x4x4xf32, #tpu.memory_space<vmem>>, vector<1x4x4xf32>
    %388 = vector.shape_cast %387 : vector<1x4x4xf32> to vector<4x4xf32>
    %cst_235 = arith.constant dense<0.000000e+00> : vector<4x512xf32>
    %389 = tpu.matmul %388, %386, %cst_235 {dimension_numbers = #tpu.dot_dimension_numbers<[1], [0], [0], [1], [0, 0, 1, 1], [], []>} : vector<4x4xf32>, vector<4x512xf32>, vector<4x512xf32> -> vector<4x512xf32>
    %390 = arith.addf %385, %389 : vector<4x512xf32>
    %c751_i32_236 = arith.constant 751 : i32
    %391 = tpu.dynamic_rotate %241 by %c751_i32_236 dim 1 : vector<4x768xf32>, i32 -> vector<4x768xf32>
    %c8_237 = arith.constant 8 : index
    %c0_238 = arith.constant 0 : index
    %392 = vector.load %arg2[%c8_237, %c0_238] : memref<9x768xf32, #tpu.memory_space<vmem>>, vector<1x768xf32>
    %393 = vector.broadcast %392 : vector<1x768xf32> to vector<4x768xf32>
    %394 = arith.mulf %391, %393 : vector<4x768xf32>
    %395 = vector.extract_strided_slice %394 {offsets = [0, 0], sizes = [4, 512], strides = [1, 1]} : vector<4x768xf32> to vector<4x512xf32>
    %c8_239 = arith.constant 8 : index
    %c0_240 = arith.constant 0 : index
    %c0_241 = arith.constant 0 : index
    %396 = vector.load %arg5[%c8_239, %c0_240, %c0_241] : memref<27x4x4xf32, #tpu.memory_space<vmem>>, vector<1x4x4xf32>
    %397 = vector.shape_cast %396 : vector<1x4x4xf32> to vector<4x4xf32>
    %cst_242 = arith.constant dense<0.000000e+00> : vector<4x512xf32>
    %398 = tpu.matmul %397, %395, %cst_242 {dimension_numbers = #tpu.dot_dimension_numbers<[1], [0], [0], [1], [0, 0, 1, 1], [], []>} : vector<4x4xf32>, vector<4x512xf32>, vector<4x512xf32> -> vector<4x512xf32>
    %399 = arith.addf %390, %398 : vector<4x512xf32>
    %400 = vector.extract_strided_slice %394 {offsets = [0, 128], sizes = [4, 512], strides = [1, 1]} : vector<4x768xf32> to vector<4x512xf32>
    %c17_243 = arith.constant 17 : index
    %c0_244 = arith.constant 0 : index
    %c0_245 = arith.constant 0 : index
    %401 = vector.load %arg5[%c17_243, %c0_244, %c0_245] : memref<27x4x4xf32, #tpu.memory_space<vmem>>, vector<1x4x4xf32>
    %402 = vector.shape_cast %401 : vector<1x4x4xf32> to vector<4x4xf32>
    %cst_246 = arith.constant dense<0.000000e+00> : vector<4x512xf32>
    %403 = tpu.matmul %402, %400, %cst_246 {dimension_numbers = #tpu.dot_dimension_numbers<[1], [0], [0], [1], [0, 0, 1, 1], [], []>} : vector<4x4xf32>, vector<4x512xf32>, vector<4x512xf32> -> vector<4x512xf32>
    %404 = arith.addf %399, %403 : vector<4x512xf32>
    %405 = vector.extract_strided_slice %394 {offsets = [0, 256], sizes = [4, 512], strides = [1, 1]} : vector<4x768xf32> to vector<4x512xf32>
    %c26_247 = arith.constant 26 : index
    %c0_248 = arith.constant 0 : index
    %c0_249 = arith.constant 0 : index
    %406 = vector.load %arg5[%c26_247, %c0_248, %c0_249] : memref<27x4x4xf32, #tpu.memory_space<vmem>>, vector<1x4x4xf32>
    %407 = vector.shape_cast %406 : vector<1x4x4xf32> to vector<4x4xf32>
    %cst_250 = arith.constant dense<0.000000e+00> : vector<4x512xf32>
    %408 = tpu.matmul %407, %405, %cst_250 {dimension_numbers = #tpu.dot_dimension_numbers<[1], [0], [0], [1], [0, 0, 1, 1], [], []>} : vector<4x4xf32>, vector<4x512xf32>, vector<4x512xf32> -> vector<4x512xf32>
    %409 = arith.addf %404, %408 : vector<4x512xf32>
    %cst_251 = arith.constant 0.000000e+00 : f32
    %410 = vector.broadcast %cst_251 : f32 to vector<4x512xf32>
    %411 = arith.maximumf %409, %410 : vector<4x512xf32>
    %c0_252 = arith.constant 0 : index
    %c0_253 = arith.constant 0 : index
    %412 = vector.load %arg6[%c0_252, %c0_253] : memref<64x4xf32, #tpu.memory_space<vmem>>, vector<64x4xf32>
    %cst_254 = arith.constant dense<0.000000e+00> : vector<64x512xf32>
    %413 = tpu.matmul %412, %411, %cst_254 {dimension_numbers = #tpu.dot_dimension_numbers<[1], [0], [0], [1], [0, 0, 1, 1], [], []>} : vector<64x4xf32>, vector<4x512xf32>, vector<64x512xf32> -> vector<64x512xf32>
    %cst_255 = arith.constant 0.000000e+00 : f32
    %414 = vector.broadcast %cst_255 : f32 to vector<64x512xf32>
    %415 = arith.maximumf %413, %414 : vector<64x512xf32>
    %416 = vector.extract_strided_slice %415 {offsets = [0, 0], sizes = [32, 512], strides = [1, 1]} : vector<64x512xf32> to vector<32x512xf32>
    %417 = vector.extract_strided_slice %415 {offsets = [32, 0], sizes = [32, 512], strides = [1, 1]} : vector<64x512xf32> to vector<32x512xf32>
    %418 = arith.addf %416, %417 : vector<32x512xf32>
    %c0_256 = arith.constant 0 : index
    %c0_257 = arith.constant 0 : index
    %419 = vector.load %arg7[%c0_256, %c0_257] : memref<32x32xf32, #tpu.memory_space<vmem>>, vector<32x32xf32>
    %cst_258 = arith.constant dense<0.000000e+00> : vector<32x512xf32>
    %420 = tpu.matmul %419, %418, %cst_258 {dimension_numbers = #tpu.dot_dimension_numbers<[1], [0], [0], [1], [0, 0, 1, 1], [], []>} : vector<32x32xf32>, vector<32x512xf32>, vector<32x512xf32> -> vector<32x512xf32>
    %cst_259 = arith.constant 0.000000e+00 : f32
    %421 = vector.broadcast %cst_259 : f32 to vector<32x512xf32>
    %422 = arith.maximumf %420, %421 : vector<32x512xf32>
    %c0_260 = arith.constant 0 : index
    %c0_261 = arith.constant 0 : index
    %c0_262 = arith.constant 0 : index
    %423 = vector.load %arg9[%c0_260, %c0_261, %c0_262] : memref<1x32x512xf32, #tpu.memory_space<vmem>>, vector<1x32x512xf32>
    %424 = vector.shape_cast %423 : vector<1x32x512xf32> to vector<32x512xf32>
    %425 = vector.shape_cast %422 : vector<32x512xf32> to vector<1x32x512xf32>
    tpu.vector_store %arg9[%c0_260, %c0_261, %c0_262], %425 {strides = array<i32>} : memref<1x32x512xf32, #tpu.memory_space<vmem>>, vector<1x32x512xf32>,
    return
  }
  func.func @transform_0(%arg0: i32) -> (i32, i32, i32) {
    %c0_i32 = arith.constant 0 : i32
    %c0_i32_0 = arith.constant 0 : i32
    %c0_i32_1 = arith.constant 0 : i32
    return %arg0, %c0_i32, %c0_i32_0 : i32, i32, i32
  }
  func.func @transform_1(%arg0: i32) -> (i32, i32) {
    %c0_i32 = arith.constant 0 : i32
    %c0_i32_0 = arith.constant 0 : i32
    %c0_i32_1 = arith.constant 0 : i32
    return %c0_i32, %c0_i32_0 : i32, i32
  }
  func.func @transform_2(%arg0: i32) -> (i32, i32, i32) {
    %c0_i32 = arith.constant 0 : i32
    %c0_i32_0 = arith.constant 0 : i32
    %c0_i32_1 = arith.constant 0 : i32
    %c0_i32_2 = arith.constant 0 : i32
    return %c0_i32, %c0_i32_0, %c0_i32_1 : i32, i32, i32
  }
  func.func @transform_3(%arg0: i32) -> (i32, i32) {
    %c0_i32 = arith.constant 0 : i32
    %c0_i32_0 = arith.constant 0 : i32
    %c0_i32_1 = arith.constant 0 : i32
    return %c0_i32, %c0_i32_0 : i32, i32
  }
  func.func @transform_4(%arg0: i32) -> (i32, i32, i32) {
    %c0_i32 = arith.constant 0 : i32
    %c0_i32_0 = arith.constant 0 : i32
    %c0_i32_1 = arith.constant 0 : i32
    %c0_i32_2 = arith.constant 0 : i32
    return %c0_i32, %c0_i32_0, %c0_i32_1 : i32, i32, i32
  }
  func.func @transform_5(%arg0: i32) -> (i32, i32) {
    %c0_i32 = arith.constant 0 : i32
    %c0_i32_0 = arith.constant 0 : i32
    %c0_i32_1 = arith.constant 0 : i32
    return %c0_i32, %c0_i32_0 : i32, i32
  }
  func.func @transform_6(%arg0: i32) -> (i32, i32) {
    %c0_i32 = arith.constant 0 : i32
    %c0_i32_0 = arith.constant 0 : i32
    %c0_i32_1 = arith.constant 0 : i32
    return %c0_i32, %c0_i32_0 : i32, i32
  }
  func.func @transform_7(%arg0: i32) -> (i32, i32) {
    %c0_i32 = arith.constant 0 : i32
    %c0_i32_0 = arith.constant 0 : i32
    %c0_i32_1 = arith.constant 0 : i32
    return %c0_i32, %c0_i32_0 : i32, i32
  }
  func.func @transform_8(%arg0: i32) -> (i32, i32, i32) {
    %c0_i32 = arith.constant 0 : i32
    %c0_i32_0 = arith.constant 0 : i32
    %c0_i32_1 = arith.constant 0 : i32
    return %arg0, %c0_i32, %c0_i32_0 : i32, i32, i32
  }
}

</mosaic_0001>

<bundles_post_ra>
// kernel: da_block_forward.1
= control target key start
LH: loop header
LB: loop body
LE: loop exit
PB: predicated region body
PF: predicated region fallthrough
CT: control target
= control target key end

     0   :  { %s14857_s27 = smov 0   ;;  %s21216_s0 = inlined_call_operand.vmem [shape: f32[2,32,512], index: 0, kind: input, shape index: {}]   ;;  %s21217_s1 = inlined_call_operand.vmem [shape: f32[9,768], index: 1, kind: input, shape index: {}]   ;;  %s21218_s2 = inlined_call_operand.vmem [shape: f32[27,4,32], index: 2, kind: input, shape index: {}]   ;;  %s21219_s3 = inlined_call_operand.vmem [shape: f32[4,2], index: 3, kind: input, shape index: {}]   ;;  %s21220_s4 = inlined_call_operand.vmem [shape: f32[27,4,4], index: 4, kind: input, shape index: {}]   ;;  %s21221_s5 = inlined_call_operand.vmem [shape: f32[64,4], index: 5, kind: input, shape index: {}]   ;;  %s21222_s6 = inlined_call_operand.vmem [shape: f32[32,32], index: 6, kind: input, shape index: {}]   ;;  %s21223_s7 = inlined_call_operand.vmem [shape: f32[1,2], index: 7, kind: input, shape index: {}]   ;;  %s21224_s8 = inlined_call_operand.vmem [shape: f32[2,32,512], index: 8, kind: output, shape index: {}]  }
   0x1 LB: > { %s13198_s28 = sadd.s32 4294967295, %s14797_s27   ;;  %p13202_p0 = scmp.ge.s32.totalorder %s14797_s27, 1  ;;  %s14797_s27 = sphi %s14857_s27, %s18_s27  }
   0x2   : > { %p262_p1 = scmp.lt.s32.totalorder %s14797_s27, 3 }
   0x4   : > { %p263_p2 = pnand %p13202_p0, %p262_p1 }
   0x6   : > { %266 = sbr.rel (%p263_p2) target bundleno = 3629 (0xe2d), region = 52 }
   0xd   : > { %p296_p3 = scmp.lt.s32.totalorder %s13198_s28, 1  ;;  %v21225_v0 = vmov 0.0   ;;  %s14800_s11 = smov 17   ;;  %v357_v13 = vlaneseq  ;;  %v380_v15 = vld [vmem:[%s21217_s1] ss:$8 sm:$0xf] }
   0xe   : > { %506 = vmatprep.mubr.f32.mxu0 %v21225_v0  ;;  %577 = vmatprep.mubr.f32.mxu1 %v21225_v0  ;;  %s14801_s12 = smov 16   ;;  %s14802_s13 = smov 15   ;;  %v381_v16 = vld [vmem:[%s21217_s1] ss:$8 sm:$0x30]  ;;  %vm438_vm1 = vcmask 261120  }
   0xf   : > { %s23539_s28 = smov (!%p296_p3, %s13198_s28), 1  ;;  %s14803_s14 = smov 1   ;;  %v15025_v14 = vshrl.u32 %v357_v13, 7  ;;  %v15033_v17 = vand.u32 127, %v357_v13  ;;  %v15039_v18 = vor.u32 %v381_v16, %v380_v15  ;;  %v15158_v16 = vld [vmem:[%s21218_s2 + $0x24] sm:$0xf] }
  0x10   : > { %s13589_s29 = sshll.u32 %s23539_s28, 7  ;;  %s14804_s15 = smov 127   ;;  %vm14809_vm9 = vmmov 0   ;;  %vm5290_vm10 = vcmask 1041408   ;;  %vm5286_vm11 = vcmask 15360   ;;  %vm5613_vm12 = vcmask 1040384  }
  0x11   : > { %s14875_s10 = scalar_lea.vmem %s21216_s0, %s13589_s29  ;;  %21999 = vst [vmem:[#allocation2_spill] sm:$0xff] %v15033_v17  ;;  %v15042_v19 = vsub.s32 2, %v15025_v14  ;;  %vm359_vm0 = vcmp.lt.s32.totalorder %v15033_v17, 17  ;;  %v15056_v23 = vsub.s32 1, %v15025_v14  ;;  %v15100_v44 = vsub.s32 0, %v15025_v14  ;;  %s14805_s26 = smov 113  }
  0x12   : > { %v14878_v1 = vld [vmem:[%s14875_s10 + $0x8] sm:$0xff]  ;;  %v14881_v2 = vld [vmem:[%s14875_s10] sm:$0xff]  ;;  %v14915_v8 = vld [vmem:[%s14875_s10 + $0x10] sm:$0xff]  ;;  %v15138_v60 = vsub.s32 3, %v15025_v14  ;;  %vm914_vm2 = vcmp.lt.s32.totalorder %v15033_v17, 16  ;;  %vm1478_vm3 = vcmp.lt.s32.totalorder %v15033_v17, 15 }
  0x13   : > { %333 = vrot.lane.b32.xlu1 %v14878_v1, %s14800_s11  ;;  %325 = vrot.lane.b32.xlu0 %v14881_v2, %s14800_s11  ;;  %v14888_v3 = vld [vmem:[%s14875_s10 + $0x28] sm:$0xff]  ;;  %v14891_v4 = vld [vmem:[%s14875_s10 + $0x20] sm:$0xff]  ;;  %v15049_v22 = vrot.slane %v15039_v18, %v15042_v19  ;;  %v15074_v31 = vrot.slane %v15039_v18, %v15056_v23  ;;  %v387_v52 = vrot.slane %v15039_v18, %v15100_v44  ;;  %s14806_s18 = smov 112   ;;  %vm2042_vm4 = vcmp.lt.s32.totalorder %v15033_v17, 1  ;;  %s14807_s22 = smov 111  }
  0x14   : > { %v14898_v5 = vld [vmem:[%s14875_s10 + $0x40] sm:$0xff]  ;;  %v14905_v6 = vld [vmem:[%s14875_s10 + $0x48] sm:$0xff]  ;;  %v14925_v10 = vld [vmem:[%s14875_s10 + $0x50] sm:$0xff]  ;;  %vm3059_vm5 = vcmp.lt.s32.totalorder %v15033_v17, 127  ;;  %vm3623_vm6 = vcmp.lt.s32.totalorder %v15033_v17, 113  ;;  %vm4187_vm7 = vcmp.lt.s32.totalorder %v15033_v17, 112 }
  0x15   : > { %v14908_v7 = vld [vmem:[%s14875_s10 + $0x60] sm:$0xff]  ;;  %v14918_v9 = vld [vmem:[%s14875_s10 + $0x68] sm:$0xff]  ;;  %v14928_v11 = vld [vmem:[%s14875_s10 + $0x30] sm:$0xff]  ;;  %22000 = vst [vmem:[#allocation3_spill] sm:$0xff] %v15049_v22  ;;  %vm4751_vm8 = vcmp.lt.s32.totalorder %v15033_v17, 111  ;;  %vm8123_vm13 = vcmask 9216  }
  0x16   : > { %v14935_v12 = vld [vmem:[%s14875_s10 + $0x70] sm:$0xff]  ;;  %v15062_v25 = vld [vmem:[%s14875_s10 + $0x18] sm:$0xff]  ;;  %22001 = vst [vmem:[#allocation4_spill] sm:$0xff] %v15074_v31  ;;  %vm8247_vm14 = vcmask 1043456   ;;  %vm8243_vm15 = vcmask 31744  }
  0x17   : > { %335 = vrot.lane.b32.xlu1 %v14888_v3, %s14800_s11  ;;  %327 = vrot.lane.b32.xlu0 %v14891_v4, %s14800_s11  ;;  %v15077_v32 = vld [vmem:[%s14875_s10 + $0x38] sm:$0xff] }
  0x18   : > { %v15097_v40 = vld [vmem:[%s14875_s10 + $0x58] sm:$0xff] }
  0x19   : > { %v15112_v47 = vld [vmem:[%s14875_s10 + $0x78] sm:$0xff] }
  0x1b   : > { %329 = vrot.lane.b32.xlu1 %v14898_v5, %s14800_s11  ;;  %323 = vrot.lane.b32.xlu0 %v21225_v0, %s14800_s11 }
  0x1f   : > { %337 = vrot.lane.b32.xlu1 %v14905_v6, %s14800_s11  ;;  %331 = vrot.lane.b32.xlu0 %v14908_v7, %s14800_s11 }
  0x23   : > { %341 = vrot.lane.b32.xlu1 %v14915_v8, %s14800_s11  ;;  %339 = vrot.lane.b32.xlu0 %v14918_v9, %s14800_s11 }
  0x27   : > { %345 = vrot.lane.b32.xlu1 %v14925_v10, %s14800_s11  ;;  %343 = vrot.lane.b32.xlu0 %v14928_v11, %s14800_s11 }
  0x2b   : > { %880 = vrot.lane.b32.xlu1 %v21225_v0, %s14801_s12  ;;  %347 = vrot.lane.b32.xlu0 %v14935_v12, %s14800_s11 }
  0x2f   : > { %884 = vrot.lane.b32.xlu1 %v14891_v4, %s14801_s12  ;;  %882 = vrot.lane.b32.xlu0 %v14881_v2, %s14801_s12 }
  0x33   : > { %888 = vrot.lane.b32.xlu1 %v14908_v7, %s14801_s12  ;;  %886 = vrot.lane.b32.xlu0 %v14898_v5, %s14801_s12 }
  0x37   : > { %892 = vrot.lane.b32.xlu1 %v14888_v3, %s14801_s12  ;;  %890 = vrot.lane.b32.xlu0 %v14878_v1, %s14801_s12 }
  0x3b   : > { %896 = vrot.lane.b32.xlu1 %v14918_v9, %s14801_s12  ;;  %894 = vrot.lane.b32.xlu0 %v14905_v6, %s14801_s12 }
  0x3f   : > { %900 = vrot.lane.b32.xlu1 %v14928_v11, %s14801_s12  ;;  %898 = vrot.lane.b32.xlu0 %v14915_v8, %s14801_s12 }
  0x43   : > { %904 = vrot.lane.b32.xlu1 %v14935_v12, %s14801_s12  ;;  %902 = vrot.lane.b32.xlu0 %v14925_v10, %s14801_s12 }
  0x47   : > { %1446 = vrot.lane.b32.xlu1 %v14881_v2, %s14802_s13  ;;  %1444 = vrot.lane.b32.xlu0 %v21225_v0, %s14802_s13 }
  0x4b   : > { %1450 = vrot.lane.b32.xlu1 %v14898_v5, %s14802_s13  ;;  %1448 = vrot.lane.b32.xlu0 %v14891_v4, %s14802_s13 }
  0x4f   : > { %1454 = vrot.lane.b32.xlu1 %v14878_v1, %s14802_s13  ;;  %1452 = vrot.lane.b32.xlu0 %v14908_v7, %s14802_s13 }
  0x53   : > { %1458 = vrot.lane.b32.xlu1 %v14905_v6, %s14802_s13  ;;  %1456 = vrot.lane.b32.xlu0 %v14888_v3, %s14802_s13 }
  0x57   : > { %1462 = vrot.lane.b32.xlu1 %v14915_v8, %s14802_s13  ;;  %1460 = vrot.lane.b32.xlu0 %v14918_v9, %s14802_s13 }
  0x5b   : > { %1466 = vrot.lane.b32.xlu1 %v14925_v10, %s14802_s13  ;;  %1464 = vrot.lane.b32.xlu0 %v14928_v11, %s14802_s13 }
  0x5f   : > { %2008 = vrot.lane.b32.xlu1 %v21225_v0, %s14803_s14  ;;  %1468 = vrot.lane.b32.xlu0 %v14935_v12, %s14802_s13 }
  0x63   : > { %2012 = vrot.lane.b32.xlu1 %v14891_v4, %s14803_s14  ;;  %2010 = vrot.lane.b32.xlu0 %v14881_v2, %s14803_s14 }
  0x67   : > { %2016 = vrot.lane.b32.xlu1 %v14908_v7, %s14803_s14  ;;  %2014 = vrot.lane.b32.xlu0 %v14898_v5, %s14803_s14 }
  0x6b   : > { %2020 = vrot.lane.b32.xlu1 %v14888_v3, %s14803_s14  ;;  %2018 = vrot.lane.b32.xlu0 %v14878_v1, %s14803_s14 }
  0x6f   : > { %2024 = vrot.lane.b32.xlu1 %v14918_v9, %s14803_s14  ;;  %2022 = vrot.lane.b32.xlu0 %v14905_v6, %s14803_s14 }
  0x73   : > { %2028 = vrot.lane.b32.xlu1 %v14928_v11, %s14803_s14  ;;  %2026 = vrot.lane.b32.xlu0 %v14915_v8, %s14803_s14 }
  0x77   : > { %2032 = vrot.lane.b32.xlu1 %v14935_v12, %s14803_s14  ;;  %2030 = vrot.lane.b32.xlu0 %v14925_v10, %s14803_s14 }
  0x7b   : > { %3029 = vrot.lane.b32.xlu1 %v14891_v4, %s14804_s15  ;;  %3027 = vrot.lane.b32.xlu0 %v14881_v2, %s14804_s15 }
  0x7f   : > { %3037 = vrot.lane.b32.xlu1 %v14888_v3, %s14804_s15  ;;  %3035 = vrot.lane.b32.xlu0 %v14878_v1, %s14804_s15 }
  0x83   : > { %3031 = vrot.lane.b32.xlu1 %v14898_v5, %s14804_s15  ;;  %3025 = vrot.lane.b32.xlu0 %v21225_v0, %s14804_s15 }
  0x85   : > { %v15044_v20 = vpop.permute.xlu1 %333  ;;  %v326_v21 = vpop.permute.xlu0 %325 }
  0x86   : > { %v372_v24 = vsel %vm359_vm0, %v326_v21, %v15044_v20 }
  0x87   : > { %3039 = vrot.lane.b32.xlu1 %v14905_v6, %s14804_s15  ;;  %3033 = vrot.lane.b32.xlu0 %v14908_v7, %s14804_s15  ;;  %v416_v29 = vmul.f32 %v15049_v22, %v372_v24 }
  0x89   : > { %v336_v26 = vpop.permute.xlu1 %335  ;;  %v328_v27 = vpop.permute.xlu0 %327 }
  0x8a   : > { %v373_v28 = vsel %vm359_vm0, %v328_v27, %v336_v26 }
  0x8b   : > { %v421_v30 = vmul.f32 %v15049_v22, %v373_v28  ;;  %349 = vrot.lane.b32.xlu1 %v15062_v25, %s14800_s11  ;;  %3041 = vrot.lane.b32.xlu0 %v14918_v9, %s14804_s15  ;;  %v13216_v28 = vld [vmem:[%s21217_s1 + $0x1] ss:$8 sm:$0x30] }
  0x8d   : > { %v330_v33 = vpop.permute.xlu1 %329  ;;  %v15079_v34 = vpop.permute.xlu0 %323  ;;  %v15081_v35 = vpack.c.bf16 %v421_v30, %v416_v29 }
  0x8e   : > { %22002 = vst [vmem:[#allocation5_spill] sm:$0xff] %v15079_v34  ;;  %v376_v36 = vsel %vm359_vm0, %v15079_v34, %v326_v21  ;;  %v377_v37 = vsel %vm359_vm0, %v15079_v34, %v328_v27  ;;  %v378_v51 = vsel %vm359_vm0, %v15079_v34, %v330_v33  ;;  %v15145_v62 = vmul.f32 %v387_v52, %v15079_v34  ;;  %v13215_v27 = vld [vmem:[%s21217_s1 + $0x1] ss:$8 sm:$0xf] }
  0x8f   : > { %3043 = vrot.lane.b32.xlu1 %v14915_v8, %s14804_s15  ;;  %351 = vrot.lane.b32.xlu0 %v15077_v32, %s14800_s11  ;;  %v415_v38 = vmul.f32 %v15074_v31, %v376_v36  ;;  %v420_v39 = vmul.f32 %v15074_v31, %v377_v37  ;;  %v425_v59 = vmul.f32 %v15074_v31, %v378_v51 }
  0x90   : > { %13615 = vmatprep.subr.bf16.mxu0 %v15081_v35  ;;  %22003 = vst [vmem:[#allocation6_spill] sm:$0xff] %v15145_v62  ;;  %v15162_v21 = vrot.slane %v15039_v18, %v15138_v60  ;;  %v15189_v37 = vor.u32 %v13216_v28, %v13215_v27 }
  0x91   : > { %v338_v41 = vpop.permute.xlu1 %337  ;;  %v332_v42 = vpop.permute.xlu0 %331  ;;  %v13616_v43 = vpack.c.bf16 %v420_v39, %v415_v38 }
  0x92   : > { %v374_v45 = vsel %vm359_vm0, %v330_v33, %v338_v41  ;;  %v379_v46 = vsel %vm359_vm0, %v15079_v34, %v332_v42  ;;  %22005 = vst [vmem:[#allocation8_spill] sm:$0xff] %v15162_v21  ;;  %v943_v52 = vrot.slane %v15189_v37, %v15100_v44 }
  0x93   : > { %353 = vrot.lane.b32.xlu1 %v15097_v40, %s14800_s11  ;;  %3045 = vrot.lane.b32.xlu0 %v14928_v11, %s14804_s15  ;;  %v426_v53 = vmul.f32 %v15049_v22, %v374_v45  ;;  %v430_v54 = vmul.f32 %v15074_v31, %v379_v46 }
  0x94   : > { %13617 = vmatpush1.bf16.msra.mxu0 %v13616_v43 }
  0x95   : > { %v15114_v48 = vpop.permute.xlu1 %341  ;;  %v340_v49 = vpop.permute.xlu0 %339  ;;  %v13620_v61 = vpack.c.bf16 %v430_v54, %v425_v59 }
  0x96   : > { %v375_v50 = vsel %vm359_vm0, %v332_v42, %v340_v49  ;;  %v368_v24 = vsel %vm359_vm0, %v15044_v20, %v15114_v48  ;;  %v15201_v42 = vrot.slane %v15189_v37, %v15056_v23 }
  0x97   : > { %v431_v55 = vmul.f32 %v15049_v22, %v375_v50  ;;  %3047 = vrot.lane.b32.xlu1 %v14925_v10, %s14804_s15  ;;  %355 = vrot.lane.b32.xlu0 %v15112_v47, %s14800_s11  ;;  %v417_v36 = vmul.f32 %v15162_v21, %v368_v24  ;;  %v15214_v50 = vld [vmem:[%s21218_s2] sm:$0xf] }
  0x98   : > { %22006 = vst [vmem:[#allocation9_spill] sm:$0xff] %v15201_v42 }
  0x99   : > { %v15130_v56 = vpop.permute.xlu1 %345  ;;  %v15132_v57 = vpop.permute.xlu0 %343  ;;  %v15134_v58 = vpack.c.bf16 %v431_v55, %v426_v53 }
  0x9a   : > { %v369_v63 = vsel %vm359_vm0, %v336_v26, %v15132_v57  ;;  %v13632_v26 = vpack.c.bf16 %v15145_v62, %v15145_v62  ;;  %v370_v38 = vsel %vm359_vm0, %v338_v41, %v15130_v56 }
  0x9b   : > { %3051 = vrot.lane.b32.xlu1 %v15062_v25, %s14804_s15  ;;  %3049 = vrot.lane.b32.xlu0 %v14935_v12, %s14804_s15  ;;  %v422_v29 = vmul.f32 %v15162_v21, %v369_v63  ;;  %v427_v51 = vmul.f32 %v15162_v21, %v370_v38 }
  0x9c   : > { %13619 = vmatprep.subr.bf16.mxu0 %v15134_v58 }
  0x9d   : > { %13621 = vmatpush1.bf16.msra.mxu0 %v13620_v61  ;;  %v15151_v13 = vpop.permute.xlu1 %880  ;;  %v15153_v15 = vpop.permute.xlu0 %347 }
  0x9e   : > { %22004 = vst [vmem:[#allocation7_spill] sm:$0xff] %v15151_v13  ;;  %13631 = vmatprep.subr.bf16.mxu0 %v13616_v43  ;;  %v371_v20 = vsel %vm359_vm0, %v340_v49, %v15153_v15  ;;  %v15203_v43 = vpack.c.bf16 %v422_v29, %v417_v36  ;;  %v15250_v29 = vrot.slane %v15189_v37, %v15042_v19 }
  0x9f   : > { %3055 = vrot.lane.b32.xlu1 %v15097_v40, %s14804_s15  ;;  %3053 = vrot.lane.b32.xlu0 %v15077_v32, %s14804_s15  ;;  %v432_v39 = vmul.f32 %v15162_v21, %v371_v20 }
  0xa0   : > { %13208 = vmatmul.mubr.msk.f32.vlgmr.msra.gmra.mrb[0].mxu0 %vm438_vm1, %v15158_v16  ;;  %22008 = vst [vmem:[#allocation11_spill] sm:$0xff] %v15250_v29 }
  0xa1   : > { %13633 = vmatpush1.bf16.msra.mxu0 %v13632_v26  ;;  %v885_v30 = vpop.permute.xlu1 %884  ;;  %v883_v33 = vpop.permute.xlu0 %882  ;;  %651 = vmatprep.mubr.f32.mxu0 %v21225_v0  ;;  %v15228_v55 = vpack.c.bf16 %v432_v39, %v427_v51 }
  0xa2   : > { %13635 = vmatprep.subr.bf16.mxu0 %v13620_v61  ;;  %v932_v45 = vsel %vm914_vm2, %v15151_v13, %v885_v30  ;;  %v931_v41 = vsel %vm914_vm2, %v15151_v13, %v883_v33 }
  0xa3   : > { %3591 = vrot.lane.b32.xlu1 %v14881_v2, %s14805_s26  ;;  %3057 = vrot.lane.b32.xlu0 %v15112_v47, %s14804_s15  ;;  %v976_v53 = vmul.f32 %v15201_v42, %v932_v45  ;;  %v971_v54 = vmul.f32 %v15201_v42, %v931_v41  ;;  %v15260_v41 = vld [vmem:[%s21218_s2 + $0x48] sm:$0xf] }
  0xa5   : > { %13637 = vmatpush1.bf16.msra.mxu0 %v13632_v26  ;;  %v889_v46 = vpop.permute.xlu1 %888  ;;  %v887_v49 = vpop.permute.xlu0 %886  ;;  %v15244_v26 = vmul.f32 %v943_v52, %v15151_v13  ;;  %v13662_v20 = vpack.c.bf16 %v976_v53, %v971_v54 }
  0xa6   : > { %13647 = vmatprep.subr.bf16.mxu0 %v15203_v43  ;;  %v934_v59 = vsel %vm914_vm2, %v15151_v13, %v889_v46  ;;  %v933_v61 = vsel %vm914_vm2, %v15151_v13, %v887_v49 }
  0xa7   : > { %3599 = vrot.lane.b32.xlu1 %v14878_v1, %s14805_s26  ;;  %3593 = vrot.lane.b32.xlu0 %v14891_v4, %s14805_s26  ;;  %22007 = vst [vmem:[#allocation10_spill] sm:$0xff] %v15244_v26  ;;  %v986_v27 = vmul.f32 %v15201_v42, %v934_v59  ;;  %v981_v28 = vmul.f32 %v15201_v42, %v933_v61 }
  0xa8   : > { %13210 = vmatmul.mubr.msk.f32.vlgmr.msra.gmra.mrb[0].mxu0 %vm438_vm1, %v15214_v50 }
  0xa9   : > { %13649 = vmatpush1.bf16.msra.mxu0 %v15081_v35  ;;  %v893_v63 = vpop.permute.xlu1 %892  ;;  %v891_v24 = vpop.permute.xlu0 %890  ;;  %798 = vmatprep.mubr.f32.mxu0 %v21225_v0  ;;  %v13666_v52 = vpack.c.bf16 %v986_v27, %v981_v28 }
  0xaa   : > { %13651 = vmatprep.subr.bf16.mxu0 %v15228_v55  ;;  %v928_v36 = vsel %vm914_vm2, %v885_v30, %v893_v63  ;;  %v927_v38 = vsel %vm914_vm2, %v883_v33, %v891_v24  ;;  %v13664_v30 = vpack.c.bf16 %v15244_v26, %v15244_v26 }
  0xab   : > { %3589 = vrot.lane.b32.xlu1 %v21225_v0, %s14805_s26  ;;  %3601 = vrot.lane.b32.xlu0 %v14888_v3, %s14805_s26  ;;  %v977_v33 = vmul.f32 %v15250_v29, %v928_v36  ;;  %v972_v51 = vmul.f32 %v15250_v29, %v927_v38 }
  0xad   : > { %13653 = vmatpush1.bf16.msra.mxu0 %v15134_v58  ;;  %v897_v39 = vpop.permute.xlu1 %896  ;;  %v895_v45 = vpop.permute.xlu0 %894  ;;  %v15291_v28 = vpack.c.bf16 %v977_v33, %v972_v51 }
  0xae   : > { %13663 = vmatprep.subr.bf16.mxu0 %v13662_v20  ;;  %v930_v53 = vsel %vm914_vm2, %v889_v46, %v897_v39  ;;  %v929_v54 = vsel %vm914_vm2, %v887_v49, %v895_v45  ;;  %v15289_v49 = vrot.slane %v15189_v37, %v15138_v60 }
  0xaf   : > { %3597 = vrot.lane.b32.xlu1 %v14908_v7, %s14805_s26  ;;  %3595 = vrot.lane.b32.xlu0 %v14898_v5, %s14805_s26  ;;  %v987_v27 = vmul.f32 %v15250_v29, %v930_v53  ;;  %v982_v46 = vmul.f32 %v15250_v29, %v929_v54  ;;  %v15306_v54 = vld [vmem:[%s21218_s2 + $0x4] sm:$0xf] }
  0xb0   : > { %13213 = vmatmul.mubr.msk.f32.vlgmr.msra.gmra.mrb[0].mxu0 %vm438_vm1, %v15260_v41  ;;  %22011 = vst [vmem:[#allocation14_spill] sm:$0xff] %v15289_v49 }
  0xb1   : > { %13665 = vmatpush1.bf16.msra.mxu0 %v13664_v30  ;;  %v15276_v59 = vpop.permute.xlu1 %900  ;;  %v15278_v61 = vpop.permute.xlu0 %898  ;;  %1060 = vmatprep.mubr.f32.mxu0 %v21225_v0  ;;  %v15323_v51 = vpack.c.bf16 %v987_v27, %v982_v46 }
  0xb2   : > { %22009 = vst [vmem:[#allocation12_spill] sm:$0xff] %v15276_v59  ;;  %22010 = vst [vmem:[#allocation13_spill] sm:$0xff] %v15278_v61  ;;  %13667 = vmatprep.subr.bf16.mxu0 %v13666_v52  ;;  %v924_v36 = vsel %vm914_vm2, %v893_v63, %v15276_v59  ;;  %v923_v38 = vsel %vm914_vm2, %v891_v24, %v15278_v61  ;;  %v13226_v63 = vld [vmem:[%s21217_s1 + $0x2] ss:$8 sm:$0xf]  ;;  %v15757_v59 = vpack.c.bf16 %v14935_v12, %v14925_v10 }
  0xb3   : > { %3605 = vrot.lane.b32.xlu1 %v14918_v9, %s14805_s26  ;;  %3603 = vrot.lane.b32.xlu0 %v14905_v6, %s14805_s26  ;;  %v13227_v24 = vld [vmem:[%s21217_s1 + $0x2] ss:$8 sm:$0x30]  ;;  %v973_v33 = vmul.f32 %v15289_v49, %v923_v38 }
  0xb4   : > { %v15335_v38 = vor.u32 %v13227_v24, %v13226_v63  ;;  %v15349_v63 = vld [vmem:[%s21218_s2 + $0x28] sm:$0xf] }
  0xb5   : > { %13669 = vmatpush1.bf16.msra.mxu0 %v13664_v30  ;;  %v15299_v0 = vpop.permute.xlu1 %904  ;;  %v15301_v53 = vpop.permute.xlu0 %902  ;;  %v978_v30 = vmul.f32 %v15289_v49, %v924_v36  ;;  %v22015_v36 = vmov 0.0   ;;  %22017 = vst [vmem:[#allocation19_spill] sm:$0xff] %v15349_v63 }
  0xb6   : > { %22012 = vst [vmem:[#allocation15_spill] sm:$0xff] %v15299_v0  ;;  %22013 = vst [vmem:[#allocation16_spill] sm:$0xff] %v15301_v53  ;;  %13679 = vmatprep.subr.bf16.mxu0 %v15291_v28  ;;  %v926_v29 = vsel %vm914_vm2, %v897_v39, %v15299_v0  ;;  %v925_v26 = vsel %vm914_vm2, %v895_v45, %v15301_v53  ;;  %v15353_v24 = vrot.slane %v15335_v38, %v15056_v23  ;;  %v15395_v0 = vld [vmem:[%s21218_s2 + $0x4c] sm:$0xf] }
  0xb7   : > { %3609 = vrot.lane.b32.xlu1 %v14928_v11, %s14805_s26  ;;  %3607 = vrot.lane.b32.xlu0 %v14915_v8, %s14805_s26  ;;  %22016 = vst [vmem:[#allocation18_spill] sm:$0xff] %v15335_v38  ;;  %v988_v39 = vmul.f32 %v15289_v49, %v926_v29  ;;  %v15344_v45 = vpack.c.bf16 %v978_v30, %v973_v33  ;;  %22020 = vst [vmem:[#allocation22_spill] sm:$0xff] %v15395_v0 }
  0xb8   : > { %13218 = vmatmul.mubr.msk.f32.vlgmr.msra.gmra.mrb[0].mxu0 %vm438_vm1, %v15306_v54  ;;  %22018 = vst [vmem:[#allocation20_spill] sm:$0xff] %v15353_v24  ;;  %v15400_v61 = vrot.slane %v15335_v38, %v15042_v19 }
  0xb9   : > { %13681 = vmatpush1.bf16.msra.mxu0 %v13662_v20  ;;  %v1447_v42 = vpop.permute.xlu1 %1446  ;;  %v15331_v62 = vpop.permute.xlu0 %1444  ;;  %1211 = vmatprep.mubr.f32.mxu0 %v22015_v36  ;;  %v983_v20 = vmul.f32 %v15289_v49, %v925_v26 }
  0xba   : > { %22014 = vst [vmem:[#allocation17_spill] sm:$0xff] %v15331_v62  ;;  %13683 = vmatprep.subr.bf16.mxu0 %v15323_v51  ;;  %v1495_v29 = vsel %vm1478_vm3, %v15331_v62, %v1447_v42  ;;  %22021 = vst [vmem:[#allocation23_spill] sm:$0xff] %v15400_v61 }
  0xbb   : > { %3613 = vrot.lane.b32.xlu1 %v14935_v12, %s14805_s26  ;;  %3611 = vrot.lane.b32.xlu0 %v14925_v10, %s14805_s26  ;;  %v15371_v33 = vpack.c.bf16 %v988_v39, %v983_v20  ;;  %v1535_v31 = vmul.f32 %v15353_v24, %v1495_v29 }
  0xbd   : > { %13685 = vmatpush1.bf16.msra.mxu0 %v13666_v52  ;;  %v1451_v27 = vpop.permute.xlu1 %1450  ;;  %v1449_v46 = vpop.permute.xlu0 %1448  ;;  %v1507_v52 = vrot.slane %v15335_v38, %v15100_v44 }
  0xbe   : > { %13695 = vmatprep.subr.bf16.mxu0 %v15344_v45  ;;  %v1496_v26 = vsel %vm1478_vm3, %v15331_v62, %v1449_v46 }
  0xbf   : > { %908 = vrot.lane.b32.xlu1 %v15077_v32, %s14801_s12  ;;  %906 = vrot.lane.b32.xlu0 %v15062_v25, %s14801_s12  ;;  %v1540_v30 = vmul.f32 %v15353_v24, %v1496_v26  ;;  %v1497_v26 = vsel %vm1478_vm3, %v15331_v62, %v1451_v27  ;;  %v15388_v39 = vmul.f32 %v1507_v52, %v15331_v62 }
  0xc0   : > { %13221 = vmatmul.mubr.msk.f32.vlgmr.msra.gmra.mrb[0].mxu0 %vm438_vm1, %v15349_v63  ;;  %v1545_v13 = vmul.f32 %v15353_v24, %v1497_v26 }
  0xc1   : > { %13697 = vmatpush1.bf16.msra.mxu0 %v15291_v28  ;;  %v1455_v49 = vpop.permute.xlu1 %1454  ;;  %v1453_v21 = vpop.permute.xlu0 %1452  ;;  %1362 = vmatprep.mubr.f32.mxu0 %v22015_v36  ;;  %22019 = vst [vmem:[#allocation21_spill] sm:$0xff] %v15388_v39  ;;  %v13710_v63 = vpack.c.bf16 %v1540_v30, %v1535_v31  ;;  %v13712_v52 = vpack.c.bf16 %v15388_v39, %v15388_v39 }
  0xc2   : > { %13699 = vmatprep.subr.bf16.mxu0 %v15371_v33  ;;  %v1498_v22 = vsel %vm1478_vm3, %v15331_v62, %v1453_v21  ;;  %v1491_v31 = vsel %vm1478_vm3, %v1447_v42, %v1455_v49 }
  0xc3   : > { %3617 = vrot.lane.b32.xlu1 %v15077_v32, %s14805_s26  ;;  %3615 = vrot.lane.b32.xlu0 %v15062_v25, %s14805_s26  ;;  %v1550_v20 = vmul.f32 %v15353_v24, %v1498_v22  ;;  %v1536_v42 = vmul.f32 %v15400_v61, %v1491_v31 }
  0xc5   : > { %13701 = vmatpush1.bf16.msra.mxu0 %v15323_v51  ;;  %v1459_v53 = vpop.permute.xlu1 %1458  ;;  %v1457_v29 = vpop.permute.xlu0 %1456  ;;  %v13714_v26 = vpack.c.bf16 %v1550_v20, %v1545_v13 }
  0xc6   : > { %13711 = vmatprep.subr.bf16.mxu0 %v13710_v63  ;;  %v1492_v22 = vsel %vm1478_vm3, %v1449_v46, %v1457_v29  ;;  %v1493_v39 = vsel %vm1478_vm3, %v1451_v27, %v1459_v53 }
  0xc7   : > { %912 = vrot.lane.b32.xlu1 %v15112_v47, %s14801_s12  ;;  %910 = vrot.lane.b32.xlu0 %v15097_v40, %s14801_s12  ;;  %v1541_v30 = vmul.f32 %v15400_v61, %v1492_v22  ;;  %v1546_v27 = vmul.f32 %v15400_v61, %v1493_v39  ;;  %v13237_v39 = vld [vmem:[%s21217_s1 + $0x3] ss:$8 sm:$0xf] }
  0xc8   : > { %13224 = vmatmul.mubr.msk.f32.vlgmr.msra.gmra.mrb[0].mxu0 %vm438_vm1, %v15395_v0  ;;  %v15442_v0 = vrot.slane %v15335_v38, %v15138_v60 }
  0xc9   : > { %13713 = vmatpush1.bf16.msra.mxu0 %v13712_v52  ;;  %v15415_v46 = vpop.permute.xlu1 %1462  ;;  %v1461_v24 = vpop.permute.xlu0 %1460  ;;  %1624 = vmatprep.mubr.f32.mxu0 %v22015_v36  ;;  %v15428_v20 = vpack.c.bf16 %v1541_v30, %v1536_v42  ;;  %v13238_v30 = vld [vmem:[%s21217_s1 + $0x3] ss:$8 sm:$0x30] }
  0xca   : > { %22022 = vst [vmem:[#allocation24_spill] sm:$0xff] %v15415_v46  ;;  %13715 = vmatprep.subr.bf16.mxu0 %v13714_v26  ;;  %v1494_v62 = vsel %vm1478_vm3, %v1453_v21, %v1461_v24  ;;  %v15437_v21 = vld [vmem:[%s21218_s2 + $0x8] sm:$0xf]  ;;  %22027 = vst [vmem:[#allocation29_spill] sm:$0xff] %v15442_v0 }
  0xcb   : > { %3621 = vrot.lane.b32.xlu1 %v15112_v47, %s14805_s26  ;;  %3619 = vrot.lane.b32.xlu0 %v15097_v40, %s14805_s26  ;;  %v1551_v13 = vmul.f32 %v15400_v61, %v1494_v62  ;;  %22023 = vst [vmem:[#allocation25_spill] sm:$0xff] %v15428_v20  ;;  %22026 = vst [vmem:[#allocation28_spill] sm:$0xff] %v15437_v21 }
  0xcd   : > { %13717 = vmatpush1.bf16.msra.mxu0 %v13712_v52  ;;  %v15430_v22 = vpop.permute.xlu1 %1466  ;;  %v15432_v31 = vpop.permute.xlu0 %1464  ;;  %v1487_v52 = vsel %vm1478_vm3, %v1455_v49, %v15415_v46  ;;  %v15464_v49 = vpack.c.bf16 %v1551_v13, %v1546_v27  ;;  %v15476_v46 = vor.u32 %v13238_v30, %v13237_v39 }
  0xce   : > { %22024 = vst [vmem:[#allocation26_spill] sm:$0xff] %v15430_v22  ;;  %22025 = vst [vmem:[#allocation27_spill] sm:$0xff] %v15432_v31  ;;  %13727 = vmatprep.subr.bf16.mxu0 %v15428_v20  ;;  %v1488_v62 = vsel %vm1478_vm3, %v1457_v29, %v15432_v31  ;;  %v1537_v31 = vmul.f32 %v15442_v0, %v1487_v52 }
  0xcf   : > { %4157 = vrot.lane.b32.xlu1 %v14891_v4, %s14806_s18  ;;  %4155 = vrot.lane.b32.xlu0 %v14881_v2, %s14806_s18  ;;  %v1542_v29 = vmul.f32 %v15442_v0, %v1488_v62  ;;  %22028 = vst [vmem:[#allocation30_spill] sm:$0xff] %v15464_v49  ;;  %22031 = vst [vmem:[#allocation33_spill] sm:$0xff] %v15476_v46  ;;  %v15489_v27 = vrot.slane %v15476_v46, %v15056_v23 }
  0xd0   : > { %13229 = vmatmul.mubr.msk.f32.vlgmr.msra.gmra.mrb[0].mxu0 %vm438_vm1, %v15437_v21 }
  0xd1   : > { %13729 = vmatpush1.bf16.msra.mxu0 %v13710_v63  ;;  %v15466_v42 = vpop.permute.xlu1 %2008  ;;  %v15468_v61 = vpop.permute.xlu0 %1468  ;;  %1775 = vmatprep.mubr.f32.mxu0 %v22015_v36  ;;  %v1489_v63 = vsel %vm1478_vm3, %v1459_v53, %v15430_v22  ;;  %22032 = vst [vmem:[#allocation34_spill] sm:$0xff] %v15489_v27  ;;  %v13231_v53 = vld [vmem:[%s21218_s2 + $0x2c] sm:$0xf] }
  0xd2   : > { %22029 = vst [vmem:[#allocation31_spill] sm:$0xff] %v15466_v42  ;;  %22030 = vst [vmem:[#allocation32_spill] sm:$0xff] %v15468_v61  ;;  %13731 = vmatprep.subr.bf16.mxu0 %v15464_v49  ;;  %v1490_v62 = vsel %vm1478_vm3, %v1461_v24, %v15468_v61  ;;  %v15491_v24 = vpack.c.bf16 %v1542_v29, %v1537_v31  ;;  %v1547_v30 = vmul.f32 %v15442_v0, %v1489_v63 }
  0xd3   : > { %4165 = vrot.lane.b32.xlu1 %v14888_v3, %s14806_s18  ;;  %4163 = vrot.lane.b32.xlu0 %v14878_v1, %s14806_s18  ;;  %v1552_v13 = vmul.f32 %v15442_v0, %v1490_v62 }
  0xd4   : > { %22033 = vst [vmem:[#allocation35_spill] sm:$0xff] %v15491_v24 }
  0xd5   : > { %13733 = vmatpush1.bf16.msra.mxu0 %v13714_v26  ;;  %v2013_v52 = vpop.permute.xlu1 %2012  ;;  %v2011_v39 = vpop.permute.xlu0 %2010  ;;  %v2071_v26 = vrot.slane %v15476_v46, %v15100_v44  ;;  %v15513_v63 = vpack.c.bf16 %v1552_v13, %v1547_v30 }
  0xd6   : > { %v2060_v61 = vsel %vm2042_vm4, %v15466_v42, %v2013_v52  ;;  %13743 = vmatprep.subr.bf16.mxu0 %v15491_v24  ;;  %v2059_v31 = vsel %vm2042_vm4, %v15466_v42, %v2011_v39  ;;  %v13234_v24 = vld [vmem:[%s21218_s2 + $0x50] sm:$0xf] }
  0xd7   : > { %4159 = vrot.lane.b32.xlu1 %v14898_v5, %s14806_s18  ;;  %4153 = vrot.lane.b32.xlu0 %v22015_v36, %s14806_s18  ;;  %v2104_v29 = vmul.f32 %v15489_v27, %v2060_v61  ;;  %v2099_v62 = vmul.f32 %v15489_v27, %v2059_v31  ;;  %22034 = vst [vmem:[#allocation36_spill] sm:$0xff] %v15513_v63 }
  0xd8   : > { %13232 = vmatmul.mubr.msk.f32.vlgmr.msra.gmra.mrb[0].mxu0 %vm438_vm1, %v13231_v53  ;;  %v15529_v13 = vmul.f32 %v2071_v26, %v15466_v42  ;;  %v15535_v31 = vrot.slane %v15476_v46, %v15042_v19 }
  0xd9   : > { %13745 = vmatpush1.bf16.msra.mxu0 %v15428_v20  ;;  %v2017_v0 = vpop.permute.xlu1 %2016  ;;  %v2015_v22 = vpop.permute.xlu0 %2014  ;;  %1926 = vmatprep.mubr.f32.mxu0 %v22015_v36  ;;  %v13758_v21 = vpack.c.bf16 %v2104_v29, %v2099_v62 }
  0xda   : > { %v2062_v38 = vsel %vm2042_vm4, %v15466_v42, %v2017_v0  ;;  %13747 = vmatprep.subr.bf16.mxu0 %v15513_v63  ;;  %v2061_v61 = vsel %vm2042_vm4, %v15466_v42, %v2015_v22  ;;  %22035 = vst [vmem:[#allocation37_spill] sm:$0xff] %v15529_v13  ;;  %22036 = vst [vmem:[#allocation38_spill] sm:$0xff] %v15535_v31  ;;  %v13760_v29 = vpack.c.bf16 %v15529_v13, %v15529_v13 }
  0xdb   : > { %4167 = vrot.lane.b32.xlu1 %v14905_v6, %s14806_s18  ;;  %4161 = vrot.lane.b32.xlu0 %v14908_v7, %s14806_s18  ;;  %v2114_v53 = vmul.f32 %v15489_v27, %v2062_v38  ;;  %v2109_v30 = vmul.f32 %v15489_v27, %v2061_v61 }
  0xdd   : > { %13749 = vmatpush1.bf16.msra.mxu0 %v15464_v49  ;;  %v2021_v63 = vpop.permute.xlu1 %2020  ;;  %v2019_v20 = vpop.permute.xlu0 %2018 }
  0xde   : > { %v2056_v26 = vsel %vm2042_vm4, %v2013_v52, %v2021_v63  ;;  %13759 = vmatprep.subr.bf16.mxu0 %v13758_v21  ;;  %v2055_v38 = vsel %vm2042_vm4, %v2011_v39, %v2019_v20  ;;  %v13762_v52 = vpack.c.bf16 %v2114_v53, %v2109_v30  ;;  %v15567_v30 = vrot.slane %v15476_v46, %v15138_v60 }
  0xdf   : > { %4171 = vrot.lane.b32.xlu1 %v14915_v8, %s14806_s18  ;;  %4169 = vrot.lane.b32.xlu0 %v14918_v9, %s14806_s18  ;;  %v2105_v62 = vmul.f32 %v15535_v31, %v2056_v26  ;;  %v2100_v61 = vmul.f32 %v15535_v31, %v2055_v38  ;;  %v13239_v38 = vld [vmem:[%s21218_s2 + $0xc] sm:$0xf] }
  0xe0   : > { %13235 = vmatmul.mubr.msk.f32.vlgmr.msra.gmra.mrb[0].mxu0 %vm438_vm1, %v13234_v24  ;;  %22037 = vst [vmem:[#allocation39_spill] sm:$0xff] %v15567_v30 }
  0xe1   : > { %13761 = vmatpush1.bf16.msra.mxu0 %v13760_v29  ;;  %v2025_v27 = vpop.permute.xlu1 %2024  ;;  %v2023_v42 = vpop.permute.xlu0 %2022  ;;  %2188 = vmatprep.mubr.f32.mxu0 %v22015_v36  ;;  %v15569_v26 = vpack.c.bf16 %v2105_v62, %v2100_v61 }
  0xe2   : > { %v2058_v39 = vsel %vm2042_vm4, %v2017_v0, %v2025_v27  ;;  %13763 = vmatprep.subr.bf16.mxu0 %v13762_v52  ;;  %v2057_v49 = vsel %vm2042_vm4, %v2015_v22, %v2023_v42 }
  0xe3   : > { %4175 = vrot.lane.b32.xlu1 %v14925_v10, %s14806_s18  ;;  %4173 = vrot.lane.b32.xlu0 %v14928_v11, %s14806_s18  ;;  %v2115_v24 = vmul.f32 %v15535_v31, %v2058_v39  ;;  %v2110_v53 = vmul.f32 %v15535_v31, %v2057_v49  ;;  %22038 = vst [vmem:[#allocation40_spill] sm:$0xff] %v15569_v26 }
  0xe5   : > { %13765 = vmatpush1.bf16.msra.mxu0 %v13760_v29  ;;  %v15571_v0 = vpop.permute.xlu1 %2028  ;;  %v15573_v22 = vpop.permute.xlu0 %2026  ;;  %v15592_v61 = vpack.c.bf16 %v2115_v24, %v2110_v53 }
  0xe6   : > { %22039 = vst [vmem:[#allocation41_spill] sm:$0xff] %v15571_v0  ;;  %22040 = vst [vmem:[#allocation42_spill] sm:$0xff] %v15573_v22  ;;  %v2052_v39 = vsel %vm2042_vm4, %v2021_v63, %v15571_v0  ;;  %13775 = vmatprep.subr.bf16.mxu0 %v15569_v26  ;;  %v2051_v49 = vsel %vm2042_vm4, %v2019_v20, %v15573_v22 }
  0xe7   : > { %1470 = vrot.lane.b32.xlu1 %v15062_v25, %s14802_s13  ;;  %4177 = vrot.lane.b32.xlu0 %v14935_v12, %s14806_s18  ;;  %v2106_v29 = vmul.f32 %v15567_v30, %v2052_v39  ;;  %v2101_v62 = vmul.f32 %v15567_v30, %v2051_v49  ;;  %22041 = vst [vmem:[#allocation43_spill] sm:$0xff] %v15592_v61 }
  0xe8   : > { %13240 = vmatmul.mubr.msk.f32.vlgmr.msra.gmra.mrb[0].mxu0 %vm438_vm1, %v13239_v38 }
  0xe9   : > { %13777 = vmatpush1.bf16.msra.mxu0 %v13758_v21  ;;  %v15594_v63 = vpop.permute.xlu1 %2032  ;;  %v15596_v31 = vpop.permute.xlu0 %2030  ;;  %2339 = vmatprep.mubr.f32.mxu0 %v22015_v36  ;;  %v15612_v53 = vpack.c.bf16 %v2106_v29, %v2101_v62  ;;  %v13806_v62 = vpack.c.bf16 %v14891_v4, %v14881_v2 }
  0xea   : > { %22042 = vst [vmem:[#allocation44_spill] sm:$0xff] %v15594_v63  ;;  %22043 = vst [vmem:[#allocation45_spill] sm:$0xff] %v15596_v31  ;;  %v2054_v20 = vsel %vm2042_vm4, %v2025_v27, %v15594_v63  ;;  %13779 = vmatprep.subr.bf16.mxu0 %v15592_v61  ;;  %v2053_v39 = vsel %vm2042_vm4, %v2023_v42, %v15596_v31  ;;  %v13242_v42 = vld [vmem:[%s21218_s2 + $0x30] sm:$0xf]  ;;  %v15665_v31 = vpack.c.bf16 %v14888_v3, %v14878_v1  ;;  %v22047_v63 = vmov 0.0|0.0  }
  0xeb   : > { %4179 = vrot.lane.b32.xlu1 %v15062_v25, %s14806_s18  ;;  %1472 = vrot.lane.b32.xlu0 %v15077_v32, %s14802_s13  ;;  %v2116_v21 = vmul.f32 %v15567_v30, %v2054_v20  ;;  %v2111_v24 = vmul.f32 %v15567_v30, %v2053_v39  ;;  %22044 = vst [vmem:[#allocation46_spill] sm:$0xff] %v15612_v53 }
  0xed   : > { %13781 = vmatpush1.bf16.msra.mxu0 %v13762_v52  ;;  %v15614_v27 = vpop.permute.xlu1 %3029  ;;  %v15616_v38 = vpop.permute.xlu0 %3027  ;;  %v15627_v49 = vpack.c.bf16 %v2116_v21, %v2111_v24  ;;  %v13245_v21 = vld [vmem:[%s21218_s2 + $0x54] sm:$0xf]  ;;  %v13809_v24 = vpack.c.bf16 %v14908_v7, %v14898_v5 }
  0xee   : > { %13791 = vmatprep.subr.bf16.mxu0 %v15612_v53  ;;  %v13251_v53 = vld [vmem:[%s21218_s2 + $0x34] sm:$0xf] }
  0xef   : > { %1474 = vrot.lane.b32.xlu1 %v15097_v40, %s14802_s13  ;;  %4181 = vrot.lane.b32.xlu0 %v15077_v32, %s14806_s18  ;;  %22045 = vst [vmem:[#allocation47_spill] sm:$0xff] %v15627_v49 }
  0xf0   : > { %13243 = vmatmul.mubr.msk.f32.vlgmr.msra.gmra.mrb[0].mxu0 %vm438_vm1, %v13242_v42  ;;  %v21268_v42 = vmov 0.0|0.0  }
  0xf1   : > { %13793 = vmatpush1.bf16.msra.mxu0 %v15569_v26  ;;  %v15630_v52 = vpop.permute.xlu1 %3037  ;;  %v15632_v29 = vpop.permute.xlu0 %3035  ;;  %2490 = vmatprep.mubr.f32.mxu0 %v22015_v36 }
  0xf2   : > { %13795 = vmatprep.subr.bf16.mxu0 %v15627_v49 }
  0xf3   : > { %4183 = vrot.lane.b32.xlu1 %v15097_v40, %s14806_s18  ;;  %1476 = vrot.lane.b32.xlu0 %v15112_v47, %s14802_s13 }
  0xf5   : > { %13797 = vmatpush1.bf16.msra.mxu0 %v15592_v61  ;;  %v15643_v20 = vpop.permute.xlu1 %3031  ;;  %v15645_v39 = vpop.permute.xlu0 %3025 }
  0xf6   : > { %22046 = vst [vmem:[#allocation48_spill] sm:$0xff] %v15645_v39  ;;  %13807 = vmatprep.subr.bf16.mxu0 %v13806_v62 }
  0xf7   : > { %4719 = vrot.lane.b32.xlu1 %v14881_v2, %s14807_s22  ;;  %4185 = vrot.lane.b32.xlu0 %v15112_v47, %s14806_s18  ;;  %v15672_v2 = vsub.s32 4, %v15025_v14 }
  0xf8   : > { %13246 = vmatmul.mubr.msk.f32.vlgmr.msra.gmra.mrb[0].mxu0 %vm438_vm1, %v13245_v21  ;;  %v13257_v21 = vld [vmem:[%s21217_s1 + $0x5] ss:$8 sm:$0xf] }
  0xf9   : > { %13808 = vmatpush1.bf16.msra.mxu0 %v21268_v42  ;;  %v15658_v13 = vpop.permute.xlu1 %3039  ;;  %v15660_v30 = vpop.permute.xlu0 %3033  ;;  %2641 = vmatprep.mubr.f32.mxu0 %v22015_v36  ;;  %v13258_v42 = vld [vmem:[%s21217_s1 + $0x5] ss:$8 sm:$0x30]  ;;  %v15695_v46 = vrot.slane %v15039_v18, %v15672_v2 }
  0xfa   : > { %13810 = vmatprep.subr.bf16.mxu0 %v13809_v24 }
  0xfb   : > { %4727 = vrot.lane.b32.xlu1 %v14878_v1, %s14807_s22  ;;  %4721 = vrot.lane.b32.xlu0 %v14891_v4, %s14807_s22  ;;  %v13248_v1 = vld [vmem:[%s21218_s2 + $0x10] sm:$0xf]  ;;  %v15691_v4 = vpack.c.bf16 %v14918_v9, %v14905_v6  ;;  %22049 = vst [vmem:[#allocation50_spill] sm:$0xff] %v15695_v46 }
  0xfd   : > { %13811 = vmatpush1.bf16.msra.mxu0 %v22047_v63  ;;  %v15681_v22 = vpop.permute.xlu1 %349  ;;  %v15683_v0 = vpop.permute.xlu0 %3041  ;;  %22048 = vst [vmem:[#allocation49_spill] sm:$0xff] %v15691_v4  ;;  %v15701_v63 = vor.u32 %v13258_v42, %v13257_v21 }
  0xfe   : > { %13821 = vmatprep.subr.bf16.mxu0 %v15665_v31  ;;  %v364_v61 = vsel %vm359_vm0, %v15114_v48, %v15681_v22  ;;  %v15721_v48 = vpack.c.bf16 %v14928_v11, %v14915_v8 }
  0xff   : > { %4717 = vrot.lane.b32.xlu1 %v22015_v36, %s14807_s22  ;;  %4729 = vrot.lane.b32.xlu0 %v14888_v3, %s14807_s22  ;;  %v15731_v21 = vrot.slane %v15701_v63, %v15056_v23 }
 0x100   : > { %13249 = vmatmul.mubr.msk.f32.vlgmr.msra.gmra.mrb[0].mxu0 %vm438_vm1, %v13248_v1 }
 0x101   : > { %13823 = vmatpush1.bf16.msra.mxu0 %v13806_v62  ;;  %v15708_v49 = vpop.permute.xlu1 %3043  ;;  %v15710_v26 = vpop.permute.xlu0 %351  ;;  %2792 = vmatprep.mubr.f32.mxu0 %v22015_v36  ;;  %v418_v62 = vmul.f32 %v15695_v46, %v364_v61  ;;  %22050 = vst [vmem:[#allocation51_spill] sm:$0xff] %v15731_v21  ;;  %v3072_v61 = vsel %vm3059_vm5, %v15616_v38, %v15632_v29 }
 0x102   : > { %v365_v3 = vsel %vm359_vm0, %v15132_v57, %v15710_v26  ;;  %13825 = vmatprep.subr.bf16.mxu0 %v15691_v4  ;;  %v3073_v57 = vsel %vm3059_vm5, %v15614_v27, %v15630_v52  ;;  %v3116_v10 = vmul.f32 %v15731_v21, %v3072_v61 }
 0x103   : > { %v423_v42 = vmul.f32 %v15695_v46, %v365_v3  ;;  %4725 = vrot.lane.b32.xlu1 %v14908_v7, %s14807_s22  ;;  %4723 = vrot.lane.b32.xlu0 %v14898_v5, %s14807_s22  ;;  %v15743_v7 = vrot.slane %v15701_v63, %v15100_v44 }
 0x105   : > { %22051 = vst [vmem:[#allocation52_spill] sm:$0xff] %v15743_v7  ;;  %13827 = vmatpush1.bf16.msra.mxu0 %v13809_v24  ;;  %v15745_v5 = vpop.permute.xlu1 %353  ;;  %v15747_v1 = vpop.permute.xlu0 %3045  ;;  %v15749_v3 = vpack.c.bf16 %v423_v42, %v418_v62  ;;  %v3076_v24 = vsel %vm3059_vm5, %v15645_v39, %v15616_v38  ;;  %v3077_v62 = vsel %vm3059_vm5, %v15645_v39, %v15614_v27 }
 0x106   : > { %13837 = vmatprep.subr.bf16.mxu0 %v15721_v48  ;;  %v3122_v42 = vmul.f32 %v15731_v21, %v3073_v57  ;;  %v366_v12 = vsel %vm359_vm0, %v15130_v56, %v15745_v5  ;;  %v3115_v27 = vmul.f32 %v15743_v7, %v3076_v24  ;;  %v3075_v38 = vsel %vm3059_vm5, %v15660_v30, %v15683_v0 }
 0x107   : > { %4733 = vrot.lane.b32.xlu1 %v14918_v9, %s14807_s22  ;;  %4731 = vrot.lane.b32.xlu0 %v14905_v6, %s14807_s22  ;;  %v428_v57 = vmul.f32 %v15695_v46, %v366_v12  ;;  %v3079_v24 = vsel %vm3059_vm5, %v15645_v39, %v15660_v30  ;;  %v3132_v12 = vmul.f32 %v15731_v21, %v3075_v38  ;;  %v13254_v30 = vld [vmem:[%s21218_s2 + $0x58] sm:$0xf] }
 0x108   : > { %13623 = vmatprep.subr.bf16.mxu1 %v15749_v3  ;;  %13252 = vmatmul.mubr.msk.f32.vlgmr.msra.gmra.mrb[0].mxu0 %vm438_vm1, %v13251_v53  ;;  %v3121_v53 = vmul.f32 %v15743_v7, %v3077_v62  ;;  %v15808_v62 = vpack.c.bf16 %v3122_v42, %v3116_v10  ;;  %v3078_v42 = vsel %vm3059_vm5, %v15645_v39, %v15643_v20  ;;  %v14777_v39 = vld [vmem:[%s14875_s10 + $0x50] sm:$0xff] }
 0x109   : > { %13625 = vmatpush1.bf16.msra.mxu1 %v15203_v43  ;;  %13839 = vmatpush1.bf16.msra.mxu0 %v15665_v31  ;;  %v15781_v6 = vpop.permute.xlu1 %3047  ;;  %v356_v9 = vpop.permute.xlu0 %355 }
 0x10a   : > { %v367_v56 = vsel %vm359_vm0, %v15153_v15, %v356_v9  ;;  %13841 = vmatprep.subr.bf16.mxu0 %v15757_v59  ;;  %2943 = vmatprep.mubr.f32.mxu0 %v22015_v36  ;;  %v3074_v15 = vsel %vm3059_vm5, %v15643_v20, %v15658_v13  ;;  %v13852_v10 = vpack.c.bf16 %v3121_v53, %v3115_v27  ;;  %v14776_v20 = vld [vmem:[%s14875_s10 + $0x70] sm:$0xff] }
 0x10b   : > { %v433_v61 = vmul.f32 %v15695_v46, %v367_v56  ;;  %4737 = vrot.lane.b32.xlu1 %v14928_v11, %s14807_s22  ;;  %4735 = vrot.lane.b32.xlu0 %v14915_v8, %s14807_s22  ;;  %v3069_v8 = vsel %vm3059_vm5, %v15630_v52, %v15747_v1  ;;  %v15829_v52 = vrot.slane %v15701_v63, %v15042_v19 }
 0x10c   : > { %v3127_v38 = vmul.f32 %v15731_v21, %v3074_v15  ;;  %v361_v27 = vsel %vm359_vm0, %v15710_v26, %v15079_v34 }
 0x10d   : > { %13843 = vmatpush1.bf16.msra.mxu0 %v15691_v4  ;;  %v15816_v11 = vpop.permute.xlu1 %3051  ;;  %v3050_v56 = vpop.permute.xlu0 %3049  ;;  %v15818_v46 = vpack.c.bf16 %v433_v61, %v428_v57  ;;  %22052 = vst [vmem:[#allocation53_spill] sm:$0xff] %v15829_v52  ;;  %v3131_v57 = vmul.f32 %v15743_v7, %v3079_v24  ;;  %v15835_v61 = vsub.s32 5, %v15025_v14  ;;  %v3068_v4 = vsel %vm3059_vm5, %v15632_v29, %v15708_v49 }
 0x10e   : > { %13851 = vmatprep.subr.bf16.mxu0 %v15808_v62  ;;  %v3123_v53 = vmul.f32 %v15829_v52, %v3069_v8  ;;  %v3126_v14 = vmul.f32 %v15743_v7, %v3078_v42  ;;  %v13854_v26 = vpack.c.bf16 %v3132_v12, %v3127_v38  ;;  %v360_v24 = vsel %vm359_vm0, %v15681_v22, %v15079_v34 }
 0x10f   : > { %4741 = vrot.lane.b32.xlu1 %v14776_v20, %s14807_s22  ;;  %4739 = vrot.lane.b32.xlu0 %v14777_v39, %s14807_s22  ;;  %v15855_v29 = vrot.slane %v15039_v18, %v15835_v61  ;;  %v3117_v8 = vmul.f32 %v15829_v52, %v3068_v4  ;;  %v3071_v18 = vsel %vm3059_vm5, %v15683_v0, %v3050_v56 }
 0x110   : > { %13627 = vmatprep.subr.bf16.mxu1 %v15818_v46  ;;  %13255 = vmatmul.mubr.msk.f32.vlgmr.msra.gmra.mrb[0].mxu0 %vm438_vm1, %v13254_v30  ;;  %v13856_v30 = vpack.c.bf16 %v3131_v57, %v3126_v14  ;;  %v3070_v12 = vsel %vm3059_vm5, %v15658_v13, %v15781_v6  ;;  %v3133_v4 = vmul.f32 %v15829_v52, %v3071_v18 }
 0x111   : > { %22053 = vst [vmem:[#allocation54_spill] sm:$0xff] %v15855_v29  ;;  %13629 = vmatpush1.bf16.msra.mxu1 %v15228_v55  ;;  %13853 = vmatpush1.bf16.msra.mxu0 %v13852_v10  ;;  %v15858_v39 = vpop.permute.xlu1 %3055  ;;  %v15860_v15 = vpop.permute.xlu0 %3053  ;;  %v424_v42 = vmul.f32 %v15855_v29, %v361_v27  ;;  %v15880_v22 = vpack.c.bf16 %v3123_v53, %v3117_v8 }
 0x112   : > { %13639 = vmatprep.subr.bf16.mxu1 %v15203_v43  ;;  %13855 = vmatprep.subr.bf16.mxu0 %v13854_v26  ;;  %v419_v0 = vmul.f32 %v15855_v29, %v360_v24  ;;  %v363_v43 = vsel %vm359_vm0, %v356_v9, %v15079_v34  ;;  %v3065_v38 = vsel %vm3059_vm5, %v15747_v1, %v15860_v15  ;;  %v15902_v9 = vld [vmem:[%s21218_s2 + $0x14] sm:$0xf]  ;;  %v13269_v1 = vld [vmem:[%s21217_s1 + $0x6] ss:$8 sm:$0x30] }
 0x113   : > { %2036 = vrot.lane.b32.xlu1 %v15077_v32, %s14803_s14  ;;  %2034 = vrot.lane.b32.xlu0 %v15062_v25, %s14803_s14  ;;  %v15907_v57 = vrot.slane %v15701_v63, %v15138_v60  ;;  %v362_v27 = vsel %vm359_vm0, %v15745_v5, %v15079_v34  ;;  %v434_v53 = vmul.f32 %v15855_v29, %v363_v43 }
 0x114   : > { %13209 = vmatmul.mubr.msk.f32.vlgmr.msra.gmra.mrb[0].mxu1 %vm438_vm1, %v15158_v16  ;;  %v3128_v16 = vmul.f32 %v15829_v52, %v3070_v12  ;;  %3205 = vmatprep.mubr.f32.mxu0 %v22015_v36  ;;  %v13654_v20 = vpack.c.bf16 %v424_v42, %v419_v0 }
 0x115   : > { %13857 = vmatpush1.bf16.msra.mxu0 %v13856_v30  ;;  %v15889_v13 = vpop.permute.xlu1 %3591  ;;  %v15891_v10 = vpop.permute.xlu0 %3057  ;;  %13641 = vmatpush1.bf16.msra.mxu1 %v15081_v35  ;;  %22054 = vst [vmem:[#allocation55_spill] sm:$0xff] %v15907_v57  ;;  %v13268_v35 = vld [vmem:[%s21217_s1 + $0x6] ss:$8 sm:$0xf]  ;;  %v3124_v14 = vmul.f32 %v15907_v57, %v3065_v38 }
 0x116   : > { %13867 = vmatprep.subr.bf16.mxu0 %v15880_v22  ;;  %13643 = vmatprep.subr.bf16.mxu1 %v15228_v55  ;;  %v3064_v55 = vsel %vm3059_vm5, %v15708_v49, %v15816_v11  ;;  %v3067_v24 = vsel %vm3059_vm5, %v3050_v56, %v15891_v10  ;;  %v15938_v18 = vpack.c.bf16 %v3133_v4, %v3128_v16 }
 0x117   : > { %4745 = vrot.lane.b32.xlu1 %v15077_v32, %s14807_s22  ;;  %4743 = vrot.lane.b32.xlu0 %v15062_v25, %s14807_s22  ;;  %v15943_v25 = vor.u32 %v13269_v1, %v13268_v35  ;;  %v429_v32 = vmul.f32 %v15855_v29, %v362_v27  ;;  %v3118_v49 = vmul.f32 %v15907_v57, %v3064_v55 }
 0x118   : > { %13260 = vmatmul.mubr.msk.f32.vlgmr.msra.gmra.mrb[0].mxu0 %vm438_vm1, %v15902_v9  ;;  %722 = vmatprep.mubr.f32.mxu1 %v22015_v36  ;;  %v3066_v56 = vsel %vm3059_vm5, %v15781_v6, %v15858_v39  ;;  %v3134_v30 = vmul.f32 %v15907_v57, %v3067_v24 }
 0x119   : > { %v15936_v5 = vpop.permute.xlu1 %3599  ;;  %v3594_v8 = vpop.permute.xlu0 %3593  ;;  %13645 = vmatpush1.bf16.msra.mxu1 %v15134_v58  ;;  %13869 = vmatpush1.bf16.msra.mxu0 %v15808_v62  ;;  %v13658_v6 = vpack.c.bf16 %v434_v53, %v429_v32  ;;  %v15962_v42 = vpack.c.bf16 %v3124_v14, %v3118_v49  ;;  %v3129_v12 = vmul.f32 %v15907_v57, %v3066_v56  ;;  %v16032_v49 = vld [vmem:[%s21218_s2 + $0x5c] sm:$0xf] }
 0x11a   : > { %13655 = vmatprep.subr.bf16.mxu1 %v13654_v20  ;;  %13871 = vmatprep.subr.bf16.mxu0 %v15938_v18  ;;  %v15976_v0 = vrot.slane %v15943_v25, %v15056_v23  ;;  %v15992_v43 = vrot.slane %v15943_v25, %v15100_v44 }
 0x11b   : > { %2040 = vrot.lane.b32.xlu1 %v15112_v47, %s14803_s14  ;;  %2038 = vrot.lane.b32.xlu0 %v15097_v40, %s14803_s14  ;;  %v15994_v4 = vpack.c.bf16 %v3134_v30, %v3129_v12 }
 0x11c   : > { %13211 = vmatmul.mubr.msk.f32.vlgmr.msra.gmra.mrb[0].mxu1 %vm438_vm1, %v15214_v50  ;;  %3356 = vmatprep.mubr.f32.mxu0 %v22015_v36  ;;  %v15972_v50 = vld [vmem:[%s21218_s2 + $0x38] sm:$0xf]  ;;  %22056 = vst [vmem:[#allocation57_spill] sm:$0xff] %v15976_v0  ;;  %22057 = vst [vmem:[#allocation58_spill] sm:$0xff] %v15992_v43 }
 0x11d   : > { %v15960_v58 = vpop.permute.xlu1 %3589  ;;  %v3602_v62 = vpop.permute.xlu0 %3601  ;;  %13657 = vmatpush1.bf16.msra.mxu1 %v15749_v3  ;;  %13873 = vmatpush1.bf16.msra.mxu0 %v13854_v26  ;;  %v3636_v3 = vsel %vm3623_vm6, %v15889_v13, %v15936_v5  ;;  %v15986_v26 = vld [vmem:[%s14875_s10 + $0x58] sm:$0xff] }
 0x11e   : > { %22055 = vst [vmem:[#allocation56_spill] sm:$0xff] %v15960_v58  ;;  %v3637_v40 = vsel %vm3623_vm6, %v3594_v8, %v3602_v62  ;;  %13659 = vmatprep.subr.bf16.mxu1 %v13658_v6  ;;  %13883 = vmatprep.subr.bf16.mxu0 %v15962_v42  ;;  %v3641_v1 = vsel %vm3623_vm6, %v15960_v58, %v3594_v8 }
 0x11f   : > { %4749 = vrot.lane.b32.xlu1 %v15112_v47, %s14807_s22  ;;  %4747 = vrot.lane.b32.xlu0 %v15986_v26, %s14807_s22  ;;  %v3686_v38 = vmul.f32 %v15976_v0, %v3637_v40  ;;  %v3640_v47 = vsel %vm3623_vm6, %v15960_v58, %v15889_v13  ;;  %v3680_v20 = vmul.f32 %v15976_v0, %v3636_v3 }
 0x120   : > { %13263 = vmatmul.mubr.msk.f32.vlgmr.msra.gmra.mrb[0].mxu0 %vm438_vm1, %v15972_v50  ;;  %869 = vmatprep.mubr.f32.mxu1 %v22015_v36  ;;  %v3679_v27 = vmul.f32 %v15992_v43, %v3640_v47  ;;  %v3685_v13 = vmul.f32 %v15992_v43, %v3641_v1 }
 0x121   : > { %v3598_v16 = vpop.permute.xlu1 %3597  ;;  %v3596_v35 = vpop.permute.xlu0 %3595  ;;  %13661 = vmatpush1.bf16.msra.mxu1 %v15818_v46  ;;  %13885 = vmatpush1.bf16.msra.mxu0 %v15880_v22  ;;  %v13898_v24 = vpack.c.bf16 %v3686_v38, %v3680_v20 }
 0x122   : > { %13671 = vmatprep.subr.bf16.mxu1 %v15344_v45  ;;  %13887 = vmatprep.subr.bf16.mxu0 %v15994_v4  ;;  %v3643_v53 = vsel %vm3623_vm6, %v15960_v58, %v3598_v16  ;;  %v3642_v46 = vsel %vm3623_vm6, %v15960_v58, %v3596_v35  ;;  %v13900_v12 = vpack.c.bf16 %v3685_v13, %v3679_v27 }
 0x123   : > { %3507 = vmatprep.mubr.f32.mxu0 %v22015_v36  ;;  %v3695_v30 = vmul.f32 %v15992_v43, %v3643_v53  ;;  %v3690_v6 = vmul.f32 %v15992_v43, %v3642_v46 }
 0x124   : > { %13214 = vmatmul.mubr.msk.f32.vlgmr.msra.gmra.mrb[0].mxu1 %vm438_vm1, %v15260_v41 }
 0x125   : > { %v3606_v55 = vpop.permute.xlu1 %3605  ;;  %v3604_v14 = vpop.permute.xlu0 %3603  ;;  %13673 = vmatpush1.bf16.msra.mxu1 %v15291_v28  ;;  %13889 = vmatpush1.bf16.msra.mxu0 %v15938_v18  ;;  %v16039_v28 = vrot.slane %v15943_v25, %v15042_v19  ;;  %v13904_v20 = vpack.c.bf16 %v3695_v30, %v3690_v6  ;;  %v22062_v30 = vld [vmem:[#allocation13_spill] sm:$0xff] }
 0x126   : > { %v3639_v8 = vsel %vm3623_vm6, %v3598_v16, %v3606_v55  ;;  %v3638_v32 = vsel %vm3623_vm6, %v3596_v35, %v3604_v14  ;;  %13675 = vmatprep.subr.bf16.mxu1 %v15371_v33  ;;  %13899 = vmatprep.subr.bf16.mxu0 %v13898_v24 }
 0x127   : > { %v3696_v41 = vmul.f32 %v15976_v0, %v3639_v8  ;;  %v3691_v56 = vmul.f32 %v15976_v0, %v3638_v32  ;;  %22058 = vst [vmem:[#allocation59_spill] sm:$0xff] %v16039_v28  ;;  %1131 = vmatprep.mubr.f32.mxu1 %v22015_v36 }
 0x128   : > { %13266 = vmatmul.mubr.msk.f32.vlgmr.msra.gmra.mrb[0].mxu0 %vm438_vm1, %v16032_v49 }
 0x129   : > { %v3610_v40 = vpop.permute.xlu1 %3609  ;;  %v3608_v3 = vpop.permute.xlu0 %3607  ;;  %v13902_v38 = vpack.c.bf16 %v3696_v41, %v3691_v56  ;;  %13677 = vmatpush1.bf16.msra.mxu1 %v15323_v51  ;;  %13901 = vmatpush1.bf16.msra.mxu0 %v13900_v12  ;;  %v22061_v41 = vld [vmem:[#allocation12_spill] sm:$0xff] }
 0x12a   : > { %v3633_v16 = vsel %vm3623_vm6, %v3602_v62, %v3610_v40  ;;  %v3632_v35 = vsel %vm3623_vm6, %v15936_v5, %v3608_v3  ;;  %3769 = vmatprep.mubr.f32.mxu0 %v22015_v36  ;;  %v16066_v62 = vld [vmem:[%s21218_s2 + $0x18] sm:$0xf] }
 0x12b   : > { %v3687_v47 = vmul.f32 %v16039_v28, %v3633_v16  ;;  %v3681_v1 = vmul.f32 %v16039_v28, %v3632_v35  ;;  %13903 = vmatprep.subr.bf16.mxu0 %v13902_v38  ;;  %22059 = vst [vmem:[#allocation60_spill] sm:$0xff] %v16066_v62  ;;  %v16091_v35 = vrot.slane %v15943_v25, %v15138_v60 }
 0x12c   : > { %13219 = vmatmul.mubr.msk.f32.vlgmr.msra.gmra.mrb[0].mxu1 %vm438_vm1, %v15306_v54  ;;  %v16074_v54 = vrot.slane %v15189_v37, %v15672_v2 }
 0x12d   : > { %v3614_v27 = vpop.permute.xlu1 %3613  ;;  %v3612_v13 = vpop.permute.xlu0 %3611  ;;  %v16055_v53 = vpack.c.bf16 %v3687_v47, %v3681_v1  ;;  %13905 = vmatpush1.bf16.msra.mxu0 %v13904_v20  ;;  %1282 = vmatprep.mubr.f32.mxu1 %v22015_v36  ;;  %22063 = vst [vmem:[#allocation12_spill] sm:$0xff] %v16091_v35  ;;  %v16100_v20 = vrot.slane %v15189_v37, %v15835_v61 }
 0x12e   : > { %v3635_v51 = vsel %vm3623_vm6, %v3606_v55, %v3614_v27  ;;  %v3634_v5 = vsel %vm3623_vm6, %v3604_v14, %v3612_v13  ;;  %22060 = vst [vmem:[#allocation61_spill] sm:$0xff] %v16074_v54 }
 0x12f   : > { %v3697_v46 = vmul.f32 %v16039_v28, %v3635_v51  ;;  %v3692_v8 = vmul.f32 %v16039_v28, %v3634_v5  ;;  %13915 = vmatprep.subr.bf16.mxu0 %v16055_v53  ;;  %22064 = vst [vmem:[#allocation13_spill] sm:$0xff] %v16100_v20 }
 0x130   : > { %13271 = vmatmul.mubr.msk.f32.vlgmr.msra.gmra.mrb[0].mxu0 %vm438_vm1, %v16066_v62 }
 0x131   : > { %v909_v55 = vpop.permute.xlu1 %908  ;;  %v907_v14 = vpop.permute.xlu0 %906  ;;  %v16078_v32 = vpack.c.bf16 %v3697_v46, %v3692_v8  ;;  %13917 = vmatpush1.bf16.msra.mxu0 %v13898_v24  ;;  %3920 = vmatprep.mubr.f32.mxu0 %v22015_v36  ;;  %v16111_v46 = vld [vmem:[%s21218_s2 + $0x3c] sm:$0xf]  ;;  %v22066_v8 = vld [vmem:[#allocation7_spill] sm:$0xff] }
 0x132   : > { %v920_v56 = vsel %vm914_vm2, %v22061_v41, %v909_v55  ;;  %v919_v6 = vsel %vm914_vm2, %v22062_v30, %v907_v14  ;;  %22065 = vst [vmem:[#allocation62_spill] sm:$0xff] %v16111_v46  ;;  %v916_v41 = vsel %vm914_vm2, %v909_v55, %v22066_v8  ;;  %v915_v37 = vsel %vm914_vm2, %v907_v14, %v22066_v8 }
 0x133   : > { %v979_v12 = vmul.f32 %v16074_v54, %v920_v56  ;;  %v974_v16 = vmul.f32 %v16074_v54, %v919_v6  ;;  %13919 = vmatprep.subr.bf16.mxu0 %v16078_v32  ;;  %v980_v55 = vmul.f32 %v16100_v20, %v916_v41  ;;  %v975_v6 = vmul.f32 %v16100_v20, %v915_v37  ;;  %v13279_v41 = vld [vmem:[%s21217_s1 + $0x7] ss:$8 sm:$0xf] }
 0x134   : > { %v13280_v37 = vld [vmem:[%s21217_s1 + $0x7] ss:$8 sm:$0x30] }
 0x135   : > { %v16094_v24 = vpop.permute.xlu1 %3617  ;;  %v16096_v47 = vpop.permute.xlu0 %3615  ;;  %v13686_v1 = vpack.c.bf16 %v979_v12, %v974_v16  ;;  %13921 = vmatpush1.bf16.msra.mxu0 %v13902_v38  ;;  %v22067_v12 = vld [vmem:[#allocation15_spill] sm:$0xff]  ;;  %v22068_v16 = vld [vmem:[#allocation16_spill] sm:$0xff]  ;;  %v16161_v0 = vor.u32 %v13280_v37, %v13279_v41 }
 0x136   : > { %v3629_v51 = vsel %vm3623_vm6, %v3610_v40, %v16094_v24  ;;  %v3628_v5 = vsel %vm3623_vm6, %v3608_v3, %v16096_v47 }
 0x137   : > { %v3688_v38 = vmul.f32 %v16091_v35, %v3629_v51  ;;  %v3682_v40 = vmul.f32 %v16091_v35, %v3628_v5  ;;  %13687 = vmatprep.subr.bf16.mxu1 %v13686_v1  ;;  %22069 = vst [vmem:[#allocation15_spill] sm:$0xff] %v16161_v0  ;;  %v16193_v37 = vrot.slane %v16161_v0, %v15100_v44 }
 0x138   : > { %13689 = vmatpush1.bf16.msra.mxu1 %v15344_v45  ;;  %13274 = vmatmul.mubr.msk.f32.vlgmr.msra.gmra.mrb[0].mxu0 %vm438_vm1, %v16111_v46  ;;  %v22093_v46 = vld [vmem:[#allocation26_spill] sm:$0xff] }
 0x139   : > { %v913_v3 = vpop.permute.xlu1 %912  ;;  %v911_v56 = vpop.permute.xlu0 %910  ;;  %v16122_v30 = vpack.c.bf16 %v3688_v38, %v3682_v40  ;;  %4071 = vmatprep.mubr.f32.mxu0 %v22015_v36  ;;  %22073 = vst [vmem:[#allocation63_spill] sm:$0xff] %v16193_v37 }
 0x13a   : > { %v922_v14 = vsel %vm914_vm2, %v22067_v12, %v913_v3  ;;  %v921_v51 = vsel %vm914_vm2, %v22068_v16, %v911_v56  ;;  %v918_v38 = vsel %vm914_vm2, %v913_v3, %v22066_v8  ;;  %v917_v40 = vsel %vm914_vm2, %v911_v56, %v22066_v8 }
 0x13b   : > { %v989_v45 = vmul.f32 %v16074_v54, %v922_v14  ;;  %v984_v5 = vmul.f32 %v16074_v54, %v921_v51  ;;  %13931 = vmatprep.subr.bf16.mxu0 %v16122_v30  ;;  %v13702_v3 = vpack.c.bf16 %v980_v55, %v975_v6  ;;  %v990_v56 = vmul.f32 %v16100_v20, %v918_v38 }
 0x13c   : > { %13933 = vmatpush1.bf16.msra.mxu0 %v16055_v53  ;;  %v985_v7 = vmul.f32 %v16100_v20, %v917_v40  ;;  %v16176_v55 = vrot.slane %v16161_v0, %v15056_v23  ;;  %v22074_v40 = vld [vmem:[#allocation35_spill] sm:$0xff] }
 0x13d   : > { %v16151_v12 = vpop.permute.xlu1 %3621  ;;  %v16153_v14 = vpop.permute.xlu0 %3619  ;;  %v13690_v16 = vpack.c.bf16 %v989_v45, %v984_v5 }
 0x13e   : > { %v3631_v51 = vsel %vm3623_vm6, %v3614_v27, %v16151_v12  ;;  %v3630_v43 = vsel %vm3623_vm6, %v3612_v13, %v16153_v14  ;;  %v22070_v13 = vld [vmem:[#allocation19_spill] sm:$0xff]  ;;  %22071 = vst [vmem:[#allocation16_spill] sm:$0xff] %v16176_v55 }
 0x13f   : > { %v3698_v21 = vmul.f32 %v16091_v35, %v3631_v51  ;;  %v3693_v28 = vmul.f32 %v16091_v35, %v3630_v43  ;;  %13691 = vmatprep.subr.bf16.mxu1 %v13690_v16  ;;  %v13706_v43 = vpack.c.bf16 %v990_v56, %v985_v7 }
 0x140   : > { %13693 = vmatpush1.bf16.msra.mxu1 %v15371_v33  ;;  %v16182_v33 = vld [vmem:[%s21218_s2 + $0x60] sm:$0xf] }
 0x141   : > { %v4158_v45 = vpop.permute.xlu1 %4157  ;;  %13703 = vmatprep.subr.bf16.mxu1 %v13702_v3  ;;  %v4156_v27 = vpop.permute.xlu0 %4155  ;;  %v16168_v5 = vpack.c.bf16 %v3698_v21, %v3693_v28  ;;  %22072 = vst [vmem:[#allocation19_spill] sm:$0xff] %v16182_v33 }
 0x143   : > { %13935 = vmatprep.subr.bf16.mxu0 %v16168_v5  ;;  %13222 = vmatmul.mubr.msk.f32.vlgmr.msra.gmra.mrb[0].mxu1 %vm438_vm1, %v22070_v13 }
 0x144   : > { %13705 = vmatpush1.bf16.msra.mxu1 %v13686_v1  ;;  %13937 = vmatpush1.bf16.msra.mxu0 %v16078_v32 }
 0x145   : > { %v4166_v21 = vpop.permute.xlu1 %4165  ;;  %13707 = vmatprep.subr.bf16.mxu1 %v13706_v43  ;;  %v4164_v28 = vpop.permute.xlu0 %4163  ;;  %1433 = vmatprep.mubr.f32.mxu1 %v22015_v36  ;;  %v22076_v43 = vld [vmem:[#allocation22_spill] sm:$0xff] }
 0x146   : > { %v4201_v6 = vsel %vm4187_vm7, %v4158_v45, %v4166_v21  ;;  %v4200_v41 = vsel %vm4187_vm7, %v4156_v27, %v4164_v28 }
 0x147   : > { %v4250_v7 = vmul.f32 %v16176_v55, %v4201_v6  ;;  %v4244_v1 = vmul.f32 %v16176_v55, %v4200_v41  ;;  %13277 = vmatmul.mubr.msk.f32.vlgmr.msra.gmra.mrb[0].mxu0 %vm438_vm1, %v16182_v33  ;;  %v22077_v41 = vld [vmem:[#allocation25_spill] sm:$0xff] }
 0x148   : > { %13709 = vmatpush1.bf16.msra.mxu1 %v13690_v16  ;;  %4333 = vmatprep.mubr.f32.mxu0 %v22015_v36 }
 0x149   : > { %v4160_v38 = vpop.permute.xlu1 %4159  ;;  %13719 = vmatprep.subr.bf16.mxu1 %v22074_v40  ;;  %v16199_v51 = vpop.permute.xlu0 %4153  ;;  %v13946_v3 = vpack.c.bf16 %v4250_v7, %v4244_v1  ;;  %v22078_v1 = vld [vmem:[#allocation36_spill] sm:$0xff] }
 0x14a   : > { %22075 = vst [vmem:[#allocation35_spill] sm:$0xff] %v16199_v51  ;;  %v4204_v56 = vsel %vm4187_vm7, %v16199_v51, %v4156_v27  ;;  %v4205_v13 = vsel %vm4187_vm7, %v16199_v51, %v4158_v45 }
 0x14b   : > { %13947 = vmatprep.subr.bf16.mxu0 %v13946_v3  ;;  %13225 = vmatmul.mubr.msk.f32.vlgmr.msra.gmra.mrb[0].mxu1 %vm438_vm1, %v22076_v43  ;;  %v4243_v16 = vmul.f32 %v16193_v37, %v4204_v56  ;;  %v4249_v6 = vmul.f32 %v16193_v37, %v4205_v13  ;;  %v22079_v56 = vld [vmem:[#allocation30_spill] sm:$0xff]  ;;  %v4206_v13 = vsel %vm4187_vm7, %v16199_v51, %v4160_v38 }
 0x14c   : > { %13721 = vmatpush1.bf16.msra.mxu1 %v22077_v41  ;;  %1695 = vmatprep.mubr.f32.mxu1 %v22015_v36 }
 0x14d   : > { %v4168_v7 = vpop.permute.xlu1 %4167  ;;  %13723 = vmatprep.subr.bf16.mxu1 %v22078_v1  ;;  %v4162_v27 = vpop.permute.xlu0 %4161  ;;  %v13948_v35 = vpack.c.bf16 %v4249_v6, %v4243_v16 }
 0x14e   : > { %v4207_v45 = vsel %vm4187_vm7, %v16199_v51, %v4162_v27  ;;  %v4202_v43 = vsel %vm4187_vm7, %v4160_v38, %v4168_v7  ;;  %v4254_v38 = vmul.f32 %v16193_v37, %v4206_v13 }
 0x14f   : > { %13949 = vmatpush1.bf16.msra.mxu0 %v13948_v35  ;;  %v4259_v57 = vmul.f32 %v16193_v37, %v4207_v45  ;;  %v4255_v6 = vmul.f32 %v16176_v55, %v4202_v43  ;;  %v16229_v35 = vrot.slane %v16161_v0, %v15042_v19 }
 0x150   : > { %13725 = vmatpush1.bf16.msra.mxu1 %v22079_v56  ;;  %v22081_v56 = vld [vmem:[#allocation28_spill] sm:$0xff] }
 0x151   : > { %v4172_v41 = vpop.permute.xlu1 %4171  ;;  %v4170_v20 = vpop.permute.xlu0 %4169  ;;  %22080 = vst [vmem:[#allocation22_spill] sm:$0xff] %v16229_v35  ;;  %v13952_v8 = vpack.c.bf16 %v4259_v57, %v4254_v38 }
 0x152   : > { %v4203_v16 = vsel %vm4187_vm7, %v4162_v27, %v4170_v20  ;;  %v4196_v54 = vsel %vm4187_vm7, %v4164_v28, %v4172_v41  ;;  %v16250_v28 = vld [vmem:[%s21218_s2 + $0x1c] sm:$0xf] }
 0x153   : > { %v4260_v52 = vmul.f32 %v16176_v55, %v4203_v16  ;;  %13230 = vmatmul.mubr.msk.f32.vlgmr.msra.gmra.mrb[0].mxu1 %vm438_vm1, %v22081_v56  ;;  %v4245_v16 = vmul.f32 %v16229_v35, %v4196_v54  ;;  %22082 = vst [vmem:[#allocation25_spill] sm:$0xff] %v16250_v28  ;;  %v22086_v56 = vld [vmem:[#allocation24_spill] sm:$0xff] }
 0x154   : > { %1846 = vmatprep.mubr.f32.mxu1 %v22015_v36 }
 0x155   : > { %v16238_v45 = vpop.permute.xlu1 %4175  ;;  %v4174_v27 = vpop.permute.xlu0 %4173  ;;  %v13950_v43 = vpack.c.bf16 %v4260_v52, %v4255_v6 }
 0x156   : > { %v4197_v29 = vsel %vm4187_vm7, %v4166_v21, %v4174_v27  ;;  %v4198_v13 = vsel %vm4187_vm7, %v4168_v7, %v16238_v45  ;;  %v22084_v21 = vld [vmem:[#allocation18_spill] sm:$0xff] }
 0x157   : > { %v4251_v55 = vmul.f32 %v16229_v35, %v4197_v29  ;;  %13951 = vmatprep.subr.bf16.mxu0 %v13950_v43  ;;  %v4256_v54 = vmul.f32 %v16229_v35, %v4198_v13  ;;  %v16262_v7 = vrot.slane %v22084_v21, %v15672_v2  ;;  %v22087_v13 = vld [vmem:[#allocation27_spill] sm:$0xff] }
 0x158   : > { %13953 = vmatpush1.bf16.msra.mxu0 %v13952_v8 }
 0x159   : > { %v1471_v52 = vpop.permute.xlu1 %1470  ;;  %v16252_v57 = vpop.permute.xlu0 %4177  ;;  %v16254_v6 = vpack.c.bf16 %v4251_v55, %v4245_v16  ;;  %22085 = vst [vmem:[#allocation30_spill] sm:$0xff] %v16262_v7 }
 0x15a   : > { %v4199_v29 = vsel %vm4187_vm7, %v4170_v20, %v16252_v57  ;;  %v1483_v55 = vsel %vm1478_vm3, %v22086_v56, %v1471_v52  ;;  %v16284_v56 = vrot.slane %v16161_v0, %v15672_v2 }
 0x15b   : > { %22083 = vst [vmem:[#allocation36_spill] sm:$0xff] %v16254_v6  ;;  %v4261_v8 = vmul.f32 %v16229_v35, %v4199_v29  ;;  %13963 = vmatprep.subr.bf16.mxu0 %v16254_v6  ;;  %13282 = vmatmul.mubr.msk.f32.vlgmr.msra.gmra.mrb[0].mxu0 %vm438_vm1, %v16250_v28  ;;  %v1538_v37 = vmul.f32 %v16262_v7, %v1483_v55  ;;  %v16296_v28 = vld [vmem:[%s21218_s2 + $0x40] sm:$0xf] }
 0x15c   : > { %13965 = vmatpush1.bf16.msra.mxu0 %v13946_v3  ;;  %4484 = vmatprep.mubr.f32.mxu0 %v22015_v36  ;;  %v16280_v35 = vrot.slane %v16161_v0, %v15138_v60  ;;  %22089 = vst [vmem:[#allocation18_spill] sm:$0xff] %v16284_v56  ;;  %22090 = vst [vmem:[#allocation24_spill] sm:$0xff] %v16296_v28  ;;  %v22092_v0 = vld [vmem:[#allocation17_spill] sm:$0xff] }
 0x15d   : > { %v4180_v20 = vpop.permute.xlu1 %4179  ;;  %v1473_v38 = vpop.permute.xlu0 %1472  ;;  %v16272_v16 = vpack.c.bf16 %v4261_v8, %v4256_v54 }
 0x15e   : > { %v1484_v29 = vsel %vm1478_vm3, %v22087_v13, %v1473_v38  ;;  %22088 = vst [vmem:[#allocation28_spill] sm:$0xff] %v16280_v35  ;;  %v4188_v54 = vsel %vm4187_vm7, %v4180_v20, %v16199_v51  ;;  %v4192_v8 = vsel %vm4187_vm7, %v4172_v41, %v4180_v20  ;;  %v1480_v33 = vsel %vm1478_vm3, %v1473_v38, %v22092_v0 }
 0x15f   : > { %v1543_v3 = vmul.f32 %v16262_v7, %v1484_v29  ;;  %13967 = vmatprep.subr.bf16.mxu0 %v16272_v16  ;;  %v16300_v29 = vrot.slane %v22084_v21, %v15835_v61  ;;  %v4247_v20 = vmul.f32 %v16284_v56, %v4188_v54  ;;  %v1479_v38 = vsel %vm1478_vm3, %v1471_v52, %v22092_v0  ;;  %v22095_v52 = vld [vmem:[#allocation32_spill] sm:$0xff] }
 0x160   : > { %13969 = vmatpush1.bf16.msra.mxu0 %v13950_v43  ;;  %v4246_v43 = vmul.f32 %v16280_v35, %v4192_v8 }
 0x161   : > { %v1475_v55 = vpop.permute.xlu1 %1474  ;;  %v4182_v13 = vpop.permute.xlu0 %4181  ;;  %v13734_v34 = vpack.c.bf16 %v1543_v3, %v1538_v37  ;;  %22091 = vst [vmem:[#allocation27_spill] sm:$0xff] %v16300_v29 }
 0x162   : > { %v4189_v41 = vsel %vm4187_vm7, %v4182_v13, %v16199_v51  ;;  %v4193_v37 = vsel %vm4187_vm7, %v4174_v27, %v4182_v13  ;;  %v1485_v62 = vsel %vm1478_vm3, %v22093_v46, %v1475_v55  ;;  %v1544_v27 = vmul.f32 %v16300_v29, %v1480_v33  ;;  %v13290_v46 = vld [vmem:[%s21217_s1 + $0x30] ss:$8 sm:$0xf] }
 0x163   : > { %v4252_v3 = vmul.f32 %v16280_v35, %v4193_v37  ;;  %v4253_v21 = vmul.f32 %v16284_v56, %v4189_v41  ;;  %13735 = vmatprep.subr.bf16.mxu1 %v13734_v34  ;;  %13285 = vmatmul.mubr.msk.f32.vlgmr.msra.gmra.mrb[0].mxu0 %vm438_vm1, %v16296_v28  ;;  %v13291_v33 = vld [vmem:[%s21217_s1 + $0x30] ss:$8 sm:$0x30] }
 0x164   : > { %13737 = vmatpush1.bf16.msra.mxu1 %v22074_v40  ;;  %4635 = vmatprep.mubr.f32.mxu0 %v22015_v36  ;;  %v1539_v40 = vmul.f32 %v16300_v29, %v1479_v38 }
 0x165   : > { %v4184_v54 = vpop.permute.xlu1 %4183  ;;  %v1477_v8 = vpop.permute.xlu0 %1476  ;;  %v16324_v13 = vpack.c.bf16 %v4252_v3, %v4246_v43  ;;  %v16327_v41 = vpack.c.bf16 %v4253_v21, %v4247_v20  ;;  %v1548_v43 = vmul.f32 %v16262_v7, %v1485_v62 }
 0x166   : > { %v1486_v37 = vsel %vm1478_vm3, %v22095_v52, %v1477_v8  ;;  %v4194_v20 = vsel %vm4187_vm7, %v16238_v45, %v4184_v54  ;;  %v4190_v21 = vsel %vm4187_vm7, %v4184_v54, %v16199_v51  ;;  %v1482_v52 = vsel %vm1478_vm3, %v1477_v8, %v22092_v0 }
 0x167   : > { %22094 = vst [vmem:[#allocation26_spill] sm:$0xff] %v16327_v41  ;;  %v1553_v3 = vmul.f32 %v16262_v7, %v1486_v37  ;;  %13979 = vmatprep.subr.bf16.mxu0 %v16324_v13  ;;  %v16352_v41 = vor.u32 %v13291_v33, %v13290_v46  ;;  %v13750_v45 = vpack.c.bf16 %v1544_v27, %v1539_v40 }
 0x168   : > { %13981 = vmatpush1.bf16.msra.mxu0 %v16254_v6  ;;  %v1481_v37 = vsel %vm1478_vm3, %v1475_v55, %v22092_v0  ;;  %v4257_v7 = vmul.f32 %v16280_v35, %v4194_v20  ;;  %v4258_v6 = vmul.f32 %v16284_v56, %v4190_v21  ;;  %v1554_v46 = vmul.f32 %v16300_v29, %v1482_v52 }
 0x169   : > { %v4720_v38 = vpop.permute.xlu1 %4719  ;;  %v4186_v62 = vpop.permute.xlu0 %4185  ;;  %v13738_v28 = vpack.c.bf16 %v1553_v3, %v1548_v43  ;;  %22096 = vst [vmem:[#allocation32_spill] sm:$0xff] %v16352_v41  ;;  %v1549_v55 = vmul.f32 %v16300_v29, %v1481_v37  ;;  %v16377_v3 = vrot.slane %v16352_v41, %v15056_v23  ;;  %v16386_v52 = vrot.slane %v16352_v41, %v15100_v44  ;;  %v16394_v23 = vld [vmem:[%s21218_s2 + $0x64] sm:$0xf]  ;;  %v22104_v29 = vld [vmem:[#allocation43_spill] sm:$0xff] }
 0x16a   : > { %v4191_v54 = vsel %vm4187_vm7, %v4186_v62, %v16199_v51  ;;  %v4195_v8 = vsel %vm4187_vm7, %v16252_v57, %v4186_v62 }
 0x16b   : > { %v4262_v27 = vmul.f32 %v16280_v35, %v4195_v8  ;;  %v4263_v33 = vmul.f32 %v16284_v56, %v4191_v54  ;;  %13739 = vmatprep.subr.bf16.mxu1 %v13738_v28  ;;  %22097 = vst [vmem:[#allocation64_spill] sm:$0xff] %v16377_v3  ;;  %v13754_v21 = vpack.c.bf16 %v1554_v46, %v1549_v55  ;;  %22098 = vst [vmem:[#allocation65_spill] sm:$0xff] %v16386_v52 }
 0x16c   : > { %13741 = vmatpush1.bf16.msra.mxu1 %v22078_v1  ;;  %v14779_v1 = vld [vmem:[%s21218_s2 + $0x2c] sm:$0xf] }
 0x16d   : > { %v4728_v40 = vpop.permute.xlu1 %4727  ;;  %13751 = vmatprep.subr.bf16.mxu1 %v13750_v45  ;;  %v4722_v43 = vpop.permute.xlu0 %4721  ;;  %v16371_v20 = vpack.c.bf16 %v4262_v27, %v4257_v7  ;;  %v16373_v57 = vpack.c.bf16 %v4263_v33, %v4258_v6 }
 0x16e   : > { %v4764_v6 = vsel %vm4751_vm8, %v4720_v38, %v4728_v40 }
 0x16f   : > { %13983 = vmatprep.subr.bf16.mxu0 %v16371_v20  ;;  %13233 = vmatmul.mubr.msk.f32.vlgmr.msra.gmra.mrb[0].mxu1 %vm438_vm1, %v14779_v1  ;;  %v4808_v37 = vmul.f32 %v16377_v3, %v4764_v6  ;;  %v22101_v6 = vld [vmem:[#allocation40_spill] sm:$0xff] }
 0x170   : > { %13753 = vmatpush1.bf16.msra.mxu1 %v13734_v34  ;;  %13985 = vmatpush1.bf16.msra.mxu0 %v16272_v16 }
 0x171   : > { %v16396_v7 = vpop.permute.xlu1 %4717  ;;  %13755 = vmatprep.subr.bf16.mxu1 %v13754_v21  ;;  %v4730_v62 = vpop.permute.xlu0 %4729  ;;  %1997 = vmatprep.mubr.f32.mxu1 %v22015_v36 }
 0x172   : > { %22099 = vst [vmem:[#allocation66_spill] sm:$0xff] %v16396_v7  ;;  %v4765_v44 = vsel %vm4751_vm8, %v4722_v43, %v4730_v62  ;;  %v4768_v34 = vsel %vm4751_vm8, %v16396_v7, %v4720_v38  ;;  %v4769_v45 = vsel %vm4751_vm8, %v16396_v7, %v4722_v43  ;;  %v22100_v38 = vld [vmem:[#allocation46_spill] sm:$0xff] }
 0x173   : > { %v4814_v54 = vmul.f32 %v16377_v3, %v4765_v44  ;;  %13288 = vmatmul.mubr.msk.f32.vlgmr.msra.gmra.mrb[0].mxu0 %vm438_vm1, %v16394_v23  ;;  %v4807_v8 = vmul.f32 %v16386_v52, %v4768_v34  ;;  %v4813_v46 = vmul.f32 %v16386_v52, %v4769_v45  ;;  %v22102_v34 = vld [vmem:[#allocation47_spill] sm:$0xff] }
 0x174   : > { %13757 = vmatpush1.bf16.msra.mxu1 %v13738_v28  ;;  %4897 = vmatprep.mubr.f32.mxu0 %v22015_v36  ;;  %v14780_v28 = vld [vmem:[%s21218_s2 + $0x50] sm:$0xf] }
 0x175   : > { %v4726_v27 = vpop.permute.xlu1 %4725  ;;  %13767 = vmatprep.subr.bf16.mxu1 %v22100_v38  ;;  %v4724_v33 = vpop.permute.xlu0 %4723  ;;  %v13994_v55 = vpack.c.bf16 %v4814_v54, %v4808_v37  ;;  %v13996_v43 = vpack.c.bf16 %v4813_v46, %v4807_v8 }
 0x176   : > { %v4771_v1 = vsel %vm4751_vm8, %v16396_v7, %v4726_v27  ;;  %v4770_v21 = vsel %vm4751_vm8, %v16396_v7, %v4724_v33 }
 0x177   : > { %13995 = vmatprep.subr.bf16.mxu0 %v13994_v55  ;;  %13236 = vmatmul.mubr.msk.f32.vlgmr.msra.gmra.mrb[0].mxu1 %vm438_vm1, %v14780_v28  ;;  %v4823_v37 = vmul.f32 %v16386_v52, %v4771_v1  ;;  %v4818_v54 = vmul.f32 %v16386_v52, %v4770_v21 }
 0x178   : > { %13769 = vmatpush1.bf16.msra.mxu1 %v22101_v6  ;;  %13997 = vmatpush1.bf16.msra.mxu0 %v13996_v43  ;;  %v16438_v6 = vrot.slane %v16352_v41, %v15042_v19  ;;  %v14781_v19 = vld [vmem:[%s21218_s2 + $0xc] sm:$0xf] }
 0x179   : > { %v4734_v44 = vpop.permute.xlu1 %4733  ;;  %13771 = vmatprep.subr.bf16.mxu1 %v22102_v34  ;;  %v4732_v45 = vpop.permute.xlu0 %4731  ;;  %2259 = vmatprep.mubr.f32.mxu1 %v22015_v36  ;;  %v14000_v21 = vpack.c.bf16 %v4823_v37, %v4818_v54 }
 0x17a   : > { %v4767_v8 = vsel %vm4751_vm8, %v4726_v27, %v4734_v44  ;;  %v4766_v46 = vsel %vm4751_vm8, %v4724_v33, %v4732_v45  ;;  %22103 = vst [vmem:[#allocation46_spill] sm:$0xff] %v16438_v6 }
 0x17b   : > { %v4824_v28 = vmul.f32 %v16377_v3, %v4767_v8  ;;  %v4819_v43 = vmul.f32 %v16377_v3, %v4766_v46 }
 0x17c   : > { %13773 = vmatpush1.bf16.msra.mxu1 %v22104_v29  ;;  %v16454_v29 = vld [vmem:[%s21218_s2 + $0x20] sm:$0xf] }
 0x17d   : > { %v4738_v56 = vpop.permute.xlu1 %4737  ;;  %v4736_v1 = vpop.permute.xlu0 %4735  ;;  %v13998_v35 = vpack.c.bf16 %v4824_v28, %v4819_v43  ;;  %22105 = vst [vmem:[#allocation40_spill] sm:$0xff] %v16454_v29 }
 0x17e   : > { %v4761_v27 = vsel %vm4751_vm8, %v4730_v62, %v4738_v56  ;;  %v4760_v33 = vsel %vm4751_vm8, %v4728_v40, %v4736_v1 }
 0x17f   : > { %v4815_v8 = vmul.f32 %v16438_v6, %v4761_v27  ;;  %v4809_v46 = vmul.f32 %v16438_v6, %v4760_v33  ;;  %13999 = vmatprep.subr.bf16.mxu0 %v13998_v35  ;;  %13241 = vmatmul.mubr.msk.f32.vlgmr.msra.gmra.mrb[0].mxu1 %vm438_vm1, %v14781_v19  ;;  %v22106_v27 = vld [vmem:[#allocation33_spill] sm:$0xff] }
 0x180   : > { %14001 = vmatpush1.bf16.msra.mxu0 %v14000_v21  ;;  %2410 = vmatprep.mubr.f32.mxu1 %v22015_v36  ;;  %v16470_v33 = vrot.slane %v22106_v27, %v15672_v2 }
 0x181   : > { %v4742_v40 = vpop.permute.xlu1 %4741  ;;  %v4740_v62 = vpop.permute.xlu0 %4739  ;;  %v16457_v37 = vpack.c.bf16 %v4815_v8, %v4809_v46  ;;  %v22108_v46 = vld [vmem:[#allocation41_spill] sm:$0xff] }
 0x182   : > { %v4763_v54 = vsel %vm4751_vm8, %v4734_v44, %v4742_v40  ;;  %v4762_v28 = vsel %vm4751_vm8, %v4732_v45, %v4740_v62  ;;  %22107 = vst [vmem:[#allocation47_spill] sm:$0xff] %v16470_v33 }
 0x183   : > { %v4825_v43 = vmul.f32 %v16438_v6, %v4763_v54  ;;  %v4820_v21 = vmul.f32 %v16438_v6, %v4762_v28  ;;  %14011 = vmatprep.subr.bf16.mxu0 %v16457_v37  ;;  %13293 = vmatmul.mubr.msk.f32.vlgmr.msra.gmra.mrb[0].mxu0 %vm438_vm1, %v16454_v29  ;;  %v22109_v54 = vld [vmem:[#allocation42_spill] sm:$0xff] }
 0x184   : > { %14013 = vmatpush1.bf16.msra.mxu0 %v13994_v55  ;;  %5048 = vmatprep.mubr.f32.mxu0 %v22015_v36 }
 0x185   : > { %v16473_v44 = vpack.c.bf16 %v4825_v43, %v4820_v21  ;;  %v2037_v8 = vpop.permute.xlu1 %2036  ;;  %v2035_v45 = vpop.permute.xlu0 %2034  ;;  %v16486_v43 = vrot.slane %v16352_v41, %v15138_v60  ;;  %v16490_v21 = vrot.slane %v16352_v41, %v15672_v2 }
 0x186   : > { %v2048_v19 = vsel %vm2042_vm4, %v22108_v46, %v2037_v8  ;;  %v2047_v28 = vsel %vm2042_vm4, %v22109_v54, %v2035_v45  ;;  %v16495_v46 = vld [vmem:[%s21218_s2 + $0x44] sm:$0xf]  ;;  %v16499_v54 = vrot.slane %v22106_v27, %v15835_v61 }
 0x187   : > { %14015 = vmatprep.subr.bf16.mxu0 %v16473_v44  ;;  %v2107_v55 = vmul.f32 %v16470_v33, %v2048_v19  ;;  %v2102_v52 = vmul.f32 %v16470_v33, %v2047_v28  ;;  %22110 = vst [vmem:[#allocation43_spill] sm:$0xff] %v16486_v43  ;;  %22111 = vst [vmem:[#allocation33_spill] sm:$0xff] %v16490_v21  ;;  %v22114_v19 = vld [vmem:[#allocation31_spill] sm:$0xff] }
 0x188   : > { %14017 = vmatpush1.bf16.msra.mxu0 %v13998_v35  ;;  %22112 = vst [vmem:[#allocation41_spill] sm:$0xff] %v16495_v46  ;;  %22113 = vst [vmem:[#allocation42_spill] sm:$0xff] %v16499_v54  ;;  %v2044_v35 = vsel %vm2042_vm4, %v2037_v8, %v22114_v19  ;;  %v2043_v60 = vsel %vm2042_vm4, %v2035_v45, %v22114_v19 }
 0x189   : > { %v4746_v28 = vpop.permute.xlu1 %4745  ;;  %v4744_v3 = vpop.permute.xlu0 %4743  ;;  %v13782_v6 = vpack.c.bf16 %v2107_v55, %v2102_v52 }
 0x18a   : > { %v4753_v0 = vsel %vm4751_vm8, %v4746_v28, %v16396_v7  ;;  %v4757_v29 = vsel %vm4751_vm8, %v4738_v56, %v4746_v28  ;;  %v4752_v27 = vsel %vm4751_vm8, %v4744_v3, %v16396_v7  ;;  %v4756_v8 = vsel %vm4751_vm8, %v4736_v1, %v4744_v3 }
 0x18b   : > { %13296 = vmatmul.mubr.msk.f32.vlgmr.msra.gmra.mrb[0].mxu0 %vm438_vm1, %v16495_v46  ;;  %v4816_v45 = vmul.f32 %v16486_v43, %v4757_v29  ;;  %v4817_v52 = vmul.f32 %v16490_v21, %v4753_v0  ;;  %v4810_v55 = vmul.f32 %v16486_v43, %v4756_v8  ;;  %v4811_v41 = vmul.f32 %v16490_v21, %v4752_v27  ;;  %v22115_v0 = vld [vmem:[#allocation44_spill] sm:$0xff]  ;;  %v22116_v27 = vld [vmem:[#allocation45_spill] sm:$0xff] }
 0x18c   : > { %13783 = vmatprep.subr.bf16.mxu1 %v13782_v6  ;;  %5199 = vmatprep.mubr.f32.mxu0 %v22015_v36  ;;  %v2108_v1 = vmul.f32 %v16499_v54, %v2044_v35  ;;  %v2103_v29 = vmul.f32 %v16499_v54, %v2043_v60 }
 0x18d   : > { %13785 = vmatpush1.bf16.msra.mxu1 %v22100_v38  ;;  %v2041_v56 = vpop.permute.xlu1 %2040  ;;  %v2039_v28 = vpop.permute.xlu0 %2038  ;;  %v16525_v7 = vpack.c.bf16 %v4816_v45, %v4810_v55  ;;  %v16527_v3 = vpack.c.bf16 %v4817_v52, %v4811_v41 }
 0x18e   : > { %v2050_v8 = vsel %vm2042_vm4, %v22115_v0, %v2041_v56  ;;  %v2049_v38 = vsel %vm2042_vm4, %v22116_v27, %v2039_v28  ;;  %v2046_v41 = vsel %vm2042_vm4, %v2041_v56, %v22114_v19  ;;  %v2045_v35 = vsel %vm2042_vm4, %v2039_v28, %v22114_v19 }
 0x18f   : > { %v2117_v46 = vmul.f32 %v16470_v33, %v2050_v8  ;;  %v2112_v21 = vmul.f32 %v16470_v33, %v2049_v38  ;;  %14027 = vmatprep.subr.bf16.mxu0 %v16525_v7  ;;  %v13798_v56 = vpack.c.bf16 %v2108_v1, %v2103_v29  ;;  %v2118_v8 = vmul.f32 %v16499_v54, %v2046_v41  ;;  %v14785_v1 = vld [vmem:[%s14875_s10 + $0x38] sm:$0xff] }
 0x190   : > { %14029 = vmatpush1.bf16.msra.mxu0 %v16457_v37  ;;  %v2113_v28 = vmul.f32 %v16499_v54, %v2045_v35  ;;  %v22117_v41 = vld [vmem:[#allocation49_spill] sm:$0xff] }
 0x191   : > { %v16547_v60 = vpop.permute.xlu1 %4749  ;;  %v16549_v45 = vpop.permute.xlu0 %4747  ;;  %v13786_v52 = vpack.c.bf16 %v2117_v46, %v2112_v21  ;;  %v14784_v46 = vld [vmem:[%s14875_s10 + $0x18] sm:$0xff] }
 0x192   : > { %v4759_v55 = vsel %vm4751_vm8, %v4742_v40, %v16547_v60  ;;  %v4758_v0 = vsel %vm4751_vm8, %v4740_v62, %v16549_v45  ;;  %v14782_v40 = vld [vmem:[%s21218_s2 + $0x30] sm:$0xf]  ;;  %v13802_v62 = vpack.c.bf16 %v2118_v8, %v2113_v28  ;;  %v13828_v29 = vpack.c.bf16 %v14785_v1, %v14784_v46  ;;  %v14786_v35 = vld [vmem:[%s14875_s10 + $0x78] sm:$0xff] }
 0x193   : > { %v4826_v27 = vmul.f32 %v16486_v43, %v4759_v55  ;;  %v4821_v38 = vmul.f32 %v16486_v43, %v4758_v0  ;;  %13787 = vmatprep.subr.bf16.mxu1 %v13786_v52  ;;  %v14787_v55 = vld [vmem:[%s21218_s2 + $0x10] sm:$0xf]  ;;  %v14788_v0 = vld [vmem:[%s21218_s2 + $0x34] sm:$0xf]  ;;  %v14789_v28 = vld [vmem:[%s21218_s2 + $0x58] sm:$0xf]  ;;  %v3672_v46 = vrot.slane %v15943_v25, %v15835_v61 }
 0x194   : > { %13789 = vmatpush1.bf16.msra.mxu1 %v22102_v34  ;;  %v16573_v34 = vld [vmem:[%s21218_s2 + $0x68] sm:$0xf] }
 0x195   : > { %13799 = vmatprep.subr.bf16.mxu1 %v13798_v56  ;;  %v16562_v21 = vpack.c.bf16 %v4826_v27, %v4821_v38 }
 0x197   : > { %13244 = vmatmul.mubr.msk.f32.vlgmr.msra.gmra.mrb[0].mxu1 %vm438_vm1, %v14782_v40  ;;  %14031 = vmatprep.subr.bf16.mxu0 %v16562_v21 }
 0x198   : > { %13801 = vmatpush1.bf16.msra.mxu1 %v13782_v6  ;;  %14033 = vmatpush1.bf16.msra.mxu0 %v16473_v44  ;;  %v14783_v6 = vld [vmem:[%s21218_s2 + $0x54] sm:$0xf] }
 0x199   : > { %13803 = vmatprep.subr.bf16.mxu1 %v13802_v62  ;;  %2561 = vmatprep.mubr.f32.mxu1 %v22015_v36  ;;  %v3108_v62 = vrot.slane %v15701_v63, %v15835_v61 }
 0x19b   : > { %13299 = vmatmul.mubr.msk.f32.vlgmr.msra.gmra.mrb[0].mxu0 %vm438_vm1, %v16573_v34 }
 0x19c   : > { %13805 = vmatpush1.bf16.msra.mxu1 %v13786_v52  ;;  %5367 = vmatprep.mubr.f32.mxu0 %v22015_v36  ;;  %v13832_v52 = vpack.c.bf16 %v14786_v35, %v15986_v26  ;;  %v16613_v26 = vrot.slane %v15701_v63, %v15672_v2  ;;  %v22130_v35 = vld [vmem:[#allocation25_spill] sm:$0xff] }
 0x19d   : > { %13813 = vmatprep.subr.bf16.mxu1 %v15721_v48 }
 0x19e   : > { %22120 = vst [vmem:[#allocation44_spill] sm:$0xff] %v16613_v26 }
 0x19f   : > { %13247 = vmatmul.mubr.msk.f32.vlgmr.msra.gmra.mrb[0].mxu1 %vm438_vm1, %v14783_v6 }
 0x1a0   : > { %13815 = vmatpush1.bf16.msra.mxu1 %v15665_v31  ;;  %2712 = vmatprep.mubr.f32.mxu1 %v22015_v36  ;;  %v22118_v31 = vmov 0.0|0.0  }
 0x1a1   : > { %13817 = vmatprep.subr.bf16.mxu1 %v15757_v59 }
 0x1a4   : > { %13819 = vmatpush1.bf16.msra.mxu1 %v22117_v41  ;;  %v22129_v41 = vld [vmem:[#allocation26_spill] sm:$0xff] }
 0x1a5   : > { %13829 = vmatprep.subr.bf16.mxu1 %v13828_v29 }
 0x1a7   : > { %13250 = vmatmul.mubr.msk.f32.vlgmr.msra.gmra.mrb[0].mxu1 %vm438_vm1, %v14787_v55 }
 0x1a8   : > { %13831 = vmatpush1.bf16.msra.mxu1 %v15721_v48  ;;  %2863 = vmatprep.mubr.f32.mxu1 %v22015_v36  ;;  %v22119_v48 = vld [vmem:[#allocation48_spill] sm:$0xff] }
 0x1a9   : > { %13833 = vmatprep.subr.bf16.mxu1 %v13832_v52  ;;  %v3060_v56 = vsel %vm3059_vm5, %v15816_v11, %v22119_v48  ;;  %v3062_v11 = vsel %vm3059_vm5, %v15858_v39, %v22119_v48  ;;  %v16645_v6 = vmul.f32 %v3108_v62, %v22119_v48  ;;  %v16657_v39 = vrot.slane %v15943_v25, %v15672_v2  ;;  %v22125_v25 = vld [vmem:[#allocation62_spill] sm:$0xff] }
 0x1aa   : > { %v3119_v27 = vmul.f32 %v16613_v26, %v3060_v56  ;;  %v3627_v2 = vsel %vm3623_vm6, %v16151_v12, %v15960_v58  ;;  %v22123_v12 = vld [vmem:[#allocation60_spill] sm:$0xff] }
 0x1ab   : > { %22121 = vst [vmem:[#allocation45_spill] sm:$0xff] %v16645_v6  ;;  %v13890_v63 = vpack.c.bf16 %v16645_v6, %v16645_v6  ;;  %22122 = vst [vmem:[#allocation49_spill] sm:$0xff] %v16657_v39 }
 0x1ac   : > { %13835 = vmatpush1.bf16.msra.mxu1 %v15757_v59  ;;  %v3061_v59 = vsel %vm3059_vm5, %v15860_v15, %v22119_v48  ;;  %v3063_v15 = vsel %vm3059_vm5, %v15891_v10, %v22119_v48 }
 0x1ad   : > { %13844 = vmatprep.subr.bf16.mxu1 %v22118_v31  ;;  %v3125_v8 = vmul.f32 %v16613_v26, %v3061_v59  ;;  %v3135_v38 = vmul.f32 %v16613_v26, %v3063_v15  ;;  %v22135_v59 = vld [vmem:[#allocation32_spill] sm:$0xff] }
 0x1ae   : > { %v4800_v56 = vrot.slane %v22135_v59, %v15835_v61 }
 0x1af   : > { %13253 = vmatmul.mubr.msk.f32.vlgmr.msra.gmra.mrb[0].mxu1 %vm438_vm1, %v14788_v0  ;;  %v13874_v40 = vpack.c.bf16 %v3125_v8, %v3119_v27 }
 0x1b0   : > { %13846 = vmatpush3.bf16.msra.mxu1 %v13828_v29  ;;  %13606 = vmatprep.mubr.msk.f32.mxu1 %vm14809_vm9, %v22015_v36 }
 0x1b1   : > { %13847 = vmatprep.subr.bf16.mxu1 %v22118_v31 }
 0x1b4   : > { %13849 = vmatpush3.bf16.msra.mxu1 %v13832_v52 }
 0x1b5   : > { %13859 = vmatprep.subr.bf16.mxu1 %v15962_v42 }
 0x1b7   : > { %13607 = vmatmul.mubr.msk.f32.vlgmr.msra.gmra.mrb[2].mxu1 %vm438_vm1, %v14789_v28 }
 0x1b8   : > { %13861 = vmatpush1.bf16.msra.mxu1 %v15880_v22  ;;  %3276 = vmatprep.mubr.f32.mxu1 %v22015_v36  ;;  %v3130_v22 = vmul.f32 %v16613_v26, %v3062_v11 }
 0x1b9   : > { %13863 = vmatprep.subr.bf16.mxu1 %v15994_v4 }
 0x1ba   : > { %v13878_v10 = vpack.c.bf16 %v3135_v38, %v3130_v22 }
 0x1bc   : > { %13865 = vmatpush1.bf16.msra.mxu1 %v15938_v18  ;;  %v3624_v18 = vsel %vm3623_vm6, %v16096_v47, %v15960_v58 }
 0x1bd   : > { %13875 = vmatprep.subr.bf16.mxu1 %v13874_v40 }
 0x1bf   : > { %13261 = vmatmul.mubr.msk.f32.vlgmr.msra.gmra.mrb[4].mxu1 %vm438_vm1, %v15902_v9  ;;  %v3625_v9 = vsel %vm3623_vm6, %v16094_v24, %v15960_v58  ;;  %v3699_v24 = vmul.f32 %v16657_v39, %v3627_v2 }
 0x1c0   : > { %13877 = vmatpush1.bf16.msra.mxu1 %v15962_v42  ;;  %3427 = vmatprep.mubr.f32.mxu1 %v22015_v36  ;;  %v3689_v42 = vmul.f32 %v16657_v39, %v3625_v9 }
 0x1c1   : > { %13879 = vmatprep.subr.bf16.mxu1 %v13878_v10 }
 0x1c4   : > { %13881 = vmatpush1.bf16.msra.mxu1 %v15994_v4  ;;  %v3626_v4 = vsel %vm3623_vm6, %v16153_v14, %v15960_v58 }
 0x1c5   : > { %13891 = vmatprep.subr.bf16.mxu1 %v13890_v63 }
 0x1c7   : > { %13264 = vmatmul.mubr.msk.f32.vlgmr.msra.gmra.mrb[6].mxu1 %vm438_vm1, %v15972_v50  ;;  %v3683_v50 = vmul.f32 %v16657_v39, %v3624_v18 }
 0x1c8   : > { %13893 = vmatpush1.bf16.msra.mxu1 %v13874_v40  ;;  %3578 = vmatprep.mubr.f32.mxu1 %v22015_v36 }
 0x1c9   : > { %13895 = vmatprep.subr.bf16.mxu1 %v13890_v63  ;;  %v13922_v47 = vpack.c.bf16 %v3689_v42, %v3683_v50 }
 0x1cc   : > { %13897 = vmatpush1.bf16.msra.mxu1 %v13878_v10 }
 0x1cd   : > { %13907 = vmatprep.subr.bf16.mxu1 %v16122_v30 }
 0x1cf   : > { %13267 = vmatmul.mubr.msk.f32.vlgmr.msra.gmra.mrb[8].mxu1 %vm438_vm1, %v16032_v49  ;;  %v3694_v49 = vmul.f32 %v16657_v39, %v3626_v4 }
 0x1d0   : > { %13909 = vmatpush1.bf16.msra.mxu1 %v16055_v53  ;;  %3840 = vmatprep.mubr.f32.mxu1 %v22015_v36  ;;  %v16691_v53 = vmul.f32 %v3672_v46, %v15960_v58 }
 0x1d1   : > { %13911 = vmatprep.subr.bf16.mxu1 %v16168_v5  ;;  %v13926_v14 = vpack.c.bf16 %v3699_v24, %v3694_v49 }
 0x1d2   : > { %22124 = vst [vmem:[#allocation60_spill] sm:$0xff] %v16691_v53  ;;  %v13938_v1 = vpack.c.bf16 %v16691_v53, %v16691_v53 }
 0x1d4   : > { %13913 = vmatpush1.bf16.msra.mxu1 %v16078_v32  ;;  %v22126_v32 = vld [vmem:[#allocation19_spill] sm:$0xff] }
 0x1d5   : > { %13923 = vmatprep.subr.bf16.mxu1 %v13922_v47 }
 0x1d7   : > { %13272 = vmatmul.mubr.msk.f32.vlgmr.msra.gmra.mrb[10].mxu1 %vm438_vm1, %v22123_v12 }
 0x1d8   : > { %13925 = vmatpush1.bf16.msra.mxu1 %v16122_v30  ;;  %3991 = vmatprep.mubr.f32.mxu1 %v22015_v36  ;;  %v22127_v30 = vld [vmem:[#allocation36_spill] sm:$0xff] }
 0x1d9   : > { %13927 = vmatprep.subr.bf16.mxu1 %v13926_v14 }
 0x1dc   : > { %13929 = vmatpush1.bf16.msra.mxu1 %v16168_v5  ;;  %v22128_v5 = vld [vmem:[#allocation15_spill] sm:$0xff] }
 0x1dd   : > { %13939 = vmatprep.subr.bf16.mxu1 %v13938_v1  ;;  %v4236_v29 = vrot.slane %v22128_v5, %v15835_v61  ;;  %v22138_v61 = vld [vmem:[#allocation41_spill] sm:$0xff] }
 0x1df   : > { %13275 = vmatmul.mubr.msk.f32.vlgmr.msra.gmra.mrb[12].mxu1 %vm438_vm1, %v22125_v25  ;;  %v16714_v52 = vmul.f32 %v4236_v29, %v16199_v51 }
 0x1e0   : > { %13941 = vmatpush1.bf16.msra.mxu1 %v13922_v47  ;;  %4142 = vmatprep.mubr.f32.mxu1 %v22015_v36 }
 0x1e1   : > { %13943 = vmatprep.subr.bf16.mxu1 %v13938_v1  ;;  %22131 = vst [vmem:[#allocation62_spill] sm:$0xff] %v16714_v52  ;;  %v13986_v55 = vpack.c.bf16 %v16714_v52, %v16714_v52 }
 0x1e4   : > { %13945 = vmatpush1.bf16.msra.mxu1 %v13926_v14 }
 0x1e5   : > { %13955 = vmatprep.subr.bf16.mxu1 %v16324_v13 }
 0x1e7   : > { %13278 = vmatmul.mubr.msk.f32.vlgmr.msra.gmra.mrb[14].mxu1 %vm438_vm1, %v22126_v32 }
 0x1e8   : > { %13957 = vmatpush1.bf16.msra.mxu1 %v22127_v30  ;;  %4404 = vmatprep.mubr.f32.mxu1 %v22015_v36 }
 0x1e9   : > { %13959 = vmatprep.subr.bf16.mxu1 %v16371_v20 }
 0x1ec   : > { %13961 = vmatpush1.bf16.msra.mxu1 %v16272_v16  ;;  %v22132_v16 = vld [vmem:[#allocation24_spill] sm:$0xff] }
 0x1ed   : > { %13971 = vmatprep.subr.bf16.mxu1 %v22129_v41 }
 0x1ef   : > { %13283 = vmatmul.mubr.msk.f32.vlgmr.msra.gmra.mrb[16].mxu1 %vm438_vm1, %v22130_v35 }
 0x1f0   : > { %13973 = vmatpush1.bf16.msra.mxu1 %v16324_v13  ;;  %4555 = vmatprep.mubr.f32.mxu1 %v22015_v36  ;;  %v22133_v13 = vld [vmem:[#allocation66_spill] sm:$0xff] }
 0x1f1   : > { %13975 = vmatprep.subr.bf16.mxu1 %v16373_v57  ;;  %v4754_v31 = vsel %vm4751_vm8, %v16549_v45, %v22133_v13 }
 0x1f4   : > { %13977 = vmatpush1.bf16.msra.mxu1 %v16371_v20  ;;  %v4755_v20 = vsel %vm4751_vm8, %v16547_v60, %v22133_v13  ;;  %v22136_v60 = vld [vmem:[#allocation40_spill] sm:$0xff] }
 0x1f5   : > { %13987 = vmatprep.subr.bf16.mxu1 %v13986_v55 }
 0x1f7   : > { %13286 = vmatmul.mubr.msk.f32.vlgmr.msra.gmra.mrb[18].mxu1 %vm438_vm1, %v22132_v16 }
 0x1f8   : > { %13989 = vmatpush1.bf16.msra.mxu1 %v22129_v41  ;;  %4706 = vmatprep.mubr.f32.mxu1 %v22015_v36 }
 0x1f9   : > { %13991 = vmatprep.subr.bf16.mxu1 %v13986_v55 }
 0x1fc   : > { %13993 = vmatpush1.bf16.msra.mxu1 %v16373_v57  ;;  %v22134_v57 = vld [vmem:[#allocation33_spill] sm:$0xff] }
 0x1fd   : > { %14003 = vmatprep.subr.bf16.mxu1 %v16525_v7  ;;  %v4827_v0 = vmul.f32 %v22134_v57, %v4755_v20 }
 0x1ff   : > { %13289 = vmatmul.mubr.msk.f32.vlgmr.msra.gmra.mrb[20].mxu1 %vm438_vm1, %v16394_v23  ;;  %v4822_v23 = vmul.f32 %v22134_v57, %v4754_v31 }
 0x200   : > { %14005 = vmatpush1.bf16.msra.mxu1 %v16457_v37  ;;  %4968 = vmatprep.mubr.f32.mxu1 %v22015_v36  ;;  %v16750_v37 = vmul.f32 %v4800_v56, %v22133_v13  ;;  %v21326_v56 = vmov 0  }
 0x201   : > { %14007 = vmatprep.subr.bf16.mxu1 %v16562_v21  ;;  %v14022_v45 = vpack.c.bf16 %v4827_v0, %v4822_v23 }
 0x202   : > { %22137 = vst [vmem:[#allocation19_spill] sm:$0xff] %v16750_v37  ;;  %v14034_v8 = vpack.c.bf16 %v16750_v37, %v16750_v37 }
 0x204   : > { %14009 = vmatpush1.bf16.msra.mxu1 %v16473_v44 }
 0x205   : > { %14019 = vmatprep.subr.bf16.mxu1 %v16527_v3 }
 0x207   : > { %13294 = vmatmul.mubr.msk.f32.vlgmr.msra.gmra.mrb[22].mxu1 %vm438_vm1, %v22136_v60 }
 0x208   : > { %14021 = vmatpush1.bf16.msra.mxu1 %v16525_v7  ;;  %5119 = vmatprep.mubr.f32.mxu1 %v22015_v36 }
 0x209   : > { %14023 = vmatprep.subr.bf16.mxu1 %v14022_v45 }
 0x20c   : > { %14025 = vmatpush1.bf16.msra.mxu1 %v16562_v21  ;;  %v16770_v21 = vld [vmem:[%s21219_s3] sm:$0xf] }
 0x20d   : > { %14035 = vmatprep.subr.bf16.mxu1 %v14034_v8 }
 0x20f   : > { %13297 = vmatmul.mubr.msk.f32.vlgmr.msra.gmra.mrb[24].mxu1 %vm438_vm1, %v22138_v61 }
 0x210   : > { %14037 = vmatpush1.bf16.msra.mxu1 %v16527_v3  ;;  %5270 = vmatprep.mubr.f32.mxu1 %v22015_v36 }
 0x211   : > { %14039 = vmatprep.subr.bf16.mxu1 %v14034_v8 }
 0x214   : > { %14041 = vmatpush1.bf16.msra.mxu1 %v14022_v45 }
 0x217   : > { %13300 = vmatmul.mubr.msk.f32.vlgmr.msra.gmra.mrb[26].mxu1 %vm438_vm1, %v16573_v34 }
 0x218   : > { %6011 = vmatprep.mubr.bf16.mxu1 %v21326_v56 }
 0x26e   : > { %v5201_v7 = vpop.f32.mrb[0].mxu0 }
 0x26f   : > { %v5203_v44 = vpop.f32.mrb[1].mxu0  ;;  %v16765_v15 = vmax.f32 %v5201_v7, 0.0 }
 0x270   : > { %v16763_v28 = vmax.f32 %v5203_v44, 0.0 }
 0x271   : > { %22140 = vst [vmem:[#allocation15_spill] sm:$0xff] %v16765_v15 }
 0x272   : > { %22139 = vst [vmem:[#allocation36_spill] sm:$0xff] %v16763_v28  ;;  %13301 = vmatprep.subr.msk.mxu0 %vm5290_vm10, %v16763_v28 }
 0x273   : > { %13302 = vmatpush1.msk.msra.mxu0 %vm5290_vm10, %v16765_v15 }
 0x274   : > { %13303 = vmatmul.mubr.msk.f32.vlgmr.msra.gmra.mrb[2].mxu0 %vm5286_vm11, %v16770_v21 }
 0x275   : > { %5438 = vmatprep.mubr.f32.mxu0 %v22015_v36 }
 0x282   : > { %v2865_v3 = vpop.f32.mrb[0].mxu1 }
 0x283   : > { %v2867_v34 = vpop.f32.mrb[1].mxu1 }
 0x28a   : > { %v3016_v27 = vpop.f32.mrb[2].mxu1 }
 0x28b   : > { %v3023_v11 = vadd.f32 %v3016_v27, %v2865_v3  ;;  %v13608_v38 = vpop.f32.mrb[3].mxu1 }
 0x292   : > { %v3278_v40 = vpop.f32.mrb[4].mxu1 }
 0x293   : > { %v3285_v62 = vadd.f32 %v3278_v40, %v3023_v11  ;;  %v3280_v22 = vpop.f32.mrb[5].mxu1 }
 0x294   : > { %v3286_v10 = vadd.f32 %v3280_v22, %v2867_v34 }
 0x29a   : > { %v3429_v63 = vpop.f32.mrb[6].mxu1 }
 0x29b   : > { %v3436_v9 = vadd.f32 %v3429_v63, %v3285_v62  ;;  %v3431_v18 = vpop.f32.mrb[7].mxu1 }
 0x29c   : > { %v3437_v42 = vadd.f32 %v3431_v18, %v3286_v10 }
 0x2a2   : > { %v3580_v50 = vpop.f32.mrb[8].mxu1 }
 0x2a3   : > { %v3587_v2 = vadd.f32 %v3580_v50, %v3436_v9  ;;  %v3582_v4 = vpop.f32.mrb[9].mxu1 }
 0x2a4   : > { %v3588_v24 = vadd.f32 %v3582_v4, %v3437_v42  ;;  %v5449_v42 = vpack.c.bf16 %v16765_v15, %v16765_v15 }
 0x2aa   : > { %v3842_v49 = vpop.f32.mrb[10].mxu1 }
 0x2ab   : > { %v3849_v47 = vadd.f32 %v3842_v49, %v3587_v2  ;;  %v3844_v46 = vpop.f32.mrb[11].mxu1  ;;  %v5450_v2 = vpack.c.bf16 %v16763_v28, %v16763_v28  ;;  %v5615_v49 = vsel %vm5613_vm12, %v5449_v42, 0 }
 0x2ac   : > { %v3850_v12 = vadd.f32 %v3844_v46, %v3588_v24 }
 0x2b2   : > { %v3993_v14 = vpop.f32.mrb[12].mxu1 }
 0x2b3   : > { %v4000_v1 = vadd.f32 %v3993_v14, %v3849_v47  ;;  %v3995_v25 = vpop.f32.mrb[13].mxu1 }
 0x2b4   : > { %v4001_v32 = vadd.f32 %v3995_v25, %v3850_v12 }
 0x2ba   : > { %v4144_v30 = vpop.f32.mrb[14].mxu1 }
 0x2bb   : > { %v4151_v5 = vadd.f32 %v4144_v30, %v4000_v1  ;;  %v4146_v29 = vpop.f32.mrb[15].mxu1 }
 0x2bc   : > { %v4152_v41 = vadd.f32 %v4146_v29, %v4001_v32 }
 0x2c2   : > { %v4406_v35 = vpop.f32.mrb[16].mxu1 }
 0x2c3   : > { %v4413_v55 = vadd.f32 %v4406_v35, %v4151_v5  ;;  %v4408_v16 = vpop.f32.mrb[17].mxu1 }
 0x2c4   : > { %v4414_v20 = vadd.f32 %v4408_v16, %v4152_v41 }
 0x2ca   : > { %v4557_v31 = vpop.f32.mrb[18].mxu1 }
 0x2cb   : > { %v4564_v0 = vadd.f32 %v4557_v31, %v4413_v55  ;;  %v4559_v23 = vpop.f32.mrb[19].mxu1 }
 0x2cc   : > { %v4565_v59 = vadd.f32 %v4559_v23, %v4414_v20 }
 0x2d2   : > { %v4708_v60 = vpop.f32.mrb[20].mxu1 }
 0x2d3   : > { %v4715_v45 = vadd.f32 %v4708_v60, %v4564_v0  ;;  %v4710_v8 = vpop.f32.mrb[21].mxu1 }
 0x2d4   : > { %v4716_v61 = vadd.f32 %v4710_v8, %v4565_v59 }
 0x2da   : > { %v4970_v7 = vpop.f32.mrb[22].mxu1 }
 0x2db   : > { %v4977_v44 = vadd.f32 %v4970_v7, %v4715_v45  ;;  %v4972_v3 = vpop.f32.mrb[23].mxu1 }
 0x2dc   : > { %v4978_v34 = vadd.f32 %v4972_v3, %v4716_v61 }
 0x2e2   : > { %v5121_v27 = vpop.f32.mrb[24].mxu1 }
 0x2e3   : > { %v5128_v11 = vadd.f32 %v5121_v27, %v4977_v44  ;;  %v5123_v38 = vpop.f32.mrb[25].mxu1 }
 0x2e4   : > { %v5129_v40 = vadd.f32 %v5123_v38, %v4978_v34 }
 0x2ea   : > { %v5272_v62 = vpop.f32.mrb[26].mxu1 }
 0x2eb   : > { %v5279_v22 = vadd.f32 %v5272_v62, %v5128_v11  ;;  %v5274_v10 = vpop.f32.mrb[27].mxu1 }
 0x2ec   : > { %v5280_v63 = vadd.f32 %v5274_v10, %v5129_v40 }
 0x2ed   : > { %v16780_v9 = vmax.f32 %v5279_v22, 0.0 }
 0x2ee   : > { %v16782_v18 = vmax.f32 %v5280_v63, 0.0 }
 0x2ef   : > { %22141 = vst [vmem:[#allocation26_spill] sm:$0xff] %v16780_v9  ;;  %v5451_v50 = vpack.c.bf16 %v16780_v9, %v16780_v9 }
 0x2f0   : > { %22142 = vst [vmem:[#allocation25_spill] sm:$0xff] %v16782_v18  ;;  %13304 = vmatprep.subr.msk.mxu0 %vm5290_vm10, %v16782_v18  ;;  %v5452_v4 = vpack.c.bf16 %v16782_v18, %v16782_v18 }
 0x2f1   : > { %13305 = vmatpush1.msk.msra.mxu0 %vm5290_vm10, %v16780_v9  ;;  %v5621_v24 = vsel %vm5613_vm12, %v5451_v50, 0 }
 0x2f2   : > { %13307 = vmatprep.subr.msk.bf16.mxu0 %vm5613_vm12, %v5450_v2  ;;  %13340 = vmatprep.subr.msk.bf16.mxu1 %vm5613_vm12, %v5452_v4 }
 0x2f3   : > { %13306 = vmatmul.mubr.msk.f32.vlgmr.msra.gmra.mrb[4].mxu0 %vm5286_vm11, %v16770_v21  ;;  %5980 = vmatpush1.bf16.msra.mxu1 %v5621_v24 }
 0x2f4   : > { %5627 = vmatpush1.bf16.msra.mxu0 %v5615_v49  ;;  %5658 = vmatprep.mubr.bf16.mxu0 %v21326_v56 }
 0x347   : > { %v5369_v47 = vpop.f32.mrb[2].mxu0 }
 0x348   : > { %v16803_v46 = vpack.c.bf16 %v5369_v47, %v5369_v47  ;;  %v5371_v12 = vpop.f32.mrb[3].mxu0 }
 0x349   : > { %v16805_v14 = vpack.c.bf16 %v5371_v12, %v5371_v12 }
 0x34a   : > { %22143 = vst [vmem:[#allocation24_spill] sm:$0xff] %v16803_v46  ;;  %5453 = vxpose.xlu0.c.b16.start.end [1/1] (short) %v16803_v46, 128 }
 0x34b   : > { %5469 = vxpose.xlu1.c.b16.start.end [1/1] (short) %v16805_v14, 128 }
 0x3b0   : > { %v5461_v1 = vpop.trf.xlu0 }
 0x3b1   : > { %13308 = vmatmul.mubr.msk.bf16.vlgmr.msra.gmra.mrb[8].mxu0 %vm5286_vm11, %v5461_v1  ;;  %13341 = vmatmul.mubr.msk.bf16.vlgmr.msra.gmra.mrb[28].mxu1 %vm5286_vm11, %v5461_v1  ;;  %v5477_v31 = vpop.trf.xlu1 }
 0x3b2   : > { %5668 = vmatprep.mubr.bf16.mxu0 %v21326_v56  ;;  %6021 = vmatprep.mubr.bf16.mxu1 %v21326_v56 }
 0x3b4   : > { %v5462_v21 = vpop.trf.xlu0 }
 0x3b5   : > { %v5478_v0 = vpop.trf.xlu1 }
 0x3b8   : > { %v5463_v25 = vpop.trf.xlu0 }
 0x3b9   : > { %13309 = vmatmul.mubr.msk.bf16.gmra.mrb[12].mxu0 %vm5286_vm11, %v5462_v21  ;;  %13342 = vmatmul.mubr.msk.bf16.gmra.mrb[32].mxu1 %vm5286_vm11, %v5462_v21  ;;  %v5479_v23 = vpop.trf.xlu1 }
 0x3ba   : > { %5678 = vmatprep.mubr.bf16.mxu0 %v21326_v56  ;;  %6031 = vmatprep.mubr.bf16.mxu1 %v21326_v56 }
 0x3bc   : > { %v5464_v30 = vpop.trf.xlu0 }
 0x3bd   : > { %v5480_v59 = vpop.trf.xlu1 }
 0x3c0   : > { %v5465_v35 = vpop.trf.xlu0 }
 0x3c1   : > { %13310 = vmatmul.mubr.msk.bf16.gmra.mrb[16].mxu0 %vm5286_vm11, %v5463_v25  ;;  %13343 = vmatmul.mubr.msk.bf16.gmra.mrb[36].mxu1 %vm5286_vm11, %v5463_v25  ;;  %v5481_v60 = vpop.trf.xlu1 }
 0x3c2   : > { %5688 = vmatprep.mubr.bf16.mxu0 %v21326_v56  ;;  %6041 = vmatprep.mubr.bf16.mxu1 %v21326_v56 }
 0x3c4   : > { %v5466_v55 = vpop.trf.xlu0 }
 0x3c5   : > { %v5482_v45 = vpop.trf.xlu1 }
 0x3c6   : > { %v5440_v32 = vpop.f32.mrb[4].mxu0 }
 0x3c7   : > { %v16821_v5 = vpack.c.bf16 %v5440_v32, %v5440_v32  ;;  %v5442_v29 = vpop.f32.mrb[5].mxu0 }
 0x3c8   : > { %v16823_v41 = vpack.c.bf16 %v5442_v29, %v5442_v29  ;;  %v5467_v16 = vpop.trf.xlu0 }
 0x3c9   : > { %22144 = vst [vmem:[#allocation32_spill] sm:$0xff] %v16821_v5  ;;  %13311 = vmatmul.mubr.msk.bf16.gmra.mrb[20].mxu0 %vm5286_vm11, %v5464_v30  ;;  %13344 = vmatmul.mubr.msk.bf16.gmra.mrb[40].mxu1 %vm5286_vm11, %v5464_v30  ;;  %v5483_v8 = vpop.trf.xlu1 }
 0x3ca   : > { %22145 = vst [vmem:[#allocation40_spill] sm:$0xff] %v16823_v41  ;;  %5485 = vxpose.xlu0.c.b16.start.end [1/1] (short) %v16821_v5, 128  ;;  %5501 = vxpose.xlu1.c.b16.start.end [1/1] (short) %v16823_v41, 128 }
 0x3cb   : > { %5698 = vmatprep.mubr.bf16.mxu0 %v21326_v56  ;;  %6051 = vmatprep.mubr.bf16.mxu1 %v21326_v56 }
 0x3cc   : > { %v5468_v20 = vpop.trf.xlu0 }
 0x3cd   : > { %v5484_v61 = vpop.trf.xlu1 }
 0x3ce   : > { %14249 = vset.pattern.permute.xlu1 %v21326_v56 }
 0x3d1   : > { %13312 = vmatmul.mubr.msk.bf16.gmra.mrb[24].mxu0 %vm5286_vm11, %v5465_v35  ;;  %13345 = vmatmul.mubr.msk.bf16.gmra.mrb[44].mxu1 %vm5286_vm11, %v5465_v35 }
 0x3d2   : > { %5708 = vmatprep.mubr.bf16.mxu0 %v21326_v56  ;;  %6061 = vmatprep.mubr.bf16.mxu1 %v21326_v56 }
 0x3d9   : > { %13313 = vmatmul.mubr.msk.bf16.gmra.mrb[28].mxu0 %vm5286_vm11, %v5466_v55  ;;  %13346 = vmatmul.mubr.msk.bf16.gmra.mrb[48].mxu1 %vm5286_vm11, %v5466_v55 }
 0x3da   : > { %5718 = vmatprep.mubr.bf16.mxu0 %v21326_v56  ;;  %6071 = vmatprep.mubr.bf16.mxu1 %v21326_v56 }
 0x3e1   : > { %13314 = vmatmul.mubr.msk.bf16.gmra.mrb[32].mxu0 %vm5286_vm11, %v5467_v16  ;;  %13347 = vmatmul.mubr.msk.bf16.gmra.mrb[52].mxu1 %vm5286_vm11, %v5467_v16 }
 0x3e2   : > { %5728 = vmatprep.mubr.bf16.mxu0 %v21326_v56  ;;  %6081 = vmatprep.mubr.bf16.mxu1 %v21326_v56 }
 0x3e9   : > { %13315 = vmatmul.mubr.msk.bf16.gmra.mrb[36].mxu0 %vm5286_vm11, %v5468_v20  ;;  %13348 = vmatmul.mubr.msk.bf16.gmra.mrb[56].mxu1 %vm5286_vm11, %v5468_v20 }
 0x3ea   : > { %5738 = vmatprep.mubr.bf16.mxu0 %v21326_v56  ;;  %6091 = vmatprep.mubr.bf16.mxu1 %v21326_v56 }
 0x3f1   : > { %13316 = vmatmul.mubr.msk.bf16.gmra.mrb[40].mxu0 %vm5286_vm11, %v5477_v31  ;;  %13349 = vmatmul.mubr.msk.bf16.gmra.mrb[60].mxu1 %vm5286_vm11, %v5477_v31 }
 0x3f2   : > { %5748 = vmatprep.mubr.bf16.mxu0 %v21326_v56  ;;  %6101 = vmatprep.mubr.bf16.mxu1 %v21326_v56 }
 0x3f9   : > { %13317 = vmatmul.mubr.msk.bf16.gmra.mrb[44].mxu0 %vm5286_vm11, %v5478_v0  ;;  %13350 = vmatmul.mubr.msk.bf16.gmra.mrb[64].mxu1 %vm5286_vm11, %v5478_v0 }
 0x3fa   : > { %5758 = vmatprep.mubr.bf16.mxu0 %v21326_v56  ;;  %6111 = vmatprep.mubr.bf16.mxu1 %v21326_v56 }
 0x401   : > { %13318 = vmatmul.mubr.msk.bf16.gmra.mrb[48].mxu0 %vm5286_vm11, %v5479_v23  ;;  %13351 = vmatmul.mubr.msk.bf16.gmra.mrb[68].mxu1 %vm5286_vm11, %v5479_v23 }
 0x402   : > { %5768 = vmatprep.mubr.bf16.mxu0 %v21326_v56  ;;  %6121 = vmatprep.mubr.bf16.mxu1 %v21326_v56 }
 0x409   : > { %13319 = vmatmul.mubr.msk.bf16.gmra.mrb[52].mxu0 %vm5286_vm11, %v5480_v59  ;;  %13352 = vmatmul.mubr.msk.bf16.gmra.mrb[72].mxu1 %vm5286_vm11, %v5480_v59 }
 0x40a   : > { %5778 = vmatprep.mubr.bf16.mxu0 %v21326_v56  ;;  %6131 = vmatprep.mubr.bf16.mxu1 %v21326_v56 }
 0x411   : > { %13320 = vmatmul.mubr.msk.bf16.gmra.mrb[56].mxu0 %vm5286_vm11, %v5481_v60  ;;  %13353 = vmatmul.mubr.msk.bf16.gmra.mrb[76].mxu1 %vm5286_vm11, %v5481_v60 }
 0x412   : > { %5788 = vmatprep.mubr.bf16.mxu0 %v21326_v56  ;;  %6141 = vmatprep.mubr.bf16.mxu1 %v21326_v56 }
 0x419   : > { %13321 = vmatmul.mubr.msk.bf16.gmra.mrb[60].mxu0 %vm5286_vm11, %v5482_v45  ;;  %13354 = vmatmul.mubr.msk.bf16.gmra.mrb[80].mxu1 %vm5286_vm11, %v5482_v45 }
 0x41a   : > { %5798 = vmatprep.mubr.bf16.mxu0 %v21326_v56  ;;  %6151 = vmatprep.mubr.bf16.mxu1 %v21326_v56 }
 0x421   : > { %13322 = vmatmul.mubr.msk.bf16.gmra.mrb[64].mxu0 %vm5286_vm11, %v5483_v8  ;;  %13355 = vmatmul.mubr.msk.bf16.gmra.mrb[84].mxu1 %vm5286_vm11, %v5483_v8 }
 0x422   : > { %5808 = vmatprep.mubr.bf16.mxu0 %v21326_v56  ;;  %6161 = vmatprep.mubr.bf16.mxu1 %v21326_v56 }
 0x429   : > { %13323 = vmatmul.mubr.msk.bf16.gmra.mrb[68].mxu0 %vm5286_vm11, %v5484_v61  ;;  %13356 = vmatmul.mubr.msk.bf16.gmra.mrb[88].mxu1 %vm5286_vm11, %v5484_v61 }
 0x42a   : > { %5818 = vmatprep.mubr.bf16.mxu0 %v21326_v56  ;;  %6171 = vmatprep.mubr.bf16.mxu1 %v21326_v56 }
 0x430   : > { %v5493_v7 = vpop.trf.xlu0  ;;  %v5509_v62 = vpop.trf.xlu1 }
 0x431   : > { %13324 = vmatmul.mubr.msk.bf16.gmra.mrb[72].mxu0 %vm5286_vm11, %v5493_v7  ;;  %13357 = vmatmul.mubr.msk.bf16.gmra.mrb[92].mxu1 %vm5286_vm11, %v5493_v7 }
 0x432   : > { %5828 = vmatprep.mubr.bf16.mxu0 %v21326_v56  ;;  %6181 = vmatprep.mubr.bf16.mxu1 %v21326_v56 }
 0x434   : > { %v5494_v44 = vpop.trf.xlu0  ;;  %v5510_v22 = vpop.trf.xlu1 }
 0x438   : > { %v5495_v3 = vpop.trf.xlu0  ;;  %v5511_v10 = vpop.trf.xlu1 }
 0x439   : > { %13325 = vmatmul.mubr.msk.bf16.gmra.mrb[76].mxu0 %vm5286_vm11, %v5494_v44  ;;  %13358 = vmatmul.mubr.msk.bf16.gmra.mrb[96].mxu1 %vm5286_vm11, %v5494_v44 }
 0x43a   : > { %5838 = vmatprep.mubr.bf16.mxu0 %v21326_v56  ;;  %6191 = vmatprep.mubr.bf16.mxu1 %v21326_v56 }
 0x43c   : > { %v5496_v34 = vpop.trf.xlu0  ;;  %v5512_v63 = vpop.trf.xlu1 }
 0x440   : > { %v5497_v27 = vpop.trf.xlu0  ;;  %v5513_v30 = vpop.trf.xlu1 }
 0x441   : > { %13326 = vmatmul.mubr.msk.bf16.gmra.mrb[80].mxu0 %vm5286_vm11, %v5495_v3  ;;  %13359 = vmatmul.mubr.msk.bf16.gmra.mrb[100].mxu1 %vm5286_vm11, %v5495_v3 }
 0x442   : > { %5848 = vmatprep.mubr.bf16.mxu0 %v21326_v56  ;;  %6201 = vmatprep.mubr.bf16.mxu1 %v21326_v56 }
 0x444   : > { %v5498_v11 = vpop.trf.xlu0 }
 0x448   : > { %v5499_v38 = vpop.trf.xlu0 }
 0x449   : > { %13327 = vmatmul.mubr.msk.bf16.gmra.mrb[84].mxu0 %vm5286_vm11, %v5496_v34  ;;  %13360 = vmatmul.mubr.msk.bf16.gmra.mrb[104].mxu1 %vm5286_vm11, %v5496_v34  ;;  %v5514_v34 = vpop.trf.xlu1 }
 0x44a   : > { %5858 = vmatprep.mubr.bf16.mxu0 %v21326_v56  ;;  %6211 = vmatprep.mubr.bf16.mxu1 %v21326_v56 }
 0x44c   : > { %v5500_v40 = vpop.trf.xlu0 }
 0x451   : > { %13328 = vmatmul.mubr.msk.bf16.gmra.mrb[88].mxu0 %vm5286_vm11, %v5497_v27  ;;  %13361 = vmatmul.mubr.msk.bf16.gmra.mrb[108].mxu1 %vm5286_vm11, %v5497_v27 }
 0x452   : > { %5868 = vmatprep.mubr.bf16.mxu0 %v21326_v56  ;;  %6221 = vmatprep.mubr.bf16.mxu1 %v21326_v56 }
 0x459   : > { %13329 = vmatmul.mubr.msk.bf16.gmra.mrb[92].mxu0 %vm5286_vm11, %v5498_v11  ;;  %13362 = vmatmul.mubr.msk.bf16.gmra.mrb[112].mxu1 %vm5286_vm11, %v5498_v11 }
 0x45a   : > { %5878 = vmatprep.mubr.bf16.mxu0 %v21326_v56  ;;  %6231 = vmatprep.mubr.bf16.mxu1 %v21326_v56 }
 0x461   : > { %13330 = vmatmul.mubr.msk.bf16.gmra.mrb[96].mxu0 %vm5286_vm11, %v5499_v38  ;;  %13363 = vmatmul.mubr.msk.bf16.gmra.mrb[116].mxu1 %vm5286_vm11, %v5499_v38 }
 0x462   : > { %5888 = vmatprep.mubr.bf16.mxu0 %v21326_v56  ;;  %6241 = vmatprep.mubr.bf16.mxu1 %v21326_v56 }
 0x469   : > { %13331 = vmatmul.mubr.msk.bf16.gmra.mrb[100].mxu0 %vm5286_vm11, %v5500_v40  ;;  %13364 = vmatmul.mubr.msk.bf16.gmra.mrb[120].mxu1 %vm5286_vm11, %v5500_v40 }
 0x46a   : > { %5898 = vmatprep.mubr.bf16.mxu0 %v21326_v56  ;;  %6251 = vmatprep.mubr.bf16.mxu1 %v21326_v56 }
 0x471   : > { %13332 = vmatmul.mubr.msk.bf16.gmra.mrb[104].mxu0 %vm5286_vm11, %v5509_v62  ;;  %13365 = vmatmul.mubr.msk.bf16.gmra.mrb[124].mxu1 %vm5286_vm11, %v5509_v62 }
 0x472   : > { %5908 = vmatprep.mubr.bf16.mxu0 %v21326_v56  ;;  %6261 = vmatprep.mubr.bf16.mxu1 %v21326_v56 }
 0x479   : > { %13333 = vmatmul.mubr.msk.bf16.gmra.mrb[108].mxu0 %vm5286_vm11, %v5510_v22  ;;  %13366 = vmatmul.mubr.msk.bf16.gmra.mrb[128].mxu1 %vm5286_vm11, %v5510_v22 }
 0x47a   : > { %5918 = vmatprep.mubr.bf16.mxu0 %v21326_v56  ;;  %6271 = vmatprep.mubr.bf16.mxu1 %v21326_v56 }
 0x481   : > { %13334 = vmatmul.mubr.msk.bf16.gmra.mrb[112].mxu0 %vm5286_vm11, %v5511_v10  ;;  %13367 = vmatmul.mubr.msk.bf16.gmra.mrb[132].mxu1 %vm5286_vm11, %v5511_v10 }
 0x482   : > { %5928 = vmatprep.mubr.bf16.mxu0 %v21326_v56  ;;  %6281 = vmatprep.mubr.bf16.mxu1 %v21326_v56 }
 0x484   : > { %v16924_v42 = vpop.f32.mrb[8].mxu0  ;;  %v16926_v50 = vpop.f32.mrb[28].mxu1 }
 0x485   : > { %22146 = vst [vmem:[#allocation41_spill] sm:$0xff] %v16926_v50  ;;  %v16928_v2 = vpop.f32.mrb[9].mxu0  ;;  %v16930_v4 = vpop.f32.mrb[29].mxu1 }
 0x486   : > { %22147 = vst [vmem:[#allocation67_spill] sm:$0xff] %v16928_v2  ;;  %22148 = vst [vmem:[#allocation68_spill] sm:$0xff] %v16930_v4  ;;  %v16932_v24 = vpop.f32.mrb[10].mxu0  ;;  %v16934_v49 = vpop.f32.mrb[30].mxu1 }
 0x487   : > { %22149 = vst [vmem:[#allocation69_spill] sm:$0xff] %v16934_v49  ;;  %v6332_v47 = vmax.f32 %v16924_v42, %v16932_v24  ;;  %v6470_v12 = vmax.f32 %v16926_v50, %v16934_v49  ;;  %v16940_v1 = vpop.f32.mrb[11].mxu0  ;;  %v16942_v21 = vpop.f32.mrb[31].mxu1 }
 0x488   : > { %22150 = vst [vmem:[#allocation70_spill] sm:$0xff] %v16940_v1  ;;  %22151 = vst [vmem:[#allocation71_spill] sm:$0xff] %v16942_v21  ;;  %v6401_v25 = vmax.f32 %v16928_v2, %v16940_v1  ;;  %v6539_v32 = vmax.f32 %v16930_v4, %v16942_v21 }
 0x489   : > { %13335 = vmatmul.mubr.msk.bf16.gmra.mrb[116].mxu0 %vm5286_vm11, %v5512_v63  ;;  %13368 = vmatmul.mubr.msk.bf16.gmra.mrb[136].mxu1 %vm5286_vm11, %v5512_v63 }
 0x48a   : > { %5938 = vmatprep.mubr.bf16.mxu0 %v21326_v56  ;;  %6291 = vmatprep.mubr.bf16.mxu1 %v21326_v56 }
 0x48c   : > { %v16952_v29 = vpop.f32.mrb[12].mxu0  ;;  %v16954_v35 = vpop.f32.mrb[32].mxu1 }
 0x48d   : > { %22152 = vst [vmem:[#allocation72_spill] sm:$0xff] %v16954_v35  ;;  %v6333_v55 = vmax.f32 %v6332_v47, %v16952_v29  ;;  %v6471_v16 = vmax.f32 %v6470_v12, %v16954_v35  ;;  %v16958_v20 = vpop.f32.mrb[13].mxu0  ;;  %v16960_v31 = vpop.f32.mrb[33].mxu1 }
 0x48e   : > { %22153 = vst [vmem:[#allocation73_spill] sm:$0xff] %v16958_v20  ;;  %22154 = vst [vmem:[#allocation74_spill] sm:$0xff] %v16960_v31  ;;  %v6402_v0 = vmax.f32 %v6401_v25, %v16958_v20  ;;  %v6540_v23 = vmax.f32 %v6539_v32, %v16960_v31  ;;  %v16964_v59 = vpop.f32.mrb[14].mxu0  ;;  %v16966_v60 = vpop.f32.mrb[34].mxu1 }
 0x48f   : > { %22155 = vst [vmem:[#allocation75_spill] sm:$0xff] %v16966_v60  ;;  %v6334_v45 = vmax.f32 %v6333_v55, %v16964_v59  ;;  %v6472_v8 = vmax.f32 %v6471_v16, %v16966_v60  ;;  %v16970_v61 = vpop.f32.mrb[15].mxu0  ;;  %v16972_v7 = vpop.f32.mrb[35].mxu1 }
 0x490   : > { %22156 = vst [vmem:[#allocation76_spill] sm:$0xff] %v16970_v61  ;;  %22157 = vst [vmem:[#allocation77_spill] sm:$0xff] %v16972_v7  ;;  %v6403_v44 = vmax.f32 %v6402_v0, %v16970_v61  ;;  %v6541_v3 = vmax.f32 %v6540_v23, %v16972_v7  ;;  %v5515_v23 = vpop.trf.xlu1 }
 0x491   : > { %13336 = vmatmul.mubr.msk.bf16.gmra.mrb[120].mxu0 %vm5286_vm11, %v5513_v30  ;;  %13369 = vmatmul.mubr.msk.bf16.gmra.mrb[140].mxu1 %vm5286_vm11, %v5513_v30 }
 0x492   : > { %5948 = vmatprep.mubr.bf16.mxu0 %v21326_v56  ;;  %6301 = vmatprep.mubr.bf16.mxu1 %v21326_v56 }
 0x494   : > { %v16980_v27 = vpop.f32.mrb[16].mxu0  ;;  %v16982_v11 = vpop.f32.mrb[36].mxu1 }
 0x495   : > { %22158 = vst [vmem:[#allocation78_spill] sm:$0xff] %v16982_v11  ;;  %v6335_v38 = vmax.f32 %v6334_v45, %v16980_v27  ;;  %v6473_v40 = vmax.f32 %v6472_v8, %v16982_v11  ;;  %v16986_v62 = vpop.f32.mrb[17].mxu0  ;;  %v16988_v22 = vpop.f32.mrb[37].mxu1 }
 0x496   : > { %22159 = vst [vmem:[#allocation79_spill] sm:$0xff] %v16986_v62  ;;  %22160 = vst [vmem:[#allocation80_spill] sm:$0xff] %v16988_v22  ;;  %v6404_v10 = vmax.f32 %v6403_v44, %v16986_v62  ;;  %v6542_v63 = vmax.f32 %v6541_v3, %v16988_v22  ;;  %v16992_v47 = vpop.f32.mrb[18].mxu0  ;;  %v16994_v12 = vpop.f32.mrb[38].mxu1 }
 0x497   : > { %22161 = vst [vmem:[#allocation81_spill] sm:$0xff] %v16994_v12  ;;  %v6336_v25 = vmax.f32 %v6335_v38, %v16992_v47  ;;  %v6474_v32 = vmax.f32 %v6473_v40, %v16994_v12  ;;  %v16998_v30 = vpop.f32.mrb[19].mxu0  ;;  %v17000_v55 = vpop.f32.mrb[39].mxu1 }
 0x498   : > { %22162 = vst [vmem:[#allocation82_spill] sm:$0xff] %v16998_v30  ;;  %22163 = vst [vmem:[#allocation83_spill] sm:$0xff] %v17000_v55  ;;  %v6405_v16 = vmax.f32 %v6404_v10, %v16998_v30  ;;  %v6543_v0 = vmax.f32 %v6542_v63, %v17000_v55 }
 0x499   : > { %13337 = vmatmul.mubr.msk.bf16.gmra.mrb[124].mxu0 %vm5286_vm11, %v5514_v34  ;;  %13370 = vmatmul.mubr.msk.bf16.gmra.mrb[144].mxu1 %vm5286_vm11, %v5514_v34 }
 0x49a   : > { %5958 = vmatprep.mubr.bf16.mxu0 %v21326_v56  ;;  %6311 = vmatprep.mubr.bf16.mxu1 %v21326_v56 }
 0x49c   : > { %v17008_v45 = vpop.f32.mrb[20].mxu0  ;;  %v17010_v8 = vpop.f32.mrb[40].mxu1 }
 0x49d   : > { %22164 = vst [vmem:[#allocation84_spill] sm:$0xff] %v17010_v8  ;;  %v6337_v44 = vmax.f32 %v6336_v25, %v17008_v45  ;;  %v6475_v3 = vmax.f32 %v6474_v32, %v17010_v8  ;;  %v17014_v38 = vpop.f32.mrb[21].mxu0  ;;  %v17016_v40 = vpop.f32.mrb[41].mxu1 }
 0x49e   : > { %22165 = vst [vmem:[#allocation85_spill] sm:$0xff] %v17014_v38  ;;  %22166 = vst [vmem:[#allocation86_spill] sm:$0xff] %v17016_v40  ;;  %v6406_v10 = vmax.f32 %v6405_v16, %v17014_v38  ;;  %v6544_v34 = vmax.f32 %v6543_v0, %v17016_v40  ;;  %v17020_v63 = vpop.f32.mrb[22].mxu0  ;;  %v17022_v56 = vpop.f32.mrb[42].mxu1  ;;  %v22170_v16 = vmov 0  }
 0x49f   : > { %22167 = vst [vmem:[#allocation87_spill] sm:$0xff] %v17022_v56  ;;  %v6338_v54 = vmax.f32 %v6337_v44, %v17020_v63  ;;  %v6476_v33 = vmax.f32 %v6475_v3, %v17022_v56  ;;  %v17026_v37 = vpop.f32.mrb[23].mxu0  ;;  %v17028_v25 = vpop.f32.mrb[43].mxu1 }
 0x4a0   : > { %22168 = vst [vmem:[#allocation88_spill] sm:$0xff] %v17026_v37  ;;  %22169 = vst [vmem:[#allocation89_spill] sm:$0xff] %v17028_v25  ;;  %v6407_v32 = vmax.f32 %v6406_v10, %v17026_v37  ;;  %v6545_v57 = vmax.f32 %v6544_v34, %v17028_v25  ;;  %v5516_v0 = vpop.trf.xlu1 }
 0x4a1   : > { %13338 = vmatmul.mubr.msk.bf16.gmra.mrb[128].mxu0 %vm5286_vm11, %v5515_v23  ;;  %13371 = vmatmul.mubr.msk.bf16.gmra.mrb[148].mxu1 %vm5286_vm11, %v5515_v23 }
 0x4a2   : > { %5968 = vmatprep.mubr.bf16.mxu0 %v22170_v16  ;;  %6321 = vmatprep.mubr.bf16.mxu1 %v22170_v16 }
 0x4a4   : > { %v17036_v44 = vpop.f32.mrb[24].mxu0  ;;  %v17038_v3 = vpop.f32.mrb[44].mxu1 }
 0x4a5   : > { %22171 = vst [vmem:[#allocation90_spill] sm:$0xff] %v17038_v3  ;;  %v6339_v13 = vmax.f32 %v6338_v54, %v17036_v44  ;;  %v6477_v43 = vmax.f32 %v6476_v33, %v17038_v3  ;;  %v17042_v10 = vpop.f32.mrb[25].mxu0  ;;  %v17044_v34 = vpop.f32.mrb[45].mxu1  ;;  %v7785_v33 = vrot.slane %v16805_v14, 1 }
 0x4a6   : > { %22172 = vst [vmem:[#allocation91_spill] sm:$0xff] %v17042_v10  ;;  %22173 = vst [vmem:[#allocation92_spill] sm:$0xff] %v17044_v34  ;;  %v6408_v52 = vmax.f32 %v6407_v32, %v17042_v10  ;;  %v6546_v23 = vmax.f32 %v6545_v57, %v17044_v34  ;;  %v17048_v19 = vpop.f32.mrb[26].mxu0  ;;  %v17050_v16 = vpop.f32.mrb[46].mxu1 }
 0x4a7   : > { %22174 = vst [vmem:[#allocation93_spill] sm:$0xff] %v17050_v16  ;;  %v6340_v51 = vmax.f32 %v6339_v13, %v17048_v19  ;;  %v6478_v53 = vmax.f32 %v6477_v43, %v17050_v16  ;;  %v17054_v39 = vpop.f32.mrb[27].mxu0  ;;  %v17056_v54 = vpop.f32.mrb[47].mxu1 }
 0x4a8   : > { %22175 = vst [vmem:[#allocation94_spill] sm:$0xff] %v17054_v39  ;;  %22176 = vst [vmem:[#allocation95_spill] sm:$0xff] %v17056_v54  ;;  %v6409_v58 = vmax.f32 %v6408_v52, %v17054_v39  ;;  %v6547_v32 = vmax.f32 %v6546_v23, %v17056_v54 }
 0x4a9   : > { %13339 = vmatmul.mubr.msk.bf16.gmra.mrb[132].mxu0 %vm5286_vm11, %v5516_v0  ;;  %13372 = vmatmul.mubr.msk.bf16.gmra.mrb[152].mxu1 %vm5286_vm11, %v5516_v0 }
 0x4aa   : > { %7824 = vmatprep.mubr.bf16.mxu0 %v7785_v33  ;;  %7906 = vmatprep.mubr.bf16.mxu1 %v7785_v33 }
 0x4ac   : > { %v17063_v57 = vpop.f32.mrb[28].mxu0  ;;  %v17065_v13 = vpop.f32.mrb[48].mxu1 }
 0x4ad   : > { %22177 = vst [vmem:[#allocation96_spill] sm:$0xff] %v17065_v13  ;;  %v6341_v43 = vmax.f32 %v6340_v51, %v17063_v57  ;;  %v6479_v6 = vmax.f32 %v6478_v53, %v17065_v13  ;;  %v17069_v26 = vpop.f32.mrb[29].mxu0  ;;  %v17071_v14 = vpop.f32.mrb[49].mxu1 }
 0x4ae   : > { %22178 = vst [vmem:[#allocation97_spill] sm:$0xff] %v17069_v26  ;;  %22179 = vst [vmem:[#allocation98_spill] sm:$0xff] %v17071_v14  ;;  %v6410_v52 = vmax.f32 %v6409_v58, %v17069_v26  ;;  %v6548_v23 = vmax.f32 %v6547_v32, %v17071_v14  ;;  %v17075_v48 = vpop.f32.mrb[30].mxu0  ;;  %v17077_v0 = vpop.f32.mrb[50].mxu1 }
 0x4af   : > { %22180 = vst [vmem:[#allocation99_spill] sm:$0xff] %v17077_v0  ;;  %v6342_v33 = vmax.f32 %v6341_v43, %v17075_v48  ;;  %v6480_v17 = vmax.f32 %v6479_v6, %v17077_v0  ;;  %v17081_v9 = vpop.f32.mrb[31].mxu0  ;;  %v17083_v51 = vpop.f32.mrb[51].mxu1 }
 0x4b0   : > { %22181 = vst [vmem:[#allocation100_spill] sm:$0xff] %v17081_v9  ;;  %22182 = vst [vmem:[#allocation101_spill] sm:$0xff] %v17083_v51  ;;  %v6411_v53 = vmax.f32 %v6410_v52, %v17081_v9  ;;  %v6549_v18 = vmax.f32 %v6548_v23, %v17083_v51 }
 0x4b4   : > { %v17087_v15 = vpop.f32.mrb[32].mxu0  ;;  %v17089_v58 = vpop.f32.mrb[52].mxu1 }
 0x4b5   : > { %22183 = vst [vmem:[#allocation102_spill] sm:$0xff] %v17089_v58  ;;  %v6343_v32 = vmax.f32 %v6342_v33, %v17087_v15  ;;  %v6481_v36 = vmax.f32 %v6480_v17, %v17089_v58  ;;  %v17093_v5 = vpop.f32.mrb[33].mxu0  ;;  %v17095_v43 = vpop.f32.mrb[53].mxu1 }
 0x4b6   : > { %22184 = vst [vmem:[#allocation103_spill] sm:$0xff] %v17093_v5  ;;  %22185 = vst [vmem:[#allocation104_spill] sm:$0xff] %v17095_v43  ;;  %v6412_v6 = vmax.f32 %v6411_v53, %v17093_v5  ;;  %v6550_v28 = vmax.f32 %v6549_v18, %v17095_v43  ;;  %v17099_v41 = vpop.f32.mrb[34].mxu0  ;;  %v17101_v52 = vpop.f32.mrb[54].mxu1 }
 0x4b7   : > { %22186 = vst [vmem:[#allocation105_spill] sm:$0xff] %v17101_v52  ;;  %v6344_v23 = vmax.f32 %v6343_v32, %v17099_v41  ;;  %v6482_v46 = vmax.f32 %v6481_v36, %v17101_v52  ;;  %v17105_v51 = vpop.f32.mrb[35].mxu0  ;;  %v17107_v33 = vpop.f32.mrb[55].mxu1 }
 0x4b8   : > { %22187 = vst [vmem:[#allocation106_spill] sm:$0xff] %v17105_v51  ;;  %22188 = vst [vmem:[#allocation107_spill] sm:$0xff] %v17107_v33  ;;  %v6413_v17 = vmax.f32 %v6412_v6, %v17105_v51  ;;  %v6551_v14 = vmax.f32 %v6550_v28, %v17107_v33 }
 0x4bc   : > { %v17111_v54 = vpop.f32.mrb[36].mxu0  ;;  %v17113_v53 = vpop.f32.mrb[56].mxu1 }
 0x4bd   : > { %22189 = vst [vmem:[#allocation108_spill] sm:$0xff] %v17113_v53  ;;  %v6345_v18 = vmax.f32 %v6344_v23, %v17111_v54  ;;  %v6483_v43 = vmax.f32 %v6482_v46, %v17113_v53  ;;  %v17117_v34 = vpop.f32.mrb[37].mxu0  ;;  %v17119_v32 = vpop.f32.mrb[57].mxu1 }
 0x4be   : > { %22190 = vst [vmem:[#allocation109_spill] sm:$0xff] %v17117_v34  ;;  %22191 = vst [vmem:[#allocation110_spill] sm:$0xff] %v17119_v32  ;;  %v6414_v36 = vmax.f32 %v6413_v17, %v17117_v34  ;;  %v6552_v25 = vmax.f32 %v6551_v14, %v17119_v32  ;;  %v17123_v40 = vpop.f32.mrb[38].mxu0  ;;  %v17125_v6 = vpop.f32.mrb[58].mxu1 }
 0x4bf   : > { %22192 = vst [vmem:[#allocation111_spill] sm:$0xff] %v17125_v6  ;;  %v6346_v28 = vmax.f32 %v6345_v18, %v17123_v40  ;;  %v6484_v33 = vmax.f32 %v6483_v43, %v17125_v6  ;;  %v17129_v55 = vpop.f32.mrb[39].mxu0  ;;  %v17131_v23 = vpop.f32.mrb[59].mxu1 }
 0x4c0   : > { %22193 = vst [vmem:[#allocation112_spill] sm:$0xff] %v17129_v55  ;;  %22194 = vst [vmem:[#allocation113_spill] sm:$0xff] %v17131_v23  ;;  %v6415_v46 = vmax.f32 %v6414_v36, %v17129_v55  ;;  %v6553_v22 = vmax.f32 %v6552_v25, %v17131_v23 }
 0x4c4   : > { %v17135_v7 = vpop.f32.mrb[40].mxu0  ;;  %v17137_v17 = vpop.f32.mrb[60].mxu1 }
 0x4c5   : > { %22195 = vst [vmem:[#allocation114_spill] sm:$0xff] %v17137_v17  ;;  %v6347_v14 = vmax.f32 %v6346_v28, %v17135_v7  ;;  %v6485_v32 = vmax.f32 %v6484_v33, %v17137_v17  ;;  %v17141_v31 = vpop.f32.mrb[41].mxu0  ;;  %v17143_v18 = vpop.f32.mrb[61].mxu1 }
 0x4c6   : > { %22196 = vst [vmem:[#allocation115_spill] sm:$0xff] %v17141_v31  ;;  %22197 = vst [vmem:[#allocation116_spill] sm:$0xff] %v17143_v18  ;;  %v6416_v43 = vmax.f32 %v6415_v46, %v17141_v31  ;;  %v6554_v21 = vmax.f32 %v6553_v22, %v17143_v18  ;;  %v17147_v4 = vpop.f32.mrb[42].mxu0  ;;  %v17149_v36 = vpop.f32.mrb[62].mxu1 }
 0x4c7   : > { %22198 = vst [vmem:[#allocation117_spill] sm:$0xff] %v17149_v36  ;;  %v6348_v25 = vmax.f32 %v6347_v14, %v17147_v4  ;;  %v6486_v23 = vmax.f32 %v6485_v32, %v17149_v36  ;;  %v17153_v55 = vpop.f32.mrb[43].mxu0  ;;  %v17155_v28 = vpop.f32.mrb[63].mxu1 }
 0x4c8   : > { %22199 = vst [vmem:[#allocation118_spill] sm:$0xff] %v17153_v55  ;;  %22200 = vst [vmem:[#allocation119_spill] sm:$0xff] %v17155_v28  ;;  %v6417_v33 = vmax.f32 %v6416_v43, %v17153_v55  ;;  %v6555_v34 = vmax.f32 %v6554_v21, %v17155_v28 }
 0x4cc   : > { %v17159_v51 = vpop.f32.mrb[44].mxu0  ;;  %v17161_v46 = vpop.f32.mrb[64].mxu1 }
 0x4cd   : > { %22201 = vst [vmem:[#allocation120_spill] sm:$0xff] %v17161_v46  ;;  %v6349_v22 = vmax.f32 %v6348_v25, %v17159_v51  ;;  %v6487_v18 = vmax.f32 %v6486_v23, %v17161_v46  ;;  %v17165_v31 = vpop.f32.mrb[45].mxu0  ;;  %v17167_v14 = vpop.f32.mrb[65].mxu1 }
 0x4ce   : > { %22202 = vst [vmem:[#allocation121_spill] sm:$0xff] %v17165_v31  ;;  %22203 = vst [vmem:[#allocation122_spill] sm:$0xff] %v17167_v14  ;;  %v6418_v32 = vmax.f32 %v6417_v33, %v17165_v31  ;;  %v6556_v5 = vmax.f32 %v6555_v34, %v17167_v14  ;;  %v17171_v9 = vpop.f32.mrb[46].mxu0  ;;  %v17173_v43 = vpop.f32.mrb[66].mxu1 }
 0x4cf   : > { %22204 = vst [vmem:[#allocation123_spill] sm:$0xff] %v17173_v43  ;;  %v6350_v21 = vmax.f32 %v6349_v22, %v17171_v9  ;;  %v6488_v28 = vmax.f32 %v6487_v18, %v17173_v43  ;;  %v17177_v55 = vpop.f32.mrb[47].mxu0  ;;  %v17179_v25 = vpop.f32.mrb[67].mxu1 }
 0x4d0   : > { %22205 = vst [vmem:[#allocation124_spill] sm:$0xff] %v17177_v55  ;;  %22206 = vst [vmem:[#allocation125_spill] sm:$0xff] %v17179_v25  ;;  %v6419_v23 = vmax.f32 %v6418_v32, %v17177_v55  ;;  %v6557_v26 = vmax.f32 %v6556_v5, %v17179_v25 }
 0x4d4   : > { %v17183_v39 = vpop.f32.mrb[48].mxu0  ;;  %v17185_v33 = vpop.f32.mrb[68].mxu1 }
 0x4d5   : > { %22207 = vst [vmem:[#allocation126_spill] sm:$0xff] %v17185_v33  ;;  %v6351_v34 = vmax.f32 %v6350_v21, %v17183_v39  ;;  %v6489_v14 = vmax.f32 %v6488_v28, %v17185_v33  ;;  %v17189_v31 = vpop.f32.mrb[49].mxu0  ;;  %v17191_v22 = vpop.f32.mrb[69].mxu1 }
 0x4d6   : > { %22208 = vst [vmem:[#allocation127_spill] sm:$0xff] %v17189_v31  ;;  %22209 = vst [vmem:[#allocation128_spill] sm:$0xff] %v17191_v22  ;;  %v6420_v18 = vmax.f32 %v6419_v23, %v17189_v31  ;;  %v6558_v10 = vmax.f32 %v6557_v26, %v17191_v22  ;;  %v17195_v37 = vpop.f32.mrb[50].mxu0  ;;  %v17197_v32 = vpop.f32.mrb[70].mxu1 }
 0x4d7   : > { %22210 = vst [vmem:[#allocation129_spill] sm:$0xff] %v17197_v32  ;;  %v6352_v5 = vmax.f32 %v6351_v34, %v17195_v37  ;;  %v6490_v25 = vmax.f32 %v6489_v14, %v17197_v32  ;;  %v17201_v55 = vpop.f32.mrb[51].mxu0  ;;  %v17203_v21 = vpop.f32.mrb[71].mxu1 }
 0x4d8   : > { %22211 = vst [vmem:[#allocation130_spill] sm:$0xff] %v17201_v55  ;;  %22212 = vst [vmem:[#allocation131_spill] sm:$0xff] %v17203_v21  ;;  %v6421_v28 = vmax.f32 %v6420_v18, %v17201_v55  ;;  %v6559_v38 = vmax.f32 %v6558_v10, %v17203_v21 }
 0x4dc   : > { %v17207_v30 = vpop.f32.mrb[52].mxu0  ;;  %v17209_v23 = vpop.f32.mrb[72].mxu1 }
 0x4dd   : > { %22213 = vst [vmem:[#allocation132_spill] sm:$0xff] %v17209_v23  ;;  %v6353_v26 = vmax.f32 %v6352_v5, %v17207_v30  ;;  %v6491_v22 = vmax.f32 %v6490_v25, %v17209_v23  ;;  %v17213_v31 = vpop.f32.mrb[53].mxu0  ;;  %v17215_v34 = vpop.f32.mrb[73].mxu1 }
 0x4de   : > { %22214 = vst [vmem:[#allocation133_spill] sm:$0xff] %v17213_v31  ;;  %22215 = vst [vmem:[#allocation134_spill] sm:$0xff] %v17215_v34  ;;  %v6422_v14 = vmax.f32 %v6421_v28, %v17213_v31  ;;  %v6560_v62 = vmax.f32 %v6559_v38, %v17215_v34  ;;  %v17219_v61 = vpop.f32.mrb[54].mxu0  ;;  %v17221_v18 = vpop.f32.mrb[74].mxu1 }
 0x4df   : > { %22216 = vst [vmem:[#allocation135_spill] sm:$0xff] %v17221_v18  ;;  %v6354_v10 = vmax.f32 %v6353_v26, %v17219_v61  ;;  %v6492_v21 = vmax.f32 %v6491_v22, %v17221_v18  ;;  %v17225_v55 = vpop.f32.mrb[55].mxu0  ;;  %v17227_v5 = vpop.f32.mrb[75].mxu1 }
 0x4e0   : > { %22217 = vst [vmem:[#allocation136_spill] sm:$0xff] %v17225_v55  ;;  %22218 = vst [vmem:[#allocation137_spill] sm:$0xff] %v17227_v5  ;;  %v6423_v25 = vmax.f32 %v6422_v14, %v17225_v55  ;;  %v6561_v20 = vmax.f32 %v6560_v62, %v17227_v5 }
 0x4e4   : > { %v17231_v1 = vpop.f32.mrb[56].mxu0  ;;  %v17233_v28 = vpop.f32.mrb[76].mxu1 }
 0x4e5   : > { %22219 = vst [vmem:[#allocation138_spill] sm:$0xff] %v17233_v28  ;;  %v6355_v38 = vmax.f32 %v6354_v10, %v17231_v1  ;;  %v6493_v34 = vmax.f32 %v6492_v21, %v17233_v28  ;;  %v17237_v31 = vpop.f32.mrb[57].mxu0  ;;  %v17239_v26 = vpop.f32.mrb[77].mxu1 }
 0x4e6   : > { %22220 = vst [vmem:[#allocation139_spill] sm:$0xff] %v17237_v31  ;;  %22221 = vst [vmem:[#allocation140_spill] sm:$0xff] %v17239_v26  ;;  %v6424_v22 = vmax.f32 %v6423_v25, %v17237_v31  ;;  %v6562_v2 = vmax.f32 %v6561_v20, %v17239_v26  ;;  %v17243_v18 = vpop.f32.mrb[58].mxu0  ;;  %v17245_v14 = vpop.f32.mrb[78].mxu1 }
 0x4e7   : > { %22222 = vst [vmem:[#allocation141_spill] sm:$0xff] %v17245_v14  ;;  %v6356_v62 = vmax.f32 %v6355_v38, %v17243_v18  ;;  %v6494_v5 = vmax.f32 %v6493_v34, %v17245_v14  ;;  %v17249_v55 = vpop.f32.mrb[59].mxu0  ;;  %v17251_v10 = vpop.f32.mrb[79].mxu1 }
 0x4e8   : > { %22223 = vst [vmem:[#allocation142_spill] sm:$0xff] %v17249_v55  ;;  %22224 = vst [vmem:[#allocation143_spill] sm:$0xff] %v17251_v10  ;;  %v6425_v21 = vmax.f32 %v6424_v22, %v17249_v55  ;;  %v6563_v28 = vmax.f32 %v6562_v2, %v17251_v10 }
 0x4ec   : > { %v17255_v23 = vpop.f32.mrb[60].mxu0  ;;  %v17257_v25 = vpop.f32.mrb[80].mxu1 }
 0x4ed   : > { %22225 = vst [vmem:[#allocation144_spill] sm:$0xff] %v17257_v25  ;;  %v6357_v20 = vmax.f32 %v6356_v62, %v17255_v23  ;;  %v6495_v26 = vmax.f32 %v6494_v5, %v17257_v25  ;;  %v17261_v31 = vpop.f32.mrb[61].mxu0  ;;  %v17263_v38 = vpop.f32.mrb[81].mxu1 }
 0x4ee   : > { %22226 = vst [vmem:[#allocation145_spill] sm:$0xff] %v17261_v31  ;;  %22227 = vst [vmem:[#allocation146_spill] sm:$0xff] %v17263_v38  ;;  %v6426_v34 = vmax.f32 %v6425_v21, %v17261_v31  ;;  %v6564_v14 = vmax.f32 %v6563_v28, %v17263_v38  ;;  %v17267_v32 = vpop.f32.mrb[62].mxu0  ;;  %v17269_v22 = vpop.f32.mrb[82].mxu1 }
 0x4ef   : > { %22228 = vst [vmem:[#allocation147_spill] sm:$0xff] %v17269_v22  ;;  %v6358_v2 = vmax.f32 %v6357_v20, %v17267_v32  ;;  %v6496_v10 = vmax.f32 %v6495_v26, %v17269_v22  ;;  %v17273_v55 = vpop.f32.mrb[63].mxu0  ;;  %v17275_v62 = vpop.f32.mrb[83].mxu1 }
 0x4f0   : > { %22229 = vst [vmem:[#allocation148_spill] sm:$0xff] %v17273_v55  ;;  %22230 = vst [vmem:[#allocation149_spill] sm:$0xff] %v17275_v62  ;;  %v6427_v5 = vmax.f32 %v6426_v34, %v17273_v55  ;;  %v6565_v25 = vmax.f32 %v6564_v14, %v17275_v62 }
 0x4f4   : > { %v17279_v33 = vpop.f32.mrb[64].mxu0  ;;  %v17281_v21 = vpop.f32.mrb[84].mxu1 }
 0x4f5   : > { %22231 = vst [vmem:[#allocation150_spill] sm:$0xff] %v17281_v21  ;;  %v6359_v28 = vmax.f32 %v6358_v2, %v17279_v33  ;;  %v6497_v38 = vmax.f32 %v6496_v10, %v17281_v21  ;;  %v17285_v31 = vpop.f32.mrb[65].mxu0  ;;  %v17287_v20 = vpop.f32.mrb[85].mxu1 }
 0x4f6   : > { %22232 = vst [vmem:[#allocation151_spill] sm:$0xff] %v17285_v31  ;;  %22233 = vst [vmem:[#allocation152_spill] sm:$0xff] %v17287_v20  ;;  %v6428_v26 = vmax.f32 %v6427_v5, %v17285_v31  ;;  %v6566_v22 = vmax.f32 %v6565_v25, %v17287_v20  ;;  %v17291_v43 = vpop.f32.mrb[66].mxu0  ;;  %v17293_v34 = vpop.f32.mrb[86].mxu1 }
 0x4f7   : > { %22234 = vst [vmem:[#allocation153_spill] sm:$0xff] %v17293_v34  ;;  %v6360_v14 = vmax.f32 %v6359_v28, %v17291_v43  ;;  %v6498_v62 = vmax.f32 %v6497_v38, %v17293_v34  ;;  %v17297_v55 = vpop.f32.mrb[67].mxu0  ;;  %v17299_v2 = vpop.f32.mrb[87].mxu1 }
 0x4f8   : > { %22235 = vst [vmem:[#allocation154_spill] sm:$0xff] %v17297_v55  ;;  %22236 = vst [vmem:[#allocation155_spill] sm:$0xff] %v17299_v2  ;;  %v6429_v10 = vmax.f32 %v6428_v26, %v17297_v55  ;;  %v6567_v21 = vmax.f32 %v6566_v22, %v17299_v2 }
 0x4fc   : > { %v17303_v46 = vpop.f32.mrb[68].mxu0  ;;  %v17305_v5 = vpop.f32.mrb[88].mxu1 }
 0x4fd   : > { %22237 = vst [vmem:[#allocation156_spill] sm:$0xff] %v17305_v5  ;;  %v6361_v25 = vmax.f32 %v6360_v14, %v17303_v46  ;;  %v6499_v20 = vmax.f32 %v6498_v62, %v17305_v5  ;;  %v17309_v31 = vpop.f32.mrb[69].mxu0  ;;  %v17311_v28 = vpop.f32.mrb[89].mxu1 }
 0x4fe   : > { %22238 = vst [vmem:[#allocation157_spill] sm:$0xff] %v17309_v31  ;;  %22239 = vst [vmem:[#allocation158_spill] sm:$0xff] %v17311_v28  ;;  %v6430_v38 = vmax.f32 %v6429_v10, %v17309_v31  ;;  %v6568_v34 = vmax.f32 %v6567_v21, %v17311_v28  ;;  %v17315_v36 = vpop.f32.mrb[70].mxu0  ;;  %v17317_v26 = vpop.f32.mrb[90].mxu1 }
 0x4ff   : > { %22240 = vst [vmem:[#allocation159_spill] sm:$0xff] %v17317_v26  ;;  %v6362_v22 = vmax.f32 %v6361_v25, %v17315_v36  ;;  %v6500_v2 = vmax.f32 %v6499_v20, %v17317_v26  ;;  %v17321_v55 = vpop.f32.mrb[71].mxu0  ;;  %v17323_v14 = vpop.f32.mrb[91].mxu1 }
 0x500   : > { %22241 = vst [vmem:[#allocation160_spill] sm:$0xff] %v17321_v55  ;;  %22242 = vst [vmem:[#allocation161_spill] sm:$0xff] %v17323_v14  ;;  %v6431_v62 = vmax.f32 %v6430_v38, %v17321_v55  ;;  %v6569_v5 = vmax.f32 %v6568_v34, %v17323_v14 }
 0x504   : > { %v17327_v17 = vpop.f32.mrb[72].mxu0  ;;  %v17329_v10 = vpop.f32.mrb[92].mxu1 }
 0x505   : > { %22243 = vst [vmem:[#allocation162_spill] sm:$0xff] %v17329_v10  ;;  %v6363_v21 = vmax.f32 %v6362_v22, %v17327_v17  ;;  %v6501_v28 = vmax.f32 %v6500_v2, %v17329_v10  ;;  %v17333_v31 = vpop.f32.mrb[73].mxu0  ;;  %v17335_v25 = vpop.f32.mrb[93].mxu1 }
 0x506   : > { %22244 = vst [vmem:[#allocation163_spill] sm:$0xff] %v17333_v31  ;;  %22245 = vst [vmem:[#allocation164_spill] sm:$0xff] %v17335_v25  ;;  %v6432_v20 = vmax.f32 %v6431_v62, %v17333_v31  ;;  %v6570_v26 = vmax.f32 %v6569_v5, %v17335_v25  ;;  %v17339_v6 = vpop.f32.mrb[74].mxu0  ;;  %v17341_v38 = vpop.f32.mrb[94].mxu1 }
 0x507   : > { %22246 = vst [vmem:[#allocation165_spill] sm:$0xff] %v17341_v38  ;;  %v6364_v34 = vmax.f32 %v6363_v21, %v17339_v6  ;;  %v6502_v14 = vmax.f32 %v6501_v28, %v17341_v38  ;;  %v17345_v55 = vpop.f32.mrb[75].mxu0  ;;  %v17347_v22 = vpop.f32.mrb[95].mxu1 }
 0x508   : > { %22247 = vst [vmem:[#allocation166_spill] sm:$0xff] %v17345_v55  ;;  %22248 = vst [vmem:[#allocation167_spill] sm:$0xff] %v17347_v22  ;;  %v6433_v2 = vmax.f32 %v6432_v20, %v17345_v55  ;;  %v6571_v10 = vmax.f32 %v6570_v26, %v17347_v22 }
 0x50c   : > { %v17351_v53 = vpop.f32.mrb[76].mxu0  ;;  %v17353_v62 = vpop.f32.mrb[96].mxu1 }
 0x50d   : > { %22249 = vst [vmem:[#allocation168_spill] sm:$0xff] %v17353_v62  ;;  %v6365_v5 = vmax.f32 %v6364_v34, %v17351_v53  ;;  %v6503_v25 = vmax.f32 %v6502_v14, %v17353_v62  ;;  %v17357_v31 = vpop.f32.mrb[77].mxu0  ;;  %v17359_v21 = vpop.f32.mrb[97].mxu1 }
 0x50e   : > { %22250 = vst [vmem:[#allocation169_spill] sm:$0xff] %v17357_v31  ;;  %22251 = vst [vmem:[#allocation170_spill] sm:$0xff] %v17359_v21  ;;  %v6434_v28 = vmax.f32 %v6433_v2, %v17357_v31  ;;  %v6572_v38 = vmax.f32 %v6571_v10, %v17359_v21  ;;  %v17363_v52 = vpop.f32.mrb[78].mxu0  ;;  %v17365_v20 = vpop.f32.mrb[98].mxu1 }
 0x50f   : > { %22252 = vst [vmem:[#allocation171_spill] sm:$0xff] %v17363_v52  ;;  %22253 = vst [vmem:[#allocation172_spill] sm:$0xff] %v17365_v20  ;;  %v6366_v26 = vmax.f32 %v6365_v5, %v17363_v52  ;;  %v6504_v22 = vmax.f32 %v6503_v25, %v17365_v20  ;;  %v17369_v55 = vpop.f32.mrb[79].mxu0  ;;  %v17371_v34 = vpop.f32.mrb[99].mxu1 }
 0x510   : > { %22254 = vst [vmem:[#allocation173_spill] sm:$0xff] %v17369_v55  ;;  %22255 = vst [vmem:[#allocation174_spill] sm:$0xff] %v17371_v34  ;;  %v6435_v14 = vmax.f32 %v6434_v28, %v17369_v55  ;;  %v6573_v62 = vmax.f32 %v6572_v38, %v17371_v34 }
 0x514   : > { %v17375_v58 = vpop.f32.mrb[80].mxu0  ;;  %v17377_v2 = vpop.f32.mrb[100].mxu1 }
 0x515   : > { %22256 = vst [vmem:[#allocation175_spill] sm:$0xff] %v17375_v58  ;;  %22257 = vst [vmem:[#allocation176_spill] sm:$0xff] %v17377_v2  ;;  %v6367_v10 = vmax.f32 %v6366_v26, %v17375_v58  ;;  %v6505_v21 = vmax.f32 %v6504_v22, %v17377_v2  ;;  %v17381_v31 = vpop.f32.mrb[81].mxu0  ;;  %v17383_v5 = vpop.f32.mrb[101].mxu1 }
 0x516   : > { %22258 = vst [vmem:[#allocation177_spill] sm:$0xff] %v17381_v31  ;;  %22259 = vst [vmem:[#allocation178_spill] sm:$0xff] %v17383_v5  ;;  %v6436_v25 = vmax.f32 %v6435_v14, %v17381_v31  ;;  %v6574_v20 = vmax.f32 %v6573_v62, %v17383_v5  ;;  %v17387_v0 = vpop.f32.mrb[82].mxu0  ;;  %v17389_v28 = vpop.f32.mrb[102].mxu1 }
 0x517   : > { %22260 = vst [vmem:[#allocation179_spill] sm:$0xff] %v17387_v0  ;;  %22261 = vst [vmem:[#allocation180_spill] sm:$0xff] %v17389_v28  ;;  %v6368_v38 = vmax.f32 %v6367_v10, %v17387_v0  ;;  %v6506_v34 = vmax.f32 %v6505_v21, %v17389_v28  ;;  %v17393_v55 = vpop.f32.mrb[83].mxu0  ;;  %v17395_v26 = vpop.f32.mrb[103].mxu1 }
 0x518   : > { %22262 = vst [vmem:[#allocation181_spill] sm:$0xff] %v17393_v55  ;;  %22263 = vst [vmem:[#allocation182_spill] sm:$0xff] %v17395_v26  ;;  %v6437_v22 = vmax.f32 %v6436_v25, %v17393_v55  ;;  %v6575_v2 = vmax.f32 %v6574_v20, %v17395_v26 }
 0x51c   : > { %v17399_v13 = vpop.f32.mrb[84].mxu0  ;;  %v17401_v14 = vpop.f32.mrb[104].mxu1 }
 0x51d   : > { %22264 = vst [vmem:[#allocation183_spill] sm:$0xff] %v17399_v13  ;;  %22265 = vst [vmem:[#allocation184_spill] sm:$0xff] %v17401_v14  ;;  %v6369_v62 = vmax.f32 %v6368_v38, %v17399_v13  ;;  %v6507_v5 = vmax.f32 %v6506_v34, %v17401_v14  ;;  %v17405_v31 = vpop.f32.mrb[85].mxu0  ;;  %v17407_v10 = vpop.f32.mrb[105].mxu1 }
 0x51e   : > { %22266 = vst [vmem:[#allocation185_spill] sm:$0xff] %v17405_v31  ;;  %22267 = vst [vmem:[#allocation186_spill] sm:$0xff] %v17407_v10  ;;  %v6438_v21 = vmax.f32 %v6437_v22, %v17405_v31  ;;  %v6576_v28 = vmax.f32 %v6575_v2, %v17407_v10  ;;  %v17411_v16 = vpop.f32.mrb[86].mxu0  ;;  %v17413_v25 = vpop.f32.mrb[106].mxu1 }
 0x51f   : > { %22268 = vst [vmem:[#allocation187_spill] sm:$0xff] %v17411_v16  ;;  %22269 = vst [vmem:[#allocation188_spill] sm:$0xff] %v17413_v25  ;;  %v6370_v20 = vmax.f32 %v6369_v62, %v17411_v16  ;;  %v6508_v26 = vmax.f32 %v6507_v5, %v17413_v25  ;;  %v17417_v55 = vpop.f32.mrb[87].mxu0  ;;  %v17419_v38 = vpop.f32.mrb[107].mxu1 }
 0x520   : > { %22270 = vst [vmem:[#allocation189_spill] sm:$0xff] %v17417_v55  ;;  %22271 = vst [vmem:[#allocation190_spill] sm:$0xff] %v17419_v38  ;;  %v6439_v34 = vmax.f32 %v6438_v21, %v17417_v55  ;;  %v6577_v14 = vmax.f32 %v6576_v28, %v17419_v38 }
 0x524   : > { %v17423_v3 = vpop.f32.mrb[88].mxu0  ;;  %v17425_v22 = vpop.f32.mrb[108].mxu1 }
 0x525   : > { %22272 = vst [vmem:[#allocation191_spill] sm:$0xff] %v17423_v3  ;;  %22273 = vst [vmem:[#allocation192_spill] sm:$0xff] %v17425_v22  ;;  %v6371_v2 = vmax.f32 %v6370_v20, %v17423_v3  ;;  %v6509_v10 = vmax.f32 %v6508_v26, %v17425_v22  ;;  %v17429_v31 = vpop.f32.mrb[89].mxu0  ;;  %v17431_v62 = vpop.f32.mrb[109].mxu1  ;;  %v22507_v3 = vld [vmem:[#allocation97_spill] sm:$0xff] }
 0x526   : > { %22274 = vst [vmem:[#allocation193_spill] sm:$0xff] %v17429_v31  ;;  %22275 = vst [vmem:[#allocation194_spill] sm:$0xff] %v17431_v62  ;;  %v6440_v5 = vmax.f32 %v6439_v34, %v17429_v31  ;;  %v6578_v25 = vmax.f32 %v6577_v14, %v17431_v62  ;;  %v17435_v56 = vpop.f32.mrb[90].mxu0  ;;  %v17437_v21 = vpop.f32.mrb[110].mxu1 }
 0x527   : > { %22276 = vst [vmem:[#allocation195_spill] sm:$0xff] %v17435_v56  ;;  %22277 = vst [vmem:[#allocation196_spill] sm:$0xff] %v17437_v21  ;;  %v6372_v28 = vmax.f32 %v6371_v2, %v17435_v56  ;;  %v6510_v38 = vmax.f32 %v6509_v10, %v17437_v21  ;;  %v17441_v55 = vpop.f32.mrb[91].mxu0  ;;  %v17443_v20 = vpop.f32.mrb[111].mxu1  ;;  %v22508_v56 = vld [vmem:[#allocation100_spill] sm:$0xff] }
 0x528   : > { %22278 = vst [vmem:[#allocation197_spill] sm:$0xff] %v17441_v55  ;;  %22279 = vst [vmem:[#allocation198_spill] sm:$0xff] %v17443_v20  ;;  %v6441_v26 = vmax.f32 %v6440_v5, %v17441_v55  ;;  %v6579_v22 = vmax.f32 %v6578_v25, %v17443_v20 }
 0x52c   : > { %v17447_v8 = vpop.f32.mrb[92].mxu0  ;;  %v17449_v34 = vpop.f32.mrb[112].mxu1 }
 0x52d   : > { %22280 = vst [vmem:[#allocation199_spill] sm:$0xff] %v17447_v8  ;;  %22281 = vst [vmem:[#allocation200_spill] sm:$0xff] %v17449_v34  ;;  %v6373_v14 = vmax.f32 %v6372_v28, %v17447_v8  ;;  %v6511_v62 = vmax.f32 %v6510_v38, %v17449_v34  ;;  %v17453_v31 = vpop.f32.mrb[93].mxu0  ;;  %v17455_v2 = vpop.f32.mrb[113].mxu1 }
 0x52e   : > { %22282 = vst [vmem:[#allocation201_spill] sm:$0xff] %v17453_v31  ;;  %22283 = vst [vmem:[#allocation202_spill] sm:$0xff] %v17455_v2  ;;  %v6442_v10 = vmax.f32 %v6441_v26, %v17453_v31  ;;  %v6580_v21 = vmax.f32 %v6579_v22, %v17455_v2  ;;  %v17459_v12 = vpop.f32.mrb[94].mxu0  ;;  %v17461_v5 = vpop.f32.mrb[114].mxu1 }
 0x52f   : > { %22284 = vst [vmem:[#allocation203_spill] sm:$0xff] %v17459_v12  ;;  %22285 = vst [vmem:[#allocation204_spill] sm:$0xff] %v17461_v5  ;;  %v6374_v25 = vmax.f32 %v6373_v14, %v17459_v12  ;;  %v6512_v20 = vmax.f32 %v6511_v62, %v17461_v5  ;;  %v17465_v55 = vpop.f32.mrb[95].mxu0  ;;  %v17467_v28 = vpop.f32.mrb[115].mxu1  ;;  %v22511_v12 = vld [vmem:[#allocation103_spill] sm:$0xff] }
 0x530   : > { %22286 = vst [vmem:[#allocation205_spill] sm:$0xff] %v17465_v55  ;;  %22287 = vst [vmem:[#allocation206_spill] sm:$0xff] %v17467_v28  ;;  %v6443_v38 = vmax.f32 %v6442_v10, %v17465_v55  ;;  %v6581_v34 = vmax.f32 %v6580_v21, %v17467_v28 }
 0x534   : > { %v17471_v11 = vpop.f32.mrb[96].mxu0  ;;  %v17473_v26 = vpop.f32.mrb[116].mxu1 }
 0x535   : > { %22288 = vst [vmem:[#allocation207_spill] sm:$0xff] %v17471_v11  ;;  %22289 = vst [vmem:[#allocation208_spill] sm:$0xff] %v17473_v26  ;;  %v6375_v22 = vmax.f32 %v6374_v25, %v17471_v11  ;;  %v6513_v2 = vmax.f32 %v6512_v20, %v17473_v26  ;;  %v17477_v31 = vpop.f32.mrb[97].mxu0  ;;  %v17479_v14 = vpop.f32.mrb[117].mxu1  ;;  %v22512_v11 = vld [vmem:[#allocation106_spill] sm:$0xff] }
 0x536   : > { %22290 = vst [vmem:[#allocation209_spill] sm:$0xff] %v17477_v31  ;;  %22291 = vst [vmem:[#allocation210_spill] sm:$0xff] %v17479_v14  ;;  %v6444_v62 = vmax.f32 %v6443_v38, %v17477_v31  ;;  %v6582_v5 = vmax.f32 %v6581_v34, %v17479_v14  ;;  %v17483_v60 = vpop.f32.mrb[98].mxu0  ;;  %v17485_v10 = vpop.f32.mrb[118].mxu1 }
 0x537   : > { %22292 = vst [vmem:[#allocation211_spill] sm:$0xff] %v17483_v60  ;;  %22293 = vst [vmem:[#allocation212_spill] sm:$0xff] %v17485_v10  ;;  %v6376_v21 = vmax.f32 %v6375_v22, %v17483_v60  ;;  %v6514_v28 = vmax.f32 %v6513_v2, %v17485_v10  ;;  %v17489_v55 = vpop.f32.mrb[99].mxu0  ;;  %v17491_v25 = vpop.f32.mrb[119].mxu1 }
 0x538   : > { %22294 = vst [vmem:[#allocation213_spill] sm:$0xff] %v17489_v55  ;;  %22295 = vst [vmem:[#allocation214_spill] sm:$0xff] %v17491_v25  ;;  %v6445_v20 = vmax.f32 %v6444_v62, %v17489_v55  ;;  %v6583_v26 = vmax.f32 %v6582_v5, %v17491_v25 }
 0x53c   : > { %v17495_v35 = vpop.f32.mrb[100].mxu0  ;;  %v17497_v38 = vpop.f32.mrb[120].mxu1 }
 0x53d   : > { %22296 = vst [vmem:[#allocation215_spill] sm:$0xff] %v17495_v35  ;;  %22297 = vst [vmem:[#allocation216_spill] sm:$0xff] %v17497_v38  ;;  %v6377_v34 = vmax.f32 %v6376_v21, %v17495_v35  ;;  %v6515_v14 = vmax.f32 %v6514_v28, %v17497_v38  ;;  %v17501_v31 = vpop.f32.mrb[101].mxu0  ;;  %v17503_v22 = vpop.f32.mrb[121].mxu1 }
 0x53e   : > { %22298 = vst [vmem:[#allocation217_spill] sm:$0xff] %v17501_v31  ;;  %22299 = vst [vmem:[#allocation218_spill] sm:$0xff] %v17503_v22  ;;  %v6446_v2 = vmax.f32 %v6445_v20, %v17501_v31  ;;  %v6584_v10 = vmax.f32 %v6583_v26, %v17503_v22  ;;  %v17507_v49 = vpop.f32.mrb[102].mxu0  ;;  %v17509_v62 = vpop.f32.mrb[122].mxu1 }
 0x53f   : > { %22300 = vst [vmem:[#allocation219_spill] sm:$0xff] %v17507_v49  ;;  %22301 = vst [vmem:[#allocation220_spill] sm:$0xff] %v17509_v62  ;;  %v6378_v5 = vmax.f32 %v6377_v34, %v17507_v49  ;;  %v6516_v25 = vmax.f32 %v6515_v14, %v17509_v62  ;;  %v17513_v55 = vpop.f32.mrb[103].mxu0  ;;  %v17515_v21 = vpop.f32.mrb[123].mxu1 }
 0x540   : > { %22302 = vst [vmem:[#allocation221_spill] sm:$0xff] %v17513_v55  ;;  %22303 = vst [vmem:[#allocation222_spill] sm:$0xff] %v17515_v21  ;;  %v6447_v28 = vmax.f32 %v6446_v2, %v17513_v55  ;;  %v6585_v38 = vmax.f32 %v6584_v10, %v17515_v21 }
 0x544   : > { %v17519_v50 = vpop.f32.mrb[104].mxu0  ;;  %v17521_v20 = vpop.f32.mrb[124].mxu1 }
 0x545   : > { %22304 = vst [vmem:[#allocation223_spill] sm:$0xff] %v17519_v50  ;;  %22305 = vst [vmem:[#allocation224_spill] sm:$0xff] %v17521_v20  ;;  %v6379_v26 = vmax.f32 %v6378_v5, %v17519_v50  ;;  %v6517_v22 = vmax.f32 %v6516_v25, %v17521_v20  ;;  %v17525_v31 = vpop.f32.mrb[105].mxu0  ;;  %v17527_v34 = vpop.f32.mrb[125].mxu1 }
 0x546   : > { %22306 = vst [vmem:[#allocation225_spill] sm:$0xff] %v17525_v31  ;;  %22307 = vst [vmem:[#allocation226_spill] sm:$0xff] %v17527_v34  ;;  %v6448_v14 = vmax.f32 %v6447_v28, %v17525_v31  ;;  %v6586_v62 = vmax.f32 %v6585_v38, %v17527_v34  ;;  %v17531_v49 = vpop.f32.mrb[106].mxu0  ;;  %v17533_v2 = vpop.f32.mrb[126].mxu1 }
 0x547   : > { %22308 = vst [vmem:[#allocation227_spill] sm:$0xff] %v17531_v49  ;;  %22309 = vst [vmem:[#allocation228_spill] sm:$0xff] %v17533_v2  ;;  %v6380_v10 = vmax.f32 %v6379_v26, %v17531_v49  ;;  %v6518_v21 = vmax.f32 %v6517_v22, %v17533_v2  ;;  %v17537_v55 = vpop.f32.mrb[107].mxu0  ;;  %v17539_v5 = vpop.f32.mrb[127].mxu1 }
 0x548   : > { %22310 = vst [vmem:[#allocation229_spill] sm:$0xff] %v17537_v55  ;;  %22311 = vst [vmem:[#allocation230_spill] sm:$0xff] %v17539_v5  ;;  %v6449_v25 = vmax.f32 %v6448_v14, %v17537_v55  ;;  %v6587_v20 = vmax.f32 %v6586_v62, %v17539_v5 }
 0x54c   : > { %v17543_v50 = vpop.f32.mrb[108].mxu0  ;;  %v17545_v28 = vpop.f32.mrb[128].mxu1 }
 0x54d   : > { %22312 = vst [vmem:[#allocation231_spill] sm:$0xff] %v17543_v50  ;;  %22313 = vst [vmem:[#allocation232_spill] sm:$0xff] %v17545_v28  ;;  %v6381_v38 = vmax.f32 %v6380_v10, %v17543_v50  ;;  %v6519_v34 = vmax.f32 %v6518_v21, %v17545_v28  ;;  %v17549_v31 = vpop.f32.mrb[109].mxu0  ;;  %v17551_v26 = vpop.f32.mrb[129].mxu1 }
 0x54e   : > { %22314 = vst [vmem:[#allocation233_spill] sm:$0xff] %v17549_v31  ;;  %22315 = vst [vmem:[#allocation234_spill] sm:$0xff] %v17551_v26  ;;  %v6450_v22 = vmax.f32 %v6449_v25, %v17549_v31  ;;  %v6588_v2 = vmax.f32 %v6587_v20, %v17551_v26  ;;  %v17555_v49 = vpop.f32.mrb[110].mxu0  ;;  %v17557_v14 = vpop.f32.mrb[130].mxu1 }
 0x54f   : > { %22316 = vst [vmem:[#allocation235_spill] sm:$0xff] %v17555_v49  ;;  %22317 = vst [vmem:[#allocation236_spill] sm:$0xff] %v17557_v14  ;;  %v6382_v62 = vmax.f32 %v6381_v38, %v17555_v49  ;;  %v6520_v5 = vmax.f32 %v6519_v34, %v17557_v14  ;;  %v17561_v55 = vpop.f32.mrb[111].mxu0  ;;  %v17563_v10 = vpop.f32.mrb[131].mxu1 }
 0x550   : > { %22318 = vst [vmem:[#allocation237_spill] sm:$0xff] %v17561_v55  ;;  %22319 = vst [vmem:[#allocation238_spill] sm:$0xff] %v17563_v10  ;;  %v6451_v21 = vmax.f32 %v6450_v22, %v17561_v55  ;;  %v6589_v28 = vmax.f32 %v6588_v2, %v17563_v10 }
 0x554   : > { %v17567_v50 = vpop.f32.mrb[112].mxu0  ;;  %v17569_v25 = vpop.f32.mrb[132].mxu1 }
 0x555   : > { %22320 = vst [vmem:[#allocation239_spill] sm:$0xff] %v17567_v50  ;;  %22321 = vst [vmem:[#allocation240_spill] sm:$0xff] %v17569_v25  ;;  %v6383_v20 = vmax.f32 %v6382_v62, %v17567_v50  ;;  %v6521_v26 = vmax.f32 %v6520_v5, %v17569_v25  ;;  %v17573_v31 = vpop.f32.mrb[113].mxu0  ;;  %v17575_v38 = vpop.f32.mrb[133].mxu1 }
 0x556   : > { %22322 = vst [vmem:[#allocation241_spill] sm:$0xff] %v17573_v31  ;;  %22323 = vst [vmem:[#allocation242_spill] sm:$0xff] %v17575_v38  ;;  %v6452_v34 = vmax.f32 %v6451_v21, %v17573_v31  ;;  %v6590_v14 = vmax.f32 %v6589_v28, %v17575_v38  ;;  %v17579_v49 = vpop.f32.mrb[114].mxu0  ;;  %v17581_v22 = vpop.f32.mrb[134].mxu1 }
 0x557   : > { %22324 = vst [vmem:[#allocation243_spill] sm:$0xff] %v17579_v49  ;;  %22325 = vst [vmem:[#allocation244_spill] sm:$0xff] %v17581_v22  ;;  %v6384_v2 = vmax.f32 %v6383_v20, %v17579_v49  ;;  %v6522_v10 = vmax.f32 %v6521_v26, %v17581_v22  ;;  %v17585_v55 = vpop.f32.mrb[115].mxu0  ;;  %v17587_v62 = vpop.f32.mrb[135].mxu1 }
 0x558   : > { %22326 = vst [vmem:[#allocation245_spill] sm:$0xff] %v17585_v55  ;;  %22327 = vst [vmem:[#allocation246_spill] sm:$0xff] %v17587_v62  ;;  %v6453_v5 = vmax.f32 %v6452_v34, %v17585_v55  ;;  %v6591_v25 = vmax.f32 %v6590_v14, %v17587_v62 }
 0x55c   : > { %v17591_v50 = vpop.f32.mrb[116].mxu0  ;;  %v17593_v21 = vpop.f32.mrb[136].mxu1 }
 0x55d   : > { %22328 = vst [vmem:[#allocation247_spill] sm:$0xff] %v17591_v50  ;;  %22329 = vst [vmem:[#allocation248_spill] sm:$0xff] %v17593_v21  ;;  %v6385_v28 = vmax.f32 %v6384_v2, %v17591_v50  ;;  %v6523_v38 = vmax.f32 %v6522_v10, %v17593_v21  ;;  %v17597_v31 = vpop.f32.mrb[117].mxu0  ;;  %v17599_v20 = vpop.f32.mrb[137].mxu1 }
 0x55e   : > { %22330 = vst [vmem:[#allocation249_spill] sm:$0xff] %v17597_v31  ;;  %22331 = vst [vmem:[#allocation250_spill] sm:$0xff] %v17599_v20  ;;  %v6454_v26 = vmax.f32 %v6453_v5, %v17597_v31  ;;  %v6592_v22 = vmax.f32 %v6591_v25, %v17599_v20  ;;  %v17603_v49 = vpop.f32.mrb[118].mxu0  ;;  %v17605_v34 = vpop.f32.mrb[138].mxu1 }
 0x55f   : > { %22332 = vst [vmem:[#allocation251_spill] sm:$0xff] %v17603_v49  ;;  %22333 = vst [vmem:[#allocation252_spill] sm:$0xff] %v17605_v34  ;;  %v6386_v14 = vmax.f32 %v6385_v28, %v17603_v49  ;;  %v6524_v62 = vmax.f32 %v6523_v38, %v17605_v34  ;;  %v17609_v55 = vpop.f32.mrb[119].mxu0  ;;  %v17611_v2 = vpop.f32.mrb[139].mxu1 }
 0x560   : > { %22334 = vst [vmem:[#allocation253_spill] sm:$0xff] %v17609_v55  ;;  %22335 = vst [vmem:[#allocation254_spill] sm:$0xff] %v17611_v2  ;;  %v6455_v10 = vmax.f32 %v6454_v26, %v17609_v55  ;;  %v6593_v21 = vmax.f32 %v6592_v22, %v17611_v2 }
 0x564   : > { %v17615_v50 = vpop.f32.mrb[120].mxu0  ;;  %v17617_v5 = vpop.f32.mrb[140].mxu1 }
 0x565   : > { %22336 = vst [vmem:[#allocation255_spill] sm:$0xff] %v17615_v50  ;;  %22337 = vst [vmem:[#allocation256_spill] sm:$0xff] %v17617_v5  ;;  %v6387_v25 = vmax.f32 %v6386_v14, %v17615_v50  ;;  %v6525_v20 = vmax.f32 %v6524_v62, %v17617_v5  ;;  %v17621_v31 = vpop.f32.mrb[121].mxu0  ;;  %v17623_v28 = vpop.f32.mrb[141].mxu1 }
 0x566   : > { %22338 = vst [vmem:[#allocation257_spill] sm:$0xff] %v17621_v31  ;;  %22339 = vst [vmem:[#allocation258_spill] sm:$0xff] %v17623_v28  ;;  %v6456_v38 = vmax.f32 %v6455_v10, %v17621_v31  ;;  %v6594_v34 = vmax.f32 %v6593_v21, %v17623_v28  ;;  %v17627_v49 = vpop.f32.mrb[122].mxu0  ;;  %v17629_v26 = vpop.f32.mrb[142].mxu1 }
 0x567   : > { %22340 = vst [vmem:[#allocation259_spill] sm:$0xff] %v17627_v49  ;;  %22341 = vst [vmem:[#allocation260_spill] sm:$0xff] %v17629_v26  ;;  %v6388_v22 = vmax.f32 %v6387_v25, %v17627_v49  ;;  %v6526_v2 = vmax.f32 %v6525_v20, %v17629_v26  ;;  %v17633_v55 = vpop.f32.mrb[123].mxu0  ;;  %v17635_v14 = vpop.f32.mrb[143].mxu1 }
 0x568   : > { %22342 = vst [vmem:[#allocation261_spill] sm:$0xff] %v17633_v55  ;;  %22343 = vst [vmem:[#allocation262_spill] sm:$0xff] %v17635_v14  ;;  %v6457_v62 = vmax.f32 %v6456_v38, %v17633_v55  ;;  %v6595_v5 = vmax.f32 %v6594_v34, %v17635_v14 }
 0x56c   : > { %v17639_v50 = vpop.f32.mrb[124].mxu0  ;;  %v17641_v10 = vpop.f32.mrb[144].mxu1 }
 0x56d   : > { %22344 = vst [vmem:[#allocation263_spill] sm:$0xff] %v17639_v50  ;;  %22345 = vst [vmem:[#allocation264_spill] sm:$0xff] %v17641_v10  ;;  %v6389_v21 = vmax.f32 %v6388_v22, %v17639_v50  ;;  %v6527_v28 = vmax.f32 %v6526_v2, %v17641_v10  ;;  %v17645_v31 = vpop.f32.mrb[125].mxu0  ;;  %v17647_v25 = vpop.f32.mrb[145].mxu1 }
 0x56e   : > { %22346 = vst [vmem:[#allocation265_spill] sm:$0xff] %v17645_v31  ;;  %22347 = vst [vmem:[#allocation266_spill] sm:$0xff] %v17647_v25  ;;  %v6458_v20 = vmax.f32 %v6457_v62, %v17645_v31  ;;  %v6596_v26 = vmax.f32 %v6595_v5, %v17647_v25  ;;  %v17651_v49 = vpop.f32.mrb[126].mxu0  ;;  %v17653_v38 = vpop.f32.mrb[146].mxu1 }
 0x56f   : > { %22348 = vst [vmem:[#allocation267_spill] sm:$0xff] %v17651_v49  ;;  %22349 = vst [vmem:[#allocation268_spill] sm:$0xff] %v17653_v38  ;;  %v6390_v34 = vmax.f32 %v6389_v21, %v17651_v49  ;;  %v6528_v14 = vmax.f32 %v6527_v28, %v17653_v38  ;;  %v17657_v55 = vpop.f32.mrb[127].mxu0  ;;  %v17659_v22 = vpop.f32.mrb[147].mxu1 }
 0x570   : > { %22350 = vst [vmem:[#allocation269_spill] sm:$0xff] %v17657_v55  ;;  %22351 = vst [vmem:[#allocation270_spill] sm:$0xff] %v17659_v22  ;;  %v6459_v2 = vmax.f32 %v6458_v20, %v17657_v55  ;;  %v6597_v10 = vmax.f32 %v6596_v26, %v17659_v22 }
 0x574   : > { %v17663_v50 = vpop.f32.mrb[128].mxu0  ;;  %v17665_v62 = vpop.f32.mrb[148].mxu1 }
 0x575   : > { %22352 = vst [vmem:[#allocation271_spill] sm:$0xff] %v17663_v50  ;;  %22353 = vst [vmem:[#allocation272_spill] sm:$0xff] %v17665_v62  ;;  %v6391_v5 = vmax.f32 %v6390_v34, %v17663_v50  ;;  %v6529_v25 = vmax.f32 %v6528_v14, %v17665_v62  ;;  %v17669_v31 = vpop.f32.mrb[129].mxu0  ;;  %v17671_v21 = vpop.f32.mrb[149].mxu1 }
 0x576   : > { %22354 = vst [vmem:[#allocation273_spill] sm:$0xff] %v17669_v31  ;;  %22355 = vst [vmem:[#allocation274_spill] sm:$0xff] %v17671_v21  ;;  %v6460_v28 = vmax.f32 %v6459_v2, %v17669_v31  ;;  %v6598_v38 = vmax.f32 %v6597_v10, %v17671_v21  ;;  %v17675_v49 = vpop.f32.mrb[130].mxu0  ;;  %v17677_v20 = vpop.f32.mrb[150].mxu1 }
 0x577   : > { %22356 = vst [vmem:[#allocation275_spill] sm:$0xff] %v17675_v49  ;;  %22357 = vst [vmem:[#allocation276_spill] sm:$0xff] %v17677_v20  ;;  %v6392_v26 = vmax.f32 %v6391_v5, %v17675_v49  ;;  %v6530_v22 = vmax.f32 %v6529_v25, %v17677_v20  ;;  %v17681_v55 = vpop.f32.mrb[131].mxu0  ;;  %v17683_v34 = vpop.f32.mrb[151].mxu1 }
 0x578   : > { %22358 = vst [vmem:[#allocation277_spill] sm:$0xff] %v17681_v55  ;;  %22359 = vst [vmem:[#allocation278_spill] sm:$0xff] %v17683_v34  ;;  %v6461_v14 = vmax.f32 %v6460_v28, %v17681_v55  ;;  %v6599_v62 = vmax.f32 %v6598_v38, %v17683_v34 }
 0x57c   : > { %v17687_v50 = vpop.f32.mrb[132].mxu0  ;;  %v17689_v2 = vpop.f32.mrb[152].mxu1 }
 0x57d   : > { %22360 = vst [vmem:[#allocation279_spill] sm:$0xff] %v17687_v50  ;;  %22361 = vst [vmem:[#allocation280_spill] sm:$0xff] %v17689_v2  ;;  %v6393_v10 = vmax.f32 %v6392_v26, %v17687_v50  ;;  %v6531_v21 = vmax.f32 %v6530_v22, %v17689_v2  ;;  %v17693_v31 = vpop.f32.mrb[133].mxu0  ;;  %v17695_v5 = vpop.f32.mrb[153].mxu1 }
 0x57e   : > { %22362 = vst [vmem:[#allocation281_spill] sm:$0xff] %v17693_v31  ;;  %22363 = vst [vmem:[#allocation282_spill] sm:$0xff] %v17695_v5  ;;  %v17698_v25 = vmax.f32 %v6461_v14, %v17693_v31  ;;  %v17701_v20 = vmax.f32 %v6599_v62, %v17695_v5  ;;  %v17703_v28 = vpop.f32.mrb[134].mxu0  ;;  %v17705_v38 = vpop.f32.mrb[154].mxu1 }
 0x57f   : > { %22366 = vst [vmem:[#allocation285_spill] sm:$0xff] %v17703_v28  ;;  %22367 = vst [vmem:[#allocation286_spill] sm:$0xff] %v17705_v38  ;;  %v6394_v34 = vmax.f32 %v6393_v10, %v17703_v28  ;;  %v6532_v26 = vmax.f32 %v6531_v21, %v17705_v38  ;;  %v22396_v21 = vld [vmem:[#allocation87_spill] sm:$0xff]  ;;  %v22397_v10 = vld [vmem:[#allocation90_spill] sm:$0xff] }
 0x580   : > { %22364 = vst [vmem:[#allocation283_spill] sm:$0xff] %v17698_v25  ;;  %22365 = vst [vmem:[#allocation284_spill] sm:$0xff] %v17701_v20  ;;  %v17713_v20 = vpop.f32.mrb[135].mxu0 }
 0x581   : > { %v6395_v55 = vrot.slane %v6394_v34, 4  ;;  %v6533_v22 = vrot.slane %v6532_v26, 4  ;;  %22370 = vst [vmem:[#allocation289_spill] sm:$0xff] %v17713_v20 }
 0x583   : > { %v6396_v2 = vmax.f32 %v6394_v34, %v6395_v55  ;;  %v6534_v50 = vmax.f32 %v6532_v26, %v6533_v22  ;;  %v22389_v34 = vld [vmem:[#allocation41_spill] sm:$0xff]  ;;  %v22399_v26 = vld [vmem:[#allocation96_spill] sm:$0xff]  ;;  %v17971_v55 = vpop.f32.mrb[155].mxu1 }
 0x584   : > { %22452 = vst [vmem:[#allocation41_spill] sm:$0xff] %v17971_v55 }
 0x585   : > { %v6397_v49 = vrot.slane %v6396_v2, 2  ;;  %v6535_v35 = vrot.slane %v6534_v50, 2 }
 0x587   : > { %v6398_v60 = vmax.f32 %v6396_v2, %v6397_v49  ;;  %v6536_v14 = vmax.f32 %v6534_v50, %v6535_v35  ;;  %v22390_v2 = vld [vmem:[#allocation69_spill] sm:$0xff]  ;;  %v22392_v35 = vld [vmem:[#allocation75_spill] sm:$0xff]  ;;  %v22393_v49 = vld [vmem:[#allocation78_spill] sm:$0xff] }
 0x588   : > { %v22394_v50 = vld [vmem:[#allocation81_spill] sm:$0xff] }
 0x589   : > { %v6399_v31 = vrot.slane %v6398_v60, 1  ;;  %v6537_v25 = vrot.slane %v6536_v14, 1 }
 0x58b   : > { %v17709_v62 = vmax.f32 %v6398_v60, %v6399_v31  ;;  %v17711_v5 = vmax.f32 %v6536_v14, %v6537_v25  ;;  %v22391_v31 = vld [vmem:[#allocation72_spill] sm:$0xff]  ;;  %v22398_v25 = vld [vmem:[#allocation93_spill] sm:$0xff] }
 0x58c   : > { %v22395_v60 = vld [vmem:[#allocation84_spill] sm:$0xff] }
 0x58d   : > { %22368 = vst [vmem:[#allocation287_spill] sm:$0xff] %v17709_v62  ;;  %22369 = vst [vmem:[#allocation288_spill] sm:$0xff] %v17711_v5  ;;  %v22453_v58 = vsub.f32 %v16924_v42, %v17709_v62  ;;  %v22454_v52 = vsub.f32 %v16932_v24, %v17709_v62  ;;  %v22455_v22 = vsub.f32 %v16952_v29, %v17709_v62 }
 0x58e   : > { %v22456_v28 = vsub.f32 %v16964_v59, %v17709_v62  ;;  %v22457_v13 = vsub.f32 %v16980_v27, %v17709_v62  ;;  %v22458_v42 = vsub.f32 %v16992_v47, %v17709_v62  ;;  %v22459_v24 = vsub.f32 %v17008_v45, %v17709_v62  ;;  %v22463_v47 = vld [vmem:[#allocation284_spill] sm:$0xff] }
 0x58f   : > { %v6864_v0 = vmul.f32 1.442695, %v22453_v58  ;;  %v6872_v8 = vmul.f32 1.442695, %v22454_v52  ;;  %v6880_v14 = vmul.f32 1.442695, %v22455_v22  ;;  %v22460_v59 = vsub.f32 %v17020_v63, %v17709_v62 }
 0x590   : > { %v6888_v16 = vmul.f32 1.442695, %v22456_v28  ;;  %v6896_v38 = vmul.f32 1.442695, %v22457_v13  ;;  %v6904_v58 = vmul.f32 1.442695, %v22458_v42  ;;  %v22461_v27 = vsub.f32 %v17036_v44, %v17709_v62 }
 0x591   : > { %14252 = vpow2.f32 %v6864_v0  ;;  %v6912_v29 = vmul.f32 1.442695, %v22459_v24  ;;  %v6920_v52 = vmul.f32 1.442695, %v22460_v59  ;;  %v18004_v28 = vmax.f32 %v22463_v47, %v17971_v55 }
 0x592   : > { %14254 = vpow2.f32 %v6872_v8  ;;  %v6928_v13 = vmul.f32 1.442695, %v22461_v27  ;;  %v22462_v8 = vld [vmem:[#allocation283_spill] sm:$0xff]  ;;  %v22464_v45 = vsub.f32 %v17048_v19, %v17709_v62  ;;  %v22465_v63 = vsub.f32 %v17063_v57, %v17709_v62 }
 0x593   : > { %14256 = vpow2.f32 %v6880_v14  ;;  %v6463_v0 = vmax.f32 %v22462_v8, %v17713_v20  ;;  %v22466_v44 = vsub.f32 %v17075_v48, %v17709_v62  ;;  %v22467_v42 = vsub.f32 %v17087_v15, %v17709_v62 }
 0x594   : > { %14258 = vpow2.f32 %v6888_v16  ;;  %v6936_v16 = vmul.f32 1.442695, %v22464_v45  ;;  %v22468_v19 = vsub.f32 %v17099_v41, %v17709_v62  ;;  %v22470_v57 = vsub.f32 %v17111_v54, %v17709_v62 }
 0x595   : > { %14260 = vpow2.f32 %v6896_v38  ;;  %v6944_v38 = vmul.f32 1.442695, %v22465_v63  ;;  %v6464_v22 = vrot.slane %v6463_v0, 4  ;;  %v6952_v14 = vmul.f32 1.442695, %v22466_v44 }
 0x596   : > { %14262 = vpow2.f32 %v6904_v58  ;;  %v6960_v58 = vmul.f32 1.442695, %v22467_v42  ;;  %v22472_v15 = vsub.f32 %v17123_v40, %v17709_v62  ;;  %v22474_v41 = vsub.f32 %v17135_v7, %v17709_v62 }
 0x597   : > { %14264 = vpow2.f32 %v6912_v29  ;;  %v6465_v24 = vmax.f32 %v6463_v0, %v6464_v22  ;;  %v6968_v29 = vmul.f32 1.442695, %v22468_v19  ;;  %v22476_v54 = vsub.f32 %v17147_v4, %v17709_v62 }
 0x598   : > { %14266 = vpow2.f32 %v6920_v52  ;;  %v6976_v52 = vmul.f32 1.442695, %v22470_v57  ;;  %v6992_v0 = vmul.f32 1.442695, %v22474_v41  ;;  %v22478_v40 = vsub.f32 %v17159_v51, %v17709_v62 }
 0x599   : > { %14268 = vpow2.f32 %v6928_v13  ;;  %v6466_v48 = vrot.slane %v6465_v24, 2  ;;  %v6984_v13 = vmul.f32 1.442695, %v22472_v15  ;;  %v22480_v7 = vsub.f32 %v17171_v9, %v17709_v62  ;;  %v22488_v15 = vld [vmem:[#allocation70_spill] sm:$0xff] }
 0x59a   : > { %14270 = vpow2.f32 %v6936_v16  ;;  %v7000_v16 = vmul.f32 1.442695, %v22476_v54  ;;  %v22482_v4 = vsub.f32 %v17183_v39, %v17709_v62  ;;  %v22484_v51 = vsub.f32 %v17195_v37, %v17709_v62  ;;  %v22500_v54 = vld [vmem:[#allocation88_spill] sm:$0xff]  ;;  %v22504_v39 = vld [vmem:[#allocation94_spill] sm:$0xff] }
 0x59b   : > { %v18021_v59 = vpop.eup %14252  ;;  %14272 = vpow2.f32 %v6944_v38  ;;  %v6467_v47 = vmax.f32 %v6465_v24, %v6466_v48  ;;  %v7008_v38 = vmul.f32 1.442695, %v22478_v40  ;;  %v22486_v9 = vsub.f32 %v17207_v30, %v17709_v62  ;;  %v22487_v48 = vld [vmem:[#allocation67_spill] sm:$0xff]  ;;  %v22499_v30 = vld [vmem:[#allocation85_spill] sm:$0xff] }
 0x59c   : > { %22469 = vst [vmem:[#allocation69_spill] sm:$0xff] %v18021_v59  ;;  %v18026_v27 = vpop.eup %14254  ;;  %14274 = vpow2.f32 %v6952_v14  ;;  %v7016_v14 = vmul.f32 1.442695, %v22480_v7  ;;  %v22490_v37 = vsub.f32 %v17219_v61, %v17709_v62  ;;  %v22495_v7 = vld [vmem:[#allocation79_spill] sm:$0xff]  ;;  %v22568_v59 = vld [vmem:[#allocation197_spill] sm:$0xff] }
 0x59d   : > { %22471 = vst [vmem:[#allocation72_spill] sm:$0xff] %v18026_v27  ;;  %v18031_v8 = vpop.eup %14256  ;;  %14276 = vpow2.f32 %v6960_v58  ;;  %v6468_v22 = vrot.slane %v6467_v47, 1  ;;  %v7024_v58 = vmul.f32 1.442695, %v22482_v4  ;;  %v22496_v4 = vld [vmem:[#allocation82_spill] sm:$0xff]  ;;  %v22564_v27 = vld [vmem:[#allocation189_spill] sm:$0xff] }
 0x59e   : > { %22473 = vst [vmem:[#allocation75_spill] sm:$0xff] %v18031_v8  ;;  %v18036_v45 = vpop.eup %14258  ;;  %14278 = vpow2.f32 %v6968_v29  ;;  %v7032_v29 = vmul.f32 1.442695, %v22484_v51  ;;  %v22560_v8 = vld [vmem:[#allocation181_spill] sm:$0xff] }
 0x59f   : > { %22475 = vst [vmem:[#allocation78_spill] sm:$0xff] %v18036_v45  ;;  %v18041_v63 = vpop.eup %14260  ;;  %14280 = vpow2.f32 %v6976_v52  ;;  %v18056_v24 = vmax.f32 %v6467_v47, %v6468_v22  ;;  %v7040_v52 = vmul.f32 1.442695, %v22486_v9  ;;  %v22491_v47 = vld [vmem:[#allocation73_spill] sm:$0xff]  ;;  %v22498_v9 = vsub.f32 %v17243_v18, %v17709_v62 }
 0x5a0   : > { %22477 = vst [vmem:[#allocation81_spill] sm:$0xff] %v18041_v63  ;;  %v18046_v44 = vpop.eup %14262  ;;  %14282 = vpow2.f32 %v6984_v13  ;;  %v22503_v13 = vld [vmem:[#allocation91_spill] sm:$0xff]  ;;  %v22552_v63 = vld [vmem:[#allocation166_spill] sm:$0xff]  ;;  %v22556_v45 = vld [vmem:[#allocation173_spill] sm:$0xff] }
 0x5a1   : > { %22479 = vst [vmem:[#allocation84_spill] sm:$0xff] %v18046_v44  ;;  %v18051_v42 = vpop.eup %14264  ;;  %14284 = vpow2.f32 %v6992_v0  ;;  %v7048_v0 = vmul.f32 1.442695, %v22490_v37  ;;  %v7064_v37 = vmul.f32 1.442695, %v22498_v9  ;;  %v22548_v44 = vld [vmem:[#allocation160_spill] sm:$0xff] }
 0x5a2   : > { %22481 = vst [vmem:[#allocation87_spill] sm:$0xff] %v18051_v42  ;;  %v18058_v19 = vpop.eup %14266  ;;  %14286 = vpow2.f32 %v7000_v16  ;;  %v22492_v16 = vld [vmem:[#allocation76_spill] sm:$0xff]  ;;  %v22544_v42 = vld [vmem:[#allocation154_spill] sm:$0xff] }
 0x5a3   : > { %22483 = vst [vmem:[#allocation90_spill] sm:$0xff] %v18058_v19  ;;  %v18063_v57 = vpop.eup %14268  ;;  %14288 = vpow2.f32 %v7008_v38  ;;  %v22494_v38 = vsub.f32 %v17231_v1, %v17709_v62  ;;  %v22540_v19 = vld [vmem:[#allocation148_spill] sm:$0xff] }
 0x5a4   : > { %22485 = vst [vmem:[#allocation93_spill] sm:$0xff] %v18063_v57  ;;  %v18072_v41 = vpop.eup %14270  ;;  %14290 = vpow2.f32 %v7016_v14  ;;  %v22502_v14 = vsub.f32 %v17255_v23, %v17709_v62  ;;  %v22536_v57 = vld [vmem:[#allocation142_spill] sm:$0xff] }
 0x5a5   : > { %22489 = vst [vmem:[#allocation96_spill] sm:$0xff] %v18072_v41  ;;  %v18081_v40 = vpop.eup %14272  ;;  %14292 = vpow2.f32 %v7024_v58  ;;  %v7056_v22 = vmul.f32 1.442695, %v22494_v38  ;;  %v22506_v58 = vsub.f32 %v17267_v32, %v17709_v62  ;;  %v22532_v41 = vld [vmem:[#allocation136_spill] sm:$0xff] }
 0x5a6   : > { %22493 = vst [vmem:[#allocation283_spill] sm:$0xff] %v18081_v40  ;;  %v18090_v51 = vpop.eup %14274  ;;  %14294 = vpow2.f32 %v7032_v29  ;;  %v7072_v61 = vmul.f32 1.442695, %v22502_v14  ;;  %v22510_v29 = vsub.f32 %v17279_v33, %v17709_v62  ;;  %v22528_v40 = vld [vmem:[#allocation130_spill] sm:$0xff] }
 0x5a7   : > { %22497 = vst [vmem:[#allocation284_spill] sm:$0xff] %v18090_v51  ;;  %v18099_v38 = vpop.eup %14276  ;;  %14296 = vpow2.f32 %v7040_v52  ;;  %v7080_v1 = vmul.f32 1.442695, %v22506_v58  ;;  %v22514_v52 = vsub.f32 %v17291_v43, %v17709_v62  ;;  %v22524_v51 = vld [vmem:[#allocation124_spill] sm:$0xff] }
 0x5a8   : > { %22501 = vst [vmem:[#allocation67_spill] sm:$0xff] %v18099_v38  ;;  %v18108_v9 = vpop.eup %14278  ;;  %14298 = vpow2.f32 %v7048_v0  ;;  %v7088_v18 = vmul.f32 1.442695, %v22510_v29  ;;  %v22518_v0 = vsub.f32 %v17303_v46, %v17709_v62  ;;  %v22520_v38 = vld [vmem:[#allocation118_spill] sm:$0xff] }
 0x5a9   : > { %22505 = vst [vmem:[#allocation70_spill] sm:$0xff] %v18108_v9  ;;  %v18117_v14 = vpop.eup %14280  ;;  %14300 = vpow2.f32 %v7056_v22  ;;  %v7096_v23 = vmul.f32 1.442695, %v22514_v52  ;;  %v22516_v9 = vld [vmem:[#allocation112_spill] sm:$0xff]  ;;  %v22522_v22 = vsub.f32 %v17315_v36, %v17709_v62 }
 0x5aa   : > { %22509 = vst [vmem:[#allocation73_spill] sm:$0xff] %v18117_v14  ;;  %v18126_v58 = vpop.eup %14282  ;;  %14302 = vpow2.f32 %v7064_v37  ;;  %v22515_v14 = vld [vmem:[#allocation109_spill] sm:$0xff]  ;;  %v7104_v32 = vmul.f32 1.442695, %v22518_v0  ;;  %v22526_v37 = vsub.f32 %v17327_v17, %v17709_v62 }
 0x5ab   : > { %22513 = vst [vmem:[#allocation76_spill] sm:$0xff] %v18126_v58  ;;  %v18135_v29 = vpop.eup %14284  ;;  %14304 = vpow2.f32 %v7072_v61  ;;  %v22519_v58 = vld [vmem:[#allocation115_spill] sm:$0xff]  ;;  %v7112_v33 = vmul.f32 1.442695, %v22522_v22  ;;  %v22530_v61 = vsub.f32 %v17339_v6, %v17709_v62 }
 0x5ac   : > { %22517 = vst [vmem:[#allocation79_spill] sm:$0xff] %v18135_v29  ;;  %v18144_v52 = vpop.eup %14286  ;;  %14306 = vpow2.f32 %v7080_v1  ;;  %v22523_v29 = vld [vmem:[#allocation121_spill] sm:$0xff]  ;;  %v7120_v43 = vmul.f32 1.442695, %v22526_v37  ;;  %v22534_v1 = vsub.f32 %v17351_v53, %v17709_v62 }
 0x5ad   : > { %22521 = vst [vmem:[#allocation82_spill] sm:$0xff] %v18144_v52  ;;  %v18153_v0 = vpop.eup %14288  ;;  %14308 = vpow2.f32 %v7088_v18  ;;  %v22527_v52 = vld [vmem:[#allocation127_spill] sm:$0xff]  ;;  %v7128_v46 = vmul.f32 1.442695, %v22530_v61  ;;  %v22538_v18 = vsub.f32 %v22389_v34, %v17711_v5  ;;  %v22610_v62 = vld [vmem:[#allocation269_spill] sm:$0xff] }
 0x5ae   : > { %22525 = vst [vmem:[#allocation85_spill] sm:$0xff] %v18153_v0  ;;  %v18162_v22 = vpop.eup %14290  ;;  %14310 = vpow2.f32 %v7096_v23  ;;  %v22531_v0 = vld [vmem:[#allocation133_spill] sm:$0xff]  ;;  %v7136_v36 = vmul.f32 1.442695, %v22534_v1  ;;  %v22542_v23 = vsub.f32 %v22390_v2, %v17711_v5 }
 0x5af   : > { %22529 = vst [vmem:[#allocation88_spill] sm:$0xff] %v18162_v22  ;;  %v18171_v37 = vpop.eup %14292  ;;  %14312 = vpow2.f32 %v7104_v32  ;;  %v22535_v22 = vld [vmem:[#allocation139_spill] sm:$0xff]  ;;  %v6868_v17 = vmul.f32 1.442695, %v22538_v18  ;;  %v22546_v32 = vsub.f32 %v22391_v31, %v17711_v5 }
 0x5b0   : > { %22533 = vst [vmem:[#allocation91_spill] sm:$0xff] %v18171_v37  ;;  %v18180_v61 = vpop.eup %14294  ;;  %14314 = vpow2.f32 %v7112_v33  ;;  %v22539_v37 = vld [vmem:[#allocation145_spill] sm:$0xff]  ;;  %v6876_v6 = vmul.f32 1.442695, %v22542_v23  ;;  %v22550_v33 = vsub.f32 %v22392_v35, %v17711_v5 }
 0x5b1   : > { %22537 = vst [vmem:[#allocation94_spill] sm:$0xff] %v18180_v61  ;;  %v18189_v1 = vpop.eup %14296  ;;  %14316 = vpow2.f32 %v7120_v43  ;;  %v22543_v61 = vld [vmem:[#allocation151_spill] sm:$0xff]  ;;  %v6884_v53 = vmul.f32 1.442695, %v22546_v32  ;;  %v22554_v43 = vsub.f32 %v22393_v49, %v17711_v5 }
 0x5b2   : > { %22541 = vst [vmem:[#allocation97_spill] sm:$0xff] %v18189_v1  ;;  %v18198_v18 = vpop.eup %14298  ;;  %14318 = vpow2.f32 %v7128_v46  ;;  %v22547_v1 = vld [vmem:[#allocation157_spill] sm:$0xff]  ;;  %v6892_v34 = vmul.f32 1.442695, %v22550_v33  ;;  %v22558_v46 = vsub.f32 %v22394_v50, %v17711_v5 }
 0x5b3   : > { %22545 = vst [vmem:[#allocation100_spill] sm:$0xff] %v18198_v18  ;;  %v18207_v23 = vpop.eup %14300  ;;  %14320 = vpow2.f32 %v7136_v36  ;;  %v22551_v18 = vld [vmem:[#allocation163_spill] sm:$0xff]  ;;  %v6900_v2 = vmul.f32 1.442695, %v22554_v43  ;;  %v22562_v36 = vsub.f32 %v22395_v60, %v17711_v5 }
 0x5b4   : > { %22549 = vst [vmem:[#allocation103_spill] sm:$0xff] %v18207_v23  ;;  %v18216_v32 = vpop.eup %14302  ;;  %14322 = vpow2.f32 %v6868_v17  ;;  %v22555_v23 = vld [vmem:[#allocation169_spill] sm:$0xff]  ;;  %v6908_v31 = vmul.f32 1.442695, %v22558_v46  ;;  %v22566_v17 = vsub.f32 %v22396_v21, %v17711_v5 }
 0x5b5   : > { %22553 = vst [vmem:[#allocation106_spill] sm:$0xff] %v18216_v32  ;;  %v18225_v33 = vpop.eup %14304  ;;  %14324 = vpow2.f32 %v6876_v6  ;;  %v22559_v32 = vld [vmem:[#allocation177_spill] sm:$0xff]  ;;  %v6916_v35 = vmul.f32 1.442695, %v22562_v36  ;;  %v22570_v6 = vsub.f32 %v22397_v10, %v17711_v5 }
 0x5b6   : > { %22557 = vst [vmem:[#allocation109_spill] sm:$0xff] %v18225_v33  ;;  %v18234_v43 = vpop.eup %14306  ;;  %14326 = vpow2.f32 %v6884_v53  ;;  %v22563_v33 = vld [vmem:[#allocation185_spill] sm:$0xff]  ;;  %v6924_v49 = vmul.f32 1.442695, %v22566_v17  ;;  %v22574_v53 = vsub.f32 %v22398_v25, %v17711_v5 }
 0x5b7   : > { %22561 = vst [vmem:[#allocation112_spill] sm:$0xff] %v18234_v43  ;;  %v18243_v46 = vpop.eup %14308  ;;  %14328 = vpow2.f32 %v6892_v34  ;;  %v22567_v43 = vld [vmem:[#allocation193_spill] sm:$0xff]  ;;  %v6932_v50 = vmul.f32 1.442695, %v22570_v6  ;;  %v22578_v34 = vsub.f32 %v22399_v26, %v17711_v5 }
 0x5b8   : > { %22565 = vst [vmem:[#allocation115_spill] sm:$0xff] %v18243_v46  ;;  %v18252_v36 = vpop.eup %14310  ;;  %14330 = vpow2.f32 %v6900_v2  ;;  %v22571_v46 = vld [vmem:[#allocation201_spill] sm:$0xff]  ;;  %v6940_v60 = vmul.f32 1.442695, %v22574_v53  ;;  %v22582_v2 = vld [vmem:[#allocation99_spill] sm:$0xff] }
 0x5b9   : > { %22569 = vst [vmem:[#allocation118_spill] sm:$0xff] %v18252_v36  ;;  %v18261_v17 = vpop.eup %14312  ;;  %14332 = vpow2.f32 %v6908_v31  ;;  %v6948_v21 = vmul.f32 1.442695, %v22578_v34  ;;  %v22583_v36 = vsub.f32 %v22582_v2, %v17711_v5  ;;  %v22587_v31 = vld [vmem:[#allocation102_spill] sm:$0xff] }
 0x5ba   : > { %22573 = vst [vmem:[#allocation121_spill] sm:$0xff] %v18261_v17  ;;  %v18270_v6 = vpop.eup %14314  ;;  %14334 = vpow2.f32 %v6916_v35  ;;  %v22588_v17 = vsub.f32 %v22587_v31, %v17711_v5  ;;  %v22592_v35 = vld [vmem:[#allocation105_spill] sm:$0xff] }
 0x5bb   : > { %22577 = vst [vmem:[#allocation124_spill] sm:$0xff] %v18270_v6  ;;  %v18279_v53 = vpop.eup %14316  ;;  %14336 = vpow2.f32 %v6924_v49  ;;  %v6956_v10 = vmul.f32 1.442695, %v22583_v36  ;;  %v22593_v6 = vsub.f32 %v22592_v35, %v17711_v5  ;;  %v22597_v49 = vld [vmem:[#allocation108_spill] sm:$0xff] }
 0x5bc   : > { %22581 = vst [vmem:[#allocation127_spill] sm:$0xff] %v18279_v53  ;;  %v18288_v34 = vpop.eup %14318  ;;  %14338 = vpow2.f32 %v6932_v50  ;;  %v6964_v25 = vmul.f32 1.442695, %v22588_v17  ;;  %v22598_v53 = vsub.f32 %v22597_v49, %v17711_v5  ;;  %v22602_v50 = vld [vmem:[#allocation111_spill] sm:$0xff] }
 0x5bd   : > { %22586 = vst [vmem:[#allocation130_spill] sm:$0xff] %v18288_v34  ;;  %v18297_v36 = vpop.eup %14320  ;;  %14340 = vpow2.f32 %v6940_v60  ;;  %v6972_v26 = vmul.f32 1.442695, %v22593_v6  ;;  %v22603_v34 = vsub.f32 %v22602_v50, %v17711_v5  ;;  %v22607_v60 = vld [vmem:[#allocation114_spill] sm:$0xff] }
 0x5be   : > { %22591 = vst [vmem:[#allocation133_spill] sm:$0xff] %v18297_v36  ;;  %v18306_v17 = vpop.eup %14322  ;;  %14342 = vpow2.f32 %v6948_v21  ;;  %v6980_v2 = vmul.f32 1.442695, %v22598_v53  ;;  %v22608_v36 = vsub.f32 %v22607_v60, %v17711_v5  ;;  %v22612_v21 = vld [vmem:[#allocation117_spill] sm:$0xff] }
 0x5bf   : > { %22596 = vst [vmem:[#allocation136_spill] sm:$0xff] %v18306_v17  ;;  %v18315_v6 = vpop.eup %14324  ;;  %14344 = vpow2.f32 %v6956_v10  ;;  %v6988_v31 = vmul.f32 1.442695, %v22603_v34  ;;  %v22613_v17 = vsub.f32 %v22612_v21, %v17711_v5  ;;  %v22617_v10 = vld [vmem:[#allocation120_spill] sm:$0xff] }
 0x5c0   : > { %22601 = vst [vmem:[#allocation139_spill] sm:$0xff] %v18315_v6  ;;  %v18324_v53 = vpop.eup %14326  ;;  %14346 = vpow2.f32 %v6964_v25  ;;  %v6996_v35 = vmul.f32 1.442695, %v22608_v36  ;;  %v22618_v6 = vsub.f32 %v22617_v10, %v17711_v5  ;;  %v22621_v25 = vld [vmem:[#allocation123_spill] sm:$0xff] }
 0x5c1   : > { %22606 = vst [vmem:[#allocation142_spill] sm:$0xff] %v18324_v53  ;;  %v18333_v34 = vpop.eup %14328  ;;  %14348 = vpow2.f32 %v6972_v26  ;;  %v7004_v49 = vmul.f32 1.442695, %v22613_v17  ;;  %v22622_v53 = vsub.f32 %v22621_v25, %v17711_v5  ;;  %v22627_v26 = vld [vmem:[#allocation129_spill] sm:$0xff] }
 0x5c2   : > { %22611 = vst [vmem:[#allocation145_spill] sm:$0xff] %v18333_v34  ;;  %v18342_v36 = vpop.eup %14330  ;;  %14350 = vpow2.f32 %v6980_v2  ;;  %v7012_v50 = vmul.f32 1.442695, %v22618_v6  ;;  %v22624_v2 = vld [vmem:[#allocation126_spill] sm:$0xff]  ;;  %v22628_v21 = vsub.f32 %v22627_v26, %v17711_v5 }
 0x5c3   : > { %22616 = vst [vmem:[#allocation148_spill] sm:$0xff] %v18342_v36  ;;  %v18351_v17 = vpop.eup %14332  ;;  %14352 = vpow2.f32 %v6988_v31  ;;  %v7020_v60 = vmul.f32 1.442695, %v22622_v53  ;;  %v22625_v10 = vsub.f32 %v22624_v2, %v17711_v5  ;;  %v22630_v31 = vld [vmem:[#allocation132_spill] sm:$0xff]  ;;  %v22636_v26 = vld [vmem:[#allocation138_spill] sm:$0xff] }
 0x5c4   : > { %22620 = vst [vmem:[#allocation151_spill] sm:$0xff] %v18351_v17  ;;  %v18356_v55 = vpop.eup %14334  ;;  %14354 = vpow2.f32 %v6996_v35  ;;  %v7036_v20 = vmul.f32 1.442695, %v22628_v21  ;;  %v22631_v53 = vsub.f32 %v22630_v31, %v17711_v5  ;;  %v22633_v35 = vld [vmem:[#allocation135_spill] sm:$0xff]  ;;  %v22637_v21 = vsub.f32 %v22636_v26, %v17711_v5  ;;  %v22639_v31 = vld [vmem:[#allocation141_spill] sm:$0xff] }
 0x5c5   : > { %22623 = vst [vmem:[#allocation154_spill] sm:$0xff] %v18356_v55  ;;  %v7028_v6 = vmul.f32 1.442695, %v22625_v10  ;;  %v18361_v36 = vpop.eup %14336  ;;  %14356 = vpow2.f32 %v7004_v49  ;;  %v22634_v2 = vsub.f32 %v22633_v35, %v17711_v5  ;;  %v6602_v49 = vrot.slane %v18004_v28, 4  ;;  %v22642_v35 = vld [vmem:[#allocation144_spill] sm:$0xff] }
 0x5c6   : > { %22626 = vst [vmem:[#allocation157_spill] sm:$0xff] %v18361_v36  ;;  %v18366_v17 = vpop.eup %14338  ;;  %14358 = vpow2.f32 %v7012_v50  ;;  %v7044_v25 = vmul.f32 1.442695, %v22631_v53  ;;  %v7060_v50 = vmul.f32 1.442695, %v22637_v21  ;;  %v22640_v53 = vsub.f32 %v22639_v31, %v17711_v5  ;;  %v22648_v31 = vld [vmem:[#allocation150_spill] sm:$0xff] }
 0x5c7   : > { %22629 = vst [vmem:[#allocation160_spill] sm:$0xff] %v18366_v17  ;;  %v18371_v55 = vpop.eup %14340  ;;  %14360 = vpow2.f32 %v7020_v60  ;;  %v7052_v10 = vmul.f32 1.442695, %v22634_v2  ;;  %v22643_v2 = vsub.f32 %v22642_v35, %v17711_v5  ;;  %v22651_v35 = vld [vmem:[#allocation153_spill] sm:$0xff] }
 0x5c8   : > { %22632 = vst [vmem:[#allocation163_spill] sm:$0xff] %v18371_v55  ;;  %v18377_v36 = vpop.eup %14342  ;;  %14362 = vpow2.f32 %v7028_v6  ;;  %v7068_v60 = vmul.f32 1.442695, %v22640_v53  ;;  %v22645_v6 = vld [vmem:[#allocation147_spill] sm:$0xff]  ;;  %v22649_v53 = vsub.f32 %v22648_v31, %v17711_v5 }
 0x5c9   : > { %22635 = vst [vmem:[#allocation166_spill] sm:$0xff] %v18377_v36  ;;  %v18382_v17 = vpop.eup %14344  ;;  %14364 = vpow2.f32 %v7036_v20  ;;  %v7076_v34 = vmul.f32 1.442695, %v22643_v2  ;;  %v22646_v26 = vsub.f32 %v22645_v6, %v17711_v5  ;;  %v6603_v20 = vmax.f32 %v18004_v28, %v6602_v49 }
 0x5ca   : > { %22638 = vst [vmem:[#allocation169_spill] sm:$0xff] %v18382_v17  ;;  %v18387_v55 = vpop.eup %14346  ;;  %14366 = vpow2.f32 %v7044_v25  ;;  %v7092_v25 = vmul.f32 1.442695, %v22649_v53  ;;  %v22652_v2 = vsub.f32 %v22651_v35, %v17711_v5  ;;  %v22654_v28 = vsub.f32 %v22487_v48, %v18056_v24  ;;  %v22737_v5 = vld [vmem:[#allocation107_spill] sm:$0xff] }
 0x5cb   : > { %22641 = vst [vmem:[#allocation173_spill] sm:$0xff] %v18387_v55  ;;  %v18392_v36 = vpop.eup %14348  ;;  %14368 = vpow2.f32 %v7052_v10  ;;  %v7084_v21 = vmul.f32 1.442695, %v22646_v26  ;;  %v6604_v31 = vrot.slane %v6603_v20, 2  ;;  %v22658_v53 = vsub.f32 %v22491_v47, %v18056_v24 }
 0x5cc   : > { %22644 = vst [vmem:[#allocation177_spill] sm:$0xff] %v18392_v36  ;;  %v18398_v17 = vpop.eup %14350  ;;  %14370 = vpow2.f32 %v7060_v50  ;;  %v7100_v10 = vmul.f32 1.442695, %v22652_v2  ;;  %v6866_v49 = vmul.f32 1.442695, %v22654_v28  ;;  %v22656_v50 = vsub.f32 %v22488_v15, %v18056_v24 }
 0x5cd   : > { %22647 = vst [vmem:[#allocation181_spill] sm:$0xff] %v18398_v17  ;;  %v18403_v55 = vpop.eup %14352  ;;  %14372 = vpow2.f32 %v7068_v60  ;;  %v6882_v35 = vmul.f32 1.442695, %v22658_v53  ;;  %v22660_v48 = vsub.f32 %v22492_v16, %v18056_v24  ;;  %v22662_v15 = vsub.f32 %v22495_v7, %v18056_v24  ;;  %v22750_v17 = vld [vmem:[#allocation128_spill] sm:$0xff] }
 0x5ce   : > { %22650 = vst [vmem:[#allocation185_spill] sm:$0xff] %v18403_v55  ;;  %v18408_v36 = vpop.eup %14354  ;;  %14374 = vpow2.f32 %v7076_v34  ;;  %v6874_v26 = vmul.f32 1.442695, %v22656_v50  ;;  %v22664_v47 = vsub.f32 %v22496_v4, %v18056_v24  ;;  %v6605_v53 = vmax.f32 %v6603_v20, %v6604_v31 }
 0x5cf   : > { %22653 = vst [vmem:[#allocation189_spill] sm:$0xff] %v18408_v36  ;;  %v18413_v6 = vpop.eup %14356  ;;  %14376 = vpow2.f32 %v7084_v21  ;;  %v6890_v2 = vmul.f32 1.442695, %v22660_v48  ;;  %v6898_v28 = vmul.f32 1.442695, %v22662_v15  ;;  %v22666_v16 = vsub.f32 %v22499_v30, %v18056_v24 }
 0x5d0   : > { %22655 = vst [vmem:[#allocation193_spill] sm:$0xff] %v18413_v6  ;;  %v18418_v60 = vpop.eup %14358  ;;  %14378 = vpow2.f32 %v7092_v25  ;;  %v6906_v25 = vmul.f32 1.442695, %v22664_v47  ;;  %v22668_v7 = vsub.f32 %v22500_v54, %v18056_v24  ;;  %v22670_v4 = vsub.f32 %v22503_v13, %v18056_v24  ;;  %v22748_v6 = vld [vmem:[#allocation125_spill] sm:$0xff] }
 0x5d1   : > { %22657 = vst [vmem:[#allocation197_spill] sm:$0xff] %v18418_v60  ;;  %v18423_v34 = vpop.eup %14360  ;;  %14380 = vpow2.f32 %v7100_v10  ;;  %v6914_v48 = vmul.f32 1.442695, %v22666_v16  ;;  %v22672_v30 = vsub.f32 %v22504_v39, %v18056_v24  ;;  %v6606_v47 = vrot.slane %v6605_v53, 1  ;;  %v22744_v60 = vld [vmem:[#allocation119_spill] sm:$0xff] }
 0x5d2   : > { %22659 = vst [vmem:[#allocation201_spill] sm:$0xff] %v18423_v34  ;;  %v18428_v21 = vpop.eup %14362  ;;  %14382 = vpow2.f32 %v6866_v49  ;;  %v6922_v15 = vmul.f32 1.442695, %v22668_v7  ;;  %v6930_v20 = vmul.f32 1.442695, %v22670_v4  ;;  %v22674_v54 = vsub.f32 %v22507_v3, %v18056_v24  ;;  %v22743_v34 = vld [vmem:[#allocation116_spill] sm:$0xff] }
 0x5d3   : > { %22661 = vst [vmem:[#allocation99_spill] sm:$0xff] %v18428_v21  ;;  %v18433_v50 = vpop.eup %14364  ;;  %14384 = vpow2.f32 %v6874_v26  ;;  %v22676_v13 = vsub.f32 %v22508_v56, %v18056_v24  ;;  %v22678_v39 = vsub.f32 %v22511_v12, %v18056_v24  ;;  %v22680_v3 = vsub.f32 %v22512_v11, %v18056_v24 }
 0x5d4   : > { %22663 = vst [vmem:[#allocation102_spill] sm:$0xff] %v18433_v50  ;;  %v18438_v10 = vpop.eup %14366  ;;  %14386 = vpow2.f32 %v6882_v35  ;;  %v6938_v35 = vmul.f32 1.442695, %v22672_v30  ;;  %v6946_v16 = vmul.f32 1.442695, %v22674_v54  ;;  %v18481_v56 = vmax.f32 %v6605_v53, %v6606_v47 }
 0x5d5   : > { %22665 = vst [vmem:[#allocation105_spill] sm:$0xff] %v18438_v10  ;;  %v18443_v49 = vpop.eup %14368  ;;  %14388 = vpow2.f32 %v6890_v2  ;;  %v6954_v7 = vmul.f32 1.442695, %v22676_v13  ;;  %v6962_v4 = vmul.f32 1.442695, %v22678_v39  ;;  %v22684_v12 = vsub.f32 %v22516_v9, %v18056_v24  ;;  %v22736_v10 = vld [vmem:[#allocation104_spill] sm:$0xff] }
 0x5d6   : > { %22667 = vst [vmem:[#allocation108_spill] sm:$0xff] %v18443_v49  ;;  %v18448_v26 = vpop.eup %14370  ;;  %14390 = vpow2.f32 %v6898_v28  ;;  %22682 = vst [vmem:[#allocation126_spill] sm:$0xff] %v18481_v56  ;;  %v22686_v11 = vsub.f32 %v22520_v38, %v18056_v24  ;;  %v22689_v47 = vsub.f32 %v22524_v51, %v18056_v24  ;;  %v22692_v38 = vsub.f32 %v22528_v40, %v18056_v24 }
 0x5d7   : > { %22669 = vst [vmem:[#allocation111_spill] sm:$0xff] %v18448_v26  ;;  %v18453_v31 = vpop.eup %14372  ;;  %14392 = vpow2.f32 %v6906_v25 }
 0x5d8   : > { %22671 = vst [vmem:[#allocation114_spill] sm:$0xff] %v18453_v31  ;;  %v18458_v2 = vpop.eup %14374  ;;  %14394 = vpow2.f32 %v6914_v48  ;;  %v6970_v48 = vmul.f32 1.442695, %v22680_v3  ;;  %v7002_v3 = vmul.f32 1.442695, %v22686_v11  ;;  %v22730_v31 = vld [vmem:[#allocation95_spill] sm:$0xff] }
 0x5d9   : > { %22673 = vst [vmem:[#allocation269_spill] sm:$0xff] %v18458_v2  ;;  %v18463_v28 = vpop.eup %14376  ;;  %14396 = vpow2.f32 %v6922_v15  ;;  %v22681_v15 = vsub.f32 %v22515_v14, %v18056_v24  ;;  %v22688_v14 = vsub.f32 %v22523_v29, %v18056_v24  ;;  %v7018_v9 = vmul.f32 1.442695, %v22689_v47  ;;  %v22729_v2 = vld [vmem:[#allocation92_spill] sm:$0xff] }
 0x5da   : > { %22675 = vst [vmem:[#allocation117_spill] sm:$0xff] %v18463_v28  ;;  %v18468_v25 = vpop.eup %14378  ;;  %14398 = vpow2.f32 %v6930_v20  ;;  %v6986_v20 = vmul.f32 1.442695, %v22684_v12  ;;  %v7034_v12 = vmul.f32 1.442695, %v22692_v38  ;;  %v22698_v47 = vsub.f32 %v22539_v37, %v18056_v24 }
 0x5db   : > { %22677 = vst [vmem:[#allocation120_spill] sm:$0xff] %v18468_v25  ;;  %v18473_v30 = vpop.eup %14380  ;;  %14400 = vpow2.f32 %v6938_v35  ;;  %v6978_v54 = vmul.f32 1.442695, %v22681_v15  ;;  %v22685_v35 = vsub.f32 %v22519_v58, %v18056_v24  ;;  %v7010_v53 = vmul.f32 1.442695, %v22688_v14 }
 0x5dc   : > { %22679 = vst [vmem:[#allocation123_spill] sm:$0xff] %v18473_v30  ;;  %v18483_v13 = vpop.eup %14382  ;;  %14402 = vpow2.f32 %v6946_v16  ;;  %v22690_v16 = vsub.f32 %v22527_v52, %v18056_v24  ;;  %v22696_v52 = vsub.f32 %v22535_v22, %v18056_v24  ;;  %v22701_v22 = vsub.f32 %v22543_v61, %v18056_v24 }
 0x5dd   : > { %22683 = vst [vmem:[#allocation129_spill] sm:$0xff] %v18483_v13  ;;  %v6994_v39 = vmul.f32 1.442695, %v22685_v35  ;;  %v18494_v30 = vpop.eup %14384  ;;  %14404 = vpow2.f32 %v6954_v7  ;;  %v22693_v7 = vsub.f32 %v22531_v0, %v18056_v24  ;;  %v22694_v35 = vsub.f32 %v22532_v41, %v18056_v24 }
 0x5de   : > { %22687 = vst [vmem:[#allocation132_spill] sm:$0xff] %v18494_v30  ;;  %v7026_v58 = vmul.f32 1.442695, %v22690_v16  ;;  %v18505_v15 = vpop.eup %14386  ;;  %14406 = vpow2.f32 %v6962_v4  ;;  %v7058_v14 = vmul.f32 1.442695, %v22696_v52  ;;  %v22697_v4 = vsub.f32 %v22536_v57, %v18056_v24 }
 0x5df   : > { %22691 = vst [vmem:[#allocation135_spill] sm:$0xff] %v18505_v15  ;;  %v7042_v29 = vmul.f32 1.442695, %v22693_v7  ;;  %v7050_v51 = vmul.f32 1.442695, %v22694_v35  ;;  %v18516_v11 = vpop.eup %14388  ;;  %14408 = vpow2.f32 %v6970_v48  ;;  %v22700_v41 = vsub.f32 %v22540_v19, %v18056_v24 }
 0x5e0   : > { %22695 = vst [vmem:[#allocation138_spill] sm:$0xff] %v18516_v11  ;;  %v7066_v40 = vmul.f32 1.442695, %v22697_v4  ;;  %v7074_v0 = vmul.f32 1.442695, %v22698_v47  ;;  %v18527_v16 = vpop.eup %14390  ;;  %14410 = vpow2.f32 %v6978_v54  ;;  %v22702_v57 = vsub.f32 %v22544_v42, %v18056_v24 }
 0x5e1   : > { %22699 = vst [vmem:[#allocation141_spill] sm:$0xff] %v18527_v16  ;;  %v18532_v38 = vmul.f32 1.442695, %v22700_v41  ;;  %v18537_v48 = vmul.f32 1.442695, %v22701_v22  ;;  %v18544_v37 = vpop.eup %14392  ;;  %14412 = vpow2.f32 %v6986_v20  ;;  %v22704_v54 = vsub.f32 %v22547_v1, %v18056_v24 }
 0x5e2   : > { %v18542_v7 = vmul.f32 1.442695, %v22702_v57  ;;  %22703 = vst [vmem:[#allocation144_spill] sm:$0xff] %v18544_v37  ;;  %v22705_v19 = vsub.f32 %v22548_v44, %v18056_v24  ;;  %v22706_v61 = vsub.f32 %v22551_v18, %v18056_v24  ;;  %v18561_v42 = vpop.eup %14394  ;;  %14414 = vpow2.f32 %v6994_v39 }
 0x5e3   : > { %v18549_v35 = vmul.f32 1.442695, %v22704_v54  ;;  %22707 = vst [vmem:[#allocation147_spill] sm:$0xff] %v18561_v42  ;;  %v22708_v20 = vsub.f32 %v22552_v63, %v18056_v24  ;;  %v22709_v1 = vsub.f32 %v22555_v23, %v18056_v24  ;;  %v22710_v44 = vsub.f32 %v22556_v45, %v18056_v24  ;;  %v18578_v18 = vpop.eup %14396  ;;  %v22713_v23 = vld [vmem:[#allocation68_spill] sm:$0xff] }
 0x5e4   : > { %v18554_v52 = vmul.f32 1.442695, %v22705_v19  ;;  %v18559_v4 = vmul.f32 1.442695, %v22706_v61  ;;  %22711 = vst [vmem:[#allocation150_spill] sm:$0xff] %v18578_v18  ;;  %14416 = vpow2.f32 %v7002_v3  ;;  %v22712_v39 = vsub.f32 %v22559_v32, %v18056_v24  ;;  %v18589_v19 = vpop.eup %14398  ;;  %v22716_v3 = vld [vmem:[#allocation71_spill] sm:$0xff] }
 0x5e5   : > { %v18566_v47 = vmul.f32 1.442695, %v22708_v20  ;;  %v18571_v41 = vmul.f32 1.442695, %v22709_v1  ;;  %v18576_v22 = vmul.f32 1.442695, %v22710_v44  ;;  %v7445_v63 = vadd.f32 %v18494_v30, %v18483_v13  ;;  %v18600_v44 = vpop.eup %14400 }
 0x5e6   : > { %v18583_v57 = vmul.f32 1.442695, %v22712_v39  ;;  %22714 = vst [vmem:[#allocation153_spill] sm:$0xff] %v18589_v19  ;;  %14418 = vpow2.f32 %v7010_v53  ;;  %v22715_v45 = vsub.f32 %v22560_v8, %v18056_v24  ;;  %v22717_v32 = vld [vmem:[#allocation74_spill] sm:$0xff]  ;;  %22718 = vst [vmem:[#allocation68_spill] sm:$0xff] %v18600_v44  ;;  %v22719_v39 = vsub.f32 %v22563_v33, %v18056_v24  ;;  %v22720_v8 = vld [vmem:[#allocation77_spill] sm:$0xff]  ;;  %v18610_v25 = vpop.eup %14402 }
 0x5e7   : > { %14420 = vpow2.f32 %v7018_v9  ;;  %v7446_v53 = vadd.f32 %v18505_v15, %v7445_v63  ;;  %22721 = vst [vmem:[#allocation71_spill] sm:$0xff] %v18610_v25  ;;  %v22722_v20 = vld [vmem:[#allocation80_spill] sm:$0xff]  ;;  %v22723_v1 = vld [vmem:[#allocation83_spill] sm:$0xff]  ;;  %v22724_v9 = vld [vmem:[#allocation86_spill] sm:$0xff]  ;;  %v18618_v33 = vpop.eup %14404  ;;  %v22726_v63 = vsub.f32 %v22564_v27, %v18056_v24 }
 0x5e8   : > { %v18594_v61 = vmul.f32 1.442695, %v22715_v45  ;;  %v18605_v54 = vmul.f32 1.442695, %v22719_v39  ;;  %14422 = vpow2.f32 %v7026_v58  ;;  %22725 = vst [vmem:[#allocation74_spill] sm:$0xff] %v18618_v33  ;;  %v22727_v58 = vld [vmem:[#allocation89_spill] sm:$0xff]  ;;  %v18628_v28 = vpop.eup %14406 }
 0x5e9   : > { %14424 = vpow2.f32 %v7034_v12  ;;  %v18623_v39 = vmul.f32 1.442695, %v22726_v63  ;;  %v7447_v45 = vadd.f32 %v18516_v11, %v7446_v53  ;;  %22728 = vst [vmem:[#allocation77_spill] sm:$0xff] %v18628_v28  ;;  %v22731_v12 = vld [vmem:[#allocation98_spill] sm:$0xff]  ;;  %v18636_v27 = vpop.eup %14408  ;;  %v22733_v53 = vsub.f32 %v22567_v43, %v18056_v24 }
 0x5ea   : > { %14426 = vpow2.f32 %v7042_v29  ;;  %22732 = vst [vmem:[#allocation80_spill] sm:$0xff] %v18636_v27  ;;  %v22734_v29 = vld [vmem:[#allocation101_spill] sm:$0xff]  ;;  %v18646_v49 = vpop.eup %14410 }
 0x5eb   : > { %14428 = vpow2.f32 %v7050_v51  ;;  %v18641_v63 = vmul.f32 1.442695, %v22733_v53  ;;  %v7448_v26 = vadd.f32 %v18527_v16, %v7447_v45  ;;  %22735 = vst [vmem:[#allocation83_spill] sm:$0xff] %v18646_v49  ;;  %v22738_v51 = vld [vmem:[#allocation110_spill] sm:$0xff]  ;;  %v18654_v43 = vpop.eup %14412  ;;  %v22740_v45 = vsub.f32 %v22568_v59, %v18056_v24 }
 0x5ec   : > { %14430 = vpow2.f32 %v7058_v14  ;;  %22739 = vst [vmem:[#allocation86_spill] sm:$0xff] %v18654_v43  ;;  %v22741_v14 = vld [vmem:[#allocation113_spill] sm:$0xff]  ;;  %v18664_v21 = vpop.eup %14414 }
 0x5ed   : > { %14432 = vpow2.f32 %v7066_v40  ;;  %v18659_v53 = vmul.f32 1.442695, %v22740_v45  ;;  %v7449_v50 = vadd.f32 %v18544_v37, %v7448_v26  ;;  %22742 = vst [vmem:[#allocation89_spill] sm:$0xff] %v18664_v21  ;;  %v22745_v40 = vld [vmem:[#allocation122_spill] sm:$0xff]  ;;  %v22747_v26 = vsub.f32 %v22571_v46, %v18056_v24 }
 0x5ee   : > { %14434 = vpow2.f32 %v7074_v0  ;;  %v18672_v59 = vpop.eup %14416 }
 0x5ef   : > { %22746 = vst [vmem:[#allocation92_spill] sm:$0xff] %v18672_v59  ;;  %14436 = vpow2.f32 %v18532_v38  ;;  %v18678_v45 = vmul.f32 1.442695, %v22747_v26  ;;  %v7450_v0 = vadd.f32 %v18561_v42, %v7449_v50  ;;  %v22753_v50 = vld [vmem:[#allocation205_spill] sm:$0xff] }
 0x5f0   : > { %v18683_v37 = vpop.eup %14418  ;;  %14438 = vpow2.f32 %v18537_v48  ;;  %v22754_v36 = vsub.f32 %v22753_v50, %v18056_v24 }
 0x5f1   : > { %22749 = vst [vmem:[#allocation95_spill] sm:$0xff] %v18683_v37  ;;  %v18692_v26 = vpop.eup %14420  ;;  %14440 = vpow2.f32 %v18542_v7  ;;  %v7451_v48 = vadd.f32 %v18578_v18, %v7450_v0  ;;  %v22759_v0 = vld [vmem:[#allocation209_spill] sm:$0xff] }
 0x5f2   : > { %v18698_v42 = vmul.f32 1.442695, %v22754_v36  ;;  %v18703_v30 = vpop.eup %14422  ;;  %14442 = vpow2.f32 %v18549_v35  ;;  %v22760_v55 = vsub.f32 %v22759_v0, %v18056_v24 }
 0x5f3   : > { %v18712_v36 = vpop.eup %14424  ;;  %14444 = vpow2.f32 %v18554_v52  ;;  %v7452_v35 = vadd.f32 %v18589_v19, %v7451_v48  ;;  %v22767_v48 = vld [vmem:[#allocation213_spill] sm:$0xff] }
 0x5f4   : > { %v18718_v18 = vmul.f32 1.442695, %v22760_v55  ;;  %v18723_v46 = vpop.eup %14426  ;;  %14446 = vpow2.f32 %v18559_v4  ;;  %v22768_v38 = vsub.f32 %v22767_v48, %v18056_v24 }
 0x5f5   : > { %22762 = vst [vmem:[#allocation98_spill] sm:$0xff] %v18723_v46  ;;  %v18732_v55 = vpop.eup %14428  ;;  %14448 = vpow2.f32 %v18566_v47  ;;  %v7453_v15 = vadd.f32 %v18600_v44, %v7452_v35  ;;  %v22832_v47 = vld [vmem:[#allocation249_spill] sm:$0xff] }
 0x5f6   : > { %22766 = vst [vmem:[#allocation101_spill] sm:$0xff] %v18732_v55  ;;  %v7226_v19 = vmul.f32 1.442695, %v22768_v38  ;;  %v18741_v7 = vpop.eup %14430  ;;  %14450 = vpow2.f32 %v18571_v41  ;;  %v22775_v38 = vld [vmem:[#allocation217_spill] sm:$0xff] }
 0x5f7   : > { %22770 = vst [vmem:[#allocation104_spill] sm:$0xff] %v18741_v7  ;;  %v18750_v48 = vpop.eup %14432  ;;  %14452 = vpow2.f32 %v18576_v22  ;;  %v22776_v35 = vsub.f32 %v22775_v38, %v18056_v24  ;;  %v7454_v44 = vadd.f32 %v18610_v25, %v7453_v15  ;;  %v22783_v15 = vld [vmem:[#allocation221_spill] sm:$0xff] }
 0x5f8   : > { %22774 = vst [vmem:[#allocation107_spill] sm:$0xff] %v18750_v48  ;;  %v18759_v0 = vpop.eup %14434  ;;  %14454 = vpow2.f32 %v18583_v57 }
 0x5f9   : > { %v7234_v16 = vmul.f32 1.442695, %v22776_v35  ;;  %22778 = vst [vmem:[#allocation110_spill] sm:$0xff] %v18759_v0  ;;  %v18768_v38 = vpop.eup %14436  ;;  %14456 = vpow2.f32 %v18594_v61  ;;  %v22784_v35 = vsub.f32 %v22783_v15, %v18056_v24  ;;  %v7455_v25 = vadd.f32 %v18618_v33, %v7454_v44  ;;  %v22791_v44 = vld [vmem:[#allocation225_spill] sm:$0xff] }
 0x5fa   : > { %22782 = vst [vmem:[#allocation113_spill] sm:$0xff] %v18768_v38  ;;  %v18777_v50 = vpop.eup %14438  ;;  %14458 = vpow2.f32 %v18605_v54 }
 0x5fb   : > { %v7242_v4 = vmul.f32 1.442695, %v22784_v35  ;;  %22786 = vst [vmem:[#allocation116_spill] sm:$0xff] %v18777_v50  ;;  %v18786_v15 = vpop.eup %14440  ;;  %14460 = vpow2.f32 %v18623_v39  ;;  %v22792_v35 = vsub.f32 %v22791_v44, %v18056_v24  ;;  %v7456_v33 = vadd.f32 %v18628_v28, %v7455_v25  ;;  %v22799_v25 = vld [vmem:[#allocation229_spill] sm:$0xff] }
 0x5fc   : > { %22790 = vst [vmem:[#allocation119_spill] sm:$0xff] %v18786_v15  ;;  %v18795_v52 = vpop.eup %14442  ;;  %14462 = vpow2.f32 %v18641_v63 }
 0x5fd   : > { %v7250_v41 = vmul.f32 1.442695, %v22792_v35  ;;  %22794 = vst [vmem:[#allocation122_spill] sm:$0xff] %v18795_v52  ;;  %v18804_v44 = vpop.eup %14444  ;;  %14464 = vpow2.f32 %v18659_v53  ;;  %v22800_v35 = vsub.f32 %v22799_v25, %v18056_v24  ;;  %v7457_v28 = vadd.f32 %v18636_v27, %v7456_v33  ;;  %v22806_v33 = vld [vmem:[#allocation233_spill] sm:$0xff] }
 0x5fe   : > { %22798 = vst [vmem:[#allocation125_spill] sm:$0xff] %v18804_v44  ;;  %v18813_v11 = vpop.eup %14446  ;;  %14466 = vpow2.f32 %v18678_v45 }
 0x5ff   : > { %v7258_v57 = vmul.f32 1.442695, %v22800_v35  ;;  %22802 = vst [vmem:[#allocation128_spill] sm:$0xff] %v18813_v11  ;;  %v18822_v25 = vpop.eup %14448  ;;  %14468 = vpow2.f32 %v18698_v42  ;;  %v22807_v35 = vsub.f32 %v22806_v33, %v18056_v24  ;;  %v7458_v27 = vadd.f32 %v18646_v49, %v7457_v28  ;;  %v22813_v28 = vld [vmem:[#allocation237_spill] sm:$0xff] }
 0x600   : > { %v18831_v13 = vpop.eup %14450  ;;  %14470 = vpow2.f32 %v18718_v18 }
 0x601   : > { %v7266_v54 = vmul.f32 1.442695, %v22807_v35  ;;  %22809 = vst [vmem:[#allocation205_spill] sm:$0xff] %v18831_v13  ;;  %v18840_v33 = vpop.eup %14452  ;;  %14472 = vpow2.f32 %v7226_v19  ;;  %v22814_v35 = vsub.f32 %v22813_v28, %v18056_v24  ;;  %v7459_v45 = vadd.f32 %v18654_v43, %v7458_v27  ;;  %v22821_v28 = vld [vmem:[#allocation241_spill] sm:$0xff] }
 0x602   : > { %v18848_v13 = vpop.eup %14454  ;;  %14474 = vpow2.f32 %v7234_v16  ;;  %v22822_v27 = vsub.f32 %v22821_v28, %v18056_v24  ;;  %v22829_v28 = vld [vmem:[#allocation245_spill] sm:$0xff]  ;;  %v22833_v19 = vsub.f32 %v22832_v47, %v18056_v24 }
 0x603   : > { %v7274_v63 = vmul.f32 1.442695, %v22814_v35  ;;  %22816 = vst [vmem:[#allocation209_spill] sm:$0xff] %v18848_v13  ;;  %v18856_v61 = vpop.eup %14456  ;;  %14476 = vpow2.f32 %v7242_v4  ;;  %v7460_v49 = vadd.f32 %v18664_v21, %v7459_v45  ;;  %v22830_v45 = vsub.f32 %v22829_v28, %v18056_v24  ;;  %v22838_v16 = vld [vmem:[#allocation257_spill] sm:$0xff] }
 0x604   : > { %22820 = vst [vmem:[#allocation213_spill] sm:$0xff] %v18856_v61  ;;  %v7282_v35 = vmul.f32 1.442695, %v22822_v27  ;;  %v18864_v43 = vpop.eup %14458  ;;  %14478 = vpow2.f32 %v7250_v41  ;;  %v7298_v53 = vmul.f32 1.442695, %v22833_v19  ;;  %v22839_v41 = vsub.f32 %v22838_v16, %v18056_v24  ;;  %v22841_v47 = vld [vmem:[#allocation261_spill] sm:$0xff] }
 0x605   : > { %22824 = vst [vmem:[#allocation217_spill] sm:$0xff] %v18864_v43  ;;  %v18872_v39 = vpop.eup %14460  ;;  %14480 = vpow2.f32 %v7258_v57  ;;  %v7290_v27 = vmul.f32 1.442695, %v22830_v45  ;;  %v7461_v18 = vadd.f32 %v18672_v59, %v7460_v49  ;;  %v22835_v57 = vld [vmem:[#allocation253_spill] sm:$0xff]  ;;  %v22842_v19 = vsub.f32 %v22841_v47, %v18056_v24 }
 0x606   : > { %22828 = vst [vmem:[#allocation221_spill] sm:$0xff] %v18872_v39  ;;  %v18880_v21 = vpop.eup %14462  ;;  %14482 = vpow2.f32 %v7266_v54  ;;  %v22836_v4 = vsub.f32 %v22835_v57, %v18056_v24  ;;  %v7314_v54 = vmul.f32 1.442695, %v22839_v41  ;;  %v22847_v16 = vsub.f32 %v22610_v62, %v18056_v24 }
 0x607   : > { %v18885_v22 = vpop.eup %14464  ;;  %14484 = vpow2.f32 %v7274_v63  ;;  %v7462_v45 = vadd.f32 %v18683_v37, %v7461_v18  ;;  %v7322_v63 = vmul.f32 1.442695, %v22842_v19  ;;  %v22844_v18 = vld [vmem:[#allocation265_spill] sm:$0xff] }
 0x608   : > { %22834 = vst [vmem:[#allocation225_spill] sm:$0xff] %v18885_v22  ;;  %v7306_v28 = vmul.f32 1.442695, %v22836_v4  ;;  %v18891_v49 = vpop.eup %14466  ;;  %14486 = vpow2.f32 %v7282_v35  ;;  %v22845_v4 = vsub.f32 %v22844_v18, %v18056_v24  ;;  %v22852_v18 = vld [vmem:[#allocation277_spill] sm:$0xff] }
 0x609   : > { %22837 = vst [vmem:[#allocation229_spill] sm:$0xff] %v18891_v49  ;;  %v18896_v42 = vpop.eup %14468  ;;  %14488 = vpow2.f32 %v7290_v27  ;;  %v7463_v59 = vadd.f32 %v18692_v26, %v7462_v45  ;;  %v7338_v27 = vmul.f32 1.442695, %v22847_v16  ;;  %v22849_v45 = vld [vmem:[#allocation273_spill] sm:$0xff] }
 0x60a   : > { %22840 = vst [vmem:[#allocation233_spill] sm:$0xff] %v18896_v42  ;;  %v18902_v57 = vpop.eup %14470  ;;  %14490 = vpow2.f32 %v7298_v53  ;;  %v7330_v35 = vmul.f32 1.442695, %v22845_v4  ;;  %v22850_v19 = vsub.f32 %v22849_v45, %v18056_v24  ;;  %v22853_v4 = vsub.f32 %v22852_v18, %v18056_v24  ;;  %v22858_v45 = vld [vmem:[#allocation289_spill] sm:$0xff] }
 0x60b   : > { %22843 = vst [vmem:[#allocation237_spill] sm:$0xff] %v18902_v57  ;;  %v18907_v37 = vpop.eup %14472  ;;  %14492 = vpow2.f32 %v7306_v28  ;;  %v7464_v41 = vadd.f32 %v18703_v30, %v7463_v59  ;;  %v22855_v59 = vld [vmem:[#allocation281_spill] sm:$0xff] }
 0x60c   : > { %22846 = vst [vmem:[#allocation241_spill] sm:$0xff] %v18907_v37  ;;  %v18913_v47 = vpop.eup %14474  ;;  %14494 = vpow2.f32 %v7314_v54  ;;  %v7346_v53 = vmul.f32 1.442695, %v22850_v19  ;;  %v7354_v28 = vmul.f32 1.442695, %v22853_v4  ;;  %v22856_v16 = vsub.f32 %v22855_v59, %v18056_v24 }
 0x60d   : > { %22848 = vst [vmem:[#allocation245_spill] sm:$0xff] %v18913_v47  ;;  %v18918_v57 = vpop.eup %14476  ;;  %14496 = vpow2.f32 %v7322_v63  ;;  %v7465_v37 = vadd.f32 %v18712_v36, %v7464_v41  ;;  %v22859_v19 = vsub.f32 %v22858_v45, %v18056_v24  ;;  %v22861_v41 = vsub.f32 %v22713_v23, %v18481_v56  ;;  %v22867_v23 = vld [vmem:[#allocation171_spill] sm:$0xff] }
 0x60e   : > { %22851 = vst [vmem:[#allocation249_spill] sm:$0xff] %v18918_v57  ;;  %v18924_v62 = vpop.eup %14478  ;;  %14498 = vpow2.f32 %v7330_v35  ;;  %v7362_v54 = vmul.f32 1.442695, %v22856_v16 }
 0x60f   : > { %22854 = vst [vmem:[#allocation253_spill] sm:$0xff] %v18924_v62  ;;  %v18929_v47 = vpop.eup %14480  ;;  %14500 = vpow2.f32 %v7338_v27  ;;  %v7370_v63 = vmul.f32 1.442695, %v22859_v19  ;;  %v7466_v57 = vadd.f32 %v18723_v46, %v7465_v37  ;;  %v6870_v35 = vmul.f32 1.442695, %v22861_v41  ;;  %v22868_v19 = vld [vmem:[#allocation287_spill] sm:$0xff] }
 0x610   : > { %22857 = vst [vmem:[#allocation257_spill] sm:$0xff] %v18929_v47  ;;  %v18935_v18 = vpop.eup %14482  ;;  %14502 = vpow2.f32 %v7346_v53  ;;  %v22863_v27 = vsub.f32 %v22716_v3, %v18481_v56  ;;  %v22865_v37 = vsub.f32 %v22717_v32, %v18481_v56  ;;  %v22869_v41 = vsub.f32 %v22867_v23, %v22868_v19 }
 0x611   : > { %22860 = vst [vmem:[#allocation261_spill] sm:$0xff] %v18935_v18  ;;  %v18940_v4 = vpop.eup %14484  ;;  %14504 = vpow2.f32 %v7354_v28  ;;  %v7467_v59 = vadd.f32 %v18732_v55, %v7466_v57  ;;  %v22871_v3 = vsub.f32 %v22720_v8, %v18481_v56  ;;  %v22881_v8 = vld [vmem:[#allocation183_spill] sm:$0xff] }
 0x612   : > { %22862 = vst [vmem:[#allocation265_spill] sm:$0xff] %v18940_v4  ;;  %v6878_v16 = vmul.f32 1.442695, %v22863_v27  ;;  %v18946_v24 = vpop.eup %14486  ;;  %14506 = vpow2.f32 %v7362_v54  ;;  %v6886_v53 = vmul.f32 1.442695, %v22865_v37  ;;  %v22873_v54 = vld [vmem:[#allocation175_spill] sm:$0xff] }
 0x613   : > { %22864 = vst [vmem:[#allocation273_spill] sm:$0xff] %v18946_v24  ;;  %v18951_v45 = vpop.eup %14488  ;;  %v18956_v4 = vmul.f32 1.442695, %v22869_v41  ;;  %14508 = vpow2.f32 %v7370_v63  ;;  %v7468_v57 = vadd.f32 %v18741_v7, %v7467_v59  ;;  %v6894_v28 = vmul.f32 1.442695, %v22871_v3 }
 0x614   : > { %22866 = vst [vmem:[#allocation277_spill] sm:$0xff] %v18951_v45  ;;  %v18962_v27 = vpop.eup %14490  ;;  %v22874_v32 = vsub.f32 %v22873_v54, %v22868_v19  ;;  %v22876_v45 = vld [vmem:[#allocation179_spill] sm:$0xff]  ;;  %14510 = vpow2.f32 %v6870_v35  ;;  %v22879_v63 = vsub.f32 %v22722_v20, %v18481_v56  ;;  %v22882_v3 = vsub.f32 %v22881_v8, %v22868_v19 }
 0x615   : > { %22870 = vst [vmem:[#allocation281_spill] sm:$0xff] %v18956_v4  ;;  %22872 = vst [vmem:[#allocation289_spill] sm:$0xff] %v18962_v27  ;;  %v22877_v24 = vsub.f32 %v22876_v45, %v22868_v19  ;;  %v18977_v41 = vpop.eup %14492  ;;  %v7469_v54 = vadd.f32 %v18750_v48, %v7468_v57  ;;  %14512 = vpow2.f32 %v6878_v16  ;;  %v22884_v45 = vsub.f32 %v22723_v1, %v18481_v56  ;;  %v22886_v35 = vld [vmem:[#allocation187_spill] sm:$0xff] }
 0x616   : > { %v18967_v37 = vmul.f32 1.442695, %v22874_v32  ;;  %v6902_v59 = vmul.f32 1.442695, %v22879_v63  ;;  %22880 = vst [vmem:[#allocation179_spill] sm:$0xff] %v18977_v41  ;;  %v18988_v32 = vpop.eup %14494  ;;  %v22887_v20 = vsub.f32 %v22886_v35, %v22868_v19  ;;  %14514 = vpow2.f32 %v6886_v53 }
 0x617   : > { %v18972_v23 = vmul.f32 1.442695, %v22877_v24  ;;  %v18982_v4 = vmul.f32 1.442695, %v22882_v3  ;;  %v6910_v24 = vmul.f32 1.442695, %v22884_v45  ;;  %v22889_v8 = vsub.f32 %v22724_v9, %v18481_v56 }
 0x618   : > { %22875 = vst [vmem:[#allocation171_spill] sm:$0xff] %v18967_v37  ;;  %22885 = vst [vmem:[#allocation290_spill] sm:$0xff] %v18988_v32  ;;  %v18993_v63 = vmul.f32 1.442695, %v22887_v20  ;;  %v22890_v57 = vsub.f32 %v22727_v58, %v18481_v56  ;;  %v7470_v1 = vadd.f32 %v18759_v0, %v7469_v54  ;;  %14516 = vpow2.f32 %v6894_v28  ;;  %v22931_v37 = vld [vmem:[#allocation161_spill] sm:$0xff]  ;;  %v22958_v0 = vld [vmem:[#allocation72_spill] sm:$0xff] }
 0x619   : > { %22878 = vst [vmem:[#allocation175_spill] sm:$0xff] %v18972_v23  ;;  %22883 = vst [vmem:[#allocation183_spill] sm:$0xff] %v18982_v4  ;;  %v6918_v3 = vmul.f32 1.442695, %v22889_v8  ;;  %v19001_v4 = vpop.eup %14496  ;;  %v22892_v45 = vsub.f32 %v22729_v2, %v18481_v56  ;;  %v22893_v53 = vsub.f32 %v22730_v31, %v18481_v56  ;;  %14518 = vpow2.f32 %v6902_v59 }
 0x61a   : > { %22888 = vst [vmem:[#allocation187_spill] sm:$0xff] %v18993_v63  ;;  %v6926_v16 = vmul.f32 1.442695, %v22890_v57  ;;  %22891 = vst [vmem:[#allocation291_spill] sm:$0xff] %v19001_v4  ;;  %v19010_v63 = vpop.eup %14498  ;;  %v22895_v9 = vsub.f32 %v22731_v12, %v18481_v56  ;;  %v22896_v8 = vsub.f32 %v22734_v29, %v18481_v56  ;;  %v22897_v28 = vsub.f32 %v22736_v10, %v18481_v56 }
 0x61b   : > { %v6934_v35 = vmul.f32 1.442695, %v22892_v45  ;;  %v6942_v20 = vmul.f32 1.442695, %v22893_v53  ;;  %22894 = vst [vmem:[#allocation292_spill] sm:$0xff] %v19010_v63  ;;  %v19021_v57 = vpop.eup %14500  ;;  %v7471_v31 = vadd.f32 %v18768_v38, %v7470_v1  ;;  %14520 = vpow2.f32 %v6910_v24  ;;  %v22929_v63 = vld [vmem:[#allocation158_spill] sm:$0xff] }
 0x61c   : > { %v6950_v58 = vmul.f32 1.442695, %v22895_v9  ;;  %v6958_v54 = vmul.f32 1.442695, %v22896_v8  ;;  %v6966_v2 = vmul.f32 1.442695, %v22897_v28  ;;  %v22899_v59 = vsub.f32 %v22737_v5, %v18481_v56  ;;  %v19030_v9 = vpop.eup %14502 }
 0x61d   : > { %22898 = vst [vmem:[#allocation293_spill] sm:$0xff] %v19021_v57  ;;  %v22900_v12 = vsub.f32 %v22738_v51, %v18481_v56  ;;  %22901 = vst [vmem:[#allocation294_spill] sm:$0xff] %v19030_v9  ;;  %14522 = vpow2.f32 %v6918_v3  ;;  %v22902_v10 = vsub.f32 %v22741_v14, %v18481_v56  ;;  %v22903_v8 = vsub.f32 %v22743_v34, %v18481_v56  ;;  %v19041_v28 = vpop.eup %14504 }
 0x61e   : > { %v6974_v45 = vmul.f32 1.442695, %v22899_v59  ;;  %v22904_v24 = vsub.f32 %v22744_v60, %v18481_v56  ;;  %22905 = vst [vmem:[#allocation295_spill] sm:$0xff] %v19041_v28  ;;  %v7472_v51 = vadd.f32 %v18777_v50, %v7471_v31  ;;  %14524 = vpow2.f32 %v6926_v16  ;;  %v22912_v16 = vld [vmem:[#allocation134_spill] sm:$0xff] }
 0x61f   : > { %v6982_v53 = vmul.f32 1.442695, %v22900_v12  ;;  %v6990_v29 = vmul.f32 1.442695, %v22902_v10  ;;  %v6998_v1 = vmul.f32 1.442695, %v22903_v8  ;;  %v22906_v3 = vsub.f32 %v22745_v40, %v18481_v56  ;;  %v19050_v10 = vpop.eup %14506 }
 0x620   : > { %v7006_v5 = vmul.f32 1.442695, %v22904_v24  ;;  %v22907_v14 = vsub.f32 %v22748_v6, %v18481_v56  ;;  %22908 = vst [vmem:[#allocation296_spill] sm:$0xff] %v19050_v10  ;;  %14526 = vpow2.f32 %v6934_v35  ;;  %v22909_v60 = vsub.f32 %v22750_v17, %v18481_v56  ;;  %v22910_v8 = vld [vmem:[#allocation131_spill] sm:$0xff]  ;;  %v19065_v19 = vpop.eup %14508  ;;  %v22915_v35 = vld [vmem:[#allocation137_spill] sm:$0xff] }
 0x621   : > { %v7014_v59 = vmul.f32 1.442695, %v22906_v3  ;;  %v22911_v24 = vsub.f32 %v22910_v8, %v18481_v56  ;;  %v22913_v40 = vsub.f32 %v22912_v16, %v18481_v56  ;;  %22914 = vst [vmem:[#allocation131_spill] sm:$0xff] %v19065_v19  ;;  %v7473_v6 = vadd.f32 %v18786_v15, %v7472_v51  ;;  %v14511_v10 = vpop.eup %14510  ;;  %v22919_v16 = vld [vmem:[#allocation143_spill] sm:$0xff]  ;;  %v22921_v19 = vld [vmem:[#allocation146_spill] sm:$0xff]  ;;  %v22956_v15 = vld [vmem:[#allocation132_spill] sm:$0xff] }
 0x622   : > { %v7022_v12 = vmul.f32 1.442695, %v22907_v14  ;;  %v7030_v34 = vmul.f32 1.442695, %v22909_v60  ;;  %14528 = vpow2.f32 %v6942_v20  ;;  %v22916_v14 = vsub.f32 %v22915_v35, %v18481_v56  ;;  %v22917_v60 = vld [vmem:[#allocation140_spill] sm:$0xff]  ;;  %v22923_v35 = vld [vmem:[#allocation149_spill] sm:$0xff] }
 0x623   : > { %v19058_v31 = vmul.f32 1.442695, %v22911_v24  ;;  %v19063_v3 = vmul.f32 1.442695, %v22913_v40  ;;  %v22918_v8 = vsub.f32 %v22917_v60, %v18481_v56  ;;  %14530 = vpow2.f32 %v6950_v58  ;;  %v14513_v60 = vpop.eup %14512  ;;  %v22925_v58 = vld [vmem:[#allocation152_spill] sm:$0xff] }
 0x624   : > { %v19071_v17 = vmul.f32 1.442695, %v22916_v14  ;;  %v22920_v40 = vsub.f32 %v22919_v16, %v18481_v56  ;;  %v22922_v20 = vsub.f32 %v22921_v19, %v18481_v56  ;;  %v22924_v14 = vsub.f32 %v22923_v35, %v18481_v56 }
 0x625   : > { %v19076_v24 = vmul.f32 1.442695, %v22918_v8  ;;  %v7474_v8 = vadd.f32 %v18795_v52, %v7473_v6  ;;  %14532 = vpow2.f32 %v6958_v54  ;;  %v22926_v23 = vsub.f32 %v22925_v58, %v18481_v56  ;;  %v22933_v58 = vld [vmem:[#allocation164_spill] sm:$0xff] }
 0x626   : > { %v19081_v28 = vmul.f32 1.442695, %v22920_v40  ;;  %v19086_v51 = vmul.f32 1.442695, %v22922_v20  ;;  %v19091_v9 = vmul.f32 1.442695, %v22924_v14  ;;  %v14515_v20 = vpop.eup %14514  ;;  %14534 = vpow2.f32 %v6966_v2 }
 0x627   : > { %v19097_v16 = vmul.f32 1.442695, %v22926_v23  ;;  %v22927_v40 = vld [vmem:[#allocation155_spill] sm:$0xff]  ;;  %v22930_v35 = vsub.f32 %v22929_v63, %v18481_v56  ;;  %v22932_v54 = vsub.f32 %v22931_v37, %v18481_v56  ;;  %v22934_v23 = vsub.f32 %v22933_v58, %v18481_v56  ;;  %v22939_v58 = vld [vmem:[#allocation174_spill] sm:$0xff] }
 0x628   : > { %v22928_v57 = vsub.f32 %v22927_v40, %v18481_v56  ;;  %v14517_v40 = vpop.eup %14516  ;;  %14536 = vpow2.f32 %v6974_v45  ;;  %v22935_v2 = vld [vmem:[#allocation167_spill] sm:$0xff] }
 0x629   : > { %v19107_v14 = vmul.f32 1.442695, %v22930_v35  ;;  %v19112_v6 = vmul.f32 1.442695, %v22932_v54  ;;  %v19117_v4 = vmul.f32 1.442695, %v22934_v23  ;;  %v22936_v32 = vsub.f32 %v22935_v2, %v18481_v56  ;;  %v19130_v54 = vpop.eup %14518 }
 0x62a   : > { %v19102_v19 = vmul.f32 1.442695, %v22928_v57  ;;  %v7475_v57 = vadd.f32 %v18804_v44, %v7474_v8  ;;  %v22937_v35 = vld [vmem:[#allocation170_spill] sm:$0xff]  ;;  %14538 = vpow2.f32 %v6982_v53  ;;  %v22940_v23 = vsub.f32 %v22939_v58, %v18481_v56 }
 0x62b   : > { %v19123_v63 = vmul.f32 1.442695, %v22936_v32  ;;  %v22938_v41 = vsub.f32 %v22937_v35, %v18481_v56  ;;  %v22941_v8 = vld [vmem:[#allocation178_spill] sm:$0xff]  ;;  %14540 = vpow2.f32 %v6990_v29 }
 0x62c   : > { %v19135_v27 = vmul.f32 1.442695, %v22940_v23  ;;  %v22942_v45 = vsub.f32 %v22941_v8, %v18481_v56  ;;  %v22943_v32 = vld [vmem:[#allocation182_spill] sm:$0xff]  ;;  %v7476_v35 = vadd.f32 %v18813_v11, %v7475_v57  ;;  %14542 = vpow2.f32 %v6998_v1 }
 0x62d   : > { %v19128_v37 = vmul.f32 1.442695, %v22938_v41  ;;  %v22944_v2 = vsub.f32 %v22943_v32, %v18481_v56  ;;  %v19147_v41 = vpop.eup %14520  ;;  %v22945_v53 = vld [vmem:[#allocation186_spill] sm:$0xff]  ;;  %14544 = vpow2.f32 %v7006_v5  ;;  %v7655_v1 = vpack.c.bf16 %v14513_v60, %v14511_v10  ;;  %v22962_v5 = vld [vmem:[#allocation135_spill] sm:$0xff] }
 0x62e   : > { %v19140_v18 = vmul.f32 1.442695, %v22942_v45  ;;  %v22946_v58 = vsub.f32 %v22945_v53, %v18481_v56  ;;  %v22947_v44 = vld [vmem:[#allocation190_spill] sm:$0xff]  ;;  %v19160_v52 = vpop.eup %14522  ;;  %v7583_v53 = vadd.f32 %v14513_v60, %v14511_v10  ;;  %14546 = vpow2.f32 %v7014_v59 }
 0x62f   : > { %v19145_v47 = vmul.f32 1.442695, %v22944_v2  ;;  %v22948_v8 = vsub.f32 %v22947_v44, %v18481_v56  ;;  %v22949_v32 = vld [vmem:[#allocation194_spill] sm:$0xff]  ;;  %v7477_v44 = vadd.f32 %v18822_v25, %v7476_v35  ;;  %14548 = vpow2.f32 %v7022_v12  ;;  %7874 = vmatprep.subr.bf16.mxu1 %v7655_v1 }
 0x630   : > { %v19153_v23 = vmul.f32 1.442695, %v22946_v58  ;;  %v22950_v2 = vsub.f32 %v22949_v32, %v18481_v56  ;;  %v22952_v57 = vld [vmem:[#allocation198_spill] sm:$0xff]  ;;  %v19172_v58 = vpop.eup %14524  ;;  %v7584_v32 = vadd.f32 %v14515_v20, %v7583_v53  ;;  %v7659_v60 = vpack.c.bf16 %v14517_v40, %v14515_v20 }
 0x631   : > { %v19158_v45 = vmul.f32 1.442695, %v22948_v8  ;;  %v22953_v29 = vsub.f32 %v22952_v57, %v18481_v56  ;;  %v22955_v8 = vld [vmem:[#allocation129_spill] sm:$0xff]  ;;  %v19177_v38 = vpop.eup %14526  ;;  %v22959_v57 = vld [vmem:[#allocation136_spill] sm:$0xff]  ;;  %v7956_v59 = vld [vmem:[%s21223_s7] sm:$0x1]  ;;  %14550 = vpow2.f32 %v7030_v34 }
 0x632   : > { %v19165_v62 = vmul.f32 1.442695, %v22950_v2  ;;  %v7653_v50 = vpack.c.bf16 %v22956_v15, %v22955_v8  ;;  %v22957_v2 = vld [vmem:[#allocation69_spill] sm:$0xff]  ;;  %v22963_v15 = vld [vmem:[#allocation138_spill] sm:$0xff]  ;;  %v7585_v1 = vadd.f32 %v14517_v40, %v7584_v32  ;;  %14552 = vpow2.f32 %v19058_v31  ;;  %14224 = vpush %v7956_v59 }
 0x633   : > { %v19170_v11 = vmul.f32 1.442695, %v22953_v29  ;;  %v7652_v48 = vpack.c.bf16 %v22958_v0, %v22957_v2  ;;  %v22960_v29 = vld [vmem:[#allocation139_spill] sm:$0xff]  ;;  %v7657_v10 = vpack.c.bf16 %v22963_v15, %v22962_v5  ;;  %v22964_v53 = vld [vmem:[#allocation202_spill] sm:$0xff]  ;;  %v22968_v34 = vld [vmem:[#allocation141_spill] sm:$0xff]  ;;  %14554 = vpow2.f32 %v19063_v3 }
 0x634   : > { %22951 = vst [vmem:[#allocation134_spill] sm:$0xff] %v19165_v62  ;;  %v7654_v7 = vpack.c.bf16 %v22960_v29, %v22959_v57  ;;  %v22961_v62 = vld [vmem:[#allocation205_spill] sm:$0xff]  ;;  %7792 = vmatprep.subr.bf16.mxu0 %v7653_v50  ;;  %v22965_v8 = vsub.f32 %v22964_v53, %v18481_v56  ;;  %v22969_v15 = vld [vmem:[#allocation144_spill] sm:$0xff]  ;;  %v22971_v40 = vld [vmem:[#allocation78_spill] sm:$0xff]  ;;  %14556 = vpow2.f32 %v19071_v17  ;;  %v7667_v3 = vpack.c.bf16 %v19172_v58, %v19160_v52 }
 0x635   : > { %22954 = vst [vmem:[#allocation137_spill] sm:$0xff] %v19170_v11  ;;  %v19183_v11 = vpop.eup %14528  ;;  %v7478_v55 = vadd.f32 %v22961_v62, %v7477_v44  ;;  %v22966_v44 = vld [vmem:[#allocation206_spill] sm:$0xff]  ;;  %7793 = vmatpush1.bf16.msra.mxu0 %v7652_v48  ;;  %v7661_v53 = vpack.c.bf16 %v22969_v15, %v22968_v34  ;;  %v22970_v48 = vld [vmem:[#allocation75_spill] sm:$0xff]  ;;  %14558 = vpow2.f32 %v19076_v24  ;;  %v22980_v24 = vld [vmem:[#allocation153_spill] sm:$0xff] }
 0x636   : > { %v19191_v35 = vpop.eup %14530  ;;  %v19196_v29 = vmul.f32 1.442695, %v22965_v8  ;;  %v22967_v50 = vsub.f32 %v22966_v44, %v18481_v56  ;;  %7875 = vmatpush1.bf16.msra.mxu1 %v7654_v7  ;;  %7794 = vmatprep.subr.bf16.mxu0 %v7657_v10  ;;  %v7663_v8 = vpack.c.bf16 %v19147_v41, %v19130_v54  ;;  %v7586_v7 = vadd.f32 %v19130_v54, %v7585_v1  ;;  %v22974_v34 = vld [vmem:[#allocation147_spill] sm:$0xff]  ;;  %v22975_v15 = vld [vmem:[#allocation150_spill] sm:$0xff]  ;;  %v23074_v62 = vld [vmem:[#allocation265_spill] sm:$0xff] }
 0x637   : > { %v19203_v20 = vpop.eup %14532  ;;  %v7479_v5 = vadd.f32 %v18840_v33, %v7478_v55  ;;  %7876 = vmatprep.subr.bf16.mxu1 %v7659_v60  ;;  %v7656_v32 = vpack.c.bf16 %v22971_v40, %v22970_v48  ;;  %v22972_v55 = vld [vmem:[#allocation142_spill] sm:$0xff]  ;;  %v7665_v57 = vpack.c.bf16 %v22975_v15, %v22974_v34  ;;  %14560 = vpow2.f32 %v19081_v28  ;;  %v22985_v48 = vld [vmem:[#allocation151_spill] sm:$0xff] }
 0x638   : > { %v19201_v12 = vmul.f32 1.442695, %v22967_v50  ;;  %v19211_v44 = vpop.eup %14534  ;;  %v22973_v50 = vld [vmem:[#allocation145_spill] sm:$0xff]  ;;  %v22976_v1 = vld [vmem:[#allocation210_spill] sm:$0xff]  ;;  %v7587_v17 = vadd.f32 %v19147_v41, %v7586_v7  ;;  %14562 = vpow2.f32 %v19086_v51  ;;  %v7675_v51 = vpack.c.bf16 %v19203_v20, %v19191_v35 }
 0x639   : > { %v7658_v31 = vpack.c.bf16 %v22973_v50, %v22972_v55  ;;  %v19219_v10 = vpop.eup %14536  ;;  %v7480_v60 = vadd.f32 %v18848_v13, %v7479_v5  ;;  %v22977_v50 = vsub.f32 %v22976_v1, %v18481_v56  ;;  %v22978_v55 = vld [vmem:[#allocation214_spill] sm:$0xff]  ;;  %7795 = vmatpush1.bf16.msra.mxu0 %v7656_v32  ;;  %v22982_v7 = vld [vmem:[#allocation81_spill] sm:$0xff]  ;;  %v22983_v32 = vld [vmem:[#allocation84_spill] sm:$0xff]  ;;  %14564 = vpow2.f32 %v19091_v9 }
 0x63a   : > { %v19227_v54 = vpop.eup %14538  ;;  %v22979_v5 = vsub.f32 %v22978_v55, %v18481_v56  ;;  %7796 = vmatprep.subr.bf16.mxu0 %v7661_v53  ;;  %v7671_v55 = vpack.c.bf16 %v19183_v11, %v19177_v38  ;;  %v7588_v41 = vadd.f32 %v19160_v52, %v7587_v17  ;;  %14566 = vpow2.f32 %v19097_v16  ;;  %v22988_v52 = vld [vmem:[#allocation218_spill] sm:$0xff]  ;;  %v22992_v16 = vld [vmem:[#allocation77_spill] sm:$0xff] }
 0x63b   : > { %v19233_v59 = vmul.f32 1.442695, %v22977_v50  ;;  %7877 = vmatpush1.bf16.msra.mxu1 %v7658_v31  ;;  %v19241_v34 = vpop.eup %14540  ;;  %v7481_v15 = vadd.f32 %v18856_v61, %v7480_v60  ;;  %v22981_v50 = vld [vmem:[#allocation68_spill] sm:$0xff]  ;;  %v7660_v31 = vpack.c.bf16 %v22983_v32, %v22982_v7  ;;  %v22989_v17 = vsub.f32 %v22988_v52, %v18481_v56  ;;  %v22997_v7 = vld [vmem:[#allocation157_spill] sm:$0xff] }
 0x63c   : > { %v19238_v40 = vmul.f32 1.442695, %v22979_v5  ;;  %7878 = vmatprep.subr.bf16.mxu1 %v7663_v8  ;;  %v7669_v1 = vpack.c.bf16 %v22981_v50, %v22980_v24  ;;  %v19249_v5 = vpop.eup %14542  ;;  %v22984_v60 = vld [vmem:[#allocation148_spill] sm:$0xff]  ;;  %v22986_v24 = vld [vmem:[#allocation71_spill] sm:$0xff]  ;;  %v22987_v50 = vld [vmem:[#allocation74_spill] sm:$0xff]  ;;  %v7589_v9 = vadd.f32 %v19172_v58, %v7588_v41  ;;  %14568 = vpow2.f32 %v19102_v19 }
 0x63d   : > { %v7662_v28 = vpack.c.bf16 %v22985_v48, %v22984_v60  ;;  %v19257_v53 = vpop.eup %14544  ;;  %v7482_v8 = vadd.f32 %v18864_v43, %v7481_v15  ;;  %v7673_v0 = vpack.c.bf16 %v22987_v50, %v22986_v24  ;;  %v19271_v48 = vmul.f32 1.442695, %v22989_v17  ;;  %v22990_v60 = vld [vmem:[#allocation222_spill] sm:$0xff]  ;;  %7797 = vmatpush1.bf16.msra.mxu0 %v7660_v31  ;;  %v22993_v52 = vld [vmem:[#allocation80_spill] sm:$0xff]  ;;  %v22994_v41 = vld [vmem:[#allocation87_spill] sm:$0xff] }
 0x63e   : > { %v19265_v2 = vpop.eup %14546  ;;  %v22991_v15 = vsub.f32 %v22990_v60, %v18481_v56  ;;  %7798 = vmatprep.subr.bf16.mxu0 %v7665_v57  ;;  %14570 = vpow2.f32 %v19107_v14  ;;  %v7590_v58 = vadd.f32 %v19177_v38, %v7589_v9  ;;  %v22995_v31 = vld [vmem:[#allocation90_spill] sm:$0xff]  ;;  %v22998_v17 = vld [vmem:[#allocation83_spill] sm:$0xff] }
 0x63f   : > { %7879 = vmatpush1.bf16.msra.mxu1 %v7662_v28  ;;  %v19279_v24 = vpop.eup %14548  ;;  %v7483_v50 = vadd.f32 %v18872_v39, %v7482_v8  ;;  %v7664_v28 = vpack.c.bf16 %v22995_v31, %v22994_v41  ;;  %v22996_v8 = vld [vmem:[#allocation154_spill] sm:$0xff]  ;;  %14572 = vpow2.f32 %v19112_v6  ;;  %v23009_v41 = vld [vmem:[#allocation163_spill] sm:$0xff] }
 0x640   : > { %v19276_v32 = vmul.f32 1.442695, %v22991_v15  ;;  %7880 = vmatprep.subr.bf16.mxu1 %v7667_v3  ;;  %v19287_v15 = vpop.eup %14550  ;;  %v7666_v19 = vpack.c.bf16 %v22997_v7, %v22996_v8  ;;  %v22999_v60 = vld [vmem:[#allocation86_spill] sm:$0xff]  ;;  %14574 = vpow2.f32 %v19117_v4  ;;  %v7591_v6 = vadd.f32 %v19183_v11, %v7590_v58  ;;  %v23004_v4 = vld [vmem:[#allocation89_spill] sm:$0xff] }
 0x641   : > { %v19295_v57 = vpop.eup %14552  ;;  %v7484_v3 = vadd.f32 %v18880_v21, %v7483_v50  ;;  %v23000_v38 = vld [vmem:[#allocation226_spill] sm:$0xff]  ;;  %7799 = vmatpush1.bf16.msra.mxu0 %v7664_v28  ;;  %14576 = vpow2.f32 %v19123_v63  ;;  %v23006_v58 = vld [vmem:[#allocation93_spill] sm:$0xff]  ;;  %v23007_v28 = vld [vmem:[#allocation96_spill] sm:$0xff] }
 0x642   : > { %v19303_v43 = vpop.eup %14554  ;;  %v23001_v9 = vsub.f32 %v23000_v38, %v18481_v56  ;;  %v23002_v8 = vld [vmem:[#allocation230_spill] sm:$0xff]  ;;  %7800 = vmatprep.subr.bf16.mxu0 %v7669_v1  ;;  %v23005_v38 = vld [vmem:[#allocation92_spill] sm:$0xff]  ;;  %14578 = vpow2.f32 %v19128_v37  ;;  %v7592_v11 = vadd.f32 %v19191_v35, %v7591_v6 }
 0x643   : > { %v23003_v50 = vsub.f32 %v23002_v8, %v18481_v56  ;;  %7881 = vmatpush1.bf16.msra.mxu1 %v7666_v19  ;;  %v19317_v39 = vpop.eup %14556  ;;  %v7485_v14 = vadd.f32 %v18885_v22, %v7484_v3  ;;  %v7668_v19 = vpack.c.bf16 %v23007_v28, %v23006_v58  ;;  %v23008_v3 = vld [vmem:[#allocation160_spill] sm:$0xff]  ;;  %14580 = vpow2.f32 %v19135_v27  ;;  %v23011_v35 = vld [vmem:[#allocation234_spill] sm:$0xff] }
 0x644   : > { %v19309_v7 = vmul.f32 1.442695, %v23001_v9  ;;  %7882 = vmatprep.subr.bf16.mxu1 %v7671_v55  ;;  %v7670_v63 = vpack.c.bf16 %v23009_v41, %v23008_v3  ;;  %v23010_v9 = vld [vmem:[#allocation95_spill] sm:$0xff]  ;;  %14582 = vpow2.f32 %v19140_v18  ;;  %v23012_v6 = vsub.f32 %v23011_v35, %v18481_v56  ;;  %v23013_v3 = vld [vmem:[#allocation238_spill] sm:$0xff] }
 0x645   : > { %v19314_v31 = vmul.f32 1.442695, %v23003_v50  ;;  %v19325_v50 = vpop.eup %14558  ;;  %v7486_v55 = vadd.f32 %v18891_v49, %v7485_v14  ;;  %v23014_v14 = vsub.f32 %v23013_v3, %v18481_v56  ;;  %v7593_v27 = vadd.f32 %v19203_v20, %v7592_v11  ;;  %7801 = vmatpush1.bf16.msra.mxu0 %v7668_v19  ;;  %v23015_v11 = vld [vmem:[#allocation283_spill] sm:$0xff]  ;;  %v23016_v19 = vld [vmem:[#allocation284_spill] sm:$0xff]  ;;  %v23027_v3 = vld [vmem:[#allocation137_spill] sm:$0xff] }
 0x646   : > { %v19333_v1 = vpop.eup %14560  ;;  %v19347_v41 = vmul.f32 1.442695, %v23012_v6  ;;  %14584 = vpow2.f32 %v19145_v47  ;;  %7802 = vmatprep.subr.bf16.mxu0 %v7673_v0  ;;  %v23018_v6 = vld [vmem:[#allocation169_spill] sm:$0xff] }
 0x647   : > { %v19341_v22 = vpop.eup %14562  ;;  %v19352_v28 = vmul.f32 1.442695, %v23014_v14  ;;  %7883 = vmatpush1.bf16.msra.mxu1 %v7670_v63  ;;  %v7487_v37 = vadd.f32 %v18896_v42, %v7486_v55  ;;  %14586 = vpow2.f32 %v19153_v23  ;;  %v7594_v20 = vadd.f32 %v19211_v44, %v7593_v27  ;;  %v23017_v55 = vld [vmem:[#allocation166_spill] sm:$0xff]  ;;  %v23026_v23 = vld [vmem:[#allocation241_spill] sm:$0xff] }
 0x648   : > { %v19355_v8 = vpop.eup %14564  ;;  %7884 = vmatprep.subr.bf16.mxu1 %v7675_v51  ;;  %v7672_v63 = vpack.c.bf16 %v23016_v19, %v23015_v11  ;;  %v7674_v47 = vpack.c.bf16 %v23018_v6, %v23017_v55  ;;  %v23019_v51 = vld [vmem:[#allocation237_spill] sm:$0xff]  ;;  %14588 = vpow2.f32 %v19158_v45  ;;  %v23021_v27 = vld [vmem:[#allocation134_spill] sm:$0xff] }
 0x649   : > { %v19363_v35 = vpop.eup %14566  ;;  %v7488_v14 = vadd.f32 %v23019_v51, %v7487_v37  ;;  %14590 = vpow2.f32 %v23021_v27  ;;  %v23022_v19 = vld [vmem:[#allocation242_spill] sm:$0xff]  ;;  %v7595_v45 = vadd.f32 %v19219_v10, %v7594_v20 }
 0x64a   : > { %v19371_v0 = vpop.eup %14568  ;;  %v23023_v11 = vsub.f32 %v23022_v19, %v18481_v56  ;;  %v23024_v55 = vld [vmem:[#allocation246_spill] sm:$0xff]  ;;  %7803 = vmatpush1.bf16.msra.mxu0 %v7672_v63  ;;  %14592 = vpow2.f32 %v23027_v3  ;;  %v23028_v19 = vpack.c.bf16 %v22993_v52, %v22992_v16  ;;  %v23034_v52 = vld [vmem:[#allocation173_spill] sm:$0xff] }
 0x64b   : > { %v19379_v58 = vpop.eup %14570  ;;  %v23025_v37 = vsub.f32 %v23024_v55, %v18481_v56  ;;  %7885 = vmatpush1.bf16.msra.mxu1 %v7674_v47  ;;  %v7489_v46 = vadd.f32 %v23026_v23, %v7488_v14  ;;  %14594 = vpow2.f32 %v19196_v29  ;;  %v7596_v3 = vadd.f32 %v19227_v54, %v7595_v45  ;;  %v23032_v47 = vld [vmem:[#allocation67_spill] sm:$0xff]  ;;  %v23033_v14 = vld [vmem:[#allocation70_spill] sm:$0xff]  ;;  %v23043_v29 = vld [vmem:[#allocation249_spill] sm:$0xff] }
 0x64c   : > { %v19385_v6 = vmul.f32 1.442695, %v23023_v11  ;;  %v19393_v18 = vpop.eup %14572  ;;  %7804 = vmatprep.subr.bf16.mxu0 %v23028_v19  ;;  %v23029_v11 = vpack.c.bf16 %v19219_v10, %v19211_v44  ;;  %v7676_v16 = vpack.c.bf16 %v23033_v14, %v23032_v47  ;;  %v23035_v19 = vld [vmem:[#allocation177_spill] sm:$0xff]  ;;  %14596 = vpow2.f32 %v19201_v12  ;;  %v23039_v45 = vld [vmem:[#allocation250_spill] sm:$0xff] }
 0x64d   : > { %v19390_v51 = vmul.f32 1.442695, %v23025_v37  ;;  %v19407_v63 = vpop.eup %14574  ;;  %v7678_v23 = vpack.c.bf16 %v23035_v19, %v23034_v52  ;;  %v23036_v10 = vld [vmem:[#allocation245_spill] sm:$0xff]  ;;  %14598 = vpow2.f32 %v19233_v59  ;;  %v23040_v14 = vsub.f32 %v23039_v45, %v18481_v56  ;;  %v23041_v52 = vld [vmem:[#allocation254_spill] sm:$0xff] }
 0x64e   : > { %7886 = vmatprep.subr.bf16.mxu1 %v23029_v11  ;;  %v19415_v44 = vpop.eup %14576  ;;  %v7490_v11 = vadd.f32 %v23036_v10, %v7489_v46  ;;  %v23042_v47 = vsub.f32 %v23041_v52, %v18481_v56  ;;  %v7597_v12 = vadd.f32 %v19241_v34, %v7596_v3  ;;  %7805 = vmatpush1.bf16.msra.mxu0 %v7676_v16  ;;  %14600 = vpow2.f32 %v19238_v40  ;;  %v23048_v16 = vld [vmem:[#allocation73_spill] sm:$0xff]  ;;  %v23104_v42 = vld [vmem:[#allocation98_spill] sm:$0xff]  ;;  %v23121_v10 = vld [vmem:[#allocation104_spill] sm:$0xff] }
 0x64f   : > { %v19423_v27 = vpop.eup %14578  ;;  %v7302_v19 = vmul.f32 1.442695, %v23040_v14  ;;  %7887 = vmatpush1.bf16.msra.mxu1 %v7678_v23  ;;  %v23044_v59 = vpack.c.bf16 %v22999_v60, %v22998_v17  ;;  %v23045_v14 = vpack.c.bf16 %v19241_v34, %v19227_v54  ;;  %14602 = vpow2.f32 %v19271_v48  ;;  %v23050_v60 = vld [vmem:[#allocation181_spill] sm:$0xff] }
 0x650   : > { %v19432_v46 = vmul.f32 1.442695, %v23042_v47  ;;  %v19435_v55 = vpop.eup %14580  ;;  %v7491_v37 = vadd.f32 %v23043_v29, %v7490_v11  ;;  %v7598_v40 = vadd.f32 %v19249_v5, %v7597_v12  ;;  %v23049_v11 = vld [vmem:[#allocation76_spill] sm:$0xff]  ;;  %v23052_v34 = vld [vmem:[#allocation253_spill] sm:$0xff]  ;;  %14604 = vpow2.f32 %v19276_v32  ;;  %v23055_v12 = vld [vmem:[#allocation258_spill] sm:$0xff] }
 0x651   : > { %7806 = vmatprep.subr.bf16.mxu0 %v23044_v59  ;;  %7888 = vmatprep.subr.bf16.mxu1 %v23045_v14  ;;  %v19449_v3 = vpop.eup %14582  ;;  %v7680_v17 = vpack.c.bf16 %v23049_v11, %v23048_v16  ;;  %v23051_v59 = vld [vmem:[#allocation185_spill] sm:$0xff]  ;;  %14606 = vpow2.f32 %v19309_v7  ;;  %v23056_v11 = vsub.f32 %v23055_v12, %v18481_v56  ;;  %v23060_v7 = vpack.c.bf16 %v23005_v38, %v23004_v4 }
 0x652   : > { %v7682_v20 = vpack.c.bf16 %v23051_v59, %v23050_v60  ;;  %v19457_v54 = vpop.eup %14584  ;;  %v7492_v14 = vadd.f32 %v23052_v34, %v7491_v37  ;;  %v23054_v23 = vld [vmem:[#allocation125_spill] sm:$0xff]  ;;  %v23057_v60 = vld [vmem:[#allocation262_spill] sm:$0xff]  ;;  %v7599_v32 = vadd.f32 %v19257_v53, %v7598_v40  ;;  %14608 = vpow2.f32 %v19314_v31 }
 0x653   : > { %v19465_v52 = vpop.eup %14586  ;;  %v7318_v59 = vmul.f32 1.442695, %v23056_v11  ;;  %v23058_v16 = vsub.f32 %v23057_v60, %v18481_v56  ;;  %7807 = vmatpush1.bf16.msra.mxu0 %v7680_v17  ;;  %v23059_v45 = vld [vmem:[#allocation257_spill] sm:$0xff]  ;;  %v23061_v11 = vpack.c.bf16 %v19257_v53, %v19249_v5  ;;  %v23062_v60 = vld [vmem:[#allocation128_spill] sm:$0xff]  ;;  %14610 = vpow2.f32 %v19347_v41  ;;  %v23063_v17 = vld [vmem:[#allocation79_spill] sm:$0xff] }
 0x654   : > { %7889 = vmatpush1.bf16.msra.mxu1 %v7682_v20  ;;  %v19475_v47 = vpop.eup %14588  ;;  %v7493_v48 = vadd.f32 %v23059_v45, %v7492_v14  ;;  %7808 = vmatprep.subr.bf16.mxu0 %v23060_v7  ;;  %v7600_v31 = vadd.f32 %v19265_v2, %v7599_v32  ;;  %v23064_v14 = vld [vmem:[#allocation82_spill] sm:$0xff]  ;;  %v23065_v38 = vld [vmem:[#allocation189_spill] sm:$0xff]  ;;  %14612 = vpow2.f32 %v19352_v28  ;;  %v23126_v45 = vld [vmem:[#allocation111_spill] sm:$0xff] }
 0x655   : > { %v7326_v37 = vmul.f32 1.442695, %v23058_v16  ;;  %7890 = vmatprep.subr.bf16.mxu1 %v23061_v11  ;;  %v19489_v40 = vpop.eup %14590  ;;  %v7684_v4 = vpack.c.bf16 %v23064_v14, %v23063_v17  ;;  %v23066_v12 = vld [vmem:[#allocation193_spill] sm:$0xff]  ;;  %14614 = vpow2.f32 %v19385_v6  ;;  %v23069_v32 = vld [vmem:[#allocation266_spill] sm:$0xff]  ;;  %v23075_v6 = vpack.c.bf16 %v18692_v26, %v23010_v9 }
 0x656   : > { %v7686_v7 = vpack.c.bf16 %v23066_v12, %v23065_v38  ;;  %v19497_v5 = vpop.eup %14592  ;;  %v23067_v53 = vld [vmem:[#allocation261_spill] sm:$0xff]  ;;  %v23070_v14 = vsub.f32 %v23069_v32, %v18481_v56  ;;  %v23071_v38 = vld [vmem:[#allocation270_spill] sm:$0xff]  ;;  %v7601_v28 = vadd.f32 %v19279_v24, %v7600_v31  ;;  %14616 = vpow2.f32 %v19390_v51 }
 0x657   : > { %v7494_v11 = vadd.f32 %v23067_v53, %v7493_v48  ;;  %v19505_v16 = vpop.eup %14594  ;;  %v23072_v17 = vsub.f32 %v23071_v38, %v18481_v56  ;;  %7809 = vmatpush1.bf16.msra.mxu0 %v7684_v4  ;;  %14618 = vpow2.f32 %v7302_v19  ;;  %v23077_v51 = vld [vmem:[#allocation85_spill] sm:$0xff] }
 0x658   : > { %23068 = vst [vmem:[#allocation140_spill] sm:$0xff] %v19505_v16  ;;  %v7334_v12 = vmul.f32 1.442695, %v23070_v14  ;;  %7891 = vmatpush1.bf16.msra.mxu1 %v7686_v7  ;;  %v19515_v20 = vpop.eup %14596  ;;  %7810 = vmatprep.subr.bf16.mxu0 %v23075_v6  ;;  %v23076_v14 = vpack.c.bf16 %v19279_v24, %v19265_v2  ;;  %v7602_v38 = vadd.f32 %v19287_v15, %v7601_v28  ;;  %v23078_v7 = vld [vmem:[#allocation88_spill] sm:$0xff]  ;;  %v23079_v26 = vld [vmem:[#allocation197_spill] sm:$0xff]  ;;  %14620 = vpow2.f32 %v19432_v46  ;;  %v23084_v28 = vld [vmem:[#allocation274_spill] sm:$0xff] }
 0x659   : > { %v7342_v48 = vmul.f32 1.442695, %v23072_v17  ;;  %23073 = vst [vmem:[#allocation143_spill] sm:$0xff] %v19515_v20  ;;  %v7495_v41 = vadd.f32 %v23074_v62, %v7494_v11  ;;  %v19529_v4 = vpop.eup %14598  ;;  %v7688_v11 = vpack.c.bf16 %v23078_v7, %v23077_v51  ;;  %v23080_v9 = vld [vmem:[#allocation201_spill] sm:$0xff]  ;;  %14622 = vpow2.f32 %v7318_v59 }
 0x65a   : > { %7892 = vmatprep.subr.bf16.mxu1 %v23076_v14  ;;  %v7690_v32 = vpack.c.bf16 %v23080_v9, %v23079_v26  ;;  %v19536_v6 = vpop.eup %14600  ;;  %v23081_v2 = vld [vmem:[#allocation273_spill] sm:$0xff]  ;;  %v23085_v7 = vsub.f32 %v23084_v28, %v18481_v56  ;;  %v23086_v9 = vld [vmem:[#allocation278_spill] sm:$0xff]  ;;  %14624 = vpow2.f32 %v7326_v37  ;;  %v23089_v59 = vpack.c.bf16 %v18712_v36, %v18703_v30  ;;  %v23092_v37 = vld [vmem:[#allocation91_spill] sm:$0xff] }
 0x65b   : > { %v7496_v24 = vadd.f32 %v23081_v2, %v7495_v41  ;;  %v23083_v17 = vld [vmem:[#allocation221_spill] sm:$0xff]  ;;  %v19544_v13 = vpop.eup %14602  ;;  %v23087_v26 = vsub.f32 %v23086_v9, %v18481_v56  ;;  %v7603_v41 = vadd.f32 %v19295_v57, %v7602_v38  ;;  %7811 = vmatpush1.bf16.msra.mxu0 %v7688_v11  ;;  %14626 = vpow2.f32 %v7334_v12  ;;  %v23094_v30 = vld [vmem:[#allocation99_spill] sm:$0xff]  ;;  %v23095_v36 = vld [vmem:[#allocation102_spill] sm:$0xff] }
 0x65c   : > { %v7350_v51 = vmul.f32 1.442695, %v23085_v7  ;;  %7893 = vmatpush1.bf16.msra.mxu1 %v7690_v32  ;;  %v19553_v46 = vpop.eup %14604  ;;  %v23088_v31 = vld [vmem:[#allocation277_spill] sm:$0xff]  ;;  %7812 = vmatprep.subr.bf16.mxu0 %v23089_v59  ;;  %v23090_v7 = vpack.c.bf16 %v19295_v57, %v19287_v15  ;;  %v7694_v59 = vpack.c.bf16 %v23095_v36, %v23094_v30  ;;  %14628 = vpow2.f32 %v7342_v48 }
 0x65d   : > { %v7358_v61 = vmul.f32 1.442695, %v23087_v26  ;;  %v7497_v14 = vadd.f32 %v23088_v31, %v7496_v24  ;;  %v23091_v9 = vld [vmem:[#allocation225_spill] sm:$0xff]  ;;  %v19566_v11 = vpop.eup %14606  ;;  %v7604_v32 = vadd.f32 %v19303_v43, %v7603_v41  ;;  %v23093_v24 = vld [vmem:[#allocation94_spill] sm:$0xff]  ;;  %v23097_v41 = vld [vmem:[#allocation156_spill] sm:$0xff] }
 0x65e   : > { %7894 = vmatprep.subr.bf16.mxu1 %v23090_v7  ;;  %v7692_v28 = vpack.c.bf16 %v23093_v24, %v23092_v37  ;;  %v19573_v19 = vpop.eup %14608  ;;  %v23096_v15 = vld [vmem:[#allocation289_spill] sm:$0xff]  ;;  %v23098_v26 = vld [vmem:[#allocation288_spill] sm:$0xff]  ;;  %v23100_v37 = vld [vmem:[#allocation159_spill] sm:$0xff]  ;;  %14630 = vpow2.f32 %v7350_v51 }
 0x65f   : > { %v7498_v57 = vadd.f32 %v23096_v15, %v7497_v14  ;;  %v19580_v12 = vpop.eup %14610  ;;  %v23099_v56 = vsub.f32 %v23097_v41, %v23098_v26  ;;  %v23101_v36 = vsub.f32 %v23100_v37, %v23098_v26  ;;  %v7605_v14 = vadd.f32 %v19317_v39, %v7604_v32  ;;  %v23102_v7 = vld [vmem:[#allocation179_spill] sm:$0xff]  ;;  %v23103_v38 = vld [vmem:[#allocation101_spill] sm:$0xff]  ;;  %v23116_v37 = vld [vmem:[#allocation290_spill] sm:$0xff] }
 0x660   : > { %7813 = vmatpush1.bf16.msra.mxu0 %v7692_v28  ;;  %7895 = vmatpush1.bf16.msra.mxu1 %v7694_v59  ;;  %v19589_v48 = vpop.eup %14612  ;;  %14632 = vpow2.f32 %v7358_v61  ;;  %v23105_v20 = vpack.c.bf16 %v23103_v38, %v23104_v42  ;;  %v23110_v61 = vld [vmem:[#allocation100_spill] sm:$0xff]  ;;  %v23111_v16 = vld [vmem:[#allocation105_spill] sm:$0xff]  ;;  %v23138_v31 = vld [vmem:[#allocation110_spill] sm:$0xff] }
 0x661   : > { %v7108_v24 = vmul.f32 1.442695, %v23099_v56  ;;  %v7116_v30 = vmul.f32 1.442695, %v23101_v36  ;;  %v7499_v49 = vadd.f32 %v23102_v7, %v7498_v57  ;;  %v23106_v56 = vpack.c.bf16 %v19317_v39, %v19303_v43  ;;  %v19602_v28 = vpop.eup %14614  ;;  %v23109_v57 = vld [vmem:[#allocation97_spill] sm:$0xff]  ;;  %v23112_v42 = vld [vmem:[#allocation108_spill] sm:$0xff] }
 0x662   : > { %7814 = vmatprep.subr.bf16.mxu0 %v23105_v20  ;;  %v7606_v59 = vadd.f32 %v19325_v50, %v7605_v14  ;;  %v7696_v41 = vpack.c.bf16 %v23110_v61, %v23109_v57  ;;  %v7698_v20 = vpack.c.bf16 %v23112_v42, %v23111_v16  ;;  %v19611_v39 = vpop.eup %14616  ;;  %v23113_v38 = vld [vmem:[#allocation281_spill] sm:$0xff]  ;;  %v23119_v16 = vld [vmem:[#allocation291_spill] sm:$0xff]  ;;  %v23125_v43 = vld [vmem:[#allocation106_spill] sm:$0xff] }
 0x663   : > { %7896 = vmatprep.subr.bf16.mxu1 %v23106_v56  ;;  %14634 = vpow2.f32 %v23113_v38  ;;  %v23114_v56 = vld [vmem:[#allocation162_spill] sm:$0xff]  ;;  %v7500_v36 = vadd.f32 %v23116_v37, %v7499_v49  ;;  %v19620_v61 = vpop.eup %14618  ;;  %v23117_v49 = vld [vmem:[#allocation165_spill] sm:$0xff]  ;;  %s14225_s16 = spop %14224 }
 0x664   : > { %v23115_v32 = vsub.f32 %v23114_v56, %v23098_v26  ;;  %14636 = vpow2.f32 %v7108_v24  ;;  %v7607_v42 = vadd.f32 %v19333_v1, %v7606_v59  ;;  %7815 = vmatpush1.bf16.msra.mxu0 %v7696_v41  ;;  %7897 = vmatpush1.bf16.msra.mxu1 %v7698_v20  ;;  %v19627_v56 = vpop.eup %14620  ;;  %v23120_v24 = vld [vmem:[#allocation107_spill] sm:$0xff]  ;;  %v23123_v41 = vpack.c.bf16 %v19333_v1, %v19325_v50  ;;  %v23129_v1 = vld [vmem:[#allocation292_spill] sm:$0xff]  ;;  %v23137_v2 = vld [vmem:[#allocation113_spill] sm:$0xff] }
 0x665   : > { %14638 = vpow2.f32 %v7116_v30  ;;  %v7501_v57 = vadd.f32 %v23119_v16, %v7500_v36  ;;  %v23122_v59 = vpack.c.bf16 %v23120_v24, %v23121_v10  ;;  %v23124_v20 = vld [vmem:[#allocation103_spill] sm:$0xff]  ;;  %v19641_v34 = vpop.eup %14622  ;;  %v23133_v10 = vld [vmem:[#allocation172_spill] sm:$0xff]  ;;  %v23148_v15 = vld [vmem:[#allocation294_spill] sm:$0xff] }
 0x666   : > { %v7124_v51 = vmul.f32 1.442695, %v23115_v32  ;;  %v23118_v32 = vsub.f32 %v23117_v49, %v23098_v26  ;;  %7898 = vmatprep.subr.bf16.mxu1 %v23123_v41  ;;  %v7700_v38 = vpack.c.bf16 %v23125_v43, %v23124_v20  ;;  %v7608_v30 = vadd.f32 %v19341_v22, %v7607_v42  ;;  %v23127_v49 = vld [vmem:[#allocation114_spill] sm:$0xff]  ;;  %v19650_v24 = vpop.eup %14624  ;;  %v23128_v50 = vld [vmem:[#allocation171_spill] sm:$0xff]  ;;  %v23136_v41 = vld [vmem:[#allocation293_spill] sm:$0xff] }
 0x667   : > { %7816 = vmatprep.subr.bf16.mxu0 %v23122_v59  ;;  %14640 = vpow2.f32 %v23128_v50  ;;  %v7502_v59 = vadd.f32 %v23129_v1, %v7501_v57  ;;  %v19658_v43 = vpop.eup %14626  ;;  %v23134_v20 = vsub.f32 %v23133_v10, %v23098_v26 }
 0x668   : > { %v7132_v14 = vmul.f32 1.442695, %v23118_v32  ;;  %v7702_v32 = vpack.c.bf16 %v23127_v49, %v23126_v45  ;;  %23130 = vst [vmem:[#allocation146_spill] sm:$0xff] %v19658_v43  ;;  %14642 = vpow2.f32 %v7124_v51  ;;  %v23131_v49 = vld [vmem:[#allocation168_spill] sm:$0xff]  ;;  %v7609_v50 = vadd.f32 %v19355_v8, %v7608_v30  ;;  %7817 = vmatpush1.bf16.msra.mxu0 %v7700_v38  ;;  %v19667_v57 = vpop.eup %14628 }
 0x669   : > { %v23132_v36 = vsub.f32 %v23131_v49, %v23098_v26  ;;  %v7148_v53 = vmul.f32 1.442695, %v23134_v20  ;;  %23135 = vst [vmem:[#allocation149_spill] sm:$0xff] %v19667_v57  ;;  %v7503_v42 = vadd.f32 %v23136_v41, %v7502_v59  ;;  %v23139_v51 = vpack.c.bf16 %v23137_v2, %v23138_v31  ;;  %v19680_v30 = vpop.eup %14630  ;;  %v23143_v59 = vld [vmem:[#allocation269_spill] sm:$0xff]  ;;  %v23159_v41 = vld [vmem:[#allocation120_spill] sm:$0xff] }
 0x66a   : > { %7899 = vmatpush1.bf16.msra.mxu1 %v7702_v32  ;;  %14644 = vpow2.f32 %v7132_v14  ;;  %v23140_v49 = vpack.c.bf16 %v19355_v8, %v19341_v22  ;;  %v7610_v14 = vadd.f32 %v19363_v35, %v7609_v50  ;;  %v23141_v32 = vld [vmem:[#allocation109_spill] sm:$0xff]  ;;  %v19689_v8 = vpop.eup %14632  ;;  %v23157_v22 = vld [vmem:[#allocation118_spill] sm:$0xff] }
 0x66b   : > { %v7140_v45 = vmul.f32 1.442695, %v23132_v36  ;;  %7818 = vmatprep.subr.bf16.mxu0 %v23139_v51  ;;  %v23142_v36 = vld [vmem:[#allocation112_spill] sm:$0xff]  ;;  %v23144_v31 = vld [vmem:[#allocation117_spill] sm:$0xff]  ;;  %v23145_v51 = vld [vmem:[#allocation175_spill] sm:$0xff]  ;;  %v7504_v7 = vadd.f32 %v23148_v15, %v7503_v42 }
 0x66c   : > { %7900 = vmatprep.subr.bf16.mxu1 %v23140_v49  ;;  %v7704_v10 = vpack.c.bf16 %v23142_v36, %v23141_v32  ;;  %v7706_v2 = vpack.c.bf16 %v23144_v31, %v23143_v59  ;;  %14646 = vpow2.f32 %v23145_v51  ;;  %v23146_v49 = vld [vmem:[#allocation176_spill] sm:$0xff]  ;;  %v7611_v36 = vadd.f32 %v19371_v0, %v7610_v14  ;;  %v23151_v59 = vld [vmem:[#allocation295_spill] sm:$0xff] }
 0x66d   : > { %v23147_v38 = vsub.f32 %v23146_v49, %v23098_v26  ;;  %14648 = vpow2.f32 %v7140_v45  ;;  %v19703_v31 = vpop.eup %14634  ;;  %v7505_v50 = vadd.f32 %v23151_v59, %v7504_v7  ;;  %v23152_v45 = vld [vmem:[#allocation119_spill] sm:$0xff]  ;;  %v23153_v32 = vld [vmem:[#allocation116_spill] sm:$0xff] }
 0x66e   : > { %7819 = vmatpush1.bf16.msra.mxu0 %v7704_v10  ;;  %7901 = vmatpush1.bf16.msra.mxu1 %v7706_v2  ;;  %14650 = vpow2.f32 %v7148_v53  ;;  %v23154_v14 = vpack.c.bf16 %v23152_v45, %v23153_v32  ;;  %v23155_v10 = vpack.c.bf16 %v19371_v0, %v19363_v35  ;;  %v23156_v2 = vld [vmem:[#allocation115_spill] sm:$0xff]  ;;  %v19717_v1 = vpop.eup %14636  ;;  %v7612_v53 = vadd.f32 %v19379_v58, %v7611_v36  ;;  %v23173_v59 = vld [vmem:[#allocation188_spill] sm:$0xff] }
 0x66f   : > { %v7156_v20 = vmul.f32 1.442695, %v23147_v38  ;;  %v23149_v38 = vld [vmem:[#allocation180_spill] sm:$0xff]  ;;  %v7708_v51 = vpack.c.bf16 %v23157_v22, %v23156_v2  ;;  %23158 = vst [vmem:[#allocation152_spill] sm:$0xff] %v19717_v1  ;;  %v19726_v45 = vpop.eup %14638  ;;  %v23162_v35 = vld [vmem:[#allocation183_spill] sm:$0xff]  ;;  %v23174_v43 = vsub.f32 %v23173_v59, %v23098_v26 }
 0x670   : > { %v23150_v42 = vsub.f32 %v23149_v38, %v23098_v26  ;;  %7820 = vmatprep.subr.bf16.mxu0 %v23154_v14  ;;  %7902 = vmatprep.subr.bf16.mxu1 %v23155_v10  ;;  %v23160_v38 = vld [vmem:[#allocation123_spill] sm:$0xff]  ;;  %23161 = vst [vmem:[#allocation155_spill] sm:$0xff] %v19726_v45  ;;  %14652 = vpow2.f32 %v23162_v35  ;;  %v23166_v2 = vld [vmem:[#allocation296_spill] sm:$0xff]  ;;  %v7613_v32 = vadd.f32 %v19393_v18, %v7612_v53 }
 0x671   : > { %v23163_v0 = vld [vmem:[#allocation191_spill] sm:$0xff]  ;;  %v7506_v57 = vadd.f32 %v23166_v2, %v7505_v50  ;;  %v19740_v35 = vpop.eup %14640  ;;  %v7180_v2 = vmul.f32 1.442695, %v23174_v43  ;;  %v7714_v43 = vpack.c.bf16 %v19726_v45, %v19717_v1  ;;  %v23185_v1 = vld [vmem:[#allocation40_spill] sm:$0xff] }
 0x672   : > { %v7164_v49 = vmul.f32 1.442695, %v23150_v42  ;;  %v7710_v42 = vpack.c.bf16 %v23160_v38, %v23159_v41  ;;  %v23164_v14 = vld [vmem:[#allocation287_spill] sm:$0xff]  ;;  %7821 = vmatpush1.bf16.msra.mxu0 %v7708_v51  ;;  %v23177_v51 = vpack.c.bf16 %v19393_v18, %v19379_v58  ;;  %v7614_v53 = vadd.f32 %v19407_v63, %v7613_v32 }
 0x673   : > { %v23165_v10 = vsub.f32 %v23163_v0, %v23164_v14  ;;  %v23167_v36 = vld [vmem:[#allocation131_spill] sm:$0xff]  ;;  %v23171_v0 = vld [vmem:[#allocation184_spill] sm:$0xff] }
 0x674   : > { %v23168_v38 = vld [vmem:[#allocation187_spill] sm:$0xff]  ;;  %7903 = vmatpush1.bf16.msra.mxu1 %v7710_v42  ;;  %v23178_v42 = vld [vmem:[#allocation121_spill] sm:$0xff]  ;;  %v7615_v32 = vadd.f32 %v19415_v44, %v7614_v53  ;;  %v23189_v53 = vpack.c.bf16 %v19415_v44, %v19407_v63 }
 0x675   : > { %v7184_v22 = vmul.f32 1.442695, %v23165_v10  ;;  %14654 = vpow2.f32 %v23168_v38  ;;  %v23169_v41 = vld [vmem:[#allocation195_spill] sm:$0xff]  ;;  %v23172_v10 = vsub.f32 %v23171_v0, %v23098_v26  ;;  %v19749_v38 = vadd.f32 %v23167_v36, %v7506_v57  ;;  %7904 = vmatprep.subr.bf16.mxu1 %v23177_v51  ;;  %v23179_v0 = vld [vmem:[#allocation124_spill] sm:$0xff] }
 0x676   : > { %v23170_v7 = vsub.f32 %v23169_v41, %v23164_v14  ;;  %14656 = vpow2.f32 %v7156_v20  ;;  %v23175_v41 = vld [vmem:[#allocation122_spill] sm:$0xff]  ;;  %v19757_v20 = vpop.eup %14642  ;;  %v7712_v59 = vpack.c.bf16 %v23179_v0, %v23178_v42  ;;  %v23182_v58 = vld [vmem:[#allocation203_spill] sm:$0xff]  ;;  %v23184_v51 = vld [vmem:[#allocation24_spill] sm:$0xff]  ;;  %v7787_v0 = vrot.slane %v23185_v1, 1 }
 0x677   : > { %v7172_v50 = vmul.f32 1.442695, %v23172_v10  ;;  %14658 = vpow2.f32 %v7164_v49  ;;  %v19764_v57 = vpop.eup %14644  ;;  %v23183_v18 = vsub.f32 %v23182_v58, %v23164_v14  ;;  %v7784_v45 = vrot.slane %v23184_v51, 1  ;;  %v23194_v51 = vld [vmem:[#allocation130_spill] sm:$0xff] }
 0x678   : > { %v7192_v15 = vmul.f32 1.442695, %v23170_v7  ;;  %v23176_v7 = vpack.c.bf16 %v23054_v23, %v23175_v41  ;;  %14660 = vpow2.f32 %v7184_v22  ;;  %v23180_v23 = vld [vmem:[#allocation199_spill] sm:$0xff]  ;;  %7905 = vmatpush1.bf16.msra.mxu1 %v7714_v43  ;;  %v23186_v22 = vld [vmem:[#allocation192_spill] sm:$0xff]  ;;  %v7718_v44 = vpack.c.bf16 %v19764_v57, %v19757_v20 }
 0x679   : > { %v23181_v10 = vsub.f32 %v23180_v23, %v23164_v14  ;;  %v7208_v49 = vmul.f32 1.442695, %v23183_v18  ;;  %v23187_v23 = vsub.f32 %v23186_v22, %v23098_v26  ;;  %7915 = vmatprep.subr.bf16.mxu1 %v23189_v53  ;;  %v23191_v43 = vld [vmem:[#allocation196_spill] sm:$0xff]  ;;  %v23193_v18 = vld [vmem:[#allocation127_spill] sm:$0xff] }
 0x67a   : > { %7822 = vmatprep.subr.bf16.mxu0 %v23176_v7  ;;  %14662 = vpow2.f32 %v7192_v15  ;;  %v19773_v7 = vpop.eup %14646  ;;  %v23188_v15 = vpack.c.bf16 %v18822_v25, %v23062_v60  ;;  %v23192_v58 = vsub.f32 %v23191_v43, %v23098_v26  ;;  %v7716_v22 = vpack.c.bf16 %v23194_v51, %v23193_v18  ;;  %v23196_v25 = vld [vmem:[#allocation207_spill] sm:$0xff] }
 0x67b   : > { %v7200_v41 = vmul.f32 1.442695, %v23181_v10  ;;  %7823 = vmatpush1.bf16.msra.mxu0 %v7712_v59  ;;  %14664 = vpow2.f32 %v7172_v50  ;;  %v7188_v10 = vmul.f32 1.442695, %v23187_v23  ;;  %v19786_v59 = vpop.eup %14648  ;;  %v7616_v50 = vadd.f32 %v19423_v27, %v7615_v32  ;;  %7907 = vmatmul.mubr.bf16.vlgmr.msra.gmra.mrb[156].mxu1 %v7784_v45 }
 0x67c   : > { %7833 = vmatprep.subr.bf16.mxu0 %v23188_v15  ;;  %23190 = vst [vmem:[#allocation158_spill] sm:$0xff] %v19786_v59  ;;  %14666 = vpow2.f32 %v7180_v2  ;;  %v7196_v1 = vmul.f32 1.442695, %v23192_v58  ;;  %v19794_v23 = vpop.eup %14650  ;;  %v23197_v60 = vsub.f32 %v23196_v25, %v23164_v14  ;;  %v23198_v2 = vld [vmem:[#allocation211_spill] sm:$0xff]  ;;  %7916 = vmatpush1.bf16.msra.mxu1 %v7718_v44 }
 0x67d   : > { %23195 = vst [vmem:[#allocation161_spill] sm:$0xff] %v19794_v23  ;;  %14668 = vpow2.f32 %v7200_v41  ;;  %v23199_v15 = vsub.f32 %v23198_v2, %v23164_v14  ;;  %v7617_v53 = vadd.f32 %v19435_v55, %v7616_v50  ;;  %v19805_v43 = vpop.eup %14652  ;;  %v23200_v41 = vld [vmem:[#allocation200_spill] sm:$0xff]  ;;  %7947 = vmatprep.mubr.bf16.mxu1 %v7787_v0 }
 0x67e   : > { %v7216_v63 = vmul.f32 1.442695, %v23197_v60  ;;  %7825 = vmatmul.mubr.bf16.vlgmr.msra.gmra.mrb[136].mxu0 %v7784_v45  ;;  %14670 = vpow2.f32 %v7208_v49  ;;  %v23201_v58 = vsub.f32 %v23200_v41, %v23098_v26  ;;  %v23202_v49 = vld [vmem:[#allocation204_spill] sm:$0xff]  ;;  %v23207_v41 = vld [vmem:[#allocation133_spill] sm:$0xff] }
 0x67f   : > { %v7224_v32 = vmul.f32 1.442695, %v23199_v15  ;;  %7834 = vmatpush1.bf16.msra.mxu0 %v7716_v22  ;;  %7865 = vmatprep.mubr.bf16.mxu0 %v7787_v0  ;;  %14672 = vpow2.f32 %v7188_v10  ;;  %v19810_v45 = vpop.eup %14654  ;;  %v23203_v60 = vsub.f32 %v23202_v49, %v23098_v26  ;;  %v7618_v50 = vadd.f32 %v19449_v3, %v7617_v53  ;;  %v23204_v22 = vld [vmem:[#allocation205_spill] sm:$0xff] }
 0x680   : > { %v7204_v25 = vmul.f32 1.442695, %v23201_v58  ;;  %14674 = vpow2.f32 %v7196_v1  ;;  %v23205_v15 = vpack.c.bf16 %v18840_v33, %v23204_v22  ;;  %v23206_v10 = vpack.c.bf16 %v19435_v55, %v19423_v27  ;;  %v19824_v44 = vpop.eup %14656  ;;  %v23208_v1 = vld [vmem:[#allocation215_spill] sm:$0xff] }
 0x681   : > { %v7212_v2 = vmul.f32 1.442695, %v23203_v60  ;;  %v7720_v0 = vpack.c.bf16 %v19703_v31, %v23207_v41  ;;  %14676 = vpow2.f32 %v7216_v63  ;;  %v23209_v58 = vsub.f32 %v23208_v1, %v23164_v14  ;;  %v19831_v60 = vpop.eup %14658  ;;  %v23211_v33 = vld [vmem:[#allocation219_spill] sm:$0xff]  ;;  %v23213_v63 = vld [vmem:[#allocation208_spill] sm:$0xff] }
 0x682   : > { %7835 = vmatprep.subr.bf16.mxu0 %v23205_v15  ;;  %7917 = vmatprep.subr.bf16.mxu1 %v23206_v10  ;;  %v7722_v53 = vpack.c.bf16 %v19794_v23, %v19786_v59  ;;  %23210 = vst [vmem:[#allocation164_spill] sm:$0xff] %v19831_v60  ;;  %14678 = vpow2.f32 %v7224_v32  ;;  %v23212_v55 = vsub.f32 %v23211_v33, %v23164_v14  ;;  %v19837_v15 = vpop.eup %14660  ;;  %v23216_v23 = vld [vmem:[#allocation209_spill] sm:$0xff]  ;;  %v23219_v33 = vld [vmem:[#allocation212_spill] sm:$0xff] }
 0x683   : > { %v7232_v49 = vmul.f32 1.442695, %v23209_v58  ;;  %v7619_v22 = vadd.f32 %v19457_v54, %v7618_v50  ;;  %7836 = vmatpush1.bf16.msra.mxu0 %v7720_v0  ;;  %14680 = vpow2.f32 %v7204_v25  ;;  %v23214_v10 = vsub.f32 %v23213_v63, %v23098_v26  ;;  %v23215_v58 = vld [vmem:[#allocation213_spill] sm:$0xff] }
 0x684   : > { %v7240_v27 = vmul.f32 1.442695, %v23212_v55  ;;  %7918 = vmatpush1.bf16.msra.mxu1 %v7722_v53  ;;  %v23217_v59 = vpack.c.bf16 %v23215_v58, %v23216_v23  ;;  %v19845_v32 = vpop.eup %14662  ;;  %14682 = vpow2.f32 %v7212_v2  ;;  %v23220_v55 = vsub.f32 %v23219_v33, %v23098_v26 }
 0x685   : > { %v7220_v1 = vmul.f32 1.442695, %v23214_v10  ;;  %23218 = vst [vmem:[#allocation167_spill] sm:$0xff] %v19845_v32  ;;  %v7620_v0 = vadd.f32 %v19465_v52, %v7619_v22  ;;  %v23221_v25 = vpack.c.bf16 %v19457_v54, %v19449_v3  ;;  %v7724_v53 = vpack.c.bf16 %v19773_v7, %v19740_v35  ;;  %v19856_v63 = vpop.eup %14664  ;;  %v23225_v22 = vld [vmem:[#allocation227_spill] sm:$0xff] }
 0x686   : > { %7837 = vmatprep.subr.bf16.mxu0 %v23217_v59  ;;  %v7228_v50 = vmul.f32 1.442695, %v23220_v55  ;;  %14684 = vpow2.f32 %v7232_v49  ;;  %v23222_v59 = vld [vmem:[#allocation223_spill] sm:$0xff]  ;;  %v7726_v10 = vpack.c.bf16 %v19831_v60, %v19824_v44  ;;  %v19863_v58 = vpop.eup %14666  ;;  %v23226_v3 = vsub.f32 %v23225_v22, %v23164_v14  ;;  %v23227_v49 = vld [vmem:[#allocation216_spill] sm:$0xff] }
 0x687   : > { %7919 = vmatprep.subr.bf16.mxu1 %v23221_v25  ;;  %v23223_v23 = vsub.f32 %v23222_v59, %v23164_v14  ;;  %23224 = vst [vmem:[#allocation170_spill] sm:$0xff] %v19863_v58  ;;  %14686 = vpow2.f32 %v7240_v27  ;;  %v7621_v33 = vadd.f32 %v19475_v47, %v7620_v0  ;;  %7838 = vmatpush1.bf16.msra.mxu0 %v7724_v53  ;;  %v19869_v55 = vpop.eup %14668  ;;  %v23231_v22 = vld [vmem:[#allocation220_spill] sm:$0xff] }
 0x688   : > { %v7256_v54 = vmul.f32 1.442695, %v23226_v3  ;;  %14688 = vpow2.f32 %v7220_v1  ;;  %v23228_v25 = vsub.f32 %v23227_v49, %v23098_v26  ;;  %7920 = vmatpush1.bf16.msra.mxu1 %v7726_v10  ;;  %v19877_v27 = vpop.eup %14670  ;;  %v23232_v3 = vsub.f32 %v23231_v22, %v23098_v26 }
 0x689   : > { %v7248_v2 = vmul.f32 1.442695, %v23223_v23  ;;  %v23229_v23 = vld [vmem:[#allocation217_spill] sm:$0xff]  ;;  %14690 = vpow2.f32 %v7228_v50  ;;  %v7622_v53 = vadd.f32 %v19489_v40, %v7621_v33  ;;  %v23233_v1 = vpack.c.bf16 %v19475_v47, %v19465_v52  ;;  %v19888_v49 = vpop.eup %14672  ;;  %v23238_v33 = vld [vmem:[#allocation235_spill] sm:$0xff] }
 0x68a   : > { %v7236_v59 = vmul.f32 1.442695, %v23228_v25  ;;  %v23230_v60 = vpack.c.bf16 %v23083_v17, %v23229_v23  ;;  %v7244_v0 = vmul.f32 1.442695, %v23232_v3  ;;  %v7728_v10 = vpack.c.bf16 %v19810_v45, %v19805_v43  ;;  %23234 = vst [vmem:[#allocation174_spill] sm:$0xff] %v19888_v49  ;;  %v23235_v17 = vld [vmem:[#allocation231_spill] sm:$0xff]  ;;  %v19895_v23 = vpop.eup %14674 }
 0x68b   : > { %7921 = vmatprep.subr.bf16.mxu1 %v23233_v1  ;;  %14692 = vpow2.f32 %v7248_v2  ;;  %v7730_v25 = vpack.c.bf16 %v19863_v58, %v19856_v63  ;;  %23237 = vst [vmem:[#allocation178_spill] sm:$0xff] %v19895_v23  ;;  %v23239_v47 = vsub.f32 %v23238_v33, %v23164_v14  ;;  %v7623_v22 = vadd.f32 %v19497_v5, %v7622_v53  ;;  %v19901_v3 = vpop.eup %14676  ;;  %v23240_v2 = vld [vmem:[#allocation224_spill] sm:$0xff] }
 0x68c   : > { %7839 = vmatprep.subr.bf16.mxu0 %v23230_v60  ;;  %v23236_v60 = vsub.f32 %v23235_v17, %v23164_v14  ;;  %14694 = vpow2.f32 %v7256_v54  ;;  %v23241_v1 = vsub.f32 %v23240_v2, %v23098_v26  ;;  %v19909_v54 = vpop.eup %14678  ;;  %v23243_v33 = vld [vmem:[#allocation228_spill] sm:$0xff] }
 0x68d   : > { %v7272_v52 = vmul.f32 1.442695, %v23239_v47  ;;  %7840 = vmatpush1.bf16.msra.mxu0 %v7728_v10  ;;  %14696 = vpow2.f32 %v7236_v59  ;;  %7922 = vmatpush1.bf16.msra.mxu1 %v7730_v25  ;;  %v23244_v47 = vsub.f32 %v23243_v33, %v23098_v26  ;;  %v23245_v10 = vld [vmem:[#allocation140_spill] sm:$0xff]  ;;  %v23246_v59 = vpack.c.bf16 %v19497_v5, %v19489_v40  ;;  %v19920_v2 = vpop.eup %14680  ;;  %v23253_v33 = vld [vmem:[#allocation143_spill] sm:$0xff] }
 0x68e   : > { %v7264_v50 = vmul.f32 1.442695, %v23236_v60  ;;  %v7252_v17 = vmul.f32 1.442695, %v23241_v1  ;;  %v23242_v60 = vpack.c.bf16 %v23091_v9, %v18880_v21  ;;  %14698 = vpow2.f32 %v7244_v0  ;;  %23247 = vst [vmem:[#allocation182_spill] sm:$0xff] %v19920_v2  ;;  %v23248_v21 = vld [vmem:[#allocation239_spill] sm:$0xff] }
 0x68f   : > { %v7260_v53 = vmul.f32 1.442695, %v23244_v47  ;;  %v7624_v58 = vadd.f32 %v23245_v10, %v7623_v22  ;;  %7923 = vmatprep.subr.bf16.mxu1 %v23246_v59  ;;  %v7732_v25 = vpack.c.bf16 %v19845_v32, %v19837_v15  ;;  %v23249_v9 = vsub.f32 %v23248_v21, %v23164_v14  ;;  %v23251_v22 = vld [vmem:[#allocation243_spill] sm:$0xff]  ;;  %v23256_v32 = vld [vmem:[#allocation233_spill] sm:$0xff] }
 0x690   : > { %7841 = vmatprep.subr.bf16.mxu0 %v23242_v60  ;;  %14700 = vpow2.f32 %v7264_v50  ;;  %v7734_v1 = vpack.c.bf16 %v19895_v23, %v19888_v49  ;;  %v19927_v60 = vpop.eup %14682  ;;  %v23252_v40 = vsub.f32 %v23251_v22, %v23164_v14  ;;  %v23254_v50 = vld [vmem:[#allocation232_spill] sm:$0xff]  ;;  %v23257_v23 = vld [vmem:[#allocation229_spill] sm:$0xff] }
 0x691   : > { %v7280_v0 = vmul.f32 1.442695, %v23249_v9  ;;  %23250 = vst [vmem:[#allocation186_spill] sm:$0xff] %v19927_v60  ;;  %14702 = vpow2.f32 %v7272_v52  ;;  %v7625_v47 = vadd.f32 %v23253_v33, %v7624_v58  ;;  %7842 = vmatpush1.bf16.msra.mxu0 %v7732_v25  ;;  %v19933_v59 = vpop.eup %14684  ;;  %v23255_v21 = vsub.f32 %v23254_v50, %v23098_v26  ;;  %v23259_v22 = vld [vmem:[#allocation236_spill] sm:$0xff] }
 0x692   : > { %v7288_v5 = vmul.f32 1.442695, %v23252_v40  ;;  %14704 = vpow2.f32 %v7252_v17  ;;  %7924 = vmatpush1.bf16.msra.mxu1 %v7734_v1  ;;  %v23258_v49 = vpack.c.bf16 %v23256_v32, %v23257_v23  ;;  %v19941_v52 = vpop.eup %14686  ;;  %v23260_v40 = vsub.f32 %v23259_v22, %v23098_v26  ;;  %v23262_v32 = vld [vmem:[#allocation247_spill] sm:$0xff] }
 0x693   : > { %v7268_v9 = vmul.f32 1.442695, %v23255_v21  ;;  %14706 = vpow2.f32 %v7260_v53  ;;  %v7626_v25 = vadd.f32 %v19529_v4, %v7625_v47  ;;  %v23261_v17 = vpack.c.bf16 %v23253_v33, %v23245_v10  ;;  %v19952_v50 = vpop.eup %14688  ;;  %v23265_v47 = vld [vmem:[#allocation251_spill] sm:$0xff] }
 0x694   : > { %7843 = vmatprep.subr.bf16.mxu0 %v23258_v49  ;;  %v7276_v58 = vmul.f32 1.442695, %v23260_v40  ;;  %v7736_v1 = vpack.c.bf16 %v19877_v27, %v19869_v55  ;;  %14708 = vpow2.f32 %v7280_v0  ;;  %v23263_v49 = vsub.f32 %v23262_v32, %v23164_v14  ;;  %v19959_v21 = vpop.eup %14690  ;;  %v23267_v0 = vld [vmem:[#allocation240_spill] sm:$0xff] }
 0x695   : > { %7925 = vmatprep.subr.bf16.mxu1 %v23261_v17  ;;  %v7738_v53 = vpack.c.bf16 %v19927_v60, %v19920_v2  ;;  %23264 = vst [vmem:[#allocation190_spill] sm:$0xff] %v19959_v21  ;;  %14710 = vpow2.f32 %v7288_v5  ;;  %v23266_v10 = vsub.f32 %v23265_v47, %v23164_v14  ;;  %v7627_v22 = vadd.f32 %v19536_v6, %v7626_v25  ;;  %v19965_v40 = vpop.eup %14692  ;;  %v23270_v60 = vld [vmem:[#allocation237_spill] sm:$0xff]  ;;  %v23272_v47 = vld [vmem:[#allocation244_spill] sm:$0xff] }
 0x696   : > { %v7296_v23 = vmul.f32 1.442695, %v23263_v49  ;;  %7844 = vmatpush1.bf16.msra.mxu0 %v7736_v1  ;;  %14712 = vpow2.f32 %v7268_v9  ;;  %v23268_v17 = vsub.f32 %v23267_v0, %v23098_v26  ;;  %v23269_v49 = vld [vmem:[#allocation241_spill] sm:$0xff]  ;;  %v19973_v5 = vpop.eup %14694  ;;  %v23274_v9 = vpack.c.bf16 %v19536_v6, %v19529_v4 }
 0x697   : > { %v7304_v33 = vmul.f32 1.442695, %v23266_v10  ;;  %7926 = vmatpush1.bf16.msra.mxu1 %v7738_v53  ;;  %v23271_v2 = vpack.c.bf16 %v23269_v49, %v23270_v60  ;;  %14714 = vpow2.f32 %v7276_v58  ;;  %v23273_v10 = vsub.f32 %v23272_v47, %v23098_v26  ;;  %v19984_v0 = vpop.eup %14696 }
 0x698   : > { %v7284_v32 = vmul.f32 1.442695, %v23268_v17  ;;  %v7628_v1 = vadd.f32 %v19544_v13, %v7627_v22  ;;  %7927 = vmatprep.subr.bf16.mxu1 %v23274_v9  ;;  %v7740_v53 = vpack.c.bf16 %v19909_v54, %v19901_v3  ;;  %23275 = vst [vmem:[#allocation194_spill] sm:$0xff] %v19984_v0  ;;  %14716 = vpow2.f32 %v7296_v23  ;;  %v19991_v49 = vpop.eup %14698  ;;  %v23279_v22 = vld [vmem:[#allocation259_spill] sm:$0xff]  ;;  %v23281_v23 = vld [vmem:[#allocation248_spill] sm:$0xff] }
 0x699   : > { %7845 = vmatprep.subr.bf16.mxu0 %v23271_v2  ;;  %v7292_v25 = vmul.f32 1.442695, %v23273_v10  ;;  %v23276_v2 = vld [vmem:[#allocation255_spill] sm:$0xff]  ;;  %v7742_v17 = vpack.c.bf16 %v19959_v21, %v19952_v50  ;;  %23278 = vst [vmem:[#allocation198_spill] sm:$0xff] %v19991_v49  ;;  %14718 = vpow2.f32 %v7304_v33  ;;  %v23280_v4 = vsub.f32 %v23279_v22, %v23164_v14  ;;  %v23286_v22 = vld [vmem:[#allocation252_spill] sm:$0xff] }
 0x69a   : > { %v23277_v60 = vsub.f32 %v23276_v2, %v23164_v14  ;;  %v7629_v47 = vadd.f32 %v19553_v46, %v7628_v1  ;;  %7846 = vmatpush1.bf16.msra.mxu0 %v7740_v53  ;;  %v19997_v10 = vpop.eup %14700  ;;  %14720 = vpow2.f32 %v7284_v32  ;;  %v23282_v9 = vsub.f32 %v23281_v23, %v23098_v26 }
 0x69b   : > { %v7320_v6 = vmul.f32 1.442695, %v23280_v4  ;;  %7928 = vmatpush1.bf16.msra.mxu1 %v7742_v17  ;;  %v20005_v33 = vpop.eup %14702  ;;  %14722 = vpow2.f32 %v7292_v25  ;;  %v23287_v4 = vsub.f32 %v23286_v22, %v23098_v26  ;;  %v23288_v32 = vpack.c.bf16 %v19553_v46, %v19544_v13 }
 0x69c   : > { %v7312_v58 = vmul.f32 1.442695, %v23277_v60  ;;  %v7300_v2 = vmul.f32 1.442695, %v23282_v9  ;;  %v23283_v60 = vld [vmem:[#allocation245_spill] sm:$0xff]  ;;  %23285 = vst [vmem:[#allocation129_spill] sm:$0xff] %v20005_v33  ;;  %v7630_v53 = vadd.f32 %v19566_v11, %v7629_v47  ;;  %v7744_v17 = vpack.c.bf16 %v19941_v52, %v19933_v59  ;;  %v20016_v23 = vpop.eup %14704 }
 0x69d   : > { %v23284_v21 = vpack.c.bf16 %v23043_v29, %v23283_v60  ;;  %v7308_v1 = vmul.f32 1.442695, %v23287_v4  ;;  %7929 = vmatprep.subr.bf16.mxu1 %v23288_v32  ;;  %v23289_v29 = vld [vmem:[#allocation263_spill] sm:$0xff]  ;;  %v7746_v9 = vpack.c.bf16 %v19991_v49, %v19984_v0  ;;  %v20023_v60 = vpop.eup %14706  ;;  %v23297_v49 = vld [vmem:[#allocation253_spill] sm:$0xff] }
 0x69e   : > { %14724 = vpow2.f32 %v7312_v58  ;;  %23291 = vst [vmem:[#allocation132_spill] sm:$0xff] %v20023_v60  ;;  %v23292_v47 = vld [vmem:[#allocation267_spill] sm:$0xff]  ;;  %v7631_v22 = vadd.f32 %v19573_v19, %v7630_v53  ;;  %v20029_v4 = vpop.eup %14708  ;;  %v23294_v58 = vld [vmem:[#allocation256_spill] sm:$0xff] }
 0x69f   : > { %7847 = vmatprep.subr.bf16.mxu0 %v23284_v21  ;;  %v23290_v21 = vsub.f32 %v23289_v29, %v23164_v14  ;;  %14726 = vpow2.f32 %v7320_v6  ;;  %v23293_v13 = vsub.f32 %v23292_v47, %v23164_v14  ;;  %v23295_v32 = vsub.f32 %v23294_v58, %v23098_v26  ;;  %7930 = vmatpush1.bf16.msra.mxu1 %v7746_v9  ;;  %v20037_v6 = vpop.eup %14710  ;;  %v23299_v47 = vld [vmem:[#allocation260_spill] sm:$0xff] }
 0x6a0   : > { %7848 = vmatpush1.bf16.msra.mxu0 %v7744_v17  ;;  %14728 = vpow2.f32 %v7300_v2  ;;  %v7632_v17 = vadd.f32 %v19580_v12, %v7631_v22  ;;  %v23301_v2 = vpack.c.bf16 %v19573_v19, %v19566_v11  ;;  %v7748_v9 = vpack.c.bf16 %v19973_v5, %v19965_v40  ;;  %v20048_v58 = vpop.eup %14712  ;;  %v23306_v22 = vld [vmem:[#allocation275_spill] sm:$0xff] }
 0x6a1   : > { %v7328_v25 = vmul.f32 1.442695, %v23290_v21  ;;  %v7336_v46 = vmul.f32 1.442695, %v23293_v13  ;;  %v7316_v29 = vmul.f32 1.442695, %v23295_v32  ;;  %14730 = vpow2.f32 %v7308_v1 }
 0x6a2   : > { %v23296_v21 = vld [vmem:[#allocation257_spill] sm:$0xff]  ;;  %v23300_v13 = vsub.f32 %v23299_v47, %v23098_v26  ;;  %7931 = vmatprep.subr.bf16.mxu1 %v23301_v2  ;;  %23302 = vst [vmem:[#allocation135_spill] sm:$0xff] %v20048_v58  ;;  %v7750_v32 = vpack.c.bf16 %v20023_v60, %v20016_v23  ;;  %v23307_v19 = vsub.f32 %v23306_v22, %v23164_v14  ;;  %v23312_v22 = vld [vmem:[#allocation268_spill] sm:$0xff] }
 0x6a3   : > { %v23298_v0 = vpack.c.bf16 %v23296_v21, %v23297_v49  ;;  %14732 = vpow2.f32 %v7328_v25  ;;  %v20055_v21 = vpop.eup %14714  ;;  %v7633_v47 = vadd.f32 %v19589_v48, %v7632_v17  ;;  %v23308_v25 = vld [vmem:[#allocation264_spill] sm:$0xff] }
 0x6a4   : > { %v7324_v53 = vmul.f32 1.442695, %v23300_v13  ;;  %23305 = vst [vmem:[#allocation138_spill] sm:$0xff] %v20055_v21  ;;  %14734 = vpow2.f32 %v7336_v46  ;;  %v7352_v11 = vmul.f32 1.442695, %v23307_v19  ;;  %v20061_v13 = vpop.eup %14716  ;;  %v23309_v2 = vsub.f32 %v23308_v25, %v23098_v26  ;;  %7932 = vmatpush1.bf16.msra.mxu1 %v7750_v32 }
 0x6a5   : > { %7849 = vmatprep.subr.bf16.mxu0 %v23298_v0  ;;  %v23303_v0 = vld [vmem:[#allocation271_spill] sm:$0xff]  ;;  %14736 = vpow2.f32 %v7316_v29  ;;  %v20069_v46 = vpop.eup %14718  ;;  %v23313_v19 = vsub.f32 %v23312_v22, %v23098_v26  ;;  %v23314_v29 = vpack.c.bf16 %v19589_v48, %v19580_v12  ;;  %v7752_v32 = vpack.c.bf16 %v20005_v33, %v19997_v10 }
 0x6a6   : > { %v23304_v49 = vsub.f32 %v23303_v0, %v23164_v14  ;;  %7850 = vmatpush1.bf16.msra.mxu0 %v7748_v9  ;;  %v7332_v0 = vmul.f32 1.442695, %v23309_v2  ;;  %14738 = vpow2.f32 %v7324_v53  ;;  %v7634_v9 = vadd.f32 %v19602_v28, %v7633_v47  ;;  %v20080_v25 = vpop.eup %14720  ;;  %v23319_v47 = vld [vmem:[#allocation272_spill] sm:$0xff] }
 0x6a7   : > { %v7340_v17 = vmul.f32 1.442695, %v23313_v19  ;;  %7933 = vmatprep.subr.bf16.mxu1 %v23314_v29  ;;  %23315 = vst [vmem:[#allocation202_spill] sm:$0xff] %v20080_v25  ;;  %v7754_v2 = vpack.c.bf16 %v20055_v21, %v20048_v58  ;;  %v23320_v12 = vsub.f32 %v23319_v47, %v23098_v26  ;;  %v23324_v21 = vld [vmem:[#allocation273_spill] sm:$0xff]  ;;  %v23326_v47 = vld [vmem:[#allocation282_spill] sm:$0xff] }
 0x6a8   : > { %v7344_v1 = vmul.f32 1.442695, %v23304_v49  ;;  %v23310_v49 = vld [vmem:[#allocation261_spill] sm:$0xff]  ;;  %v7635_v22 = vadd.f32 %v19611_v39, %v7634_v9 }
 0x6a9   : > { %v23311_v60 = vpack.c.bf16 %v23074_v62, %v23310_v49  ;;  %v23316_v62 = vld [vmem:[#allocation279_spill] sm:$0xff]  ;;  %v20087_v49 = vpop.eup %14722  ;;  %v7348_v48 = vmul.f32 1.442695, %v23320_v12  ;;  %7934 = vmatpush1.bf16.msra.mxu1 %v7754_v2  ;;  %v23327_v12 = vld [vmem:[#allocation126_spill] sm:$0xff]  ;;  %v7756_v2 = vpack.c.bf16 %v20037_v6, %v20029_v4 }
 0x6aa   : > { %14740 = vpow2.f32 %v7344_v1  ;;  %23318 = vst [vmem:[#allocation206_spill] sm:$0xff] %v20087_v49  ;;  %v20093_v19 = vpop.eup %14724  ;;  %v23321_v1 = vld [vmem:[#allocation276_spill] sm:$0xff]  ;;  %v23328_v33 = vsub.f32 %v23326_v47, %v23327_v12 }
 0x6ab   : > { %7851 = vmatprep.subr.bf16.mxu0 %v23311_v60  ;;  %v23317_v60 = vsub.f32 %v23316_v62, %v23164_v14  ;;  %14742 = vpow2.f32 %v7352_v11  ;;  %v23322_v29 = vsub.f32 %v23321_v1, %v23098_v26  ;;  %v20101_v11 = vpop.eup %14726 }
 0x6ac   : > { %7852 = vmatpush1.bf16.msra.mxu0 %v7752_v32  ;;  %14744 = vpow2.f32 %v7332_v0  ;;  %v7366_v9 = vmul.f32 1.442695, %v23328_v33  ;;  %v7636_v32 = vadd.f32 %v19620_v61, %v7635_v22  ;;  %v23329_v0 = vpack.c.bf16 %v19611_v39, %v19602_v28  ;;  %v20112_v1 = vpop.eup %14728  ;;  %v23332_v22 = vld [vmem:[#allocation285_spill] sm:$0xff] }
 0x6ad   : > { %v7360_v53 = vmul.f32 1.442695, %v23317_v60  ;;  %v7356_v62 = vmul.f32 1.442695, %v23322_v29  ;;  %v23323_v60 = vld [vmem:[#allocation277_spill] sm:$0xff]  ;;  %14746 = vpow2.f32 %v7340_v17  ;;  %v7758_v29 = vpack.c.bf16 %v20087_v49, %v20080_v25  ;;  %v20119_v33 = vpop.eup %14730 }
 0x6ae   : > { %v23325_v58 = vpack.c.bf16 %v23323_v60, %v23324_v21  ;;  %7935 = vmatprep.subr.bf16.mxu1 %v23329_v0  ;;  %v23333_v60 = vsub.f32 %v23332_v22, %v23164_v14  ;;  %v7637_v39 = vadd.f32 %v19627_v56, %v7636_v32  ;;  %v20125_v47 = vpop.eup %14732  ;;  %v23339_v14 = vld [vmem:[#allocation286_spill] sm:$0xff] }
 0x6af   : > { %14748 = vpow2.f32 %v7360_v53  ;;  %v23334_v53 = vld [vmem:[#allocation280_spill] sm:$0xff]  ;;  %7936 = vmatpush1.bf16.msra.mxu1 %v7758_v29  ;;  %v20133_v25 = vpop.eup %14734 }
 0x6b0   : > { %7853 = vmatprep.subr.bf16.mxu0 %v23325_v58  ;;  %v23330_v58 = vld [vmem:[#allocation41_spill] sm:$0xff]  ;;  %v7368_v28 = vmul.f32 1.442695, %v23333_v60  ;;  %14750 = vpow2.f32 %v7348_v48  ;;  %v23340_v48 = vsub.f32 %v23339_v14, %v23098_v26  ;;  %v7638_v32 = vadd.f32 %v19641_v34, %v7637_v39  ;;  %v20144_v29 = vpop.eup %14736 }
 0x6b1   : > { %v23331_v21 = vsub.f32 %v23330_v58, %v23327_v12  ;;  %7854 = vmatpush1.bf16.msra.mxu0 %v7756_v2  ;;  %14752 = vpow2.f32 %v7356_v62  ;;  %v23335_v12 = vsub.f32 %v23334_v53, %v23098_v26  ;;  %v23336_v58 = vld [vmem:[#allocation179_spill] sm:$0xff]  ;;  %v23341_v62 = vpack.c.bf16 %v19627_v56, %v19620_v61  ;;  %v20148_v60 = vpop.eup %14738  ;;  %v23348_v14 = vld [vmem:[#allocation293_spill] sm:$0xff] }
 0x6b2   : > { %v7372_v22 = vmul.f32 1.442695, %v23340_v48  ;;  %14754 = vpow2.f32 %v7366_v9  ;;  %v7760_v2 = vpack.c.bf16 %v20069_v46, %v20061_v13  ;;  %v7639_v26 = vadd.f32 %v19650_v24, %v7638_v32  ;;  %v23349_v48 = vld [vmem:[#allocation292_spill] sm:$0xff] }
 0x6b3   : > { %v7374_v17 = vmul.f32 1.442695, %v23331_v21  ;;  %v7364_v0 = vmul.f32 1.442695, %v23335_v12  ;;  %v23337_v21 = vld [vmem:[#allocation289_spill] sm:$0xff]  ;;  %7937 = vmatprep.subr.bf16.mxu1 %v23341_v62  ;;  %v23342_v61 = vpack.c.bf16 %v23119_v16, %v23116_v37  ;;  %v23344_v53 = vpack.c.bf16 %v19650_v24, %v19641_v34 }
 0x6b4   : > { %v23338_v49 = vpack.c.bf16 %v23336_v58, %v23337_v21  ;;  %v20151_v9 = vpop.eup %14740  ;;  %v23346_v16 = vld [vmem:[#allocation149_spill] sm:$0xff]  ;;  %v23350_v34 = vpack.c.bf16 %v23348_v14, %v23349_v48  ;;  %v7768_v62 = vpack.c.bf16 %v20133_v25, %v20125_v47 }
 0x6b5   : > { %14756 = vpow2.f32 %v7374_v17  ;;  %v20156_v56 = vpop.eup %14742  ;;  %v23343_v17 = vld [vmem:[#allocation146_spill] sm:$0xff] }
 0x6b6   : > { %7855 = vmatprep.subr.bf16.mxu0 %v23338_v49  ;;  %v7762_v49 = vpack.c.bf16 %v20119_v33, %v20112_v1  ;;  %14758 = vpow2.f32 %v7368_v28  ;;  %v7640_v39 = vadd.f32 %v23343_v17, %v7639_v26  ;;  %v7764_v28 = vpack.c.bf16 %v20101_v11, %v20093_v19  ;;  %v20164_v12 = vpop.eup %14744 }
 0x6b7   : > { %7856 = vmatpush1.bf16.msra.mxu0 %v7760_v2  ;;  %14760 = vpow2.f32 %v7364_v0  ;;  %v7766_v0 = vpack.c.bf16 %v20148_v60, %v20144_v29  ;;  %v20168_v58 = vpop.eup %14746  ;;  %v23352_v32 = vpack.c.bf16 %v23346_v16, %v23343_v17  ;;  %v7772_v14 = vpack.c.bf16 %v20156_v56, %v20151_v9 }
 0x6b8   : > { %7938 = vmatpush1.bf16.msra.mxu1 %v7762_v49  ;;  %7857 = vmatprep.subr.bf16.mxu0 %v23342_v61  ;;  %14762 = vpow2.f32 %v7372_v22  ;;  %23345 = vst [vmem:[#allocation141_spill] sm:$0xff] %v20168_v58  ;;  %v7641_v37 = vadd.f32 %v23346_v16, %v7640_v39  ;;  %v7770_v49 = vpack.c.bf16 %v20168_v58, %v20164_v12  ;;  %v23405_v58 = vld [vmem:[#allocation173_spill] sm:$0xff] }
 0x6b9   : > { %7939 = vmatprep.subr.bf16.mxu1 %v23344_v53  ;;  %v20171_v21 = vpop.eup %14748  ;;  %v23354_v53 = vld [vmem:[#allocation295_spill] sm:$0xff] }
 0x6ba   : > { %23347 = vst [vmem:[#allocation144_spill] sm:$0xff] %v20171_v21  ;;  %v20176_v24 = vpop.eup %14750  ;;  %v7642_v22 = vadd.f32 %v19680_v30, %v7641_v37  ;;  %v23358_v37 = vpack.c.bf16 %v19689_v8, %v19680_v30 }
 0x6bb   : > { %7858 = vmatpush1.bf16.msra.mxu0 %v7764_v28  ;;  %23351 = vst [vmem:[#allocation147_spill] sm:$0xff] %v20176_v24  ;;  %v20184_v2 = vpop.eup %14752  ;;  %v23355_v28 = vld [vmem:[#allocation294_spill] sm:$0xff] }
 0x6bc   : > { %7940 = vmatpush1.bf16.msra.mxu1 %v7766_v0  ;;  %7859 = vmatprep.subr.bf16.mxu0 %v23350_v34  ;;  %23353 = vst [vmem:[#allocation150_spill] sm:$0xff] %v20184_v2  ;;  %v14755_v26 = vpop.eup %14754  ;;  %v7643_v61 = vadd.f32 %v19689_v8, %v7642_v22  ;;  %v23356_v0 = vpack.c.bf16 %v23354_v53, %v23355_v28  ;;  %v23365_v28 = vld [vmem:[#allocation32_spill] sm:$0xff] }
 0x6bd   : > { %7941 = vmatprep.subr.bf16.mxu1 %v23352_v32  ;;  %v7774_v34 = vpack.c.bf16 %v20184_v2, %v20176_v24 }
 0x6be   : > { %v7644_v16 = vadd.f32 %v14755_v26, %v7643_v61  ;;  %v23363_v61 = vld [vmem:[#allocation36_spill] sm:$0xff] }
 0x6bf   : > { %7860 = vmatpush1.bf16.msra.mxu0 %v7768_v62  ;;  %v14757_v39 = vpop.eup %14756  ;;  %v23361_v62 = vld [vmem:[#allocation296_spill] sm:$0xff]  ;;  %v20213_v53 = vrot.slane %v23363_v61, 2 }
 0x6c0   : > { %7942 = vmatpush1.bf16.msra.mxu1 %v7770_v49  ;;  %7861 = vmatprep.subr.bf16.mxu0 %v23356_v0  ;;  %v20192_v17 = vpop.eup %14758  ;;  %v7779_v32 = vpack.c.bf16 %v14757_v39, %v14755_v26  ;;  %v23362_v49 = vpack.c.bf16 %v23167_v36, %v23361_v62  ;;  %v7786_v0 = vrot.slane %v23365_v28, 1  ;;  %v23366_v36 = vmov 0.0   ;;  %v23367_v26 = vld [vmem:[#allocation15_spill] sm:$0xff] }
 0x6c1   : > { %23357 = vst [vmem:[#allocation210_spill] sm:$0xff] %v20192_v17  ;;  %7943 = vmatprep.subr.bf16.mxu1 %v23358_v37  ;;  %v20199_v48 = vpop.eup %14760  ;;  %v7776_v30 = vpack.c.bf16 %v20192_v17, %v20171_v21  ;;  %23364 = vst [vmem:[#allocation68_spill] sm:$0xff] %v20213_v53  ;;  %v20220_v37 = vrot.slane %v23367_v26, 2  ;;  %v23389_v17 = vld [vmem:[#allocation148_spill] sm:$0xff]  ;;  %v23390_v21 = vld [vmem:[#allocation90_spill] sm:$0xff] }
 0x6c2   : > { %23359 = vst [vmem:[#allocation214_spill] sm:$0xff] %v20199_v48  ;;  %v20203_v22 = vpop.eup %14762 }
 0x6c3   : > { %23360 = vst [vmem:[#allocation153_spill] sm:$0xff] %v20203_v22  ;;  %7862 = vmatpush1.bf16.msra.mxu0 %v7772_v14  ;;  %v7778_v8 = vpack.c.bf16 %v20203_v22, %v20199_v48  ;;  %23368 = vst [vmem:[#allocation71_spill] sm:$0xff] %v20220_v37  ;;  %v23369_v14 = vld [vmem:[#allocation25_spill] sm:$0xff] }
 0x6c4   : > { %7944 = vmatpush1.bf16.msra.mxu1 %v7774_v34  ;;  %7863 = vmatprep.subr.bf16.mxu0 %v23362_v49  ;;  %v20223_v34 = vrot.slane %v23369_v14, 2  ;;  %v7645_v49 = vadd.f32 %v14757_v39, %v7644_v16 }
 0x6c5   : > { %7945 = vmatprep.subr.bf16.mxu1 %v7779_v32  ;;  %v23371_v32 = vld [vmem:[#allocation26_spill] sm:$0xff] }
 0x6c6   : > { %23370 = vst [vmem:[#allocation74_spill] sm:$0xff] %v20223_v34  ;;  %v20228_v62 = vrot.slane %v23371_v32, 2 }
 0x6c7   : > { %7864 = vmatpush1.bf16.msra.mxu0 %v7776_v30  ;;  %v7508_v30 = vrot.slane %v19749_v38, 4 }
 0x6c8   : > { %7946 = vmatpush1.bf16.msra.mxu1 %v7778_v8  ;;  %7983 = vmatprep.subr.mxu0 %v20213_v53  ;;  %23372 = vst [vmem:[#allocation218_spill] sm:$0xff] %v20228_v62  ;;  %v7646_v8 = vrot.slane %v7645_v49, 4 }
 0x6c9   : > { %v7509_v28 = vadd.f32 %v7508_v30, %v19749_v38 }
 0x6ca   : > { %7866 = vmatmul.mubr.bf16.vlgmr.msra.gmra.mrb[136].mxu0 %v7786_v0 }
 0x6cb   : > { %7948 = vmatmul.mubr.bf16.vlgmr.msra.gmra.mrb[156].mxu1 %v7786_v0  ;;  %8047 = vmatprep.mubr.f32.mxu0 %v20213_v53  ;;  %v7647_v0 = vadd.f32 %v7646_v8, %v7645_v49  ;;  %v7510_v53 = vrot.slane %v7509_v28, 2 }
 0x6cc   : > { %8324 = vmatprep.mubr.f32.mxu1 %v23366_v36 }
 0x6cd   : > { %v7511_v14 = vadd.f32 %v7510_v53, %v7509_v28 }
 0x6cf   : > { %v7512_v61 = vrot.slane %v7511_v14, 1 }
 0x6d0   : > { %7984 = vmatpush1.xpose.msra.mxu0 %v20220_v37 }
 0x6d1   : > { %8053 = vmatprep.subr.mxu0 %v20223_v34  ;;  %v7513_v26 = vadd.f32 %v7512_v61, %v7511_v14 }
 0x6d3   : > { %8048 = vmatmul.mubr.f32.vlgmr.msra.gmra.mrb[6].mxu0 %v20220_v37  ;;  %v7648_v37 = vrot.slane %v7647_v0, 2  ;;  %14764 = vrcp.f32 %v7513_v26 }
 0x6d4   : > { %8054 = vmatpush1.xpose.msra.mxu0 %v20228_v62  ;;  %8117 = vmatprep.mubr.f32.mxu0 %v20223_v34 }
 0x6d5   : > { %13609 = vmatprep.subr.mxu0 %v23366_v36  ;;  %v7649_v32 = vadd.f32 %v7648_v37, %v7647_v0 }
 0x6d7   : > { %v7650_v34 = vrot.slane %v7649_v32, 1 }
 0x6d9   : > { %v7651_v22 = vadd.f32 %v7650_v34, %v7649_v32 }
 0x6db   : > { %8118 = vmatmul.mubr.f32.vlgmr.msra.gmra.mrb[6].mxu0 %v20228_v62  ;;  %14766 = vrcp.f32 %v7651_v22 }
 0x6dc   : > { %13611 = vmatprep.mubr.msk.f32.mxu0 %vm14809_vm9, %v23366_v36  ;;  %v20239_v36 = vstv %s14225_s16 }
 0x6dd   : > { %v14765_v62 = vpop.eup %14764  ;;  %23373 = vst [vmem:[#allocation222_spill] sm:$0xff] %v20239_v36 }
 0x6de   : > { %v7964_v38 = vmul.f32 %v14765_v62, %v20239_v36 }
 0x6e5   : > { %v14767_v39 = vpop.eup %14766 }
 0x6e6   : > { %v7966_v53 = vmul.f32 %v14767_v39, %v20239_v36  ;;  %v23387_v36 = vld [vmem:[#allocation145_spill] sm:$0xff] }
 0x79d   : > { %v20241_v16 = vpop.f32.mrb[136].mxu0 }
 0x79e   : > { %23374 = vst [vmem:[#allocation77_spill] sm:$0xff] %v20241_v16  ;;  %v20244_v49 = vpop.f32.mrb[156].mxu1  ;;  %v7869_v30 = vpop.f32.mrb[137].mxu0 }
 0x79f   : > { %23375 = vst [vmem:[#allocation80_spill] sm:$0xff] %v20244_v49  ;;  %v20247_v37 = vmul.f32 %v7964_v38, %v7869_v30  ;;  %v7951_v61 = vpop.f32.mrb[157].mxu1  ;;  %v7871_v14 = vpop.f32.mrb[138].mxu0  ;;  %v23378_v30 = vld [vmem:[#allocation69_spill] sm:$0xff] }
 0x7a0   : > { %v20249_v26 = vmul.f32 %v7966_v53, %v7951_v61  ;;  %v7953_v22 = vpop.f32.mrb[158].mxu1  ;;  %v7872_v34 = vpop.f32.mrb[139].mxu0  ;;  %v23379_v14 = vld [vmem:[#allocation72_spill] sm:$0xff] }
 0x7a1   : > { %23376 = vst [vmem:[#allocation83_spill] sm:$0xff] %v20247_v37  ;;  %v7954_v32 = vpop.f32.mrb[159].mxu1  ;;  %v7376_v53 = vadd.f32 %v23379_v14, %v23378_v30  ;;  %v23380_v34 = vld [vmem:[#allocation75_spill] sm:$0xff] }
 0x7a2   : > { %23377 = vst [vmem:[#allocation86_spill] sm:$0xff] %v20249_v26  ;;  %v23382_v26 = vld [vmem:[#allocation136_spill] sm:$0xff]  ;;  %v23388_v14 = vld [vmem:[#allocation87_spill] sm:$0xff] }
 0x7a3   : > { %v7377_v32 = vadd.f32 %v23380_v34, %v7376_v53 }
 0x7ae   : > { %v8119_v8 = vpop.f32.mrb[6].mxu0 }
 0x7af   : > { %v8121_v28 = vpop.f32.mrb[7].mxu0  ;;  %v8124_v0 = vsel %vm8123_vm13, %v8119_v8, -inf }
 0x7b0   : > { %8125 = vmax.xlane.f32.xlu0 %v8124_v0  ;;  %v23381_v28 = vld [vmem:[#allocation78_spill] sm:$0xff] }
 0x7b1   : > { %v7378_v0 = vadd.f32 %v23381_v28, %v7377_v32  ;;  %v23392_v32 = vld [vmem:[#allocation93_spill] sm:$0xff] }
 0x83d   : > { %v8126_v62 = vpop.xlane.xlu0 %8125 }
 0x83e   : > { %v8127_v16 = vsub.f32 %v8126_v62, %v8119_v8  ;;  %v23383_v8 = vld [vmem:[#allocation139_spill] sm:$0xff] }
 0x83f   : > { %v7514_v62 = vadd.f32 %v23383_v8, %v23382_v26  ;;  %v23391_v26 = vld [vmem:[#allocation151_spill] sm:$0xff]  ;;  %v23394_v8 = vld [vmem:[#allocation96_spill] sm:$0xff] }
 0x840   : > { %v8128_v49 = vsel %vm8123_vm13, %v8127_v16, -inf }
 0x841   : > { %8129 = vmax.xlane.f32.xlu1 %v8128_v49  ;;  %v23384_v49 = vld [vmem:[#allocation81_spill] sm:$0xff] }
 0x842   : > { %v7379_v37 = vadd.f32 %v23384_v49, %v7378_v0  ;;  %v23393_v0 = vld [vmem:[#allocation154_spill] sm:$0xff] }
 0x8ce   : > { %v8130_v48 = vpop.xlane.xlu1 %8129 }
 0x8cf   : > { %v8131_v39 = vsub.f32 %v8127_v16, %v8130_v48  ;;  %v23385_v48 = vld [vmem:[#allocation142_spill] sm:$0xff] }
 0x8d0   : > { %v7515_v16 = vadd.f32 %v23385_v48, %v7514_v62  ;;  %v21997_v62 = vmov 1   ;;  %v23397_v48 = vld [vmem:[#allocation160_spill] sm:$0xff] }
 0x8d1   : > { %v8132_v38 = vmul.f32 1.442695, %v8131_v39  ;;  %v23386_v39 = vld [vmem:[#allocation84_spill] sm:$0xff]  ;;  %14251 = vset.pattern.permute.xlu0 %v21997_v62 }
 0x8d2   : > { %v7516_v30 = vadd.f32 %v23387_v36, %v7515_v16 }
 0x8d3   : > { %14768 = vpow2.f32 %v8132_v38  ;;  %v7380_v38 = vadd.f32 %v23386_v39, %v7379_v37  ;;  %v23398_v39 = vld [vmem:[#allocation284_spill] sm:$0xff] }
 0x8d4   : > { %v7517_v24 = vadd.f32 %v23389_v17, %v7516_v30  ;;  %v23395_v17 = vld [vmem:[#allocation157_spill] sm:$0xff]  ;;  %v23399_v30 = vld [vmem:[#allocation163_spill] sm:$0xff] }
 0x8d5   : > { %v7381_v2 = vadd.f32 %v23388_v14, %v7380_v38 }
 0x8d6   : > { %v7518_v34 = vadd.f32 %v23391_v26, %v7517_v24  ;;  %v23400_v24 = vld [vmem:[#allocation67_spill] sm:$0xff] }
 0x8d7   : > { %v7382_v53 = vadd.f32 %v23390_v21, %v7381_v2  ;;  %v23396_v21 = vld [vmem:[#allocation283_spill] sm:$0xff] }
 0x8d8   : > { %v7519_v37 = vadd.f32 %v23393_v0, %v7518_v34  ;;  %v23402_v34 = vld [vmem:[#allocation70_spill] sm:$0xff] }
 0x8d9   : > { %v7383_v28 = vadd.f32 %v23392_v32, %v7382_v53  ;;  %v23401_v53 = vld [vmem:[#allocation166_spill] sm:$0xff] }
 0x8da   : > { %v7520_v49 = vadd.f32 %v23395_v17, %v7519_v37  ;;  %v23406_v17 = vld [vmem:[#allocation76_spill] sm:$0xff] }
 0x8db   : > { %v7384_v36 = vadd.f32 %v23394_v8, %v7383_v28  ;;  %v23403_v28 = vld [vmem:[#allocation169_spill] sm:$0xff] }
 0x8dc   : > { %v7521_v16 = vadd.f32 %v23397_v48, %v7520_v49  ;;  %v23404_v8 = vld [vmem:[#allocation73_spill] sm:$0xff]  ;;  %v23408_v48 = vld [vmem:[#allocation79_spill] sm:$0xff] }
 0x8dd   : > { %v20253_v61 = vpop.eup %14768  ;;  %v7385_v2 = vadd.f32 %v23396_v21, %v7384_v36  ;;  %v23407_v21 = vld [vmem:[#allocation177_spill] sm:$0xff] }
 0x8de   : > { %v8134_v22 = vsel %vm8123_vm13, %v20253_v61, 0.0  ;;  %v7522_v14 = vadd.f32 %v23399_v30, %v7521_v16  ;;  %v23410_v30 = vld [vmem:[#allocation82_spill] sm:$0xff] }
 0x8df   : > { %8135 = vadd.xlane.f32.xlu0 %v8134_v22  ;;  %v14790_v22 = vld [vmem:[%s21223_s7] sm:$0x1]  ;;  %v7386_v38 = vadd.f32 %v23398_v39, %v7385_v2  ;;  %v23409_v39 = vld [vmem:[#allocation181_spill] sm:$0xff] }
 0x8e0   : > { %v7523_v26 = vadd.f32 %v23401_v53, %v7522_v14  ;;  %v23412_v53 = vld [vmem:[#allocation85_spill] sm:$0xff] }
 0x8e2   : > { %v7524_v0 = vadd.f32 %v23403_v28, %v7523_v26  ;;  %v23414_v28 = vld [vmem:[#allocation88_spill] sm:$0xff] }
 0x8e4   : > { %v7525_v37 = vadd.f32 %v23405_v58, %v7524_v0  ;;  %v23416_v0 = vld [vmem:[#allocation91_spill] sm:$0xff] }
 0x8e6   : > { %v7526_v49 = vadd.f32 %v23407_v21, %v7525_v37  ;;  %v23418_v21 = vld [vmem:[#allocation94_spill] sm:$0xff] }
 0x8e8   : > { %v7527_v16 = vadd.f32 %v23409_v39, %v7526_v49  ;;  %v23420_v39 = vld [vmem:[#allocation97_spill] sm:$0xff] }
 0x8f5   : > { %8193 = vrot.lane.b32.xlu0 %v14790_v22, %s14804_s15  ;;  %v7387_v22 = vadd.f32 %v23400_v24, %v7386_v38  ;;  %v23411_v24 = vld [vmem:[#allocation185_spill] sm:$0xff] }
 0x8f6   : > { %v7528_v14 = vadd.f32 %v23411_v24, %v7527_v16  ;;  %v23422_v24 = vld [vmem:[#allocation100_spill] sm:$0xff] }
 0x8f7   : > { %v7388_v32 = vadd.f32 %v23402_v34, %v7387_v22  ;;  %v23413_v34 = vld [vmem:[#allocation189_spill] sm:$0xff] }
 0x8f8   : > { %v7529_v26 = vadd.f32 %v23413_v34, %v7528_v14  ;;  %v23424_v34 = vld [vmem:[#allocation103_spill] sm:$0xff] }
 0x8f9   : > { %v7389_v62 = vadd.f32 %v23404_v8, %v7388_v32  ;;  %v23415_v8 = vld [vmem:[#allocation193_spill] sm:$0xff] }
 0x8fa   : > { %v7530_v58 = vadd.f32 %v23415_v8, %v7529_v26  ;;  %v23426_v8 = vld [vmem:[#allocation106_spill] sm:$0xff] }
 0x8fb   : > { %v7390_v36 = vadd.f32 %v23406_v17, %v7389_v62  ;;  %v23417_v17 = vld [vmem:[#allocation197_spill] sm:$0xff] }
 0x8fc   : > { %v7531_v37 = vadd.f32 %v23417_v17, %v7530_v58  ;;  %v23428_v17 = vld [vmem:[#allocation109_spill] sm:$0xff] }
 0x8fd   : > { %v7391_v2 = vadd.f32 %v23408_v48, %v7390_v36  ;;  %v23419_v48 = vld [vmem:[#allocation201_spill] sm:$0xff] }
 0x8fe   : > { %v7532_v49 = vadd.f32 %v23419_v48, %v7531_v37  ;;  %v23430_v48 = vld [vmem:[#allocation112_spill] sm:$0xff] }
 0x8ff   : > { %v7392_v38 = vadd.f32 %v23410_v30, %v7391_v2  ;;  %v23421_v30 = vld [vmem:[#allocation99_spill] sm:$0xff] }
 0x900   : > { %v7533_v16 = vadd.f32 %v23421_v30, %v7532_v49  ;;  %v23432_v30 = vld [vmem:[#allocation115_spill] sm:$0xff] }
 0x901   : > { %v7393_v22 = vadd.f32 %v23412_v53, %v7392_v38  ;;  %v23423_v53 = vld [vmem:[#allocation102_spill] sm:$0xff] }
 0x902   : > { %v7534_v14 = vadd.f32 %v23423_v53, %v7533_v16  ;;  %v23434_v53 = vld [vmem:[#allocation118_spill] sm:$0xff] }
 0x903   : > { %v7394_v32 = vadd.f32 %v23414_v28, %v7393_v22  ;;  %v23425_v28 = vld [vmem:[#allocation105_spill] sm:$0xff] }
 0x904   : > { %v7535_v26 = vadd.f32 %v23425_v28, %v7534_v14  ;;  %v23436_v28 = vld [vmem:[#allocation120_spill] sm:$0xff] }
 0x905   : > { %v7395_v62 = vadd.f32 %v23416_v0, %v7394_v32  ;;  %v23427_v0 = vld [vmem:[#allocation108_spill] sm:$0xff] }
 0x906   : > { %v7536_v58 = vadd.f32 %v23427_v0, %v7535_v26  ;;  %v23438_v0 = vld [vmem:[#allocation123_spill] sm:$0xff] }
 0x907   : > { %v7396_v36 = vadd.f32 %v23418_v21, %v7395_v62  ;;  %v23429_v21 = vld [vmem:[#allocation111_spill] sm:$0xff] }
 0x908   : > { %v7537_v37 = vadd.f32 %v23429_v21, %v7536_v58 }
 0x909   : > { %v7397_v2 = vadd.f32 %v23420_v39, %v7396_v36  ;;  %v23431_v39 = vld [vmem:[#allocation114_spill] sm:$0xff] }
 0x90a   : > { %v7538_v49 = vadd.f32 %v23431_v39, %v7537_v37 }
 0x90b   : > { %v7398_v38 = vadd.f32 %v23422_v24, %v7397_v2  ;;  %v23433_v24 = vld [vmem:[#allocation269_spill] sm:$0xff] }
 0x90c   : > { %v7539_v16 = vadd.f32 %v23433_v24, %v7538_v49  ;;  %v23441_v24 = vld [vmem:[#allocation158_spill] sm:$0xff] }
 0x90d   : > { %v7399_v22 = vadd.f32 %v23424_v34, %v7398_v38  ;;  %v23435_v34 = vld [vmem:[#allocation117_spill] sm:$0xff] }
 0x90e   : > { %v7540_v14 = vadd.f32 %v23435_v34, %v7539_v16 }
 0x90f   : > { %v7400_v32 = vadd.f32 %v23426_v8, %v7399_v22  ;;  %v23437_v8 = vld [vmem:[#allocation124_spill] sm:$0xff] }
 0x910   : > { %v7541_v26 = vadd.f32 %v23436_v28, %v7540_v14 }
 0x911   : > { %v7401_v62 = vadd.f32 %v23428_v17, %v7400_v32 }
 0x912   : > { %v7542_v58 = vadd.f32 %v23438_v0, %v7541_v26  ;;  %v23444_v26 = vld [vmem:[#allocation167_spill] sm:$0xff]  ;;  %v23446_v0 = vmov 1  }
 0x913   : > { %v7402_v36 = vadd.f32 %v23430_v48, %v7401_v62  ;;  %v23439_v62 = vld [vmem:[#allocation152_spill] sm:$0xff]  ;;  %v23440_v48 = vld [vmem:[#allocation155_spill] sm:$0xff] }
 0x914   : > { %v7543_v21 = vadd.f32 %v23439_v62, %v7542_v58  ;;  %v23448_v62 = vld [vmem:[#allocation178_spill] sm:$0xff] }
 0x915   : > { %v7403_v2 = vadd.f32 %v23432_v30, %v7402_v36 }
 0x916   : > { %v7544_v36 = vadd.f32 %v23440_v48, %v7543_v21  ;;  %v23449_v21 = vld [vmem:[#allocation182_spill] sm:$0xff] }
 0x917   : > { %v7404_v38 = vadd.f32 %v23434_v53, %v7403_v2  ;;  %v23450_v48 = vld [vmem:[#allocation186_spill] sm:$0xff] }
 0x918   : > { %v7545_v49 = vadd.f32 %v19757_v20, %v7544_v36 }
 0x919   : > { %v7405_v22 = vadd.f32 %v23178_v42, %v7404_v38  ;;  %v23442_v38 = vld [vmem:[#allocation161_spill] sm:$0xff] }
 0x91a   : > { %v7546_v30 = vadd.f32 %v19764_v57, %v7545_v49 }
 0x91b   : > { %v7406_v32 = vadd.f32 %v23437_v8, %v7405_v22 }
 0x91c   : > { %v7547_v16 = vadd.f32 %v23441_v24, %v7546_v30 }
 0x91d   : > { %v7407_v17 = vadd.f32 %v23193_v18, %v7406_v32  ;;  %v23445_v32 = vld [vmem:[#allocation170_spill] sm:$0xff] }
 0x91f   : > { %v7408_v37 = vadd.f32 %v23194_v51, %v7407_v17  ;;  %v7548_v51 = vadd.f32 %v23442_v38, %v7547_v16  ;;  %v23453_v16 = vld [vmem:[#allocation198_spill] sm:$0xff]  ;;  %v23454_v38 = vld [vmem:[#allocation129_spill] sm:$0xff] }
 0x921   : > { %v7409_v39 = vadd.f32 %v23207_v41, %v7408_v37  ;;  %v7549_v20 = vadd.f32 %v19824_v44, %v7548_v51  ;;  %v23443_v41 = vld [vmem:[#allocation164_spill] sm:$0xff] }
 0x922   : > { %v23455_v51 = vld [vmem:[#allocation132_spill] sm:$0xff] }
 0x923   : > { %v7410_v42 = vadd.f32 %v19703_v31, %v7409_v39  ;;  %v7550_v57 = vadd.f32 %v23443_v41, %v7549_v20  ;;  %v23457_v20 = vld [vmem:[#allocation138_spill] sm:$0xff] }
 0x924   : > { %v23458_v41 = vld [vmem:[#allocation202_spill] sm:$0xff] }
 0x925   : > { %v7411_v2 = vadd.f32 %v19740_v35, %v7410_v42  ;;  %v23451_v42 = vld [vmem:[#allocation190_spill] sm:$0xff] }
 0x927   : > { %v7412_v18 = vadd.f32 %v19773_v7, %v7411_v2  ;;  %v7551_v7 = vadd.f32 %v19856_v63, %v7550_v57  ;;  %v23452_v2 = vld [vmem:[#allocation194_spill] sm:$0xff] }
 0x929   : > { %v7413_v34 = vadd.f32 %v19805_v43, %v7412_v18  ;;  %v7552_v43 = vadd.f32 %v23445_v32, %v7551_v7 }
 0x92b   : > { %v7414_v31 = vadd.f32 %v19810_v45, %v7413_v34  ;;  %v23447_v45 = vld [vmem:[#allocation174_spill] sm:$0xff]  ;;  %v23456_v34 = vld [vmem:[#allocation135_spill] sm:$0xff] }
 0x92c   : > { %v7553_v58 = vadd.f32 %v23447_v45, %v7552_v43  ;;  %v23460_v43 = vld [vmem:[#allocation141_spill] sm:$0xff]  ;;  %v23463_v45 = vld [vmem:[#allocation210_spill] sm:$0xff] }
 0x92d   : > { %v7415_v35 = vadd.f32 %v19837_v15, %v7414_v31 }
 0x92e   : > { %v7554_v15 = vadd.f32 %v23448_v62, %v7553_v58  ;;  %v23464_v58 = vld [vmem:[#allocation150_spill] sm:$0xff] }
 0x92f   : > { %v7416_v8 = vadd.f32 %v23444_v26, %v7415_v35 }
 0x930   : > { %v7555_v63 = vadd.f32 %v23449_v21, %v7554_v15  ;;  %v23466_v15 = vld [vmem:[#allocation153_spill] sm:$0xff] }
 0x931   : > { %v7417_v44 = vadd.f32 %v19869_v55, %v7416_v8 }
 0x932   : > { %v7556_v36 = vadd.f32 %v23450_v48, %v7555_v63 }
 0x933   : > { %v7418_v17 = vadd.f32 %v19877_v27, %v7417_v44  ;;  %v23462_v44 = vld [vmem:[#allocation147_spill] sm:$0xff] }
 0x934   : > { %v7557_v49 = vadd.f32 %v19952_v50, %v7556_v36 }
 0x936   : > { %v7558_v30 = vadd.f32 %v23451_v42, %v7557_v49 }
 0x938   : > { %v7559_v24 = vadd.f32 %v23452_v2, %v7558_v30  ;;  %v23467_v30 = vld [vmem:[#allocation15_spill] sm:$0xff] }
 0x939   : > { %v8168_v2 = vrot.slane %v23467_v30, 1 }
 0x93a   : > { %v7560_v18 = vadd.f32 %v23453_v16, %v7559_v24  ;;  %v23468_v24 = vld [vmem:[#allocation36_spill] sm:$0xff]  ;;  %v23469_v16 = vld [vmem:[#allocation26_spill] sm:$0xff] }
 0x96c   : > { %v8136_v53 = vpop.xlane.xlu0 %8135 }
 0x96d   : > { %14770 = vrcp.f32 %v8136_v53  ;;  %v7561_v53 = vadd.f32 %v20016_v23, %v7560_v18  ;;  %v8154_v18 = vrot.slane %v23469_v16, 3 }
 0x96f   : > { %v7562_v50 = vadd.f32 %v23455_v51, %v7561_v53  ;;  %v8170_v53 = vrot.slane %v23469_v16, 1  ;;  %v23471_v51 = vld [vmem:[#allocation25_spill] sm:$0xff] }
 0x970   : > { %v8194_v14 = vpop.permute.xlu0 %8193 }
 0x971   : > { %14226 = vpush %v8194_v14  ;;  %v7563_v14 = vadd.f32 %v23456_v34, %v7562_v50  ;;  %v8155_v50 = vrot.slane %v23471_v51, 3 }
 0x973   : > { %v7564_v31 = vadd.f32 %v23457_v20, %v7563_v14  ;;  %v23472_v14 = vld [vmem:[#allocation71_spill] sm:$0xff]  ;;  %v23473_v20 = vld [vmem:[#allocation68_spill] sm:$0xff] }
 0x975   : > { %v7565_v57 = vadd.f32 %v23458_v41, %v7564_v31 }
 0x977   : > { %v14771_v22 = vpop.eup %14770 }
 0x978   : > { %v8138_v28 = vmul.f32 %v14771_v22, %v20253_v61  ;;  %v7419_v61 = vadd.f32 %v19901_v3, %v7418_v17  ;;  %v23459_v22 = vld [vmem:[#allocation206_spill] sm:$0xff] }
 0x979   : > { %v7566_v23 = vadd.f32 %v23459_v22, %v7565_v57  ;;  %v23475_v57 = vld [vmem:[#allocation74_spill] sm:$0xff] }
 0x97a   : > { %8141 = vperm.xlu1 %14249, %v8138_v28   ;;  %v7420_v37 = vadd.f32 %v19909_v54, %v7419_v61 }
 0x97c   : > { %v7421_v39 = vadd.f32 %v19933_v59, %v7420_v37 }
 0x97e   : > { %14250 = vset.pattern.permute.xlu1 %v23446_v0  ;;  %v7422_v55 = vadd.f32 %v19941_v52, %v7421_v39  ;;  %v23461_v0 = vld [vmem:[#allocation144_spill] sm:$0xff] }
 0x97f   : > { %8149 = vperm.xlu1 %14250, %v8138_v28   ;;  %v7567_v28 = vadd.f32 %v20112_v1, %v7566_v23 }
 0x980   : > { %v7423_v27 = vadd.f32 %v19965_v40, %v7422_v55 }
 0x981   : > { %v7568_v7 = vadd.f32 %v20119_v33, %v7567_v28 }
 0x982   : > { %v7424_v3 = vadd.f32 %v19973_v5, %v7423_v27  ;;  %v8152_v27 = vrot.slane %v23467_v30, 3 }
 0x983   : > { %v7569_v26 = vadd.f32 %v20144_v29, %v7568_v7 }
 0x984   : > { %v7425_v54 = vadd.f32 %v19997_v10, %v7424_v3  ;;  %v8153_v3 = vrot.slane %v23468_v24, 3 }
 0x985   : > { %v7570_v8 = vadd.f32 %v20148_v60, %v7569_v26 }
 0x986   : > { %v7426_v59 = vadd.f32 %v23454_v38, %v7425_v54  ;;  %v8169_v54 = vrot.slane %v23468_v24, 1  ;;  %v23470_v38 = vld [vmem:[#allocation222_spill] sm:$0xff] }
 0x987   : > { %v7571_v32 = vadd.f32 %v20164_v12, %v7570_v8 }
 0x988   : > { %v7427_v52 = vadd.f32 %v20029_v4, %v7426_v59 }
 0x989   : > { %v7572_v1 = vadd.f32 %v23460_v43, %v7571_v32 }
 0x98a   : > { %v7428_v40 = vadd.f32 %v20037_v6, %v7427_v52  ;;  %v8171_v52 = vrot.slane %v23471_v51, 1 }
 0x98b   : > { %v7573_v33 = vadd.f32 %v23462_v44, %v7572_v1 }
 0x98c   : > { %v7429_v5 = vadd.f32 %v20061_v13, %v7428_v40 }
 0x98d   : > { %v7574_v29 = vadd.f32 %v23464_v58, %v7573_v33  ;;  %v23476_v58 = vld [vmem:[#allocation77_spill] sm:$0xff] }
 0x98e   : > { %v7430_v10 = vadd.f32 %v20069_v46, %v7429_v5  ;;  %v23474_v5 = vld [vmem:[#allocation218_spill] sm:$0xff] }
 0x990   : > { %v7431_v35 = vadd.f32 %v20093_v19, %v7430_v10 }
 0x992   : > { %v7432_v4 = vadd.f32 %v20101_v11, %v7431_v35 }
 0x994   : > { %v7433_v6 = vadd.f32 %v20125_v47, %v7432_v4 }
 0x996   : > { %v7434_v13 = vadd.f32 %v20133_v25, %v7433_v6  ;;  %v23465_v25 = vld [vmem:[#allocation214_spill] sm:$0xff] }
 0x997   : > { %v7575_v62 = vadd.f32 %v23465_v25, %v7574_v29 }
 0x998   : > { %v7435_v46 = vadd.f32 %v20151_v9, %v7434_v13 }
 0x999   : > { %v7576_v9 = vadd.f32 %v23466_v15, %v7575_v62 }
 0x99a   : > { %v7436_v19 = vadd.f32 %v20156_v56, %v7435_v46 }
 0x99b   : > { %v7577_v12 = vrot.slane %v7576_v9, 4 }
 0x99c   : > { %v7437_v11 = vadd.f32 %v23461_v0, %v7436_v19 }
 0x99d   : > { %v7578_v56 = vadd.f32 %v7577_v12, %v7576_v9 }
 0x99e   : > { %v7438_v47 = vadd.f32 %v23463_v45, %v7437_v11 }
 0x99f   : > { %v7579_v37 = vrot.slane %v7578_v56, 2 }
 0x9a0   : > { %v7439_v17 = vrot.slane %v7438_v47, 4 }
 0x9a1   : > { %v7580_v36 = vadd.f32 %v7579_v37, %v7578_v56 }
 0x9a2   : > { %v7440_v60 = vadd.f32 %v7439_v17, %v7438_v47  ;;  %s14227_s20 = spop %14226 }
 0x9a3   : > { %v7581_v39 = vrot.slane %v7580_v36, 1  ;;  %v8197_v34 = vstv %s14227_s20 }
 0x9a4   : > { %v7441_v61 = vrot.slane %v7440_v60, 2 }
 0x9a5   : > { %v7582_v49 = vadd.f32 %v7581_v39, %v7580_v36  ;;  %v23477_v39 = vld [vmem:[#allocation83_spill] sm:$0xff] }
 0x9a6   : > { %v7442_v21 = vadd.f32 %v7441_v61, %v7440_v60 }
 0x9a8   : > { %v7443_v63 = vrot.slane %v7442_v21, 1 }
 0x9aa   : > { %v7444_v48 = vadd.f32 %v7443_v63, %v7442_v21 }
 0x9ac   : > { %14772 = vrcp.f32 %v7444_v48 }
 0x9ad   : > { %14774 = vrcp.f32 %v7582_v49  ;;  %v7972_v49 = vadd.f32 %v23477_v39, %v23468_v24 }
 0x9b6   : > { %v14773_v55 = vpop.eup %14772 }
 0x9b7   : > { %v7963_v59 = vmul.f32 %v14773_v55, %v23470_v38  ;;  %v14775_v17 = vpop.eup %14774  ;;  %v23478_v55 = vld [vmem:[#allocation86_spill] sm:$0xff] }
 0x9b8   : > { %v7965_v56 = vmul.f32 %v14775_v17, %v23470_v38 }
 0x9b9   : > { %v7967_v29 = vmul.f32 %v7963_v59, %v23476_v58  ;;  %v23489_v58 = vld [vmem:[#allocation7_spill] sm:$0xff] }
 0x9bb   : > { %v7971_v36 = vadd.f32 %v7967_v29, %v23467_v30 }
 0x9f9   : > { %v8142_v42 = vpop.permute.xlu1 %8141 }
 0x9fa   : > { %v8144_v40 = vmul.f32 %v8142_v42, %v23472_v14  ;;  %v8145_v31 = vmul.f32 %v8142_v42, %v23473_v20  ;;  %v8146_v41 = vmul.f32 %v8142_v42, %v23474_v5  ;;  %v8147_v10 = vmul.f32 %v8142_v42, %v23475_v57 }
 0x9fb   : > { %v8176_v23 = vmul.f32 %v8168_v2, %v8142_v42  ;;  %v8177_v35 = vmul.f32 %v8169_v54, %v8142_v42  ;;  %v8178_v28 = vmul.f32 %v8170_v53, %v8142_v42  ;;  %v8179_v4 = vmul.f32 %v8171_v52, %v8142_v42  ;;  %v23479_v54 = vld [vmem:[#allocation80_spill] sm:$0xff] }
 0x9fc   : > { %v7974_v42 = vadd.f32 %v23478_v55, %v23471_v51  ;;  %v7969_v53 = vmul.f32 %v7965_v56, %v23479_v54  ;;  %v23491_v56 = vld [vmem:[#allocation14_spill] sm:$0xff] }
 0x9fe   : > { %v8150_v22 = vpop.permute.xlu1 %8149 }
 0x9ff   : > { %v8160_v7 = vmul.f32 %v8152_v27, %v8150_v22  ;;  %v8161_v6 = vmul.f32 %v8153_v3, %v8150_v22  ;;  %v8162_v26 = vmul.f32 %v8154_v18, %v8150_v22  ;;  %v8163_v13 = vmul.f32 %v8155_v50, %v8150_v22 }
 0xa00   : > { %v8180_v8 = vmul.f32 %v8150_v22, %v23472_v14  ;;  %v8181_v46 = vmul.f32 %v8150_v22, %v23473_v20  ;;  %v8182_v32 = vmul.f32 %v8150_v22, %v23474_v5  ;;  %v8183_v19 = vmul.f32 %v8150_v22, %v23475_v57 }
 0xa01   : > { %v8164_v43 = vadd.f32 %v8160_v7, %v8144_v40  ;;  %v8165_v1 = vadd.f32 %v8161_v6, %v8145_v31  ;;  %v8166_v0 = vadd.f32 %v8162_v26, %v8146_v41  ;;  %v8167_v11 = vadd.f32 %v8163_v13, %v8147_v10  ;;  %v23482_v31 = vld [vmem:[#allocation5_spill] sm:$0xff]  ;;  %v23483_v41 = vld [vmem:[#allocation4_spill] sm:$0xff]  ;;  %v23484_v10 = vld [vmem:[#allocation3_spill] sm:$0xff] }
 0xa02   : > { %v8184_v44 = vadd.f32 %v8180_v8, %v8176_v23  ;;  %v8185_v33 = vadd.f32 %v8181_v46, %v8177_v35  ;;  %v8186_v45 = vadd.f32 %v8182_v32, %v8178_v28  ;;  %v8187_v47 = vadd.f32 %v8183_v19, %v8179_v4  ;;  %v13373_v35 = vld [vmem:[%s21220_s4 + $0x24] sm:$0xf]  ;;  %v23485_v6 = vld [vmem:[#allocation8_spill] sm:$0xff] }
 0xa03   : > { %v23486_v13 = vld [vmem:[#allocation50_spill] sm:$0xff] }
 0xa04   : > { %v8188_v25 = vsel %vm5613_vm12, %v8164_v43, %v8184_v44  ;;  %v8189_v62 = vsel %vm5613_vm12, %v8165_v1, %v8185_v33  ;;  %v8190_v60 = vsel %vm5613_vm12, %v8166_v0, %v8186_v45  ;;  %v8191_v15 = vsel %vm5613_vm12, %v8167_v11, %v8187_v47  ;;  %v23487_v19 = vld [vmem:[#allocation6_spill] sm:$0xff] }
 0xa05   : > { %v8198_v9 = vmul.f32 %v8197_v34, %v8188_v25  ;;  %v8199_v61 = vmul.f32 %v8197_v34, %v8189_v62  ;;  %v8200_v12 = vmul.f32 %v8197_v34, %v8190_v60  ;;  %v8201_v21 = vmul.f32 %v8197_v34, %v8191_v15  ;;  %v8240_v1 = vld [vmem:[%s21220_s4] sm:$0xf]  ;;  %v13386_v25 = vld [vmem:[%s21220_s4 + $0x48] sm:$0xf]  ;;  %v23490_v60 = vld [vmem:[#allocation9_spill] sm:$0xff] }
 0xa06   : > { %v23488_v45 = vld [vmem:[#allocation54_spill] sm:$0xff] }
 0xa07   : > { %v8206_v63 = vrot.slane %v8198_v9, 6  ;;  %v8207_v37 = vrot.slane %v8199_v61, 6  ;;  %v8209_v48 = vrot.slane %v8201_v21, 6  ;;  %v8208_v27 = vrot.slane %v8200_v12, 6 }
 0xa09   : > { %v8214_v2 = vadd.f32 %v8206_v63, %v23467_v30  ;;  %v8215_v3 = vadd.f32 %v8207_v37, %v23468_v24  ;;  %v8217_v18 = vadd.f32 %v8209_v48, %v23471_v51  ;;  %v8216_v52 = vadd.f32 %v8208_v27, %v23469_v16  ;;  %v23492_v37 = vld [vmem:[#allocation10_spill] sm:$0xff] }
 0xa0a   : > { %v7973_v30 = vadd.f32 %v7969_v53, %v23469_v16  ;;  %v20468_v16 = vld [vmem:[%s21220_s4 + $0x58] sm:$0xf]  ;;  %v23480_v51 = vmov 0.0  }
 0xa0b   : > { %v20422_v38 = vsel %vm5290_vm10, %v7971_v36, %v8214_v2  ;;  %v20425_v59 = vsel %vm5290_vm10, %v7972_v49, %v8215_v3  ;;  %v20428_v50 = vsel %vm5290_vm10, %v7974_v42, %v8217_v18  ;;  %v13393_v36 = vld [vmem:[%s21220_s4 + $0x4] sm:$0xf]  ;;  %v23493_v49 = vld [vmem:[#allocation11_spill] sm:$0xff]  ;;  %v23494_v18 = vld [vmem:[#allocation61_spill] sm:$0xff] }
 0xa0c   : > { %13610 = vmatpush3.msk.msra.mxu0 %vm8247_vm14, %v20428_v50  ;;  %8224 = vrot.lane.b32.xlu1 %v20425_v59, %s14800_s11  ;;  %v20439_v24 = vsel %vm5290_vm10, %v7973_v30, %v8216_v52  ;;  %v13400_v52 = vld [vmem:[%s21220_s4 + $0x28] sm:$0xf] }
 0xa0d   : > { %8222 = vrot.lane.b32.xlu0 %v20422_v38, %s14800_s11  ;;  %13612 = vmatmul.mubr.msk.f32.vlgmr.msra.gmra.mrb[140].mxu0 %vm8243_vm15, %v20468_v16 }
 0xa0e   : > { %10809 = vmatprep.mubr.f32.mxu0 %v23480_v51 }
 0xa10   : > { %8228 = vrot.lane.b32.xlu1 %v20428_v50, %s14800_s11 }
 0xa11   : > { %8226 = vrot.lane.b32.xlu0 %v20439_v24, %s14800_s11 }
 0xa14   : > { %8706 = vrot.lane.b32.xlu1 %v20425_v59, %s14801_s12 }
 0xa15   : > { %8704 = vrot.lane.b32.xlu0 %v20422_v38, %s14801_s12 }
 0xa18   : > { %8710 = vrot.lane.b32.xlu1 %v20428_v50, %s14801_s12 }
 0xa19   : > { %8708 = vrot.lane.b32.xlu0 %v20439_v24, %s14801_s12 }
 0xa1c   : > { %9195 = vrot.lane.b32.xlu1 %v20425_v59, %s14802_s13 }
 0xa1d   : > { %9193 = vrot.lane.b32.xlu0 %v20422_v38, %s14802_s13 }
 0xa20   : > { %9199 = vrot.lane.b32.xlu1 %v20428_v50, %s14802_s13 }
 0xa21   : > { %9197 = vrot.lane.b32.xlu0 %v20439_v24, %s14802_s13 }
 0xa24   : > { %9684 = vrot.lane.b32.xlu1 %v20425_v59, %s14803_s14 }
 0xa25   : > { %9682 = vrot.lane.b32.xlu0 %v20422_v38, %s14803_s14 }
 0xa28   : > { %9688 = vrot.lane.b32.xlu1 %v20428_v50, %s14803_s14 }
 0xa29   : > { %9686 = vrot.lane.b32.xlu0 %v20439_v24, %s14803_s14 }
 0xa2c   : > { %10641 = vrot.lane.b32.xlu1 %v20425_v59, %s14804_s15 }
 0xa2d   : > { %10639 = vrot.lane.b32.xlu0 %v20422_v38, %s14804_s15 }
 0xa30   : > { %10645 = vrot.lane.b32.xlu1 %v20428_v50, %s14804_s15 }
 0xa31   : > { %10643 = vrot.lane.b32.xlu0 %v20439_v24, %s14804_s15  ;;  %s21195_s15 = scalar_lea.vmem %s21224_s8, %s13589_s29 }
 0xa34   : > { %11130 = vrot.lane.b32.xlu1 %v20425_v59, %s14805_s26 }
 0xa35   : > { %11128 = vrot.lane.b32.xlu0 %v20422_v38, %s14805_s26 }
 0xa38   : > { %11134 = vrot.lane.b32.xlu1 %v20428_v50, %s14805_s26 }
 0xa39   : > { %11132 = vrot.lane.b32.xlu0 %v20439_v24, %s14805_s26 }
 0xa3c   : > { %11619 = vrot.lane.b32.xlu1 %v20425_v59, %s14806_s18 }
 0xa3d   : > { %11617 = vrot.lane.b32.xlu0 %v20422_v38, %s14806_s18 }
 0xa40   : > { %11623 = vrot.lane.b32.xlu1 %v20428_v50, %s14806_s18 }
 0xa41   : > { %11621 = vrot.lane.b32.xlu0 %v20439_v24, %s14806_s18 }
 0xa44   : > { %12108 = vrot.lane.b32.xlu1 %v20425_v59, %s14807_s22 }
 0xa45   : > { %12106 = vrot.lane.b32.xlu0 %v20422_v38, %s14807_s22 }
 0xa48   : > { %12112 = vrot.lane.b32.xlu1 %v20428_v50, %s14807_s22 }
 0xa49   : > { %12110 = vrot.lane.b32.xlu0 %v20439_v24, %s14807_s22 }
 0xa7e   : > { %v8225_v34 = vpop.permute.xlu1 %8224 }
 0xa7f   : > { %v8223_v14 = vpop.permute.xlu0 %8222 }
 0xa80   : > { %v8233_v20 = vsel %vm359_vm0, %v8223_v14, %v8225_v34  ;;  %v8234_v5 = vsel %vm359_vm0, %v23482_v31, %v8223_v14 }
 0xa81   : > { %v8235_v57 = vmul.f32 %v8234_v5, %v23483_v41  ;;  %v8236_v22 = vmul.f32 %v8233_v20, %v23484_v10  ;;  %v23495_v20 = vld [vmem:[#allocation48_spill] sm:$0xff]  ;;  %v23496_v5 = vld [vmem:[#allocation53_spill] sm:$0xff] }
 0xa82   : > { %v8229_v23 = vpop.permute.xlu1 %8228 }
 0xa83   : > { %13374 = vmatprep.subr.msk.mxu1 %vm8247_vm14, %v8236_v22  ;;  %v8227_v28 = vpop.permute.xlu0 %8226  ;;  %v8230_v11 = vsel %vm359_vm0, %v8229_v23, %v23482_v31 }
 0xa84   : > { %v8231_v4 = vsel %vm359_vm0, %v8227_v28, %v8229_v23  ;;  %v8232_v7 = vsel %vm359_vm0, %v8225_v34, %v8227_v28  ;;  %13375 = vmatpush1.msk.msra.mxu1 %vm8247_vm14, %v8235_v57  ;;  %v8239_v47 = vmul.f32 %v8230_v11, %v23488_v45  ;;  %v23502_v45 = vld [vmem:[#allocation20_spill] sm:$0xff] }
 0xa85   : > { %v8237_v26 = vmul.f32 %v8232_v7, %v23485_v6  ;;  %v8238_v8 = vmul.f32 %v8231_v4, %v23486_v13  ;;  %13376 = vmatmul.mubr.msk.f32.vlgmr.msra.gmra.mrb[160].mxu1 %vm8243_vm15, %v13373_v35  ;;  %v23498_v4 = vld [vmem:[#allocation44_spill] sm:$0xff] }
 0xa86   : > { %v8707_v46 = vpop.permute.xlu1 %8706  ;;  %8395 = vmatprep.mubr.f32.mxu1 %v23480_v51 }
 0xa87   : > { %13377 = vmatprep.subr.msk.mxu1 %vm8247_vm14, %v8238_v8  ;;  %v8705_v32 = vpop.permute.xlu0 %8704 }
 0xa88   : > { %13378 = vmatpush1.msk.msra.mxu1 %vm8247_vm14, %v8237_v26  ;;  %v8716_v29 = vsel %vm914_vm2, %v23489_v58, %v8705_v32  ;;  %v8715_v21 = vsel %vm914_vm2, %v8705_v32, %v8707_v46 }
 0xa89   : > { %13379 = vmatmul.mubr.msk.f32.vlgmr.msra.gmra.mrb[162].mxu1 %vm8243_vm15, %v13373_v35  ;;  %13380 = vmatprep.subr.msk.mxu1 %vm8247_vm14, %v8235_v57  ;;  %v8717_v15 = vmul.f32 %v8716_v29, %v23490_v60  ;;  %v8718_v55 = vmul.f32 %v8715_v21, %v23493_v49  ;;  %v23497_v57 = vld [vmem:[#allocation55_spill] sm:$0xff]  ;;  %v20636_v35 = vld [vmem:[%s21220_s4 + $0x14] sm:$0xf]  ;;  %v23505_v49 = vld [vmem:[#allocation29_spill] sm:$0xff] }
 0xa8a   : > { %13381 = vmatpush1.msk.msra.mxu1 %vm8247_vm14, %v23487_v19  ;;  %v8711_v43 = vpop.permute.xlu1 %8710  ;;  %8472 = vmatprep.mubr.f32.mxu1 %v23480_v51  ;;  %v13407_v19 = vld [vmem:[%s21220_s4 + $0x4c] sm:$0xf] }
 0xa8b   : > { %13383 = vmatprep.subr.msk.mxu1 %vm8247_vm14, %v8237_v26  ;;  %v8709_v0 = vpop.permute.xlu0 %8708 }
 0xa8c   : > { %v8714_v9 = vsel %vm914_vm2, %v8707_v46, %v8709_v0  ;;  %v8713_v42 = vsel %vm914_vm2, %v8709_v0, %v8711_v43  ;;  %v23501_v0 = vld [vmem:[#allocation45_spill] sm:$0xff] }
 0xa8d   : > { %13382 = vmatmul.mubr.msk.f32.vlgmr.msra.gmra.mrb[160].mxu1 %vm8243_vm15, %v8240_v1  ;;  %v8719_v63 = vmul.f32 %v8714_v9, %v23491_v56  ;;  %v8720_v54 = vmul.f32 %v8713_v42, %v23494_v18  ;;  %v23504_v9 = vld [vmem:[#allocation56_spill] sm:$0xff]  ;;  %v23506_v42 = vld [vmem:[#allocation59_spill] sm:$0xff]  ;;  %v23507_v18 = vld [vmem:[#allocation49_spill] sm:$0xff] }
 0xa8e   : > { %13384 = vmatpush1.msk.msra.mxu1 %vm8247_vm14, %v8236_v22  ;;  %v20545_v44 = vpop.permute.xlu1 %9195  ;;  %8543 = vmatprep.mubr.f32.mxu1 %v23480_v51 }
 0xa8f   : > { %13387 = vmatprep.subr.msk.mxu1 %vm8247_vm14, %v8237_v26  ;;  %v20549_v33 = vpop.permute.xlu0 %9193  ;;  %v23499_v26 = vld [vmem:[#allocation13_spill] sm:$0xff] }
 0xa91   : > { %13385 = vmatmul.mubr.msk.f32.vlgmr.msra.gmra.mrb[162].mxu1 %vm8243_vm15, %v8240_v1  ;;  %v20670_v1 = vld [vmem:[%s21220_s4 + $0x38] sm:$0xf] }
 0xa92   : > { %13388 = vmatpush1.msk.msra.mxu1 %vm8247_vm14, %v8236_v22  ;;  %v20557_v17 = vpop.permute.xlu1 %9199  ;;  %8622 = vmatprep.mubr.f32.mxu1 %v23480_v51  ;;  %v8712_v22 = vsel %vm914_vm2, %v8711_v43, %v23489_v58  ;;  %v23503_v58 = vld [vmem:[#allocation12_spill] sm:$0xff] }
 0xa93   : > { %13390 = vmatprep.subr.msk.mxu1 %vm8247_vm14, %v8239_v47  ;;  %v20564_v62 = vpop.permute.xlu0 %9197  ;;  %v8721_v13 = vmul.f32 %v8712_v22, %v23499_v26 }
 0xa95   : > { %13389 = vmatmul.mubr.msk.f32.vlgmr.msra.gmra.mrb[160].mxu1 %vm8243_vm15, %v13386_v25 }
 0xa96   : > { %13391 = vmatpush1.msk.msra.mxu1 %vm8247_vm14, %v8238_v8  ;;  %v20571_v61 = vpop.permute.xlu1 %9684  ;;  %8693 = vmatprep.mubr.f32.mxu1 %v23480_v51  ;;  %v23500_v8 = vld [vmem:[#allocation17_spill] sm:$0xff] }
 0xa97   : > { %13394 = vmatprep.subr.msk.mxu1 %vm8247_vm14, %v8717_v15  ;;  %v20575_v12 = vpop.permute.xlu0 %9682  ;;  %v9205_v46 = vsel %vm1478_vm3, %v23500_v8, %v20549_v33 }
 0xa98   : > { %v9206_v47 = vmul.f32 %v9205_v46, %v23502_v45  ;;  %v23512_v46 = vld [vmem:[#allocation28_spill] sm:$0xff]  ;;  %v23514_v45 = vld [vmem:[#allocation22_spill] sm:$0xff] }
 0xa99   : > { %13392 = vmatmul.mubr.msk.f32.vlgmr.msra.gmra.mrb[162].mxu1 %vm8243_vm15, %v13386_v25  ;;  %v9203_v25 = vsel %vm1478_vm3, %v20545_v44, %v20564_v62 }
 0xa9a   : > { %13395 = vmatpush1.msk.msra.mxu1 %vm8247_vm14, %v23492_v37  ;;  %v20583_v48 = vpop.permute.xlu1 %9688  ;;  %8803 = vmatprep.mubr.f32.mxu1 %v23480_v51 }
 0xa9b   : > { %13397 = vmatprep.subr.msk.mxu1 %vm8247_vm14, %v8719_v63  ;;  %v20590_v39 = vpop.permute.xlu0 %9686 }
 0xa9d   : > { %13396 = vmatmul.mubr.msk.f32.vlgmr.msra.gmra.mrb[160].mxu1 %vm8243_vm15, %v13393_v36 }
 0xa9e   : > { %13398 = vmatpush1.msk.msra.mxu1 %vm8247_vm14, %v8718_v55  ;;  %v10642_v27 = vpop.permute.xlu1 %10641  ;;  %8874 = vmatprep.mubr.f32.mxu1 %v23480_v51 }
 0xa9f   : > { %13401 = vmatprep.subr.msk.mxu1 %vm8247_vm14, %v8718_v55  ;;  %v20599_v2 = vpop.permute.xlu0 %10639 }
 0xaa0   : > { %v20604_v3 = vsel %vm3059_vm5, %v20599_v2, %v10642_v27 }
 0xaa1   : > { %13399 = vmatmul.mubr.msk.f32.vlgmr.msra.gmra.mrb[162].mxu1 %vm8243_vm15, %v13393_v36  ;;  %v9204_v36 = vsel %vm1478_vm3, %v20549_v33, %v20545_v44  ;;  %v13414_v44 = vld [vmem:[%s21220_s4 + $0x8] sm:$0xf] }
 0xaa2   : > { %13402 = vmatpush1.msk.msra.mxu1 %vm8247_vm14, %v8717_v15  ;;  %v10646_v53 = vpop.permute.xlu1 %10645  ;;  %8957 = vmatprep.mubr.f32.mxu1 %v23480_v51 }
 0xaa3   : > { %13404 = vmatprep.subr.msk.mxu1 %vm8247_vm14, %v8720_v54  ;;  %v10644_v30 = vpop.permute.xlu0 %10643  ;;  %v10647_v31 = vsel %vm3059_vm5, %v10646_v53, %v23495_v20 }
 0xaa4   : > { %v10648_v34 = vsel %vm3059_vm5, %v10644_v30, %v10646_v53  ;;  %v10649_v14 = vsel %vm3059_vm5, %v10642_v27, %v10644_v30  ;;  %v10656_v7 = vmul.f32 %v10647_v31, %v23498_v4  ;;  %v23508_v53 = vld [vmem:[#allocation21_spill] sm:$0xff]  ;;  %v9202_v31 = vsel %vm1478_vm3, %v20564_v62, %v20557_v17 }
 0xaa5   : > { %v20622_v41 = vmul.f32 %v10649_v14, %v23496_v5  ;;  %v20625_v10 = vmul.f32 %v10648_v34, %v23497_v57  ;;  %13403 = vmatmul.mubr.msk.f32.vlgmr.msra.gmra.mrb[160].mxu1 %vm8243_vm15, %v13400_v52  ;;  %v20736_v30 = vld [vmem:[%s21220_s4 + $0x18] sm:$0xf]  ;;  %v23509_v34 = vld [vmem:[#allocation23_spill] sm:$0xff]  ;;  %v20760_v62 = vld [vmem:[%s21220_s4 + $0x3c] sm:$0xf] }
 0xaa6   : > { %13405 = vmatpush1.msk.msra.mxu1 %vm8247_vm14, %v8719_v63  ;;  %v11131_v23 = vpop.permute.xlu1 %11130  ;;  %9028 = vmatprep.mubr.f32.mxu1 %v23480_v51  ;;  %v9207_v14 = vmul.f32 %v9204_v36, %v23509_v34 }
 0xaa7   : > { %13408 = vmatprep.subr.msk.mxu1 %vm8247_vm14, %v8719_v63  ;;  %13479 = vmatprep.subr.msk.mxu0 %vm8247_vm14, %v20625_v10  ;;  %v20641_v28 = vpop.permute.xlu0 %11128  ;;  %v20702_v63 = vld [vmem:[%s21220_s4 + $0x5c] sm:$0xf] }
 0xaa8   : > { %v20647_v6 = vsel %vm3623_vm6, %v20641_v28, %v11131_v23  ;;  %13480 = vmatpush1.msk.msra.mxu0 %vm8247_vm14, %v20622_v41 }
 0xaa9   : > { %13406 = vmatmul.mubr.msk.f32.vlgmr.msra.gmra.mrb[162].mxu1 %vm8243_vm15, %v13400_v52  ;;  %13481 = vmatmul.mubr.msk.f32.vlgmr.msra.gmra.mrb[142].mxu0 %vm8243_vm15, %v20636_v35 }
 0xaaa   : > { %13409 = vmatpush1.msk.msra.mxu1 %vm8247_vm14, %v8718_v55  ;;  %13486 = vmatprep.subr.msk.mxu0 %vm8247_vm14, %v10656_v7  ;;  %v11135_v32 = vpop.permute.xlu1 %11134  ;;  %v9208_v55 = vmul.f32 %v9203_v25, %v23505_v49  ;;  %v23515_v25 = vld [vmem:[#allocation18_spill] sm:$0xff]  ;;  %v23517_v49 = vld [vmem:[#allocation31_spill] sm:$0xff] }
 0xaab   : > { %13411 = vmatprep.subr.msk.mxu1 %vm8247_vm14, %v8721_v13  ;;  %13487 = vmatpush1.msk.msra.mxu0 %vm8247_vm14, %v20625_v10  ;;  %v11133_v43 = vpop.permute.xlu0 %11132  ;;  %v11136_v21 = vsel %vm3623_vm6, %v11135_v32, %v23504_v9 }
 0xaac   : > { %13493 = vmatprep.subr.msk.mxu0 %vm8247_vm14, %v23501_v0  ;;  %v11137_v11 = vsel %vm3623_vm6, %v11133_v43, %v11135_v32  ;;  %9111 = vmatprep.mubr.f32.mxu1 %v23480_v51  ;;  %v11138_v60 = vsel %vm3623_vm6, %v11131_v23, %v11133_v43  ;;  %v23510_v23 = vld [vmem:[#allocation60_spill] sm:$0xff]  ;;  %v23513_v43 = vld [vmem:[#allocation35_spill] sm:$0xff] }
 0xaad   : > { %v20679_v29 = vmul.f32 %v11137_v11, %v23503_v58  ;;  %10963 = vmatprep.mubr.f32.mxu0 %v23480_v51  ;;  %13410 = vmatmul.mubr.msk.f32.vlgmr.msra.gmra.mrb[160].mxu1 %vm8243_vm15, %v13407_v19  ;;  %v20718_v27 = vmul.f32 %v11138_v60, %v23506_v42  ;;  %v20792_v11 = vld [vmem:[%s21220_s4 + $0x60] sm:$0xf]  ;;  %v9201_v58 = vsel %vm1478_vm3, %v20557_v17, %v23500_v8  ;;  %v23516_v17 = vld [vmem:[#allocation27_spill] sm:$0xff]  ;;  %v13428_v42 = vld [vmem:[%s21220_s4 + $0x50] sm:$0xf] }
 0xaae   : > { %13412 = vmatpush1.msk.msra.mxu1 %vm8247_vm14, %v8720_v54  ;;  %13488 = vmatmul.mubr.msk.f32.vlgmr.msra.gmra.mrb[144].mxu0 %vm8243_vm15, %v20670_v1  ;;  %v11620_v15 = vpop.permute.xlu1 %11619  ;;  %v11145_v54 = vmul.f32 %v11136_v21, %v23507_v18  ;;  %v9210_v8 = vmul.f32 %v9201_v58, %v23516_v17  ;;  %v23525_v58 = vld [vmem:[#allocation37_spill] sm:$0xff]  ;;  %v23527_v17 = vld [vmem:[#allocation19_spill] sm:$0xff] }
 0xaaf   : > { %13494 = vmatpush1.msk.msra.mxu0 %vm8247_vm14, %v10656_v7  ;;  %13415 = vmatprep.subr.msk.mxu1 %vm8247_vm14, %v9206_v47  ;;  %v20697_v56 = vpop.permute.xlu0 %11617  ;;  %v23511_v7 = vld [vmem:[#allocation30_spill] sm:$0xff] }
 0xab0   : > { %13500 = vmatprep.subr.msk.mxu0 %vm8247_vm14, %v20679_v29  ;;  %v20709_v37 = vsel %vm4187_vm7, %v20697_v56, %v11620_v15  ;;  %9182 = vmatprep.mubr.f32.mxu1 %v23480_v51  ;;  %v9209_v26 = vmul.f32 %v9202_v31, %v23511_v7  ;;  %v9693_v7 = vsel %vm2042_vm4, %v20575_v12, %v20571_v61 }
 0xab1   : > { %11117 = vmatprep.mubr.f32.mxu0 %v23480_v51  ;;  %13413 = vmatmul.mubr.msk.f32.vlgmr.msra.gmra.mrb[162].mxu1 %vm8243_vm15, %v13407_v19  ;;  %v13421_v19 = vld [vmem:[%s21220_s4 + $0x2c] sm:$0xf] }
 0xab2   : > { %13416 = vmatpush1.msk.msra.mxu1 %vm8247_vm14, %v23508_v53  ;;  %13495 = vmatmul.mubr.msk.f32.vlgmr.msra.gmra.mrb[146].mxu0 %vm8243_vm15, %v20702_v63  ;;  %v11624_v52 = vpop.permute.xlu1 %11623  ;;  %v23518_v53 = vld [vmem:[#allocation62_spill] sm:$0xff] }
 0xab3   : > { %13501 = vmatpush1.msk.msra.mxu0 %vm8247_vm14, %v20718_v27  ;;  %13418 = vmatprep.subr.msk.mxu1 %vm8247_vm14, %v9208_v55  ;;  %v11622_v33 = vpop.permute.xlu0 %11621  ;;  %v11625_v0 = vsel %vm4187_vm7, %v11624_v52, %v23513_v43 }
 0xab4   : > { %13507 = vmatprep.subr.msk.mxu0 %vm8247_vm14, %v11145_v54  ;;  %9292 = vmatprep.mubr.f32.mxu1 %v23480_v51  ;;  %v11626_v57 = vsel %vm4187_vm7, %v11622_v33, %v11624_v52  ;;  %v11627_v13 = vsel %vm4187_vm7, %v11620_v15, %v11622_v33  ;;  %v11634_v60 = vmul.f32 %v11625_v0, %v23515_v25  ;;  %v20816_v15 = vld [vmem:[%s21220_s4 + $0x1c] sm:$0xf]  ;;  %v23519_v52 = vld [vmem:[#allocation34_spill] sm:$0xff] }
 0xab5   : > { %11298 = vmatprep.mubr.f32.mxu0 %v23480_v51  ;;  %13417 = vmatmul.mubr.msk.f32.vlgmr.msra.gmra.mrb[160].mxu1 %vm8243_vm15, %v13414_v44  ;;  %v20776_v32 = vmul.f32 %v11626_v57, %v23512_v46  ;;  %v9692_v33 = vsel %vm2042_vm4, %v20571_v61, %v20590_v39  ;;  %v23521_v57 = vld [vmem:[#allocation66_spill] sm:$0xff]  ;;  %v23524_v0 = vld [vmem:[#allocation33_spill] sm:$0xff]  ;;  %v13435_v61 = vld [vmem:[%s21220_s4 + $0xc] sm:$0xf] }
 0xab6   : > { %13419 = vmatpush1.msk.msra.mxu1 %vm8247_vm14, %v9207_v14  ;;  %13502 = vmatmul.mubr.msk.f32.vlgmr.msra.gmra.mrb[148].mxu0 %vm8243_vm15, %v20736_v30  ;;  %v12109_v5 = vpop.permute.xlu1 %12108  ;;  %v23523_v46 = vld [vmem:[#allocation46_spill] sm:$0xff] }
 0xab7   : > { %13508 = vmatpush1.msk.msra.mxu0 %vm8247_vm14, %v20679_v29  ;;  %13422 = vmatprep.subr.msk.mxu1 %vm8247_vm14, %v9207_v14  ;;  %v20755_v22 = vpop.permute.xlu0 %12106  ;;  %v23526_v25 = vld [vmem:[#allocation38_spill] sm:$0xff] }
 0xab8   : > { %13514 = vmatprep.subr.msk.mxu0 %vm8247_vm14, %v23510_v23  ;;  %v20767_v4 = vsel %vm4751_vm8, %v20755_v22, %v12109_v5  ;;  %9363 = vmatprep.mubr.f32.mxu1 %v23480_v51 }
 0xab9   : > { %11452 = vmatprep.mubr.f32.mxu0 %v23480_v51  ;;  %13420 = vmatmul.mubr.msk.f32.vlgmr.msra.gmra.mrb[162].mxu1 %vm8243_vm15, %v13414_v44 }
 0xaba   : > { %13423 = vmatpush1.msk.msra.mxu1 %vm8247_vm14, %v9206_v47  ;;  %13509 = vmatmul.mubr.msk.f32.vlgmr.msra.gmra.mrb[150].mxu0 %vm8243_vm15, %v20760_v62  ;;  %v20798_v47 = vmul.f32 %v11627_v13, %v23514_v45  ;;  %v12113_v21 = vpop.permute.xlu1 %12112 }
 0xabb   : > { %13515 = vmatpush1.msk.msra.mxu0 %vm8247_vm14, %v11145_v54  ;;  %13425 = vmatprep.subr.msk.mxu1 %vm8247_vm14, %v9209_v26  ;;  %v12111_v36 = vpop.permute.xlu0 %12110  ;;  %v20841_v54 = vld [vmem:[%s21220_s4 + $0x40] sm:$0xf]  ;;  %v12114_v23 = vsel %vm4751_vm8, %v12113_v21, %v23521_v57 }
 0xabc   : > { %13521 = vmatprep.subr.msk.mxu0 %vm8247_vm14, %v20776_v32  ;;  %9446 = vmatprep.mubr.f32.mxu1 %v23480_v51  ;;  %v12115_v18 = vsel %vm4751_vm8, %v12111_v36, %v12113_v21  ;;  %v12116_v34 = vsel %vm4751_vm8, %v12109_v5, %v12111_v36  ;;  %v20869_v5 = vld [vmem:[%s21220_s4 + $0x64] sm:$0xf]  ;;  %v12123_v45 = vmul.f32 %v12114_v23, %v23524_v0 }
 0xabd   : > { %11606 = vmatprep.mubr.f32.mxu0 %v23480_v51  ;;  %13424 = vmatmul.mubr.msk.f32.vlgmr.msra.gmra.mrb[160].mxu1 %vm8243_vm15, %v13421_v19  ;;  %v9691_v21 = vsel %vm2042_vm4, %v20590_v39, %v20583_v48  ;;  %v20918_v36 = vld [vmem:[%s21220_s4 + $0x44] sm:$0xf]  ;;  %v23528_v39 = vld [vmem:[#allocation47_spill] sm:$0xff] }
 0xabe   : > { %13426 = vmatpush1.msk.msra.mxu1 %vm8247_vm14, %v9208_v55  ;;  %13516 = vmatmul.mubr.msk.f32.vlgmr.msra.gmra.mrb[152].mxu0 %vm8243_vm15, %v20792_v11 }
 0xabf   : > { %13522 = vmatpush1.msk.msra.mxu0 %vm8247_vm14, %v20798_v47  ;;  %13429 = vmatprep.subr.msk.mxu1 %vm8247_vm14, %v9208_v55  ;;  %v9694_v55 = vsel %vm2042_vm4, %v23517_v49, %v20575_v12  ;;  %v20898_v12 = vld [vmem:[%s21220_s4 + $0x20] sm:$0xf] }
 0xac0   : > { %13528 = vmatprep.subr.msk.mxu0 %vm8247_vm14, %v11634_v60  ;;  %9517 = vmatprep.mubr.f32.mxu1 %v23480_v51  ;;  %v9695_v44 = vmul.f32 %v9694_v55, %v23519_v52  ;;  %v13442_v55 = vld [vmem:[%s21220_s4 + $0x30] sm:$0xf] }
 0xac1   : > { %11787 = vmatprep.mubr.f32.mxu0 %v23480_v51  ;;  %13427 = vmatmul.mubr.msk.f32.vlgmr.msra.gmra.mrb[162].mxu1 %vm8243_vm15, %v13421_v19  ;;  %v20880_v19 = vmul.f32 %v12116_v34, %v23523_v46 }
 0xac2   : > { %13430 = vmatpush1.msk.msra.mxu1 %vm8247_vm14, %v9207_v14  ;;  %13523 = vmatmul.mubr.msk.f32.vlgmr.msra.gmra.mrb[154].mxu0 %vm8243_vm15, %v20816_v15  ;;  %v23520_v14 = vld [vmem:[#allocation43_spill] sm:$0xff] }
 0xac3   : > { %13529 = vmatpush1.msk.msra.mxu0 %vm8247_vm14, %v20776_v32  ;;  %13432 = vmatprep.subr.msk.mxu1 %vm8247_vm14, %v9210_v8  ;;  %v20856_v31 = vmul.f32 %v12115_v18, %v23520_v14  ;;  %v9698_v8 = vmul.f32 %v9691_v21, %v23528_v39  ;;  %v9690_v18 = vsel %vm2042_vm4, %v20583_v48, %v23517_v49  ;;  %v13449_v48 = vld [vmem:[%s21220_s4 + $0x54] sm:$0xf]  ;;  %v13456_v49 = vld [vmem:[%s21220_s4 + $0x10] sm:$0xf] }
 0xac4   : > { %13535 = vmatprep.subr.msk.mxu0 %vm8247_vm14, %v23518_v53  ;;  %9600 = vmatprep.mubr.f32.mxu1 %v23480_v51  ;;  %v23529_v53 = vld [vmem:[#allocation42_spill] sm:$0xff] }
 0xac5   : > { %11941 = vmatprep.mubr.f32.mxu0 %v23480_v51  ;;  %13431 = vmatmul.mubr.msk.f32.vlgmr.msra.gmra.mrb[160].mxu1 %vm8243_vm15, %v13428_v42  ;;  %v9699_v52 = vmul.f32 %v9690_v18, %v23529_v53 }
 0xac6   : > { %13433 = vmatpush1.msk.msra.mxu1 %vm8247_vm14, %v9209_v26  ;;  %13530 = vmatmul.mubr.msk.f32.vlgmr.msra.gmra.mrb[156].mxu0 %vm8243_vm15, %v20841_v54  ;;  %v23522_v26 = vld [vmem:[#allocation39_spill] sm:$0xff] }
 0xac7   : > { %13536 = vmatpush1.msk.msra.mxu0 %vm8247_vm14, %v11634_v60  ;;  %13436 = vmatprep.subr.msk.mxu1 %vm8247_vm14, %v9695_v44  ;;  %v9697_v13 = vmul.f32 %v9692_v33, %v23522_v26  ;;  %v9696_v60 = vmul.f32 %v9693_v7, %v23526_v25  ;;  %v23530_v33 = vld [vmem:[#allocation51_spill] sm:$0xff] }
 0xac8   : > { %13542 = vmatprep.subr.msk.mxu0 %vm8247_vm14, %v20856_v31  ;;  %9671 = vmatprep.mubr.f32.mxu1 %v23480_v51  ;;  %v10653_v34 = vmul.f32 %v20604_v3, %v23530_v33  ;;  %v11140_v3 = vsel %vm3623_vm6, %v23504_v9, %v20641_v28  ;;  %v11629_v28 = vsel %vm4187_vm7, %v23513_v43, %v20697_v56 }
 0xac9   : > { %12095 = vmatprep.mubr.f32.mxu0 %v23480_v51  ;;  %13434 = vmatmul.mubr.msk.f32.vlgmr.msra.gmra.mrb[162].mxu1 %vm8243_vm15, %v13428_v42  ;;  %v20938_v42 = vld [vmem:[%s21220_s4 + $0x68] sm:$0xf]  ;;  %v12118_v56 = vsel %vm4751_vm8, %v23521_v57, %v20755_v22 }
 0xaca   : > { %13437 = vmatpush1.msk.msra.mxu1 %vm8247_vm14, %v23525_v58  ;;  %13537 = vmatmul.mubr.msk.f32.vlgmr.msra.gmra.mrb[158].mxu0 %vm8243_vm15, %v20869_v5 }
 0xacb   : > { %13543 = vmatpush1.msk.msra.mxu0 %vm8247_vm14, %v20880_v19  ;;  %13439 = vmatprep.subr.msk.mxu1 %vm8247_vm14, %v9697_v13 }
 0xacc   : > { %13549 = vmatprep.subr.msk.mxu0 %vm8247_vm14, %v12123_v45  ;;  %9781 = vmatprep.mubr.f32.mxu1 %v23480_v51 }
 0xacd   : > { %12276 = vmatprep.mubr.f32.mxu0 %v23480_v51  ;;  %13438 = vmatmul.mubr.msk.f32.vlgmr.msra.gmra.mrb[160].mxu1 %vm8243_vm15, %v13435_v61 }
 0xace   : > { %13440 = vmatpush1.msk.msra.mxu1 %vm8247_vm14, %v9696_v60  ;;  %13544 = vmatmul.mubr.msk.f32.vlgmr.msra.gmra.mrb[160].mxu0 %vm8243_vm15, %v20898_v12 }
 0xacf   : > { %13550 = vmatpush1.msk.msra.mxu0 %vm8247_vm14, %v20856_v31  ;;  %13443 = vmatprep.subr.msk.mxu1 %vm8247_vm14, %v9696_v60 }
 0xad0   : > { %13556 = vmatprep.subr.msk.mxu0 %vm8247_vm14, %v23527_v17  ;;  %9852 = vmatprep.mubr.f32.mxu1 %v23480_v51 }
 0xad1   : > { %12430 = vmatprep.mubr.f32.mxu0 %v23480_v51  ;;  %13441 = vmatmul.mubr.msk.f32.vlgmr.msra.gmra.mrb[162].mxu1 %vm8243_vm15, %v13435_v61 }
 0xad2   : > { %13444 = vmatpush1.msk.msra.mxu1 %vm8247_vm14, %v9695_v44  ;;  %13551 = vmatmul.mubr.msk.f32.vlgmr.msra.gmra.mrb[162].mxu0 %vm8243_vm15, %v20918_v36  ;;  %v13462_v44 = vld [vmem:[%s21220_s4 + $0x34] sm:$0xf] }
 0xad3   : > { %13557 = vmatpush1.msk.msra.mxu0 %vm8247_vm14, %v12123_v45  ;;  %13446 = vmatprep.subr.msk.mxu1 %vm8247_vm14, %v9698_v8 }
 0xad4   : > { %9935 = vmatprep.mubr.f32.mxu1 %v23480_v51  ;;  %12584 = vmatprep.mubr.f32.mxu0 %v23480_v51 }
 0xad5   : > { %13445 = vmatmul.mubr.msk.f32.vlgmr.msra.gmra.mrb[160].mxu1 %vm8243_vm15, %v13442_v55 }
 0xad6   : > { %13447 = vmatpush1.msk.msra.mxu1 %vm8247_vm14, %v9697_v13  ;;  %10006 = vmatprep.mubr.f32.mxu1 %v23480_v51 }
 0xad7   : > { %13450 = vmatprep.subr.msk.mxu1 %vm8247_vm14, %v9697_v13  ;;  %13558 = vmatmul.mubr.msk.f32.vlgmr.msra.gmra.mrb[164].mxu0 %vm8243_vm15, %v20938_v42 }
 0xad8   : > { %12707 = vmatprep.mubr.f32.mxu0 %v23480_v51 }
 0xad9   : > { %13448 = vmatmul.mubr.msk.f32.vlgmr.msra.gmra.mrb[162].mxu1 %vm8243_vm15, %v13442_v55 }
 0xada   : > { %13451 = vmatpush1.msk.msra.mxu1 %vm8247_vm14, %v9696_v60  ;;  %10089 = vmatprep.mubr.f32.mxu1 %v23480_v51 }
 0xadb   : > { %13453 = vmatprep.subr.msk.mxu1 %vm8247_vm14, %v9699_v52 }
 0xadd   : > { %13452 = vmatmul.mubr.msk.f32.vlgmr.msra.gmra.mrb[160].mxu1 %vm8243_vm15, %v13449_v48 }
 0xade   : > { %13454 = vmatpush1.msk.msra.mxu1 %vm8247_vm14, %v9698_v8  ;;  %10160 = vmatprep.mubr.f32.mxu1 %v23480_v51 }
 0xadf   : > { %13457 = vmatprep.subr.msk.mxu1 %vm8247_vm14, %v20422_v38 }
 0xae1   : > { %13455 = vmatmul.mubr.msk.f32.vlgmr.msra.gmra.mrb[162].mxu1 %vm8243_vm15, %v13449_v48 }
 0xae2   : > { %10189 = vmatpush1.msra.mxu1 %v23480_v51  ;;  %10252 = vmatprep.mubr.f32.mxu1 %v23480_v51 }
 0xae3   : > { %13459 = vmatprep.subr.msk.mxu1 %vm8247_vm14, %v20439_v24 }
 0xae5   : > { %13458 = vmatmul.mubr.msk.f32.vlgmr.msra.gmra.mrb[160].mxu1 %vm8243_vm15, %v13456_v49 }
 0xae6   : > { %13460 = vmatpush1.msk.msra.mxu1 %vm8247_vm14, %v20425_v59  ;;  %10323 = vmatprep.mubr.f32.mxu1 %v23480_v51 }
 0xae7   : > { %13463 = vmatprep.subr.msk.mxu1 %vm8247_vm14, %v20425_v59 }
 0xae9   : > { %13461 = vmatmul.mubr.msk.f32.vlgmr.msra.gmra.mrb[162].mxu1 %vm8243_vm15, %v13456_v49 }
 0xaea   : > { %13464 = vmatpush1.msk.msra.mxu1 %vm8247_vm14, %v20422_v38  ;;  %10406 = vmatprep.mubr.f32.mxu1 %v23480_v51  ;;  %v10651_v38 = vsel %vm3059_vm5, %v23495_v20, %v20599_v2  ;;  %v23533_v20 = vld [vmem:[#allocation58_spill] sm:$0xff] }
 0xaeb   : > { %13466 = vmatprep.subr.msk.mxu1 %vm8247_vm14, %v20428_v50  ;;  %v23531_v50 = vld [vmem:[#allocation52_spill] sm:$0xff] }
 0xaec   : > { %v10652_v14 = vmul.f32 %v10651_v38, %v23531_v50 }
 0xaed   : > { %13465 = vmatmul.mubr.msk.f32.vlgmr.msra.gmra.mrb[160].mxu1 %vm8243_vm15, %v13462_v44 }
 0xaee   : > { %13467 = vmatpush1.msk.msra.mxu1 %vm8247_vm14, %v20439_v24  ;;  %10477 = vmatprep.mubr.f32.mxu1 %v23480_v51 }
 0xaef   : > { %13470 = vmatprep.subr.msk.mxu1 %vm8247_vm14, %v20439_v24  ;;  %v21012_v24 = vpop.f32.mrb[140].mxu0 }
 0xaf0   : > { %v13613_v2 = vpop.f32.mrb[141].mxu0 }
 0xaf1   : > { %13468 = vmatmul.mubr.msk.f32.vlgmr.msra.gmra.mrb[162].mxu1 %vm8243_vm15, %v13462_v44 }
 0xaf2   : > { %13471 = vmatpush1.msk.msra.mxu1 %vm8247_vm14, %v20425_v59  ;;  %10557 = vmatprep.mubr.f32.mxu1 %v23480_v51  ;;  %v23532_v59 = vld [vmem:[#allocation57_spill] sm:$0xff] }
 0xaf3   : > { %13476 = vmatprep.subr.msk.mxu1 %vm8247_vm14, %v10653_v34 }
 0xaf5   : > { %13472 = vmatmul.mubr.msk.f32.vlgmr.msra.gmra.mrb[160].mxu1 %vm8243_vm15, %v20468_v16  ;;  %v11142_v16 = vmul.f32 %v20647_v6, %v23532_v59  ;;  %v23535_v6 = vld [vmem:[#allocation63_spill] sm:$0xff] }
 0xaf6   : > { %13477 = vmatpush1.msk.msra.mxu1 %vm8247_vm14, %v10652_v14  ;;  %10738 = vmatprep.mubr.f32.mxu1 %v23480_v51 }
 0xaf7   : > { %13483 = vmatprep.subr.msk.mxu1 %vm8247_vm14, %v20622_v41 }
 0xafd   : > { %13478 = vmatmul.mubr.msk.f32.vlgmr.msra.gmra.mrb[160].mxu1 %vm8243_vm15, %v20636_v35 }
 0xafe   : > { %13484 = vmatpush1.msk.msra.mxu1 %vm8247_vm14, %v10653_v34  ;;  %10892 = vmatprep.mubr.f32.mxu1 %v23480_v51 }
 0xaff   : > { %13490 = vmatprep.subr.msk.mxu1 %vm8247_vm14, %v20625_v10  ;;  %v11141_v10 = vmul.f32 %v11140_v3, %v23533_v20 }
 0xb05   : > { %13485 = vmatmul.mubr.msk.f32.vlgmr.msra.gmra.mrb[160].mxu1 %vm8243_vm15, %v20670_v1  ;;  %v11630_v1 = vmul.f32 %v11629_v28, %v23535_v6  ;;  %v12599_v28 = vld [vmem:[%s21221_s5] sm:$0xff] }
 0xb06   : > { %13491 = vmatpush1.msk.msra.mxu1 %vm8247_vm14, %v20622_v41  ;;  %11046 = vmatprep.mubr.f32.mxu1 %v23480_v51  ;;  %v23534_v41 = vld [vmem:[#allocation16_spill] sm:$0xff] }
 0xb07   : > { %13497 = vmatprep.subr.msk.mxu1 %vm8247_vm14, %v11142_v16  ;;  %v11631_v35 = vmul.f32 %v20709_v37, %v23534_v41 }
 0xb0d   : > { %13492 = vmatmul.mubr.msk.f32.vlgmr.msra.gmra.mrb[160].mxu1 %vm8243_vm15, %v20702_v63  ;;  %v23537_v63 = vld [vmem:[#allocation65_spill] sm:$0xff] }
 0xb0e   : > { %13498 = vmatpush1.msk.msra.mxu1 %vm8247_vm14, %v11141_v10  ;;  %11227 = vmatprep.mubr.f32.mxu1 %v23480_v51  ;;  %v12119_v37 = vmul.f32 %v12118_v56, %v23537_v63  ;;  %v12602_v56 = vld [vmem:[%s21221_s5 + $0x18] sm:$0xff]  ;;  %v12603_v63 = vld [vmem:[%s21221_s5 + $0x20] sm:$0xff] }
 0xb0f   : > { %13504 = vmatprep.subr.msk.mxu1 %vm8247_vm14, %v20718_v27 }
 0xb15   : > { %13499 = vmatmul.mubr.msk.f32.vlgmr.msra.gmra.mrb[160].mxu1 %vm8243_vm15, %v20736_v30 }
 0xb16   : > { %13505 = vmatpush1.msk.msra.mxu1 %vm8247_vm14, %v11142_v16  ;;  %11381 = vmatprep.mubr.f32.mxu1 %v23480_v51 }
 0xb17   : > { %13511 = vmatprep.subr.msk.mxu1 %vm8247_vm14, %v20679_v29  ;;  %v23536_v29 = vld [vmem:[#allocation64_spill] sm:$0xff] }
 0xb18   : > { %v12120_v9 = vmul.f32 %v20767_v4, %v23536_v29  ;;  %v12600_v29 = vld [vmem:[%s21221_s5 + $0x8] sm:$0xff] }
 0xb1d   : > { %13506 = vmatmul.mubr.msk.f32.vlgmr.msra.gmra.mrb[160].mxu1 %vm8243_vm15, %v20760_v62 }
 0xb1e   : > { %13512 = vmatpush1.msk.msra.mxu1 %vm8247_vm14, %v20718_v27  ;;  %11535 = vmatprep.mubr.f32.mxu1 %v23480_v51 }
 0xb1f   : > { %13518 = vmatprep.subr.msk.mxu1 %vm8247_vm14, %v11631_v35 }
 0xb25   : > { %13513 = vmatmul.mubr.msk.f32.vlgmr.msra.gmra.mrb[160].mxu1 %vm8243_vm15, %v20792_v11 }
 0xb26   : > { %13519 = vmatpush1.msk.msra.mxu1 %vm8247_vm14, %v11630_v1  ;;  %11716 = vmatprep.mubr.f32.mxu1 %v23480_v51 }
 0xb27   : > { %13525 = vmatprep.subr.msk.mxu1 %vm8247_vm14, %v20798_v47 }
 0xb2d   : > { %13520 = vmatmul.mubr.msk.f32.vlgmr.msra.gmra.mrb[160].mxu1 %vm8243_vm15, %v20816_v15 }
 0xb2e   : > { %13526 = vmatpush1.msk.msra.mxu1 %vm8247_vm14, %v11631_v35  ;;  %11870 = vmatprep.mubr.f32.mxu1 %v23480_v51 }
 0xb2f   : > { %13532 = vmatprep.subr.msk.mxu1 %vm8247_vm14, %v20776_v32 }
 0xb35   : > { %13527 = vmatmul.mubr.msk.f32.vlgmr.msra.gmra.mrb[160].mxu1 %vm8243_vm15, %v20841_v54 }
 0xb36   : > { %13533 = vmatpush1.msk.msra.mxu1 %vm8247_vm14, %v20798_v47  ;;  %12024 = vmatprep.mubr.f32.mxu1 %v23480_v51 }
 0xb37   : > { %13539 = vmatprep.subr.msk.mxu1 %vm8247_vm14, %v12120_v9 }
 0xb3d   : > { %13534 = vmatmul.mubr.msk.f32.vlgmr.msra.gmra.mrb[160].mxu1 %vm8243_vm15, %v20869_v5 }
 0xb3e   : > { %13540 = vmatpush1.msk.msra.mxu1 %vm8247_vm14, %v12119_v37  ;;  %12205 = vmatprep.mubr.f32.mxu1 %v23480_v51  ;;  %v12604_v37 = vld [vmem:[%s21221_s5 + $0x28] sm:$0xff] }
 0xb3f   : > { %13546 = vmatprep.subr.msk.mxu1 %vm8247_vm14, %v20880_v19 }
 0xb45   : > { %13541 = vmatmul.mubr.msk.f32.vlgmr.msra.gmra.mrb[160].mxu1 %vm8243_vm15, %v20898_v12 }
 0xb46   : > { %13547 = vmatpush1.msk.msra.mxu1 %vm8247_vm14, %v12120_v9  ;;  %12359 = vmatprep.mubr.f32.mxu1 %v23480_v51  ;;  %v12601_v9 = vld [vmem:[%s21221_s5 + $0x10] sm:$0xff] }
 0xb47   : > { %13553 = vmatprep.subr.msk.mxu1 %vm8247_vm14, %v20856_v31 }
 0xb4d   : > { %13548 = vmatmul.mubr.msk.f32.vlgmr.msra.gmra.mrb[160].mxu1 %vm8243_vm15, %v20918_v36 }
 0xb4e   : > { %13554 = vmatpush1.msk.msra.mxu1 %vm8247_vm14, %v20880_v19  ;;  %12513 = vmatprep.mubr.f32.mxu1 %v23480_v51 }
 0xb55   : > { %13555 = vmatmul.mubr.msk.f32.vlgmr.msra.gmra.mrb[160].mxu1 %vm8243_vm15, %v20938_v42 }
 0xb7c   : > { %v10811_v40 = vpop.f32.mrb[142].mxu0 }
 0xb7d   : > { %v10813_v27 = vpop.f32.mrb[143].mxu0 }
 0xb81   : > { %v10965_v30 = vpop.f32.mrb[144].mxu0 }
 0xb82   : > { %v10967_v22 = vpop.f32.mrb[145].mxu0 }
 0xb85   : > { %v11119_v62 = vpop.f32.mrb[146].mxu0 }
 0xb86   : > { %v11121_v4 = vpop.f32.mrb[147].mxu0 }
 0xb89   : > { %v11300_v32 = vpop.f32.mrb[148].mxu0 }
 0xb8a   : > { %v11302_v43 = vpop.f32.mrb[149].mxu0 }
 0xb8d   : > { %v11454_v11 = vpop.f32.mrb[150].mxu0 }
 0xb8e   : > { %v11456_v47 = vpop.f32.mrb[151].mxu0 }
 0xb91   : > { %v11608_v15 = vpop.f32.mrb[152].mxu0 }
 0xb92   : > { %v11610_v54 = vpop.f32.mrb[153].mxu0 }
 0xb95   : > { %v11789_v31 = vpop.f32.mrb[154].mxu0 }
 0xb96   : > { %v11791_v57 = vpop.f32.mrb[155].mxu0 }
 0xb99   : > { %v11943_v23 = vpop.f32.mrb[156].mxu0 }
 0xb9a   : > { %v11945_v5 = vpop.f32.mrb[157].mxu0 }
 0xb9d   : > { %v12097_v7 = vpop.f32.mrb[158].mxu0 }
 0xb9e   : > { %v12099_v26 = vpop.f32.mrb[159].mxu0 }
 0xba1   : > { %v12278_v13 = vpop.f32.mrb[160].mxu0 }
 0xba2   : > { %v12280_v46 = vpop.f32.mrb[161].mxu0 }
 0xba5   : > { %v12432_v19 = vpop.f32.mrb[162].mxu0 }
 0xba6   : > { %v12434_v0 = vpop.f32.mrb[163].mxu0 }
 0xbaa   : > { %v12586_v45 = vpop.f32.mrb[164].mxu0 }
 0xbab   : > { %v12588_v58 = vpop.f32.mrb[165].mxu0 }
 0xbc4   : > { %v10479_v61 = vpop.f32.mrb[162].mxu1 }
 0xbc5   : > { %v10637_v12 = vadd.f32 %v21012_v24, %v10479_v61  ;;  %v10481_v25 = vpop.f32.mrb[163].mxu1 }
 0xbc6   : > { %v10819_v60 = vadd.f32 %v10813_v27, %v10481_v25  ;;  %v12606_v27 = vld [vmem:[%s21221_s5 + $0x38] sm:$0xff] }
 0xbc7   : > { %v10818_v21 = vadd.f32 %v10811_v40, %v10637_v12  ;;  %v12605_v40 = vld [vmem:[%s21221_s5 + $0x30] sm:$0xff] }
 0xbc8   : > { %v10973_v36 = vadd.f32 %v10967_v22, %v10819_v60 }
 0xbc9   : > { %v10972_v17 = vadd.f32 %v10965_v30, %v10818_v21 }
 0xbca   : > { %v11127_v39 = vadd.f32 %v11121_v4, %v10973_v36 }
 0xbcb   : > { %v11126_v8 = vadd.f32 %v11119_v62, %v10972_v17 }
 0xbcc   : > { %v11308_v55 = vadd.f32 %v11302_v43, %v11127_v39 }
 0xbcd   : > { %v11307_v42 = vadd.f32 %v11300_v32, %v11126_v8 }
 0xbce   : > { %v11462_v18 = vadd.f32 %v11456_v47, %v11308_v55 }
 0xbcf   : > { %v11461_v53 = vadd.f32 %v11454_v11, %v11307_v42 }
 0xbd0   : > { %v11616_v52 = vadd.f32 %v11610_v54, %v11462_v18 }
 0xbd1   : > { %v11615_v48 = vadd.f32 %v11608_v15, %v11461_v53 }
 0xbd2   : > { %v11797_v49 = vadd.f32 %v11791_v57, %v11616_v52 }
 0xbd3   : > { %v11796_v44 = vadd.f32 %v11789_v31, %v11615_v48 }
 0xbd4   : > { %v11951_v38 = vadd.f32 %v11945_v5, %v11797_v49 }
 0xbd5   : > { %v11950_v33 = vadd.f32 %v11943_v23, %v11796_v44 }
 0xbd6   : > { %v12105_v34 = vadd.f32 %v12099_v26, %v11951_v38 }
 0xbd7   : > { %v12104_v50 = vadd.f32 %v12097_v7, %v11950_v33 }
 0xbd8   : > { %v12286_v14 = vadd.f32 %v12280_v46, %v12105_v34 }
 0xbd9   : > { %v12285_v24 = vadd.f32 %v12278_v13, %v12104_v50 }
 0xbda   : > { %v12440_v2 = vadd.f32 %v12434_v0, %v12286_v14 }
 0xbdb   : > { %v12439_v59 = vadd.f32 %v12432_v19, %v12285_v24 }
 0xbdc   : > { %v12594_v16 = vadd.f32 %v12588_v58, %v12440_v2 }
 0xbdd   : > { %v12593_v3 = vadd.f32 %v12586_v45, %v12439_v59 }
 0xbde   : > { %v12598_v6 = vmax.f32 %v12594_v16, 0.0 }
 0xbdf   : > { %v12597_v1 = vmax.f32 %v12593_v3, 0.0  ;;  %v12917_v3 = vld [vmem:[%s21222_s6] sm:$0xff] }
 0xc28   : > { %v12515_v20 = vpop.f32.mrb[160].mxu1 }
 0xc29   : > { %v12517_v10 = vpop.f32.mrb[161].mxu1  ;;  %v12595_v35 = vmax.f32 %v12515_v20, 0.0 }
 0xc2a   : > { %v12596_v41 = vmax.f32 %v12517_v10, 0.0 }
 0xc2c   : > { %13559 = vmatprep.subr.msk.mxu0 %vm8247_vm14, %v12596_v41  ;;  %v12918_v41 = vld [vmem:[%s21222_s6 + $0x8] sm:$0xff] }
 0xc2d   : > { %13560 = vmatpush1.msk.msra.mxu0 %vm8247_vm14, %v12595_v35 }
 0xc2e   : > { %13569 = vmatprep.subr.msk.mxu0 %vm8247_vm14, %v12598_v6  ;;  %13561 = vmatmul.mubr.msk.f32.vlgmr.msra.gmra.mrb[166].mxu0 %vm8243_vm15, %v12599_v28  ;;  %v12919_v6 = vld [vmem:[%s21222_s6 + $0x10] sm:$0xff] }
 0xc2f   : > { %13570 = vmatpush1.msk.msra.mxu0 %vm8247_vm14, %v12597_v1  ;;  %12713 = vmatprep.mubr.f32.mxu0 %v23480_v51 }
 0xc32   : > { %13562 = vmatmul.mubr.msk.f32.gmra.mrb[168].mxu0 %vm8243_vm15, %v12600_v29 }
 0xc33   : > { %12719 = vmatprep.mubr.f32.mxu0 %v23480_v51 }
 0xc36   : > { %13563 = vmatmul.mubr.msk.f32.gmra.mrb[170].mxu0 %vm8243_vm15, %v12601_v9 }
 0xc37   : > { %12725 = vmatprep.mubr.f32.mxu0 %v23480_v51 }
 0xc3a   : > { %13564 = vmatmul.mubr.msk.f32.gmra.mrb[172].mxu0 %vm8243_vm15, %v12602_v56 }
 0xc3b   : > { %12731 = vmatprep.mubr.f32.mxu0 %v23480_v51 }
 0xc3e   : > { %13565 = vmatmul.mubr.msk.f32.gmra.mrb[174].mxu0 %vm8243_vm15, %v12603_v63 }
 0xc3f   : > { %12737 = vmatprep.mubr.f32.mxu0 %v23480_v51 }
 0xc42   : > { %13566 = vmatmul.mubr.msk.f32.gmra.mrb[176].mxu0 %vm8243_vm15, %v12604_v37 }
 0xc43   : > { %12743 = vmatprep.mubr.f32.mxu0 %v23480_v51 }
 0xc46   : > { %13567 = vmatmul.mubr.msk.f32.gmra.mrb[178].mxu0 %vm8243_vm15, %v12605_v40 }
 0xc47   : > { %12749 = vmatprep.mubr.f32.mxu0 %v23480_v51 }
 0xc4a   : > { %13568 = vmatmul.mubr.msk.f32.gmra.mrb[180].mxu0 %vm8243_vm15, %v12606_v27 }
 0xc4b   : > { %12820 = vmatprep.mubr.f32.mxu0 %v23480_v51 }
 0xc4e   : > { %13571 = vmatmul.mubr.msk.f32.vlgmr.msra.gmra.mrb[182].mxu0 %vm8243_vm15, %v12599_v28 }
 0xc4f   : > { %12826 = vmatprep.mubr.f32.mxu0 %v23480_v51 }
 0xc52   : > { %13572 = vmatmul.mubr.msk.f32.gmra.mrb[184].mxu0 %vm8243_vm15, %v12600_v29 }
 0xc53   : > { %12832 = vmatprep.mubr.f32.mxu0 %v23480_v51 }
 0xc56   : > { %13573 = vmatmul.mubr.msk.f32.gmra.mrb[186].mxu0 %vm8243_vm15, %v12601_v9 }
 0xc57   : > { %12838 = vmatprep.mubr.f32.mxu0 %v23480_v51 }
 0xc5a   : > { %13574 = vmatmul.mubr.msk.f32.gmra.mrb[188].mxu0 %vm8243_vm15, %v12602_v56 }
 0xc5b   : > { %12844 = vmatprep.mubr.f32.mxu0 %v23480_v51 }
 0xc5e   : > { %13575 = vmatmul.mubr.msk.f32.gmra.mrb[190].mxu0 %vm8243_vm15, %v12603_v63  ;;  %v12920_v63 = vld [vmem:[%s21222_s6 + $0x18] sm:$0xff] }
 0xc5f   : > { %12850 = vmatprep.mubr.f32.mxu0 %v23480_v51 }
 0xc62   : > { %13576 = vmatmul.mubr.msk.f32.gmra.mrb[192].mxu0 %vm8243_vm15, %v12604_v37 }
 0xc63   : > { %12856 = vmatprep.mubr.f32.mxu0 %v23480_v51 }
 0xc66   : > { %13577 = vmatmul.mubr.msk.f32.gmra.mrb[194].mxu0 %vm8243_vm15, %v12605_v40 }
 0xc67   : > { %12862 = vmatprep.mubr.f32.mxu0 %v23480_v51 }
 0xc6a   : > { %13578 = vmatmul.mubr.msk.f32.gmra.mrb[196].mxu0 %vm8243_vm15, %v12606_v27 }
 0xc6b   : > { %12997 = vmatprep.mubr.f32.mxu0 %v23480_v51 }
 0xd01   : > { %v12709_v30 = vpop.f32.mrb[166].mxu0 }
 0xd02   : > { %v12711_v22 = vpop.f32.mrb[167].mxu0  ;;  %v12869_v54 = vmax.f32 %v12709_v30, 0.0 }
 0xd03   : > { %v12870_v23 = vmax.f32 %v12711_v22, 0.0 }
 0xd05   : > { %v12715_v62 = vpop.f32.mrb[168].mxu0 }
 0xd06   : > { %v12717_v4 = vpop.f32.mrb[169].mxu0  ;;  %v12873_v46 = vmax.f32 %v12715_v62, 0.0 }
 0xd07   : > { %v12874_v45 = vmax.f32 %v12717_v4, 0.0 }
 0xd09   : > { %v12721_v32 = vpop.f32.mrb[170].mxu0 }
 0xd0a   : > { %v12723_v43 = vpop.f32.mrb[171].mxu0  ;;  %v12877_v60 = vmax.f32 %v12721_v32, 0.0 }
 0xd0b   : > { %v12878_v39 = vmax.f32 %v12723_v43, 0.0 }
 0xd0d   : > { %v12727_v11 = vpop.f32.mrb[172].mxu0 }
 0xd0e   : > { %v12729_v47 = vpop.f32.mrb[173].mxu0  ;;  %v12881_v52 = vmax.f32 %v12727_v11, 0.0 }
 0xd0f   : > { %v12882_v44 = vmax.f32 %v12729_v47, 0.0 }
 0xd11   : > { %v12733_v15 = vpop.f32.mrb[174].mxu0 }
 0xd12   : > { %v12885_v31 = vmax.f32 %v12733_v15, 0.0  ;;  %v12735_v57 = vpop.f32.mrb[175].mxu0 }
 0xd13   : > { %v12886_v5 = vmax.f32 %v12735_v57, 0.0 }
 0xd14   : > { %v12901_v7 = vadd.f32 %v12885_v31, %v12869_v54 }
 0xd15   : > { %v12902_v26 = vadd.f32 %v12886_v5, %v12870_v23  ;;  %v12739_v13 = vpop.f32.mrb[176].mxu0 }
 0xd16   : > { %v12889_v19 = vmax.f32 %v12739_v13, 0.0  ;;  %v12741_v0 = vpop.f32.mrb[177].mxu0 }
 0xd17   : > { %v12890_v58 = vmax.f32 %v12741_v0, 0.0 }
 0xd18   : > { %v12905_v61 = vadd.f32 %v12889_v19, %v12873_v46 }
 0xd19   : > { %v12906_v12 = vadd.f32 %v12890_v58, %v12874_v45  ;;  %v12745_v25 = vpop.f32.mrb[178].mxu0 }
 0xd1a   : > { %v14044_v21 = vpack.c.bf16 %v12905_v61, %v12901_v7  ;;  %v12893_v36 = vmax.f32 %v12745_v25, 0.0  ;;  %v12747_v17 = vpop.f32.mrb[179].mxu0 }
 0xd1b   : > { %v12894_v8 = vmax.f32 %v12747_v17, 0.0  ;;  %v14042_v55 = vpack.c.bf16 %v12906_v12, %v12902_v26 }
 0xd1c   : > { %v12909_v42 = vadd.f32 %v12893_v36, %v12877_v60 }
 0xd1d   : > { %v12910_v18 = vadd.f32 %v12894_v8, %v12878_v39  ;;  %v12751_v53 = vpop.f32.mrb[180].mxu0  ;;  %14043 = vmatprep.subr.bf16.mxu0 %v14042_v55 }
 0xd1e   : > { %v12897_v48 = vmax.f32 %v12751_v53, 0.0  ;;  %v12753_v49 = vpop.f32.mrb[181].mxu0  ;;  %14045 = vmatpush1.bf16.msra.mxu0 %v14044_v21 }
 0xd1f   : > { %v12898_v38 = vmax.f32 %v12753_v49, 0.0 }
 0xd20   : > { %v12913_v33 = vadd.f32 %v12897_v48, %v12881_v52 }
 0xd21   : > { %v12914_v34 = vadd.f32 %v12898_v38, %v12882_v44  ;;  %v12822_v50 = vpop.f32.mrb[182].mxu0 }
 0xd22   : > { %v14048_v14 = vpack.c.bf16 %v12913_v33, %v12909_v42  ;;  %v12824_v24 = vpop.f32.mrb[183].mxu0  ;;  %v12871_v29 = vmax.f32 %v12822_v50, 0.0 }
 0xd23   : > { %v14046_v2 = vpack.c.bf16 %v12914_v34, %v12910_v18  ;;  %v12872_v37 = vmax.f32 %v12824_v24, 0.0 }
 0xd25   : > { %14047 = vmatprep.subr.bf16.mxu0 %v14046_v2  ;;  %v12828_v59 = vpop.f32.mrb[184].mxu0 }
 0xd26   : > { %14049 = vmatpush1.bf16.msra.mxu0 %v14048_v14  ;;  %v12830_v16 = vpop.f32.mrb[185].mxu0  ;;  %v12875_v62 = vmax.f32 %v12828_v59, 0.0 }
 0xd27   : > { %v12876_v43 = vmax.f32 %v12830_v16, 0.0 }
 0xd29   : > { %v12834_v20 = vpop.f32.mrb[186].mxu0  ;;  %13579 = vmatmul.mubr.msk.f32.vlgmr.msra.gmra.mrb[198].mxu0 %vm438_vm1, %v12917_v3 }
 0xd2a   : > { %v12836_v10 = vpop.f32.mrb[187].mxu0  ;;  %13003 = vmatprep.mubr.f32.mxu0 %v23480_v51  ;;  %v12879_v31 = vmax.f32 %v12834_v20, 0.0 }
 0xd2b   : > { %v12880_v7 = vmax.f32 %v12836_v10, 0.0 }
 0xd2d   : > { %v12840_v35 = vpop.f32.mrb[188].mxu0  ;;  %13580 = vmatmul.mubr.msk.f32.gmra.mrb[200].mxu0 %vm438_vm1, %v12918_v41 }
 0xd2e   : > { %v12842_v28 = vpop.f32.mrb[189].mxu0  ;;  %13009 = vmatprep.mubr.f32.mxu0 %v23480_v51  ;;  %v12883_v45 = vmax.f32 %v12840_v35, 0.0 }
 0xd2f   : > { %v12884_v12 = vmax.f32 %v12842_v28, 0.0 }
 0xd31   : > { %v12846_v1 = vpop.f32.mrb[190].mxu0  ;;  %13581 = vmatmul.mubr.msk.f32.gmra.mrb[202].mxu0 %vm438_vm1, %v12919_v6 }
 0xd32   : > { %v12887_v9 = vmax.f32 %v12846_v1, 0.0  ;;  %v12848_v56 = vpop.f32.mrb[191].mxu0  ;;  %13015 = vmatprep.mubr.f32.mxu0 %v23480_v51 }
 0xd33   : > { %v12888_v40 = vmax.f32 %v12848_v56, 0.0 }
 0xd34   : > { %v12903_v27 = vadd.f32 %v12887_v9, %v12871_v29 }
 0xd35   : > { %v12904_v30 = vadd.f32 %v12888_v40, %v12872_v37  ;;  %v12852_v22 = vpop.f32.mrb[192].mxu0  ;;  %13582 = vmatmul.mubr.msk.f32.gmra.mrb[204].mxu0 %vm438_vm1, %v12920_v63 }
 0xd36   : > { %v12891_v4 = vmax.f32 %v12852_v22, 0.0  ;;  %v12854_v32 = vpop.f32.mrb[193].mxu0  ;;  %13086 = vmatprep.mubr.f32.mxu0 %v23480_v51 }
 0xd37   : > { %v12892_v11 = vmax.f32 %v12854_v32, 0.0 }
 0xd38   : > { %v12907_v47 = vadd.f32 %v12891_v4, %v12875_v62 }
 0xd39   : > { %v12908_v15 = vadd.f32 %v12892_v11, %v12876_v43  ;;  %v12858_v54 = vpop.f32.mrb[194].mxu0 }
 0xd3a   : > { %v14052_v57 = vpack.c.bf16 %v12907_v47, %v12903_v27  ;;  %v12895_v23 = vmax.f32 %v12858_v54, 0.0  ;;  %v12860_v5 = vpop.f32.mrb[195].mxu0 }
 0xd3b   : > { %v12896_v26 = vmax.f32 %v12860_v5, 0.0  ;;  %v14050_v13 = vpack.c.bf16 %v12908_v15, %v12904_v30 }
 0xd3c   : > { %v12911_v46 = vadd.f32 %v12895_v23, %v12879_v31 }
 0xd3d   : > { %v12912_v19 = vadd.f32 %v12896_v26, %v12880_v7  ;;  %v12864_v0 = vpop.f32.mrb[196].mxu0  ;;  %14051 = vmatprep.subr.bf16.mxu0 %v14050_v13 }
 0xd3e   : > { %v12899_v58 = vmax.f32 %v12864_v0, 0.0  ;;  %v12866_v61 = vpop.f32.mrb[197].mxu0  ;;  %14053 = vmatpush1.bf16.msra.mxu0 %v14052_v57 }
 0xd3f   : > { %v12900_v25 = vmax.f32 %v12866_v61, 0.0 }
 0xd40   : > { %v12915_v60 = vadd.f32 %v12899_v58, %v12883_v45 }
 0xd41   : > { %v12916_v21 = vadd.f32 %v12900_v25, %v12884_v12 }
 0xd42   : > { %v14056_v36 = vpack.c.bf16 %v12915_v60, %v12911_v46 }
 0xd43   : > { %v14054_v17 = vpack.c.bf16 %v12916_v21, %v12912_v19 }
 0xd45   : > { %14055 = vmatprep.subr.bf16.mxu0 %v14054_v17 }
 0xd46   : > { %14057 = vmatpush1.bf16.msra.mxu0 %v14056_v36 }
 0xd49   : > { %13583 = vmatmul.mubr.msk.f32.vlgmr.msra.gmra.mrb[206].mxu0 %vm438_vm1, %v12917_v3 }
 0xd4a   : > { %13092 = vmatprep.mubr.f32.mxu0 %v23480_v51 }
 0xd4d   : > { %13584 = vmatmul.mubr.msk.f32.gmra.mrb[208].mxu0 %vm438_vm1, %v12918_v41 }
 0xd4e   : > { %13098 = vmatprep.mubr.f32.mxu0 %v23480_v51 }
 0xd51   : > { %13585 = vmatmul.mubr.msk.f32.gmra.mrb[210].mxu0 %vm438_vm1, %v12919_v6 }
 0xd52   : > { %13104 = vmatprep.mubr.f32.mxu0 %v23480_v51 }
 0xd55   : > { %13586 = vmatmul.mubr.msk.f32.gmra.mrb[212].mxu0 %vm438_vm1, %v12920_v63 }
 0xdfc   : > { %v12999_v39 = vpop.f32.mrb[198].mxu0 }
 0xdfd   : > { %v13111_v8 = vmax.f32 %v12999_v39, 0.0  ;;  %v13001_v55 = vpop.f32.mrb[199].mxu0 }
 0xdfe   : > { %v13112_v42 = vmax.f32 %v13001_v55, 0.0 }
 0xdff   : > { %13127 = vst [vmem:[%s21195_s15] sm:$0xff] %v13111_v8 }
 0xe00   : > { %13128 = vst [vmem:[%s21195_s15 + $0x8] sm:$0xff] %v13112_v42  ;;  %v13005_v51 = vpop.f32.mrb[200].mxu0 }
 0xe01   : > { %v13115_v18 = vmax.f32 %v13005_v51, 0.0  ;;  %v13007_v53 = vpop.f32.mrb[201].mxu0 }
 0xe02   : > { %v13116_v52 = vmax.f32 %v13007_v53, 0.0 }
 0xe03   : > { %13131 = vst [vmem:[%s21195_s15 + $0x20] sm:$0xff] %v13115_v18 }
 0xe04   : > { %13132 = vst [vmem:[%s21195_s15 + $0x28] sm:$0xff] %v13116_v52  ;;  %v13011_v48 = vpop.f32.mrb[202].mxu0 }
 0xe05   : > { %v13119_v49 = vmax.f32 %v13011_v48, 0.0  ;;  %v13013_v44 = vpop.f32.mrb[203].mxu0 }
 0xe06   : > { %v13120_v38 = vmax.f32 %v13013_v44, 0.0 }
 0xe07   : > { %13135 = vst [vmem:[%s21195_s15 + $0x40] sm:$0xff] %v13119_v49 }
 0xe08   : > { %13136 = vst [vmem:[%s21195_s15 + $0x48] sm:$0xff] %v13120_v38  ;;  %v13017_v33 = vpop.f32.mrb[204].mxu0 }
 0xe09   : > { %v13123_v34 = vmax.f32 %v13017_v33, 0.0  ;;  %v13019_v50 = vpop.f32.mrb[205].mxu0 }
 0xe0a   : > { %v13124_v14 = vmax.f32 %v13019_v50, 0.0 }
 0xe0b   : > { %13139 = vst [vmem:[%s21195_s15 + $0x60] sm:$0xff] %v13123_v34 }
 0xe0c   : > { %13140 = vst [vmem:[%s21195_s15 + $0x68] sm:$0xff] %v13124_v14 }
 0xe1c   : > { %v13088_v24 = vpop.f32.mrb[206].mxu0 }
 0xe1d   : > { %v13113_v2 = vmax.f32 %v13088_v24, 0.0  ;;  %v13090_v59 = vpop.f32.mrb[207].mxu0 }
 0xe1e   : > { %v13114_v16 = vmax.f32 %v13090_v59, 0.0 }
 0xe1f   : > { %13129 = vst [vmem:[%s21195_s15 + $0x10] sm:$0xff] %v13113_v2 }
 0xe20   : > { %13130 = vst [vmem:[%s21195_s15 + $0x18] sm:$0xff] %v13114_v16  ;;  %v13094_v3 = vpop.f32.mrb[208].mxu0 }
 0xe21   : > { %v13117_v20 = vmax.f32 %v13094_v3, 0.0  ;;  %v13096_v10 = vpop.f32.mrb[209].mxu0 }
 0xe22   : > { %v13118_v41 = vmax.f32 %v13096_v10, 0.0 }
 0xe23   : > { %13133 = vst [vmem:[%s21195_s15 + $0x30] sm:$0xff] %v13117_v20 }
 0xe24   : > { %13134 = vst [vmem:[%s21195_s15 + $0x38] sm:$0xff] %v13118_v41  ;;  %v13100_v35 = vpop.f32.mrb[210].mxu0 }
 0xe25   : > { %v13121_v28 = vmax.f32 %v13100_v35, 0.0  ;;  %v13102_v6 = vpop.f32.mrb[211].mxu0 }
 0xe26   : > { %v13122_v1 = vmax.f32 %v13102_v6, 0.0 }
 0xe27   : > { %13137 = vst [vmem:[%s21195_s15 + $0x50] sm:$0xff] %v13121_v28 }
 0xe28   : > { %13138 = vst [vmem:[%s21195_s15 + $0x58] sm:$0xff] %v13122_v1  ;;  %v13106_v29 = vpop.f32.mrb[212].mxu0 }
 0xe29   : > { %v13125_v9 = vmax.f32 %v13106_v29, 0.0  ;;  %v13108_v56 = vpop.f32.mrb[213].mxu0 }
 0xe2a   : > { %v13126_v63 = vmax.f32 %v13108_v56, 0.0 }
 0xe2b   : > { %13141 = vst [vmem:[%s21195_s15 + $0x70] sm:$0xff] %v13125_v9 }
 0xe2c   : > { %13142 = vst [vmem:[%s21195_s15 + $0x78] sm:$0xff] %v13126_v63 }
 0xe2d PF: > { %s18_s27 = sadd.s32 1, %s14797_s27  }
 0xe2e   : > { %p15_p4 = scmp.ge.s32.totalorder %s18_s27, 4  }
 0xe30   :  { %17 = sbr.rel (!%p15_p4) target bundleno = 1 (0x1), region = 141 }

</bundles_post_ra>
